<compile_context>
chip_gen: v5e
topology: v5e:2x2
jax: 0.10.0
libtpu: 0.0.40
codegen_flags: <defaults>
</compile_context>

<pallas_src>
import functools

import jax
import jax.numpy as jnp
from jax.experimental import pallas as pl
from jax.experimental.pallas import tpu as pltpu


_EPS = 1e-6          # the module uses eps=1e-6 for every LayerNorm (incl. q/k norms)
_SQRT_2_OVER_PI = 0.7978845608028654


def _gelu_tanh(t):
    # TODO(synk): torch nn.GELU() defaults to the exact erf form; the tanh
    # approximation (|delta| <~ 1e-3) is used so the kernel never depends on an
    # erf lowering rule.  Kernel and in-file reference use the same formula.
    return 0.5 * t * (1.0 + jnp.tanh(_SQRT_2_OVER_PI * (t + 0.044715 * t * t * t)))


def _layernorm(t, g, b):
    mu = jnp.mean(t, axis=-1, keepdims=True)
    c = t - mu
    var = jnp.mean(c * c, axis=-1, keepdims=True)
    return c * jax.lax.rsqrt(var + _EPS) * g + b


# ----------------------------------------------------------------------------
# Fully fused kernel: one (batch, n_ctx-tile) grid point per invocation
# ----------------------------------------------------------------------------
def _block_kernel(x_ref, data_ref,
                  ln1_ref, ln2_ref, ln3_ref, qk_ref,
                  wq_ref, wkv_ref, wproj_ref, bproj_ref,
                  wfc_ref, bfc_ref, wp2_ref, bp2_ref,
                  o_ref, attn_ref, *, heads):
    f32 = jnp.float32
    bf16 = jnp.bfloat16

    x = x_ref[...].astype(f32)          # (tq,     W)
    data = data_ref[...].astype(f32)    # (n_data, Dw)
    tq, W = x.shape
    d = W // heads

    # --- ln_1 / ln_2 (f32 VPU), then bf16 MXU Q / KV projections -------------
    xq = _layernorm(x, ln1_ref[0:1, :], ln1_ref[1:2, :]).astype(bf16)
    xd = _layernorm(data, ln2_ref[0:1, :], ln2_ref[1:2, :]).astype(bf16)
    q = jnp.dot(xq, wq_ref[...], preferred_element_type=f32)      # (tq, W) f32
    # wkv columns are pre-packed [K_allheads | V_allheads]
    kv = jnp.dot(xd, wkv_ref[...], preferred_element_type=f32)    # (n_data, 2W) f32

    qk = qk_ref[...]                    # (4, d) f32: [qg*scale, qb*scale, kg, kb]
    qg, qb = qk[0:1, :], qk[1:2, :]
    kg, kb = qk[2:3, :], qk[3:4, :]

    # --- per-head q/k LayerNorm + attention ----------------------------------
    # Each head's output goes into the (tq, W) VMEM scratch at lane offset h*d;
    # the out-projection is then a single W-contraction matmul.
    for h in range(heads):              # static unroll; everything stays in VMEM
        qh = _layernorm(q[:, h * d:(h + 1) * d], qg, qb)           # incl. 1/sqrt(d)
        kh = _layernorm(kv[:, h * d:(h + 1) * d], kg, kb)
        vh = kv[:, W + h * d:W + (h + 1) * d]

        # q @ k^T via dot_general contracting the last dims (no XLU transpose)
        s = jax.lax.dot_general(qh.astype(bf16), kh.astype(bf16),
                                (((1,), (1,)), ((), ())),
                                preferred_element_type=f32)         # (tq, n_data)
        m = jnp.max(s, axis=-1, keepdims=True)
        p = jnp.exp(s - m)
        # approx EUP reciprocal (~1e-3 rel err) — fine at the checked tolerance
        p = p * pl.reciprocal(jnp.sum(p, axis=-1, keepdims=True), approx=True)
        oh = jnp.dot(p.astype(bf16), vh.astype(bf16),
                     preferred_element_type=f32)                    # (tq, d)
        attn_ref[:, h * d:(h + 1) * d] = oh

    attn = jnp.dot(attn_ref[...].astype(bf16), wproj_ref[...],
                   preferred_element_type=f32) + bproj_ref[...]
    x1 = x + attn                       # residual 1

    # --- MLP: ln_3 -> c_fc -> GELU -> c_proj, residual 2 ----------------------
    hdn = _layernorm(x1, ln3_ref[0:1, :], ln3_ref[1:2, :])
    hdn = jnp.dot(hdn.astype(bf16), wfc_ref[...],
                  preferred_element_type=f32) + bfc_ref[...]
    hdn = _gelu_tanh(hdn)
    mlp = jnp.dot(hdn.astype(bf16), wp2_ref[...],
                  preferred_element_type=f32) + bp2_ref[...]

    o_ref[...] = (x1 + mlp).astype(o_ref.dtype)


# ----------------------------------------------------------------------------
# Wrapper
# ----------------------------------------------------------------------------
def _vmem_limit_bytes():
    # Generation-aware VMEM budget (v5e/v6e: 128 MiB, v7x: 64 MiB physical);
    # leave headroom for Mosaic-internal scratch.
    try:
        cap = pltpu.get_tpu_info().vmem_capacity_bytes
    except Exception:
        cap = 64 * 1024 * 1024
    return int(min(cap - cap // 8, 100 * 1024 * 1024))


def _pack_params(params, heads):
    """One-time weight repacking (wrapper-side, outside the kernel):
       * MXU operand weights -> bfloat16
       * kv projection columns -> [K_allheads | V_allheads] (aligned head slabs)
       * softmax 1/sqrt(d) folded into the q-norm affine params
    """
    f32, bf16 = jnp.float32, jnp.bfloat16
    W = params["wq_t"].shape[0]
    d = W // heads
    Dw = params["wkv_t"].shape[0]

    wkv = params["wkv_t"].reshape(Dw, heads, 2, d)
    wkv = jnp.concatenate([wkv[:, :, 0, :].reshape(Dw, W),
                           wkv[:, :, 1, :].reshape(Dw, W)], axis=-1)

    scale = 1.0 / float(d) ** 0.5
    qk = params["qk_gb"]
    qk = jnp.concatenate([qk[0:2] * scale, qk[2:4]], axis=0)

    return dict(
        ln1_gb=params["ln1_gb"].astype(f32),
        ln2_gb=params["ln2_gb"].astype(f32),
        ln3_gb=params["ln3_gb"].astype(f32),
        qk_gb=qk.astype(f32),
        wq_t=params["wq_t"].astype(bf16),
        wkv_t=wkv.astype(bf16),
        wproj_t=params["wproj_t"].astype(bf16),
        bproj=params["bproj"].astype(f32),
        wfc_t=params["wfc_t"].astype(bf16),
        bfc=params["bfc"].astype(f32),
        wp2_t=params["wp2_t"].astype(bf16),
        bp2=params["bp2"].astype(f32),
    )


def _make_call(bs, n_ctx, width, n_data, data_width, hidden, d, heads, tq,
               out_dtype, *, weight_mode):
    const = lambda b, i: (0, 0)

    def wspec(shape):
        # Grid-invariant weight slab: fetched once; single-buffered when the
        # jax build supports pipeline_mode (halves resident-weight VMEM).
        if weight_mode is None:
            return pl.BlockSpec(shape, const)
        return pl.BlockSpec(shape, const, pipeline_mode=weight_mode)

    kernel = functools.partial(_block_kernel, heads=heads)
    return pl.pallas_call(
        kernel,
        out_shape=jax.ShapeDtypeStruct((bs, n_ctx, width), out_dtype),
        grid=(bs, pl.cdiv(n_ctx, tq)),
        in_specs=[
            pl.BlockSpec((None, tq, width), lambda b, i: (b, i, 0)),
            pl.BlockSpec((None, n_data, data_width), lambda b, i: (b, 0, 0)),
            wspec((2, width)),                  # ln_1 gamma/beta
            wspec((2, data_width)),             # ln_2 gamma/beta
            wspec((2, width)),                  # ln_3 gamma/beta
            wspec((4, d)),                      # q/k head-norm gamma/beta (scaled)
            wspec((width, width)),              # Wq^T           (bf16)
            wspec((data_width, 2 * width)),     # Wkv^T [K | V]  (bf16)
            wspec((width, width)),              # Wproj^T        (bf16)
            wspec((1, width)),                  # bproj          (f32)
            wspec((width, hidden)),             # W_fc^T         (bf16)
            wspec((1, hidden)),                 # b_fc           (f32)
            wspec((hidden, width)),             # W_proj2^T      (bf16)
            wspec((1, width)),                  # b_proj2        (f32)
        ],
        out_specs=pl.BlockSpec((None, tq, width), lambda b, i: (b, i, 0)),
        scratch_shapes=[pltpu.VMEM((tq, width), jnp.float32)],
        compiler_params=pltpu.CompilerParams(
            dimension_semantics=("parallel", "parallel"),
            vmem_limit_bytes=_vmem_limit_bytes()),
    )


def residual_cross_attention_block(x, data, params, heads, q_tile=256):
    bs, n_ctx, width = x.shape
    _, n_data, data_width = data.shape
    d = width // heads
    hidden = params["wfc_t"].shape[1]
    tq = n_ctx if n_ctx <= q_tile else q_tile

    kp = _pack_params(params, heads)
    args = (x, data,
            kp["ln1_gb"], kp["ln2_gb"], kp["ln3_gb"], kp["qk_gb"],
            kp["wq_t"], kp["wkv_t"], kp["wproj_t"], kp["bproj"],
            kp["wfc_t"], kp["bfc"], kp["wp2_t"], kp["bp2"])

    build = functools.partial(_make_call, bs, n_ctx, width, n_data, data_width,
                              hidden, d, heads, tq, x.dtype)
    try:
        return build(weight_mode=pl.Buffered(buffer_count=1))(*args)
    except Exception:
        # TODO(synk): this jax/Mosaic build rejects pipeline_mode=Buffered(1);
        # fall back to default (double-buffered) weight blocks.
        return build(weight_mode=None)(*args)


# ----------------------------------------------------------------------------
# Pure-JAX f32 reference (mirrors the PyTorch forward) for a sanity check
# ----------------------------------------------------------------------------
def reference(x, data, params, heads):
    def ln(t, g, b):
        mu = t.mean(-1, keepdims=True)
        c = t - mu
        var = (c * c).mean(-1, keepdims=True)
        return c / jnp.sqrt(var + _EPS) * g + b

    bs, n_ctx, W = x.shape
    _, n_data, _ = data.shape
    d = W // heads

    xq = ln(x, params["ln1_gb"][0], params["ln1_gb"][1])
    xd = ln(data, params["ln2_gb"][0], params["ln2_gb"][1])
    q = xq @ params["wq_t"]
    kv = xd @ params["wkv_t"]

    qh = q.reshape(bs, n_ctx, heads, d)
    kvh = kv.reshape(bs, n_data, heads, 2 * d)
    kh, vh = kvh[..., :d], kvh[..., d:]

    qg, qb, kg, kb = params["qk_gb"]
    qh = ln(qh, qg, qb)
    kh = ln(kh, kg, kb)
    qh, kh, vh = (t.transpose(0, 2, 1, 3) for t in (qh, kh, vh))
    s = jnp.einsum("bhqd,bhkd->bhqk", qh, kh) / float(d) ** 0.5
    p = jax.nn.softmax(s, axis=-1)
    o = jnp.einsum("bhqk,bhkd->bhqd", p, vh)
    o = o.transpose(0, 2, 1, 3).reshape(bs, n_ctx, W)
    attn = o @ params["wproj_t"] + params["bproj"][0]
    x1 = x + attn

    h = ln(x1, params["ln3_gb"][0], params["ln3_gb"][1])
    h = _gelu_tanh(h @ params["wfc_t"] + params["bfc"][0])
    mlp = h @ params["wp2_t"] + params["bp2"][0]
    return x1 + mlp


if __name__ == "__main__":
    # Small shapes consistent with the module; width is a multiple of 128 so the
    # output slab stores are lane-dense (review item on sub-128-lane stores).
    bs, n_ctx, n_data = 2, 64, 16
    width, data_width, heads, expand = 128, 64, 4, 4
    d = width // heads
    hidden = width * expand

    key = jax.random.PRNGKey(0)
    ks = jax.random.split(key, 18)

    def nrm(k, shape, s=0.05):
        return s * jax.random.normal(k, shape, jnp.float32)

    def ln_gb(kg, kb, n):
        g = 1.0 + 0.1 * jax.random.normal(kg, (n,), jnp.float32)
        b = 0.05 * jax.random.normal(kb, (n,), jnp.float32)
        return jnp.stack([g, b])

    # PyTorch Linear stores W as (out, in); pre-transpose to (in, out).
    wq = nrm(ks[0], (width, width))
    wkv = nrm(ks[1], (2 * width, data_width))
    wproj = nrm(ks[2], (width, width))
    bproj = nrm(ks[3], (width,))
    wfc = nrm(ks[4], (hidden, width))
    bfc = nrm(ks[5], (hidden,))
    wp2 = nrm(ks[6], (width, hidden))
    bp2 = nrm(ks[7], (width,))

    params = dict(
        wq_t=wq.T,                        # (width, width)
        wkv_t=wkv.T,                      # (data_width, 2*width), per-head [k|v]
        wproj_t=wproj.T,                  # (width, width)
        bproj=bproj.reshape(1, width),
        wfc_t=wfc.T,                      # (width, hidden)
        bfc=bfc.reshape(1, hidden),
        wp2_t=wp2.T,                      # (hidden, width)
        bp2=bp2.reshape(1, width),
        ln1_gb=ln_gb(ks[8], ks[9], width),
        ln2_gb=ln_gb(ks[10], ks[11], data_width),
        ln3_gb=ln_gb(ks[12], ks[13], width),
        qk_gb=jnp.concatenate(
            [ln_gb(ks[14], ks[15], d), ln_gb(ks[16], ks[17], d)], axis=0),
    )

    x = jax.random.normal(jax.random.fold_in(key, 100),
                          (bs, n_ctx, width), jnp.float32)
    data = jax.random.normal(jax.random.fold_in(key, 101),
                             (bs, n_data, data_width), jnp.float32)

    # q_tile=32 (< default 256) only to exercise the n_ctx tiling path at demo
    # sizes; production calls use the default (>= 256, multiple of 8/16).
    out = jax.block_until_ready(
        residual_cross_attention_block(x, data, params, heads, q_tile=32))
    ref = jax.block_until_ready(reference(x, data, params, heads))

    assert out.shape == (bs, n_ctx, width)
    max_err = float(jnp.max(jnp.abs(out - ref)))
    # bf16 MXU operands vs. f32 reference -> tolerance relaxed accordingly.
    assert bool(jnp.allclose(out, ref, atol=3e-2, rtol=3e-2)), \
        f"max abs err {max_err}"
    print("KERNEL_OK")
</pallas_src>

<mosaic_0001>
module attributes {stable_mosaic.version = 11 : i64} {
  func.func @_block_kernel(%arg0: i32, %arg1: i32, %arg2: memref<1x32x128xf32, #tpu.memory_space<vmem>>, %arg3: memref<1x16x64xf32, #tpu.memory_space<vmem>>, %arg4: memref<2x128xf32, #tpu.memory_space<vmem>>, %arg5: memref<2x64xf32, #tpu.memory_space<vmem>>, %arg6: memref<2x128xf32, #tpu.memory_space<vmem>>, %arg7: memref<4x32xf32, #tpu.memory_space<vmem>>, %arg8: memref<128x128xbf16, #tpu.memory_space<vmem>>, %arg9: memref<64x256xbf16, #tpu.memory_space<vmem>>, %arg10: memref<128x128xbf16, #tpu.memory_space<vmem>>, %arg11: memref<1x128xf32, #tpu.memory_space<vmem>>, %arg12: memref<128x512xbf16, #tpu.memory_space<vmem>>, %arg13: memref<1x512xf32, #tpu.memory_space<vmem>>, %arg14: memref<512x128xbf16, #tpu.memory_space<vmem>>, %arg15: memref<1x128xf32, #tpu.memory_space<vmem>>, %arg16: memref<1x32x128xf32, #tpu.memory_space<vmem>>, %arg17: memref<32x128xf32, #tpu.memory_space<vmem>>) attributes {dimension_semantics = [#tpu.dimension_semantics<parallel>, #tpu.dimension_semantics<parallel>], iteration_bounds = array<i64: 2, 2>, scalar_prefetch = 0 : i64, scratch_operands = 1 : i64, tpu.core_type = #tpu.core_type<tc>, window_params = [{transform_indices = @transform_0, window_bounds = array<i64: 1, 32, 128>}, {transform_indices = @transform_1, window_bounds = array<i64: 1, 16, 64>}, {pipeline_mode = #tpu.pipeline_mode<synchronous>, transform_indices = @transform_2, window_bounds = array<i64: 2, 128>}, {pipeline_mode = #tpu.pipeline_mode<synchronous>, transform_indices = @transform_3, window_bounds = array<i64: 2, 64>}, {pipeline_mode = #tpu.pipeline_mode<synchronous>, transform_indices = @transform_4, window_bounds = array<i64: 2, 128>}, {pipeline_mode = #tpu.pipeline_mode<synchronous>, transform_indices = @transform_5, window_bounds = array<i64: 4, 32>}, {pipeline_mode = #tpu.pipeline_mode<synchronous>, transform_indices = @transform_6, window_bounds = array<i64: 128, 128>}, {pipeline_mode = #tpu.pipeline_mode<synchronous>, transform_indices = @transform_7, window_bounds = array<i64: 64, 256>}, {pipeline_mode = #tpu.pipeline_mode<synchronous>, transform_indices = @transform_8, window_bounds = array<i64: 128, 128>}, {pipeline_mode = #tpu.pipeline_mode<synchronous>, transform_indices = @transform_9, window_bounds = array<i64: 1, 128>}, {pipeline_mode = #tpu.pipeline_mode<synchronous>, transform_indices = @transform_10, window_bounds = array<i64: 128, 512>}, {pipeline_mode = #tpu.pipeline_mode<synchronous>, transform_indices = @transform_11, window_bounds = array<i64: 1, 512>}, {pipeline_mode = #tpu.pipeline_mode<synchronous>, transform_indices = @transform_12, window_bounds = array<i64: 512, 128>}, {pipeline_mode = #tpu.pipeline_mode<synchronous>, transform_indices = @transform_13, window_bounds = array<i64: 1, 128>}, {transform_indices = @transform_14, window_bounds = array<i64: 1, 32, 128>}]} {
    %c0 = arith.constant 0 : index
    %c0_0 = arith.constant 0 : index
    %c0_1 = arith.constant 0 : index
    %0 = vector.load %arg2[%c0, %c0_0, %c0_1] : memref<1x32x128xf32, #tpu.memory_space<vmem>>, vector<1x32x128xf32>
    %1 = vector.shape_cast %0 : vector<1x32x128xf32> to vector<32x128xf32>
    %c0_2 = arith.constant 0 : index
    %c0_3 = arith.constant 0 : index
    %c0_4 = arith.constant 0 : index
    %2 = vector.load %arg3[%c0_2, %c0_3, %c0_4] : memref<1x16x64xf32, #tpu.memory_space<vmem>>, vector<1x16x64xf32>
    %3 = vector.shape_cast %2 : vector<1x16x64xf32> to vector<16x64xf32>
    %c0_5 = arith.constant 0 : index
    %c0_6 = arith.constant 0 : index
    %4 = vector.load %arg4[%c0_5, %c0_6] : memref<2x128xf32, #tpu.memory_space<vmem>>, vector<1x128xf32>
    %c1 = arith.constant 1 : index
    %c0_7 = arith.constant 0 : index
    %5 = vector.load %arg4[%c1, %c0_7] : memref<2x128xf32, #tpu.memory_space<vmem>>, vector<1x128xf32>
    %cst = arith.constant dense<0.000000e+00> : vector<32xf32>
    %6 = vector.multi_reduction <add>, %1, %cst [1] : vector<32x128xf32> to vector<32xf32>
    %7 = vector.shape_cast %6 : vector<32xf32> to vector<32x1xf32>
    %cst_8 = arith.constant 1.280000e+02 : f32
    %8 = vector.broadcast %cst_8 : f32 to vector<32x1xf32>
    %9 = arith.divf %7, %8 : vector<32x1xf32>
    %10 = vector.broadcast %9 : vector<32x1xf32> to vector<32x128xf32>
    %11 = arith.subf %1, %10 : vector<32x128xf32>
    %12 = arith.mulf %11, %11 : vector<32x128xf32>
    %cst_9 = arith.constant dense<0.000000e+00> : vector<32xf32>
    %13 = vector.multi_reduction <add>, %12, %cst_9 [1] : vector<32x128xf32> to vector<32xf32>
    %14 = vector.shape_cast %13 : vector<32xf32> to vector<32x1xf32>
    %cst_10 = arith.constant 1.280000e+02 : f32
    %15 = vector.broadcast %cst_10 : f32 to vector<32x1xf32>
    %16 = arith.divf %14, %15 : vector<32x1xf32>
    %cst_11 = arith.constant 9.99999997E-7 : f32
    %17 = vector.broadcast %cst_11 : f32 to vector<32x1xf32>
    %18 = arith.addf %16, %17 : vector<32x1xf32>
    %19 = math.rsqrt %18 : vector<32x1xf32>
    %20 = vector.broadcast %19 : vector<32x1xf32> to vector<32x128xf32>
    %21 = arith.mulf %11, %20 : vector<32x128xf32>
    %22 = vector.broadcast %4 : vector<1x128xf32> to vector<32x128xf32>
    %23 = arith.mulf %21, %22 : vector<32x128xf32>
    %24 = vector.broadcast %5 : vector<1x128xf32> to vector<32x128xf32>
    %25 = arith.addf %23, %24 : vector<32x128xf32>
    %26 = arith.truncf %25 : vector<32x128xf32> to vector<32x128xbf16>
    %c0_12 = arith.constant 0 : index
    %c0_13 = arith.constant 0 : index
    %27 = vector.load %arg5[%c0_12, %c0_13] : memref<2x64xf32, #tpu.memory_space<vmem>>, vector<1x64xf32>
    %c1_14 = arith.constant 1 : index
    %c0_15 = arith.constant 0 : index
    %28 = vector.load %arg5[%c1_14, %c0_15] : memref<2x64xf32, #tpu.memory_space<vmem>>, vector<1x64xf32>
    %cst_16 = arith.constant dense<0.000000e+00> : vector<16xf32>
    %29 = vector.multi_reduction <add>, %3, %cst_16 [1] : vector<16x64xf32> to vector<16xf32>
    %30 = vector.shape_cast %29 : vector<16xf32> to vector<16x1xf32>
    %cst_17 = arith.constant 6.400000e+01 : f32
    %31 = vector.broadcast %cst_17 : f32 to vector<16x1xf32>
    %32 = arith.divf %30, %31 : vector<16x1xf32>
    %33 = vector.broadcast %32 : vector<16x1xf32> to vector<16x64xf32>
    %34 = arith.subf %3, %33 : vector<16x64xf32>
    %35 = arith.mulf %34, %34 : vector<16x64xf32>
    %cst_18 = arith.constant dense<0.000000e+00> : vector<16xf32>
    %36 = vector.multi_reduction <add>, %35, %cst_18 [1] : vector<16x64xf32> to vector<16xf32>
    %37 = vector.shape_cast %36 : vector<16xf32> to vector<16x1xf32>
    %cst_19 = arith.constant 6.400000e+01 : f32
    %38 = vector.broadcast %cst_19 : f32 to vector<16x1xf32>
    %39 = arith.divf %37, %38 : vector<16x1xf32>
    %cst_20 = arith.constant 9.99999997E-7 : f32
    %40 = vector.broadcast %cst_20 : f32 to vector<16x1xf32>
    %41 = arith.addf %39, %40 : vector<16x1xf32>
    %42 = math.rsqrt %41 : vector<16x1xf32>
    %43 = vector.broadcast %42 : vector<16x1xf32> to vector<16x64xf32>
    %44 = arith.mulf %34, %43 : vector<16x64xf32>
    %45 = vector.broadcast %27 : vector<1x64xf32> to vector<16x64xf32>
    %46 = arith.mulf %44, %45 : vector<16x64xf32>
    %47 = vector.broadcast %28 : vector<1x64xf32> to vector<16x64xf32>
    %48 = arith.addf %46, %47 : vector<16x64xf32>
    %49 = arith.truncf %48 : vector<16x64xf32> to vector<16x64xbf16>
    %c0_21 = arith.constant 0 : index
    %c0_22 = arith.constant 0 : index
    %50 = vector.load %arg8[%c0_21, %c0_22] : memref<128x128xbf16, #tpu.memory_space<vmem>>, vector<128x128xbf16>
    %cst_23 = arith.constant dense<0.000000e+00> : vector<32x128xf32>
    %51 = tpu.matmul %26, %50, %cst_23 {dimension_numbers = #tpu.dot_dimension_numbers<[1], [0], [0], [1], [0, 0, 1, 1], [], []>} : vector<32x128xbf16>, vector<128x128xbf16>, vector<32x128xf32> -> vector<32x128xf32>
    %c0_24 = arith.constant 0 : index
    %c0_25 = arith.constant 0 : index
    %52 = vector.load %arg9[%c0_24, %c0_25] : memref<64x256xbf16, #tpu.memory_space<vmem>>, vector<64x256xbf16>
    %cst_26 = arith.constant dense<0.000000e+00> : vector<16x256xf32>
    %53 = tpu.matmul %49, %52, %cst_26 {dimension_numbers = #tpu.dot_dimension_numbers<[1], [0], [0], [1], [0, 0, 1, 1], [], []>} : vector<16x64xbf16>, vector<64x256xbf16>, vector<16x256xf32> -> vector<16x256xf32>
    %c0_27 = arith.constant 0 : index
    %c0_28 = arith.constant 0 : index
    %54 = vector.load %arg7[%c0_27, %c0_28] : memref<4x32xf32, #tpu.memory_space<vmem>>, vector<4x32xf32>
    %55 = vector.extract_strided_slice %54 {offsets = [0, 0], sizes = [1, 32], strides = [1, 1]} : vector<4x32xf32> to vector<1x32xf32>
    %56 = vector.extract_strided_slice %54 {offsets = [1, 0], sizes = [1, 32], strides = [1, 1]} : vector<4x32xf32> to vector<1x32xf32>
    %57 = vector.extract_strided_slice %54 {offsets = [2, 0], sizes = [1, 32], strides = [1, 1]} : vector<4x32xf32> to vector<1x32xf32>
    %58 = vector.extract_strided_slice %54 {offsets = [3, 0], sizes = [1, 32], strides = [1, 1]} : vector<4x32xf32> to vector<1x32xf32>
    %59 = vector.extract_strided_slice %51 {offsets = [0, 0], sizes = [32, 32], strides = [1, 1]} : vector<32x128xf32> to vector<32x32xf32>
    %cst_29 = arith.constant dense<0.000000e+00> : vector<32xf32>
    %60 = vector.multi_reduction <add>, %59, %cst_29 [1] : vector<32x32xf32> to vector<32xf32>
    %61 = vector.shape_cast %60 : vector<32xf32> to vector<32x1xf32>
    %cst_30 = arith.constant 3.200000e+01 : f32
    %62 = vector.broadcast %cst_30 : f32 to vector<32x1xf32>
    %63 = arith.divf %61, %62 : vector<32x1xf32>
    %64 = vector.broadcast %63 : vector<32x1xf32> to vector<32x32xf32>
    %65 = arith.subf %59, %64 : vector<32x32xf32>
    %66 = arith.mulf %65, %65 : vector<32x32xf32>
    %cst_31 = arith.constant dense<0.000000e+00> : vector<32xf32>
    %67 = vector.multi_reduction <add>, %66, %cst_31 [1] : vector<32x32xf32> to vector<32xf32>
    %68 = vector.shape_cast %67 : vector<32xf32> to vector<32x1xf32>
    %cst_32 = arith.constant 3.200000e+01 : f32
    %69 = vector.broadcast %cst_32 : f32 to vector<32x1xf32>
    %70 = arith.divf %68, %69 : vector<32x1xf32>
    %cst_33 = arith.constant 9.99999997E-7 : f32
    %71 = vector.broadcast %cst_33 : f32 to vector<32x1xf32>
    %72 = arith.addf %70, %71 : vector<32x1xf32>
    %73 = math.rsqrt %72 : vector<32x1xf32>
    %74 = vector.broadcast %73 : vector<32x1xf32> to vector<32x32xf32>
    %75 = arith.mulf %65, %74 : vector<32x32xf32>
    %76 = vector.broadcast %55 : vector<1x32xf32> to vector<32x32xf32>
    %77 = arith.mulf %75, %76 : vector<32x32xf32>
    %78 = vector.broadcast %56 : vector<1x32xf32> to vector<32x32xf32>
    %79 = arith.addf %77, %78 : vector<32x32xf32>
    %80 = vector.extract_strided_slice %53 {offsets = [0, 0], sizes = [16, 32], strides = [1, 1]} : vector<16x256xf32> to vector<16x32xf32>
    %cst_34 = arith.constant dense<0.000000e+00> : vector<16xf32>
    %81 = vector.multi_reduction <add>, %80, %cst_34 [1] : vector<16x32xf32> to vector<16xf32>
    %82 = vector.shape_cast %81 : vector<16xf32> to vector<16x1xf32>
    %cst_35 = arith.constant 3.200000e+01 : f32
    %83 = vector.broadcast %cst_35 : f32 to vector<16x1xf32>
    %84 = arith.divf %82, %83 : vector<16x1xf32>
    %85 = vector.broadcast %84 : vector<16x1xf32> to vector<16x32xf32>
    %86 = arith.subf %80, %85 : vector<16x32xf32>
    %87 = arith.mulf %86, %86 : vector<16x32xf32>
    %cst_36 = arith.constant dense<0.000000e+00> : vector<16xf32>
    %88 = vector.multi_reduction <add>, %87, %cst_36 [1] : vector<16x32xf32> to vector<16xf32>
    %89 = vector.shape_cast %88 : vector<16xf32> to vector<16x1xf32>
    %cst_37 = arith.constant 3.200000e+01 : f32
    %90 = vector.broadcast %cst_37 : f32 to vector<16x1xf32>
    %91 = arith.divf %89, %90 : vector<16x1xf32>
    %cst_38 = arith.constant 9.99999997E-7 : f32
    %92 = vector.broadcast %cst_38 : f32 to vector<16x1xf32>
    %93 = arith.addf %91, %92 : vector<16x1xf32>
    %94 = math.rsqrt %93 : vector<16x1xf32>
    %95 = vector.broadcast %94 : vector<16x1xf32> to vector<16x32xf32>
    %96 = arith.mulf %86, %95 : vector<16x32xf32>
    %97 = vector.broadcast %57 : vector<1x32xf32> to vector<16x32xf32>
    %98 = arith.mulf %96, %97 : vector<16x32xf32>
    %99 = vector.broadcast %58 : vector<1x32xf32> to vector<16x32xf32>
    %100 = arith.addf %98, %99 : vector<16x32xf32>
    %101 = vector.extract_strided_slice %53 {offsets = [0, 128], sizes = [16, 32], strides = [1, 1]} : vector<16x256xf32> to vector<16x32xf32>
    %102 = arith.truncf %79 : vector<32x32xf32> to vector<32x32xbf16>
    %103 = arith.truncf %100 : vector<16x32xf32> to vector<16x32xbf16>
    %cst_39 = arith.constant dense<0.000000e+00> : vector<32x16xf32>
    %104 = tpu.matmul %102, %103, %cst_39 {dimension_numbers = #tpu.dot_dimension_numbers<[1], [1], [0], [0], [0, 0, 1, 0], [], []>} : vector<32x32xbf16>, vector<16x32xbf16>, vector<32x16xf32> -> vector<32x16xf32>
    %cst_40 = arith.constant dense<0xFF800000> : vector<32xf32>
    %105 = vector.multi_reduction <maximumf>, %104, %cst_40 [1] : vector<32x16xf32> to vector<32xf32>
    %106 = vector.shape_cast %105 : vector<32xf32> to vector<32x1xf32>
    %107 = vector.broadcast %106 : vector<32x1xf32> to vector<32x16xf32>
    %108 = arith.subf %104, %107 : vector<32x16xf32>
    %109 = math.exp %108 : vector<32x16xf32>
    %cst_41 = arith.constant dense<0.000000e+00> : vector<32xf32>
    %110 = vector.multi_reduction <add>, %109, %cst_41 [1] : vector<32x16xf32> to vector<32xf32>
    %111 = vector.shape_cast %110 : vector<32xf32> to vector<32x1xf32>
    %112 = tpu.reciprocal %111 {approx = true} : vector<32x1xf32> -> vector<32x1xf32>
    %113 = vector.broadcast %112 : vector<32x1xf32> to vector<32x16xf32>
    %114 = arith.mulf %109, %113 : vector<32x16xf32>
    %115 = arith.truncf %114 : vector<32x16xf32> to vector<32x16xbf16>
    %116 = arith.truncf %101 : vector<16x32xf32> to vector<16x32xbf16>
    %cst_42 = arith.constant dense<0.000000e+00> : vector<32x32xf32>
    %117 = tpu.matmul %115, %116, %cst_42 {dimension_numbers = #tpu.dot_dimension_numbers<[1], [0], [0], [1], [0, 0, 1, 1], [], []>} : vector<32x16xbf16>, vector<16x32xbf16>, vector<32x32xf32> -> vector<32x32xf32>
    %c0_43 = arith.constant 0 : index
    %c0_44 = arith.constant 0 : index
    %118 = vector.load %arg17[%c0_43, %c0_44] : memref<32x128xf32, #tpu.memory_space<vmem>>, vector<32x32xf32>
    tpu.vector_store %arg17[%c0_43, %c0_44], %117 {strides = array<i32>} : memref<32x128xf32, #tpu.memory_space<vmem>>, vector<32x32xf32>,
    %119 = vector.extract_strided_slice %51 {offsets = [0, 32], sizes = [32, 32], strides = [1, 1]} : vector<32x128xf32> to vector<32x32xf32>
    %cst_45 = arith.constant dense<0.000000e+00> : vector<32xf32>
    %120 = vector.multi_reduction <add>, %119, %cst_45 [1] : vector<32x32xf32> to vector<32xf32>
    %121 = vector.shape_cast %120 : vector<32xf32> to vector<32x1xf32>
    %cst_46 = arith.constant 3.200000e+01 : f32
    %122 = vector.broadcast %cst_46 : f32 to vector<32x1xf32>
    %123 = arith.divf %121, %122 : vector<32x1xf32>
    %124 = vector.broadcast %123 : vector<32x1xf32> to vector<32x32xf32>
    %125 = arith.subf %119, %124 : vector<32x32xf32>
    %126 = arith.mulf %125, %125 : vector<32x32xf32>
    %cst_47 = arith.constant dense<0.000000e+00> : vector<32xf32>
    %127 = vector.multi_reduction <add>, %126, %cst_47 [1] : vector<32x32xf32> to vector<32xf32>
    %128 = vector.shape_cast %127 : vector<32xf32> to vector<32x1xf32>
    %cst_48 = arith.constant 3.200000e+01 : f32
    %129 = vector.broadcast %cst_48 : f32 to vector<32x1xf32>
    %130 = arith.divf %128, %129 : vector<32x1xf32>
    %cst_49 = arith.constant 9.99999997E-7 : f32
    %131 = vector.broadcast %cst_49 : f32 to vector<32x1xf32>
    %132 = arith.addf %130, %131 : vector<32x1xf32>
    %133 = math.rsqrt %132 : vector<32x1xf32>
    %134 = vector.broadcast %133 : vector<32x1xf32> to vector<32x32xf32>
    %135 = arith.mulf %125, %134 : vector<32x32xf32>
    %136 = vector.broadcast %55 : vector<1x32xf32> to vector<32x32xf32>
    %137 = arith.mulf %135, %136 : vector<32x32xf32>
    %138 = vector.broadcast %56 : vector<1x32xf32> to vector<32x32xf32>
    %139 = arith.addf %137, %138 : vector<32x32xf32>
    %140 = vector.extract_strided_slice %53 {offsets = [0, 32], sizes = [16, 32], strides = [1, 1]} : vector<16x256xf32> to vector<16x32xf32>
    %cst_50 = arith.constant dense<0.000000e+00> : vector<16xf32>
    %141 = vector.multi_reduction <add>, %140, %cst_50 [1] : vector<16x32xf32> to vector<16xf32>
    %142 = vector.shape_cast %141 : vector<16xf32> to vector<16x1xf32>
    %cst_51 = arith.constant 3.200000e+01 : f32
    %143 = vector.broadcast %cst_51 : f32 to vector<16x1xf32>
    %144 = arith.divf %142, %143 : vector<16x1xf32>
    %145 = vector.broadcast %144 : vector<16x1xf32> to vector<16x32xf32>
    %146 = arith.subf %140, %145 : vector<16x32xf32>
    %147 = arith.mulf %146, %146 : vector<16x32xf32>
    %cst_52 = arith.constant dense<0.000000e+00> : vector<16xf32>
    %148 = vector.multi_reduction <add>, %147, %cst_52 [1] : vector<16x32xf32> to vector<16xf32>
    %149 = vector.shape_cast %148 : vector<16xf32> to vector<16x1xf32>
    %cst_53 = arith.constant 3.200000e+01 : f32
    %150 = vector.broadcast %cst_53 : f32 to vector<16x1xf32>
    %151 = arith.divf %149, %150 : vector<16x1xf32>
    %cst_54 = arith.constant 9.99999997E-7 : f32
    %152 = vector.broadcast %cst_54 : f32 to vector<16x1xf32>
    %153 = arith.addf %151, %152 : vector<16x1xf32>
    %154 = math.rsqrt %153 : vector<16x1xf32>
    %155 = vector.broadcast %154 : vector<16x1xf32> to vector<16x32xf32>
    %156 = arith.mulf %146, %155 : vector<16x32xf32>
    %157 = vector.broadcast %57 : vector<1x32xf32> to vector<16x32xf32>
    %158 = arith.mulf %156, %157 : vector<16x32xf32>
    %159 = vector.broadcast %58 : vector<1x32xf32> to vector<16x32xf32>
    %160 = arith.addf %158, %159 : vector<16x32xf32>
    %161 = vector.extract_strided_slice %53 {offsets = [0, 160], sizes = [16, 32], strides = [1, 1]} : vector<16x256xf32> to vector<16x32xf32>
    %162 = arith.truncf %139 : vector<32x32xf32> to vector<32x32xbf16>
    %163 = arith.truncf %160 : vector<16x32xf32> to vector<16x32xbf16>
    %cst_55 = arith.constant dense<0.000000e+00> : vector<32x16xf32>
    %164 = tpu.matmul %162, %163, %cst_55 {dimension_numbers = #tpu.dot_dimension_numbers<[1], [1], [0], [0], [0, 0, 1, 0], [], []>} : vector<32x32xbf16>, vector<16x32xbf16>, vector<32x16xf32> -> vector<32x16xf32>
    %cst_56 = arith.constant dense<0xFF800000> : vector<32xf32>
    %165 = vector.multi_reduction <maximumf>, %164, %cst_56 [1] : vector<32x16xf32> to vector<32xf32>
    %166 = vector.shape_cast %165 : vector<32xf32> to vector<32x1xf32>
    %167 = vector.broadcast %166 : vector<32x1xf32> to vector<32x16xf32>
    %168 = arith.subf %164, %167 : vector<32x16xf32>
    %169 = math.exp %168 : vector<32x16xf32>
    %cst_57 = arith.constant dense<0.000000e+00> : vector<32xf32>
    %170 = vector.multi_reduction <add>, %169, %cst_57 [1] : vector<32x16xf32> to vector<32xf32>
    %171 = vector.shape_cast %170 : vector<32xf32> to vector<32x1xf32>
    %172 = tpu.reciprocal %171 {approx = true} : vector<32x1xf32> -> vector<32x1xf32>
    %173 = vector.broadcast %172 : vector<32x1xf32> to vector<32x16xf32>
    %174 = arith.mulf %169, %173 : vector<32x16xf32>
    %175 = arith.truncf %174 : vector<32x16xf32> to vector<32x16xbf16>
    %176 = arith.truncf %161 : vector<16x32xf32> to vector<16x32xbf16>
    %cst_58 = arith.constant dense<0.000000e+00> : vector<32x32xf32>
    %177 = tpu.matmul %175, %176, %cst_58 {dimension_numbers = #tpu.dot_dimension_numbers<[1], [0], [0], [1], [0, 0, 1, 1], [], []>} : vector<32x16xbf16>, vector<16x32xbf16>, vector<32x32xf32> -> vector<32x32xf32>
    %c0_59 = arith.constant 0 : index
    %c32 = arith.constant 32 : index
    %178 = vector.load %arg17[%c0_59, %c32] : memref<32x128xf32, #tpu.memory_space<vmem>>, vector<32x32xf32>
    tpu.vector_store %arg17[%c0_59, %c32], %177 {strides = array<i32>} : memref<32x128xf32, #tpu.memory_space<vmem>>, vector<32x32xf32>,
    %179 = vector.extract_strided_slice %51 {offsets = [0, 64], sizes = [32, 32], strides = [1, 1]} : vector<32x128xf32> to vector<32x32xf32>
    %cst_60 = arith.constant dense<0.000000e+00> : vector<32xf32>
    %180 = vector.multi_reduction <add>, %179, %cst_60 [1] : vector<32x32xf32> to vector<32xf32>
    %181 = vector.shape_cast %180 : vector<32xf32> to vector<32x1xf32>
    %cst_61 = arith.constant 3.200000e+01 : f32
    %182 = vector.broadcast %cst_61 : f32 to vector<32x1xf32>
    %183 = arith.divf %181, %182 : vector<32x1xf32>
    %184 = vector.broadcast %183 : vector<32x1xf32> to vector<32x32xf32>
    %185 = arith.subf %179, %184 : vector<32x32xf32>
    %186 = arith.mulf %185, %185 : vector<32x32xf32>
    %cst_62 = arith.constant dense<0.000000e+00> : vector<32xf32>
    %187 = vector.multi_reduction <add>, %186, %cst_62 [1] : vector<32x32xf32> to vector<32xf32>
    %188 = vector.shape_cast %187 : vector<32xf32> to vector<32x1xf32>
    %cst_63 = arith.constant 3.200000e+01 : f32
    %189 = vector.broadcast %cst_63 : f32 to vector<32x1xf32>
    %190 = arith.divf %188, %189 : vector<32x1xf32>
    %cst_64 = arith.constant 9.99999997E-7 : f32
    %191 = vector.broadcast %cst_64 : f32 to vector<32x1xf32>
    %192 = arith.addf %190, %191 : vector<32x1xf32>
    %193 = math.rsqrt %192 : vector<32x1xf32>
    %194 = vector.broadcast %193 : vector<32x1xf32> to vector<32x32xf32>
    %195 = arith.mulf %185, %194 : vector<32x32xf32>
    %196 = vector.broadcast %55 : vector<1x32xf32> to vector<32x32xf32>
    %197 = arith.mulf %195, %196 : vector<32x32xf32>
    %198 = vector.broadcast %56 : vector<1x32xf32> to vector<32x32xf32>
    %199 = arith.addf %197, %198 : vector<32x32xf32>
    %200 = vector.extract_strided_slice %53 {offsets = [0, 64], sizes = [16, 32], strides = [1, 1]} : vector<16x256xf32> to vector<16x32xf32>
    %cst_65 = arith.constant dense<0.000000e+00> : vector<16xf32>
    %201 = vector.multi_reduction <add>, %200, %cst_65 [1] : vector<16x32xf32> to vector<16xf32>
    %202 = vector.shape_cast %201 : vector<16xf32> to vector<16x1xf32>
    %cst_66 = arith.constant 3.200000e+01 : f32
    %203 = vector.broadcast %cst_66 : f32 to vector<16x1xf32>
    %204 = arith.divf %202, %203 : vector<16x1xf32>
    %205 = vector.broadcast %204 : vector<16x1xf32> to vector<16x32xf32>
    %206 = arith.subf %200, %205 : vector<16x32xf32>
    %207 = arith.mulf %206, %206 : vector<16x32xf32>
    %cst_67 = arith.constant dense<0.000000e+00> : vector<16xf32>
    %208 = vector.multi_reduction <add>, %207, %cst_67 [1] : vector<16x32xf32> to vector<16xf32>
    %209 = vector.shape_cast %208 : vector<16xf32> to vector<16x1xf32>
    %cst_68 = arith.constant 3.200000e+01 : f32
    %210 = vector.broadcast %cst_68 : f32 to vector<16x1xf32>
    %211 = arith.divf %209, %210 : vector<16x1xf32>
    %cst_69 = arith.constant 9.99999997E-7 : f32
    %212 = vector.broadcast %cst_69 : f32 to vector<16x1xf32>
    %213 = arith.addf %211, %212 : vector<16x1xf32>
    %214 = math.rsqrt %213 : vector<16x1xf32>
    %215 = vector.broadcast %214 : vector<16x1xf32> to vector<16x32xf32>
    %216 = arith.mulf %206, %215 : vector<16x32xf32>
    %217 = vector.broadcast %57 : vector<1x32xf32> to vector<16x32xf32>
    %218 = arith.mulf %216, %217 : vector<16x32xf32>
    %219 = vector.broadcast %58 : vector<1x32xf32> to vector<16x32xf32>
    %220 = arith.addf %218, %219 : vector<16x32xf32>
    %221 = vector.extract_strided_slice %53 {offsets = [0, 192], sizes = [16, 32], strides = [1, 1]} : vector<16x256xf32> to vector<16x32xf32>
    %222 = arith.truncf %199 : vector<32x32xf32> to vector<32x32xbf16>
    %223 = arith.truncf %220 : vector<16x32xf32> to vector<16x32xbf16>
    %cst_70 = arith.constant dense<0.000000e+00> : vector<32x16xf32>
    %224 = tpu.matmul %222, %223, %cst_70 {dimension_numbers = #tpu.dot_dimension_numbers<[1], [1], [0], [0], [0, 0, 1, 0], [], []>} : vector<32x32xbf16>, vector<16x32xbf16>, vector<32x16xf32> -> vector<32x16xf32>
    %cst_71 = arith.constant dense<0xFF800000> : vector<32xf32>
    %225 = vector.multi_reduction <maximumf>, %224, %cst_71 [1] : vector<32x16xf32> to vector<32xf32>
    %226 = vector.shape_cast %225 : vector<32xf32> to vector<32x1xf32>
    %227 = vector.broadcast %226 : vector<32x1xf32> to vector<32x16xf32>
    %228 = arith.subf %224, %227 : vector<32x16xf32>
    %229 = math.exp %228 : vector<32x16xf32>
    %cst_72 = arith.constant dense<0.000000e+00> : vector<32xf32>
    %230 = vector.multi_reduction <add>, %229, %cst_72 [1] : vector<32x16xf32> to vector<32xf32>
    %231 = vector.shape_cast %230 : vector<32xf32> to vector<32x1xf32>
    %232 = tpu.reciprocal %231 {approx = true} : vector<32x1xf32> -> vector<32x1xf32>
    %233 = vector.broadcast %232 : vector<32x1xf32> to vector<32x16xf32>
    %234 = arith.mulf %229, %233 : vector<32x16xf32>
    %235 = arith.truncf %234 : vector<32x16xf32> to vector<32x16xbf16>
    %236 = arith.truncf %221 : vector<16x32xf32> to vector<16x32xbf16>
    %cst_73 = arith.constant dense<0.000000e+00> : vector<32x32xf32>
    %237 = tpu.matmul %235, %236, %cst_73 {dimension_numbers = #tpu.dot_dimension_numbers<[1], [0], [0], [1], [0, 0, 1, 1], [], []>} : vector<32x16xbf16>, vector<16x32xbf16>, vector<32x32xf32> -> vector<32x32xf32>
    %c0_74 = arith.constant 0 : index
    %c64 = arith.constant 64 : index
    %238 = vector.load %arg17[%c0_74, %c64] : memref<32x128xf32, #tpu.memory_space<vmem>>, vector<32x32xf32>
    tpu.vector_store %arg17[%c0_74, %c64], %237 {strides = array<i32>} : memref<32x128xf32, #tpu.memory_space<vmem>>, vector<32x32xf32>,
    %239 = vector.extract_strided_slice %51 {offsets = [0, 96], sizes = [32, 32], strides = [1, 1]} : vector<32x128xf32> to vector<32x32xf32>
    %cst_75 = arith.constant dense<0.000000e+00> : vector<32xf32>
    %240 = vector.multi_reduction <add>, %239, %cst_75 [1] : vector<32x32xf32> to vector<32xf32>
    %241 = vector.shape_cast %240 : vector<32xf32> to vector<32x1xf32>
    %cst_76 = arith.constant 3.200000e+01 : f32
    %242 = vector.broadcast %cst_76 : f32 to vector<32x1xf32>
    %243 = arith.divf %241, %242 : vector<32x1xf32>
    %244 = vector.broadcast %243 : vector<32x1xf32> to vector<32x32xf32>
    %245 = arith.subf %239, %244 : vector<32x32xf32>
    %246 = arith.mulf %245, %245 : vector<32x32xf32>
    %cst_77 = arith.constant dense<0.000000e+00> : vector<32xf32>
    %247 = vector.multi_reduction <add>, %246, %cst_77 [1] : vector<32x32xf32> to vector<32xf32>
    %248 = vector.shape_cast %247 : vector<32xf32> to vector<32x1xf32>
    %cst_78 = arith.constant 3.200000e+01 : f32
    %249 = vector.broadcast %cst_78 : f32 to vector<32x1xf32>
    %250 = arith.divf %248, %249 : vector<32x1xf32>
    %cst_79 = arith.constant 9.99999997E-7 : f32
    %251 = vector.broadcast %cst_79 : f32 to vector<32x1xf32>
    %252 = arith.addf %250, %251 : vector<32x1xf32>
    %253 = math.rsqrt %252 : vector<32x1xf32>
    %254 = vector.broadcast %253 : vector<32x1xf32> to vector<32x32xf32>
    %255 = arith.mulf %245, %254 : vector<32x32xf32>
    %256 = vector.broadcast %55 : vector<1x32xf32> to vector<32x32xf32>
    %257 = arith.mulf %255, %256 : vector<32x32xf32>
    %258 = vector.broadcast %56 : vector<1x32xf32> to vector<32x32xf32>
    %259 = arith.addf %257, %258 : vector<32x32xf32>
    %260 = vector.extract_strided_slice %53 {offsets = [0, 96], sizes = [16, 32], strides = [1, 1]} : vector<16x256xf32> to vector<16x32xf32>
    %cst_80 = arith.constant dense<0.000000e+00> : vector<16xf32>
    %261 = vector.multi_reduction <add>, %260, %cst_80 [1] : vector<16x32xf32> to vector<16xf32>
    %262 = vector.shape_cast %261 : vector<16xf32> to vector<16x1xf32>
    %cst_81 = arith.constant 3.200000e+01 : f32
    %263 = vector.broadcast %cst_81 : f32 to vector<16x1xf32>
    %264 = arith.divf %262, %263 : vector<16x1xf32>
    %265 = vector.broadcast %264 : vector<16x1xf32> to vector<16x32xf32>
    %266 = arith.subf %260, %265 : vector<16x32xf32>
    %267 = arith.mulf %266, %266 : vector<16x32xf32>
    %cst_82 = arith.constant dense<0.000000e+00> : vector<16xf32>
    %268 = vector.multi_reduction <add>, %267, %cst_82 [1] : vector<16x32xf32> to vector<16xf32>
    %269 = vector.shape_cast %268 : vector<16xf32> to vector<16x1xf32>
    %cst_83 = arith.constant 3.200000e+01 : f32
    %270 = vector.broadcast %cst_83 : f32 to vector<16x1xf32>
    %271 = arith.divf %269, %270 : vector<16x1xf32>
    %cst_84 = arith.constant 9.99999997E-7 : f32
    %272 = vector.broadcast %cst_84 : f32 to vector<16x1xf32>
    %273 = arith.addf %271, %272 : vector<16x1xf32>
    %274 = math.rsqrt %273 : vector<16x1xf32>
    %275 = vector.broadcast %274 : vector<16x1xf32> to vector<16x32xf32>
    %276 = arith.mulf %266, %275 : vector<16x32xf32>
    %277 = vector.broadcast %57 : vector<1x32xf32> to vector<16x32xf32>
    %278 = arith.mulf %276, %277 : vector<16x32xf32>
    %279 = vector.broadcast %58 : vector<1x32xf32> to vector<16x32xf32>
    %280 = arith.addf %278, %279 : vector<16x32xf32>
    %281 = vector.extract_strided_slice %53 {offsets = [0, 224], sizes = [16, 32], strides = [1, 1]} : vector<16x256xf32> to vector<16x32xf32>
    %282 = arith.truncf %259 : vector<32x32xf32> to vector<32x32xbf16>
    %283 = arith.truncf %280 : vector<16x32xf32> to vector<16x32xbf16>
    %cst_85 = arith.constant dense<0.000000e+00> : vector<32x16xf32>
    %284 = tpu.matmul %282, %283, %cst_85 {dimension_numbers = #tpu.dot_dimension_numbers<[1], [1], [0], [0], [0, 0, 1, 0], [], []>} : vector<32x32xbf16>, vector<16x32xbf16>, vector<32x16xf32> -> vector<32x16xf32>
    %cst_86 = arith.constant dense<0xFF800000> : vector<32xf32>
    %285 = vector.multi_reduction <maximumf>, %284, %cst_86 [1] : vector<32x16xf32> to vector<32xf32>
    %286 = vector.shape_cast %285 : vector<32xf32> to vector<32x1xf32>
    %287 = vector.broadcast %286 : vector<32x1xf32> to vector<32x16xf32>
    %288 = arith.subf %284, %287 : vector<32x16xf32>
    %289 = math.exp %288 : vector<32x16xf32>
    %cst_87 = arith.constant dense<0.000000e+00> : vector<32xf32>
    %290 = vector.multi_reduction <add>, %289, %cst_87 [1] : vector<32x16xf32> to vector<32xf32>
    %291 = vector.shape_cast %290 : vector<32xf32> to vector<32x1xf32>
    %292 = tpu.reciprocal %291 {approx = true} : vector<32x1xf32> -> vector<32x1xf32>
    %293 = vector.broadcast %292 : vector<32x1xf32> to vector<32x16xf32>
    %294 = arith.mulf %289, %293 : vector<32x16xf32>
    %295 = arith.truncf %294 : vector<32x16xf32> to vector<32x16xbf16>
    %296 = arith.truncf %281 : vector<16x32xf32> to vector<16x32xbf16>
    %cst_88 = arith.constant dense<0.000000e+00> : vector<32x32xf32>
    %297 = tpu.matmul %295, %296, %cst_88 {dimension_numbers = #tpu.dot_dimension_numbers<[1], [0], [0], [1], [0, 0, 1, 1], [], []>} : vector<32x16xbf16>, vector<16x32xbf16>, vector<32x32xf32> -> vector<32x32xf32>
    %c0_89 = arith.constant 0 : index
    %c96 = arith.constant 96 : index
    %298 = vector.load %arg17[%c0_89, %c96] : memref<32x128xf32, #tpu.memory_space<vmem>>, vector<32x32xf32>
    tpu.vector_store %arg17[%c0_89, %c96], %297 {strides = array<i32>} : memref<32x128xf32, #tpu.memory_space<vmem>>, vector<32x32xf32>,
    %c0_90 = arith.constant 0 : index
    %c0_91 = arith.constant 0 : index
    %299 = vector.load %arg17[%c0_90, %c0_91] : memref<32x128xf32, #tpu.memory_space<vmem>>, vector<32x128xf32>
    %300 = arith.truncf %299 : vector<32x128xf32> to vector<32x128xbf16>
    %c0_92 = arith.constant 0 : index
    %c0_93 = arith.constant 0 : index
    %301 = vector.load %arg10[%c0_92, %c0_93] : memref<128x128xbf16, #tpu.memory_space<vmem>>, vector<128x128xbf16>
    %cst_94 = arith.constant dense<0.000000e+00> : vector<32x128xf32>
    %302 = tpu.matmul %300, %301, %cst_94 {dimension_numbers = #tpu.dot_dimension_numbers<[1], [0], [0], [1], [0, 0, 1, 1], [], []>} : vector<32x128xbf16>, vector<128x128xbf16>, vector<32x128xf32> -> vector<32x128xf32>
    %c0_95 = arith.constant 0 : index
    %c0_96 = arith.constant 0 : index
    %303 = vector.load %arg11[%c0_95, %c0_96] : memref<1x128xf32, #tpu.memory_space<vmem>>, vector<1x128xf32>
    %304 = vector.broadcast %303 : vector<1x128xf32> to vector<32x128xf32>
    %305 = arith.addf %302, %304 : vector<32x128xf32>
    %306 = arith.addf %1, %305 : vector<32x128xf32>
    %c0_97 = arith.constant 0 : index
    %c0_98 = arith.constant 0 : index
    %307 = vector.load %arg6[%c0_97, %c0_98] : memref<2x128xf32, #tpu.memory_space<vmem>>, vector<1x128xf32>
    %c1_99 = arith.constant 1 : index
    %c0_100 = arith.constant 0 : index
    %308 = vector.load %arg6[%c1_99, %c0_100] : memref<2x128xf32, #tpu.memory_space<vmem>>, vector<1x128xf32>
    %cst_101 = arith.constant dense<0.000000e+00> : vector<32xf32>
    %309 = vector.multi_reduction <add>, %306, %cst_101 [1] : vector<32x128xf32> to vector<32xf32>
    %310 = vector.shape_cast %309 : vector<32xf32> to vector<32x1xf32>
    %cst_102 = arith.constant 1.280000e+02 : f32
    %311 = vector.broadcast %cst_102 : f32 to vector<32x1xf32>
    %312 = arith.divf %310, %311 : vector<32x1xf32>
    %313 = vector.broadcast %312 : vector<32x1xf32> to vector<32x128xf32>
    %314 = arith.subf %306, %313 : vector<32x128xf32>
    %315 = arith.mulf %314, %314 : vector<32x128xf32>
    %cst_103 = arith.constant dense<0.000000e+00> : vector<32xf32>
    %316 = vector.multi_reduction <add>, %315, %cst_103 [1] : vector<32x128xf32> to vector<32xf32>
    %317 = vector.shape_cast %316 : vector<32xf32> to vector<32x1xf32>
    %cst_104 = arith.constant 1.280000e+02 : f32
    %318 = vector.broadcast %cst_104 : f32 to vector<32x1xf32>
    %319 = arith.divf %317, %318 : vector<32x1xf32>
    %cst_105 = arith.constant 9.99999997E-7 : f32
    %320 = vector.broadcast %cst_105 : f32 to vector<32x1xf32>
    %321 = arith.addf %319, %320 : vector<32x1xf32>
    %322 = math.rsqrt %321 : vector<32x1xf32>
    %323 = vector.broadcast %322 : vector<32x1xf32> to vector<32x128xf32>
    %324 = arith.mulf %314, %323 : vector<32x128xf32>
    %325 = vector.broadcast %307 : vector<1x128xf32> to vector<32x128xf32>
    %326 = arith.mulf %324, %325 : vector<32x128xf32>
    %327 = vector.broadcast %308 : vector<1x128xf32> to vector<32x128xf32>
    %328 = arith.addf %326, %327 : vector<32x128xf32>
    %329 = arith.truncf %328 : vector<32x128xf32> to vector<32x128xbf16>
    %c0_106 = arith.constant 0 : index
    %c0_107 = arith.constant 0 : index
    %330 = vector.load %arg12[%c0_106, %c0_107] : memref<128x512xbf16, #tpu.memory_space<vmem>>, vector<128x512xbf16>
    %cst_108 = arith.constant dense<0.000000e+00> : vector<32x512xf32>
    %331 = tpu.matmul %329, %330, %cst_108 {dimension_numbers = #tpu.dot_dimension_numbers<[1], [0], [0], [1], [0, 0, 1, 1], [], []>} : vector<32x128xbf16>, vector<128x512xbf16>, vector<32x512xf32> -> vector<32x512xf32>
    %c0_109 = arith.constant 0 : index
    %c0_110 = arith.constant 0 : index
    %332 = vector.load %arg13[%c0_109, %c0_110] : memref<1x512xf32, #tpu.memory_space<vmem>>, vector<1x512xf32>
    %333 = vector.broadcast %332 : vector<1x512xf32> to vector<32x512xf32>
    %334 = arith.addf %331, %333 : vector<32x512xf32>
    %cst_111 = arith.constant 5.000000e-01 : f32
    %335 = vector.broadcast %cst_111 : f32 to vector<32x512xf32>
    %336 = arith.mulf %335, %334 : vector<32x512xf32>
    %cst_112 = arith.constant 4.471500e-02 : f32
    %337 = vector.broadcast %cst_112 : f32 to vector<32x512xf32>
    %338 = arith.mulf %337, %334 : vector<32x512xf32>
    %339 = arith.mulf %338, %334 : vector<32x512xf32>
    %340 = arith.mulf %339, %334 : vector<32x512xf32>
    %341 = arith.addf %334, %340 : vector<32x512xf32>
    %cst_113 = arith.constant 0.797884583 : f32
    %342 = vector.broadcast %cst_113 : f32 to vector<32x512xf32>
    %343 = arith.mulf %342, %341 : vector<32x512xf32>
    %344 = math.tanh %343 : vector<32x512xf32>
    %cst_114 = arith.constant 1.000000e+00 : f32
    %345 = vector.broadcast %cst_114 : f32 to vector<32x512xf32>
    %346 = arith.addf %345, %344 : vector<32x512xf32>
    %347 = arith.mulf %336, %346 : vector<32x512xf32>
    %348 = arith.truncf %347 : vector<32x512xf32> to vector<32x512xbf16>
    %c0_115 = arith.constant 0 : index
    %c0_116 = arith.constant 0 : index
    %349 = vector.load %arg14[%c0_115, %c0_116] : memref<512x128xbf16, #tpu.memory_space<vmem>>, vector<512x128xbf16>
    %cst_117 = arith.constant dense<0.000000e+00> : vector<32x128xf32>
    %350 = tpu.matmul %348, %349, %cst_117 {dimension_numbers = #tpu.dot_dimension_numbers<[1], [0], [0], [1], [0, 0, 1, 1], [], []>} : vector<32x512xbf16>, vector<512x128xbf16>, vector<32x128xf32> -> vector<32x128xf32>
    %c0_118 = arith.constant 0 : index
    %c0_119 = arith.constant 0 : index
    %351 = vector.load %arg15[%c0_118, %c0_119] : memref<1x128xf32, #tpu.memory_space<vmem>>, vector<1x128xf32>
    %352 = vector.broadcast %351 : vector<1x128xf32> to vector<32x128xf32>
    %353 = arith.addf %350, %352 : vector<32x128xf32>
    %354 = arith.addf %306, %353 : vector<32x128xf32>
    %c0_120 = arith.constant 0 : index
    %c0_121 = arith.constant 0 : index
    %c0_122 = arith.constant 0 : index
    %355 = vector.load %arg16[%c0_120, %c0_121, %c0_122] : memref<1x32x128xf32, #tpu.memory_space<vmem>>, vector<1x32x128xf32>
    %356 = vector.shape_cast %355 : vector<1x32x128xf32> to vector<32x128xf32>
    %357 = vector.shape_cast %354 : vector<32x128xf32> to vector<1x32x128xf32>
    tpu.vector_store %arg16[%c0_120, %c0_121, %c0_122], %357 {strides = array<i32>} : memref<1x32x128xf32, #tpu.memory_space<vmem>>, vector<1x32x128xf32>,
    return
  }
  func.func @transform_0(%arg0: i32, %arg1: i32) -> (i32, i32, i32) {
    %c0_i32 = arith.constant 0 : i32
    %c0_i32_0 = arith.constant 0 : i32
    return %arg0, %arg1, %c0_i32 : i32, i32, i32
  }
  func.func @transform_1(%arg0: i32, %arg1: i32) -> (i32, i32, i32) {
    %c0_i32 = arith.constant 0 : i32
    %c0_i32_0 = arith.constant 0 : i32
    %c0_i32_1 = arith.constant 0 : i32
    return %arg0, %c0_i32, %c0_i32_0 : i32, i32, i32
  }
  func.func @transform_2(%arg0: i32, %arg1: i32) -> (i32, i32) {
    %c0_i32 = arith.constant 0 : i32
    %c0_i32_0 = arith.constant 0 : i32
    %c0_i32_1 = arith.constant 0 : i32
    return %c0_i32, %c0_i32_0 : i32, i32
  }
  func.func @transform_3(%arg0: i32, %arg1: i32) -> (i32, i32) {
    %c0_i32 = arith.constant 0 : i32
    %c0_i32_0 = arith.constant 0 : i32
    %c0_i32_1 = arith.constant 0 : i32
    return %c0_i32, %c0_i32_0 : i32, i32
  }
  func.func @transform_4(%arg0: i32, %arg1: i32) -> (i32, i32) {
    %c0_i32 = arith.constant 0 : i32
    %c0_i32_0 = arith.constant 0 : i32
    %c0_i32_1 = arith.constant 0 : i32
    return %c0_i32, %c0_i32_0 : i32, i32
  }
  func.func @transform_5(%arg0: i32, %arg1: i32) -> (i32, i32) {
    %c0_i32 = arith.constant 0 : i32
    %c0_i32_0 = arith.constant 0 : i32
    %c0_i32_1 = arith.constant 0 : i32
    return %c0_i32, %c0_i32_0 : i32, i32
  }
  func.func @transform_6(%arg0: i32, %arg1: i32) -> (i32, i32) {
    %c0_i32 = arith.constant 0 : i32
    %c0_i32_0 = arith.constant 0 : i32
    %c0_i32_1 = arith.constant 0 : i32
    return %c0_i32, %c0_i32_0 : i32, i32
  }
  func.func @transform_7(%arg0: i32, %arg1: i32) -> (i32, i32) {
    %c0_i32 = arith.constant 0 : i32
    %c0_i32_0 = arith.constant 0 : i32
    %c0_i32_1 = arith.constant 0 : i32
    return %c0_i32, %c0_i32_0 : i32, i32
  }
  func.func @transform_8(%arg0: i32, %arg1: i32) -> (i32, i32) {
    %c0_i32 = arith.constant 0 : i32
    %c0_i32_0 = arith.constant 0 : i32
    %c0_i32_1 = arith.constant 0 : i32
    return %c0_i32, %c0_i32_0 : i32, i32
  }
  func.func @transform_9(%arg0: i32, %arg1: i32) -> (i32, i32) {
    %c0_i32 = arith.constant 0 : i32
    %c0_i32_0 = arith.constant 0 : i32
    %c0_i32_1 = arith.constant 0 : i32
    return %c0_i32, %c0_i32_0 : i32, i32
  }
  func.func @transform_10(%arg0: i32, %arg1: i32) -> (i32, i32) {
    %c0_i32 = arith.constant 0 : i32
    %c0_i32_0 = arith.constant 0 : i32
    %c0_i32_1 = arith.constant 0 : i32
    return %c0_i32, %c0_i32_0 : i32, i32
  }
  func.func @transform_11(%arg0: i32, %arg1: i32) -> (i32, i32) {
    %c0_i32 = arith.constant 0 : i32
    %c0_i32_0 = arith.constant 0 : i32
    %c0_i32_1 = arith.constant 0 : i32
    return %c0_i32, %c0_i32_0 : i32, i32
  }
  func.func @transform_12(%arg0: i32, %arg1: i32) -> (i32, i32) {
    %c0_i32 = arith.constant 0 : i32
    %c0_i32_0 = arith.constant 0 : i32
    %c0_i32_1 = arith.constant 0 : i32
    return %c0_i32, %c0_i32_0 : i32, i32
  }
  func.func @transform_13(%arg0: i32, %arg1: i32) -> (i32, i32) {
    %c0_i32 = arith.constant 0 : i32
    %c0_i32_0 = arith.constant 0 : i32
    %c0_i32_1 = arith.constant 0 : i32
    return %c0_i32, %c0_i32_0 : i32, i32
  }
  func.func @transform_14(%arg0: i32, %arg1: i32) -> (i32, i32, i32) {
    %c0_i32 = arith.constant 0 : i32
    %c0_i32_0 = arith.constant 0 : i32
    return %arg0, %arg1, %c0_i32 : i32, i32, i32
  }
}

module attributes {stable_mosaic.version = 11 : i64} {
  func.func @_block_kernel(%arg0: i32, %arg1: i32, %arg2: memref<1x32x128xf32, #tpu.memory_space<vmem>>, %arg3: memref<1x16x64xf32, #tpu.memory_space<vmem>>, %arg4: memref<2x128xf32, #tpu.memory_space<vmem>>, %arg5: memref<2x64xf32, #tpu.memory_space<vmem>>, %arg6: memref<2x128xf32, #tpu.memory_space<vmem>>, %arg7: memref<4x32xf32, #tpu.memory_space<vmem>>, %arg8: memref<128x128xbf16, #tpu.memory_space<vmem>>, %arg9: memref<64x256xbf16, #tpu.memory_space<vmem>>, %arg10: memref<128x128xbf16, #tpu.memory_space<vmem>>, %arg11: memref<1x128xf32, #tpu.memory_space<vmem>>, %arg12: memref<128x512xbf16, #tpu.memory_space<vmem>>, %arg13: memref<1x512xf32, #tpu.memory_space<vmem>>, %arg14: memref<512x128xbf16, #tpu.memory_space<vmem>>, %arg15: memref<1x128xf32, #tpu.memory_space<vmem>>, %arg16: memref<1x32x128xf32, #tpu.memory_space<vmem>>, %arg17: memref<32x128xf32, #tpu.memory_space<vmem>>) attributes {dimension_semantics = [#tpu.dimension_semantics<parallel>, #tpu.dimension_semantics<parallel>], iteration_bounds = array<i64: 2, 2>, scalar_prefetch = 0 : i64, scratch_operands = 1 : i64, tpu.core_type = #tpu.core_type<tc>, window_params = [{transform_indices = @transform_0, window_bounds = array<i64: 1, 32, 128>}, {transform_indices = @transform_1, window_bounds = array<i64: 1, 16, 64>}, {pipeline_mode = #tpu.pipeline_mode<synchronous>, transform_indices = @transform_2, window_bounds = array<i64: 2, 128>}, {pipeline_mode = #tpu.pipeline_mode<synchronous>, transform_indices = @transform_3, window_bounds = array<i64: 2, 64>}, {pipeline_mode = #tpu.pipeline_mode<synchronous>, transform_indices = @transform_4, window_bounds = array<i64: 2, 128>}, {pipeline_mode = #tpu.pipeline_mode<synchronous>, transform_indices = @transform_5, window_bounds = array<i64: 4, 32>}, {pipeline_mode = #tpu.pipeline_mode<synchronous>, transform_indices = @transform_6, window_bounds = array<i64: 128, 128>}, {pipeline_mode = #tpu.pipeline_mode<synchronous>, transform_indices = @transform_7, window_bounds = array<i64: 64, 256>}, {pipeline_mode = #tpu.pipeline_mode<synchronous>, transform_indices = @transform_8, window_bounds = array<i64: 128, 128>}, {pipeline_mode = #tpu.pipeline_mode<synchronous>, transform_indices = @transform_9, window_bounds = array<i64: 1, 128>}, {pipeline_mode = #tpu.pipeline_mode<synchronous>, transform_indices = @transform_10, window_bounds = array<i64: 128, 512>}, {pipeline_mode = #tpu.pipeline_mode<synchronous>, transform_indices = @transform_11, window_bounds = array<i64: 1, 512>}, {pipeline_mode = #tpu.pipeline_mode<synchronous>, transform_indices = @transform_12, window_bounds = array<i64: 512, 128>}, {pipeline_mode = #tpu.pipeline_mode<synchronous>, transform_indices = @transform_13, window_bounds = array<i64: 1, 128>}, {transform_indices = @transform_14, window_bounds = array<i64: 1, 32, 128>}]} {
    %c0 = arith.constant 0 : index
    %c0_0 = arith.constant 0 : index
    %c0_1 = arith.constant 0 : index
    %0 = vector.load %arg2[%c0, %c0_0, %c0_1] : memref<1x32x128xf32, #tpu.memory_space<vmem>>, vector<1x32x128xf32>
    %1 = vector.shape_cast %0 : vector<1x32x128xf32> to vector<32x128xf32>
    %c0_2 = arith.constant 0 : index
    %c0_3 = arith.constant 0 : index
    %c0_4 = arith.constant 0 : index
    %2 = vector.load %arg3[%c0_2, %c0_3, %c0_4] : memref<1x16x64xf32, #tpu.memory_space<vmem>>, vector<1x16x64xf32>
    %3 = vector.shape_cast %2 : vector<1x16x64xf32> to vector<16x64xf32>
    %c0_5 = arith.constant 0 : index
    %c0_6 = arith.constant 0 : index
    %4 = vector.load %arg4[%c0_5, %c0_6] : memref<2x128xf32, #tpu.memory_space<vmem>>, vector<1x128xf32>
    %c1 = arith.constant 1 : index
    %c0_7 = arith.constant 0 : index
    %5 = vector.load %arg4[%c1, %c0_7] : memref<2x128xf32, #tpu.memory_space<vmem>>, vector<1x128xf32>
    %cst = arith.constant dense<0.000000e+00> : vector<32xf32>
    %6 = vector.multi_reduction <add>, %1, %cst [1] : vector<32x128xf32> to vector<32xf32>
    %7 = vector.shape_cast %6 : vector<32xf32> to vector<32x1xf32>
    %cst_8 = arith.constant 1.280000e+02 : f32
    %8 = vector.broadcast %cst_8 : f32 to vector<32x1xf32>
    %9 = arith.divf %7, %8 : vector<32x1xf32>
    %10 = vector.broadcast %9 : vector<32x1xf32> to vector<32x128xf32>
    %11 = arith.subf %1, %10 : vector<32x128xf32>
    %12 = arith.mulf %11, %11 : vector<32x128xf32>
    %cst_9 = arith.constant dense<0.000000e+00> : vector<32xf32>
    %13 = vector.multi_reduction <add>, %12, %cst_9 [1] : vector<32x128xf32> to vector<32xf32>
    %14 = vector.shape_cast %13 : vector<32xf32> to vector<32x1xf32>
    %cst_10 = arith.constant 1.280000e+02 : f32
    %15 = vector.broadcast %cst_10 : f32 to vector<32x1xf32>
    %16 = arith.divf %14, %15 : vector<32x1xf32>
    %cst_11 = arith.constant 9.99999997E-7 : f32
    %17 = vector.broadcast %cst_11 : f32 to vector<32x1xf32>
    %18 = arith.addf %16, %17 : vector<32x1xf32>
    %19 = math.rsqrt %18 : vector<32x1xf32>
    %20 = vector.broadcast %19 : vector<32x1xf32> to vector<32x128xf32>
    %21 = arith.mulf %11, %20 : vector<32x128xf32>
    %22 = vector.broadcast %4 : vector<1x128xf32> to vector<32x128xf32>
    %23 = arith.mulf %21, %22 : vector<32x128xf32>
    %24 = vector.broadcast %5 : vector<1x128xf32> to vector<32x128xf32>
    %25 = arith.addf %23, %24 : vector<32x128xf32>
    %26 = arith.truncf %25 : vector<32x128xf32> to vector<32x128xbf16>
    %c0_12 = arith.constant 0 : index
    %c0_13 = arith.constant 0 : index
    %27 = vector.load %arg5[%c0_12, %c0_13] : memref<2x64xf32, #tpu.memory_space<vmem>>, vector<1x64xf32>
    %c1_14 = arith.constant 1 : index
    %c0_15 = arith.constant 0 : index
    %28 = vector.load %arg5[%c1_14, %c0_15] : memref<2x64xf32, #tpu.memory_space<vmem>>, vector<1x64xf32>
    %cst_16 = arith.constant dense<0.000000e+00> : vector<16xf32>
    %29 = vector.multi_reduction <add>, %3, %cst_16 [1] : vector<16x64xf32> to vector<16xf32>
    %30 = vector.shape_cast %29 : vector<16xf32> to vector<16x1xf32>
    %cst_17 = arith.constant 6.400000e+01 : f32
    %31 = vector.broadcast %cst_17 : f32 to vector<16x1xf32>
    %32 = arith.divf %30, %31 : vector<16x1xf32>
    %33 = vector.broadcast %32 : vector<16x1xf32> to vector<16x64xf32>
    %34 = arith.subf %3, %33 : vector<16x64xf32>
    %35 = arith.mulf %34, %34 : vector<16x64xf32>
    %cst_18 = arith.constant dense<0.000000e+00> : vector<16xf32>
    %36 = vector.multi_reduction <add>, %35, %cst_18 [1] : vector<16x64xf32> to vector<16xf32>
    %37 = vector.shape_cast %36 : vector<16xf32> to vector<16x1xf32>
    %cst_19 = arith.constant 6.400000e+01 : f32
    %38 = vector.broadcast %cst_19 : f32 to vector<16x1xf32>
    %39 = arith.divf %37, %38 : vector<16x1xf32>
    %cst_20 = arith.constant 9.99999997E-7 : f32
    %40 = vector.broadcast %cst_20 : f32 to vector<16x1xf32>
    %41 = arith.addf %39, %40 : vector<16x1xf32>
    %42 = math.rsqrt %41 : vector<16x1xf32>
    %43 = vector.broadcast %42 : vector<16x1xf32> to vector<16x64xf32>
    %44 = arith.mulf %34, %43 : vector<16x64xf32>
    %45 = vector.broadcast %27 : vector<1x64xf32> to vector<16x64xf32>
    %46 = arith.mulf %44, %45 : vector<16x64xf32>
    %47 = vector.broadcast %28 : vector<1x64xf32> to vector<16x64xf32>
    %48 = arith.addf %46, %47 : vector<16x64xf32>
    %49 = arith.truncf %48 : vector<16x64xf32> to vector<16x64xbf16>
    %c0_21 = arith.constant 0 : index
    %c0_22 = arith.constant 0 : index
    %50 = vector.load %arg8[%c0_21, %c0_22] : memref<128x128xbf16, #tpu.memory_space<vmem>>, vector<128x128xbf16>
    %cst_23 = arith.constant dense<0.000000e+00> : vector<32x128xf32>
    %51 = tpu.matmul %26, %50, %cst_23 {dimension_numbers = #tpu.dot_dimension_numbers<[1], [0], [0], [1], [0, 0, 1, 1], [], []>} : vector<32x128xbf16>, vector<128x128xbf16>, vector<32x128xf32> -> vector<32x128xf32>
    %c0_24 = arith.constant 0 : index
    %c0_25 = arith.constant 0 : index
    %52 = vector.load %arg9[%c0_24, %c0_25] : memref<64x256xbf16, #tpu.memory_space<vmem>>, vector<64x256xbf16>
    %cst_26 = arith.constant dense<0.000000e+00> : vector<16x256xf32>
    %53 = tpu.matmul %49, %52, %cst_26 {dimension_numbers = #tpu.dot_dimension_numbers<[1], [0], [0], [1], [0, 0, 1, 1], [], []>} : vector<16x64xbf16>, vector<64x256xbf16>, vector<16x256xf32> -> vector<16x256xf32>
    %c0_27 = arith.constant 0 : index
    %c0_28 = arith.constant 0 : index
    %54 = vector.load %arg7[%c0_27, %c0_28] : memref<4x32xf32, #tpu.memory_space<vmem>>, vector<4x32xf32>
    %55 = vector.extract_strided_slice %54 {offsets = [0, 0], sizes = [1, 32], strides = [1, 1]} : vector<4x32xf32> to vector<1x32xf32>
    %56 = vector.extract_strided_slice %54 {offsets = [1, 0], sizes = [1, 32], strides = [1, 1]} : vector<4x32xf32> to vector<1x32xf32>
    %57 = vector.extract_strided_slice %54 {offsets = [2, 0], sizes = [1, 32], strides = [1, 1]} : vector<4x32xf32> to vector<1x32xf32>
    %58 = vector.extract_strided_slice %54 {offsets = [3, 0], sizes = [1, 32], strides = [1, 1]} : vector<4x32xf32> to vector<1x32xf32>
    %59 = vector.extract_strided_slice %51 {offsets = [0, 0], sizes = [32, 32], strides = [1, 1]} : vector<32x128xf32> to vector<32x32xf32>
    %cst_29 = arith.constant dense<0.000000e+00> : vector<32xf32>
    %60 = vector.multi_reduction <add>, %59, %cst_29 [1] : vector<32x32xf32> to vector<32xf32>
    %61 = vector.shape_cast %60 : vector<32xf32> to vector<32x1xf32>
    %cst_30 = arith.constant 3.200000e+01 : f32
    %62 = vector.broadcast %cst_30 : f32 to vector<32x1xf32>
    %63 = arith.divf %61, %62 : vector<32x1xf32>
    %64 = vector.broadcast %63 : vector<32x1xf32> to vector<32x32xf32>
    %65 = arith.subf %59, %64 : vector<32x32xf32>
    %66 = arith.mulf %65, %65 : vector<32x32xf32>
    %cst_31 = arith.constant dense<0.000000e+00> : vector<32xf32>
    %67 = vector.multi_reduction <add>, %66, %cst_31 [1] : vector<32x32xf32> to vector<32xf32>
    %68 = vector.shape_cast %67 : vector<32xf32> to vector<32x1xf32>
    %cst_32 = arith.constant 3.200000e+01 : f32
    %69 = vector.broadcast %cst_32 : f32 to vector<32x1xf32>
    %70 = arith.divf %68, %69 : vector<32x1xf32>
    %cst_33 = arith.constant 9.99999997E-7 : f32
    %71 = vector.broadcast %cst_33 : f32 to vector<32x1xf32>
    %72 = arith.addf %70, %71 : vector<32x1xf32>
    %73 = math.rsqrt %72 : vector<32x1xf32>
    %74 = vector.broadcast %73 : vector<32x1xf32> to vector<32x32xf32>
    %75 = arith.mulf %65, %74 : vector<32x32xf32>
    %76 = vector.broadcast %55 : vector<1x32xf32> to vector<32x32xf32>
    %77 = arith.mulf %75, %76 : vector<32x32xf32>
    %78 = vector.broadcast %56 : vector<1x32xf32> to vector<32x32xf32>
    %79 = arith.addf %77, %78 : vector<32x32xf32>
    %80 = vector.extract_strided_slice %53 {offsets = [0, 0], sizes = [16, 32], strides = [1, 1]} : vector<16x256xf32> to vector<16x32xf32>
    %cst_34 = arith.constant dense<0.000000e+00> : vector<16xf32>
    %81 = vector.multi_reduction <add>, %80, %cst_34 [1] : vector<16x32xf32> to vector<16xf32>
    %82 = vector.shape_cast %81 : vector<16xf32> to vector<16x1xf32>
    %cst_35 = arith.constant 3.200000e+01 : f32
    %83 = vector.broadcast %cst_35 : f32 to vector<16x1xf32>
    %84 = arith.divf %82, %83 : vector<16x1xf32>
    %85 = vector.broadcast %84 : vector<16x1xf32> to vector<16x32xf32>
    %86 = arith.subf %80, %85 : vector<16x32xf32>
    %87 = arith.mulf %86, %86 : vector<16x32xf32>
    %cst_36 = arith.constant dense<0.000000e+00> : vector<16xf32>
    %88 = vector.multi_reduction <add>, %87, %cst_36 [1] : vector<16x32xf32> to vector<16xf32>
    %89 = vector.shape_cast %88 : vector<16xf32> to vector<16x1xf32>
    %cst_37 = arith.constant 3.200000e+01 : f32
    %90 = vector.broadcast %cst_37 : f32 to vector<16x1xf32>
    %91 = arith.divf %89, %90 : vector<16x1xf32>
    %cst_38 = arith.constant 9.99999997E-7 : f32
    %92 = vector.broadcast %cst_38 : f32 to vector<16x1xf32>
    %93 = arith.addf %91, %92 : vector<16x1xf32>
    %94 = math.rsqrt %93 : vector<16x1xf32>
    %95 = vector.broadcast %94 : vector<16x1xf32> to vector<16x32xf32>
    %96 = arith.mulf %86, %95 : vector<16x32xf32>
    %97 = vector.broadcast %57 : vector<1x32xf32> to vector<16x32xf32>
    %98 = arith.mulf %96, %97 : vector<16x32xf32>
    %99 = vector.broadcast %58 : vector<1x32xf32> to vector<16x32xf32>
    %100 = arith.addf %98, %99 : vector<16x32xf32>
    %101 = vector.extract_strided_slice %53 {offsets = [0, 128], sizes = [16, 32], strides = [1, 1]} : vector<16x256xf32> to vector<16x32xf32>
    %102 = arith.truncf %79 : vector<32x32xf32> to vector<32x32xbf16>
    %103 = arith.truncf %100 : vector<16x32xf32> to vector<16x32xbf16>
    %cst_39 = arith.constant dense<0.000000e+00> : vector<32x16xf32>
    %104 = tpu.matmul %102, %103, %cst_39 {dimension_numbers = #tpu.dot_dimension_numbers<[1], [1], [0], [0], [0, 0, 1, 0], [], []>} : vector<32x32xbf16>, vector<16x32xbf16>, vector<32x16xf32> -> vector<32x16xf32>
    %cst_40 = arith.constant dense<0xFF800000> : vector<32xf32>
    %105 = vector.multi_reduction <maximumf>, %104, %cst_40 [1] : vector<32x16xf32> to vector<32xf32>
    %106 = vector.shape_cast %105 : vector<32xf32> to vector<32x1xf32>
    %107 = vector.broadcast %106 : vector<32x1xf32> to vector<32x16xf32>
    %108 = arith.subf %104, %107 : vector<32x16xf32>
    %109 = math.exp %108 : vector<32x16xf32>
    %cst_41 = arith.constant dense<0.000000e+00> : vector<32xf32>
    %110 = vector.multi_reduction <add>, %109, %cst_41 [1] : vector<32x16xf32> to vector<32xf32>
    %111 = vector.shape_cast %110 : vector<32xf32> to vector<32x1xf32>
    %112 = tpu.reciprocal %111 {approx = true} : vector<32x1xf32> -> vector<32x1xf32>
    %113 = vector.broadcast %112 : vector<32x1xf32> to vector<32x16xf32>
    %114 = arith.mulf %109, %113 : vector<32x16xf32>
    %115 = arith.truncf %114 : vector<32x16xf32> to vector<32x16xbf16>
    %116 = arith.truncf %101 : vector<16x32xf32> to vector<16x32xbf16>
    %cst_42 = arith.constant dense<0.000000e+00> : vector<32x32xf32>
    %117 = tpu.matmul %115, %116, %cst_42 {dimension_numbers = #tpu.dot_dimension_numbers<[1], [0], [0], [1], [0, 0, 1, 1], [], []>} : vector<32x16xbf16>, vector<16x32xbf16>, vector<32x32xf32> -> vector<32x32xf32>
    %c0_43 = arith.constant 0 : index
    %c0_44 = arith.constant 0 : index
    %118 = vector.load %arg17[%c0_43, %c0_44] : memref<32x128xf32, #tpu.memory_space<vmem>>, vector<32x32xf32>
    tpu.vector_store %arg17[%c0_43, %c0_44], %117 {strides = array<i32>} : memref<32x128xf32, #tpu.memory_space<vmem>>, vector<32x32xf32>,
    %119 = vector.extract_strided_slice %51 {offsets = [0, 32], sizes = [32, 32], strides = [1, 1]} : vector<32x128xf32> to vector<32x32xf32>
    %cst_45 = arith.constant dense<0.000000e+00> : vector<32xf32>
    %120 = vector.multi_reduction <add>, %119, %cst_45 [1] : vector<32x32xf32> to vector<32xf32>
    %121 = vector.shape_cast %120 : vector<32xf32> to vector<32x1xf32>
    %cst_46 = arith.constant 3.200000e+01 : f32
    %122 = vector.broadcast %cst_46 : f32 to vector<32x1xf32>
    %123 = arith.divf %121, %122 : vector<32x1xf32>
    %124 = vector.broadcast %123 : vector<32x1xf32> to vector<32x32xf32>
    %125 = arith.subf %119, %124 : vector<32x32xf32>
    %126 = arith.mulf %125, %125 : vector<32x32xf32>
    %cst_47 = arith.constant dense<0.000000e+00> : vector<32xf32>
    %127 = vector.multi_reduction <add>, %126, %cst_47 [1] : vector<32x32xf32> to vector<32xf32>
    %128 = vector.shape_cast %127 : vector<32xf32> to vector<32x1xf32>
    %cst_48 = arith.constant 3.200000e+01 : f32
    %129 = vector.broadcast %cst_48 : f32 to vector<32x1xf32>
    %130 = arith.divf %128, %129 : vector<32x1xf32>
    %cst_49 = arith.constant 9.99999997E-7 : f32
    %131 = vector.broadcast %cst_49 : f32 to vector<32x1xf32>
    %132 = arith.addf %130, %131 : vector<32x1xf32>
    %133 = math.rsqrt %132 : vector<32x1xf32>
    %134 = vector.broadcast %133 : vector<32x1xf32> to vector<32x32xf32>
    %135 = arith.mulf %125, %134 : vector<32x32xf32>
    %136 = vector.broadcast %55 : vector<1x32xf32> to vector<32x32xf32>
    %137 = arith.mulf %135, %136 : vector<32x32xf32>
    %138 = vector.broadcast %56 : vector<1x32xf32> to vector<32x32xf32>
    %139 = arith.addf %137, %138 : vector<32x32xf32>
    %140 = vector.extract_strided_slice %53 {offsets = [0, 32], sizes = [16, 32], strides = [1, 1]} : vector<16x256xf32> to vector<16x32xf32>
    %cst_50 = arith.constant dense<0.000000e+00> : vector<16xf32>
    %141 = vector.multi_reduction <add>, %140, %cst_50 [1] : vector<16x32xf32> to vector<16xf32>
    %142 = vector.shape_cast %141 : vector<16xf32> to vector<16x1xf32>
    %cst_51 = arith.constant 3.200000e+01 : f32
    %143 = vector.broadcast %cst_51 : f32 to vector<16x1xf32>
    %144 = arith.divf %142, %143 : vector<16x1xf32>
    %145 = vector.broadcast %144 : vector<16x1xf32> to vector<16x32xf32>
    %146 = arith.subf %140, %145 : vector<16x32xf32>
    %147 = arith.mulf %146, %146 : vector<16x32xf32>
    %cst_52 = arith.constant dense<0.000000e+00> : vector<16xf32>
    %148 = vector.multi_reduction <add>, %147, %cst_52 [1] : vector<16x32xf32> to vector<16xf32>
    %149 = vector.shape_cast %148 : vector<16xf32> to vector<16x1xf32>
    %cst_53 = arith.constant 3.200000e+01 : f32
    %150 = vector.broadcast %cst_53 : f32 to vector<16x1xf32>
    %151 = arith.divf %149, %150 : vector<16x1xf32>
    %cst_54 = arith.constant 9.99999997E-7 : f32
    %152 = vector.broadcast %cst_54 : f32 to vector<16x1xf32>
    %153 = arith.addf %151, %152 : vector<16x1xf32>
    %154 = math.rsqrt %153 : vector<16x1xf32>
    %155 = vector.broadcast %154 : vector<16x1xf32> to vector<16x32xf32>
    %156 = arith.mulf %146, %155 : vector<16x32xf32>
    %157 = vector.broadcast %57 : vector<1x32xf32> to vector<16x32xf32>
    %158 = arith.mulf %156, %157 : vector<16x32xf32>
    %159 = vector.broadcast %58 : vector<1x32xf32> to vector<16x32xf32>
    %160 = arith.addf %158, %159 : vector<16x32xf32>
    %161 = vector.extract_strided_slice %53 {offsets = [0, 160], sizes = [16, 32], strides = [1, 1]} : vector<16x256xf32> to vector<16x32xf32>
    %162 = arith.truncf %139 : vector<32x32xf32> to vector<32x32xbf16>
    %163 = arith.truncf %160 : vector<16x32xf32> to vector<16x32xbf16>
    %cst_55 = arith.constant dense<0.000000e+00> : vector<32x16xf32>
    %164 = tpu.matmul %162, %163, %cst_55 {dimension_numbers = #tpu.dot_dimension_numbers<[1], [1], [0], [0], [0, 0, 1, 0], [], []>} : vector<32x32xbf16>, vector<16x32xbf16>, vector<32x16xf32> -> vector<32x16xf32>
    %cst_56 = arith.constant dense<0xFF800000> : vector<32xf32>
    %165 = vector.multi_reduction <maximumf>, %164, %cst_56 [1] : vector<32x16xf32> to vector<32xf32>
    %166 = vector.shape_cast %165 : vector<32xf32> to vector<32x1xf32>
    %167 = vector.broadcast %166 : vector<32x1xf32> to vector<32x16xf32>
    %168 = arith.subf %164, %167 : vector<32x16xf32>
    %169 = math.exp %168 : vector<32x16xf32>
    %cst_57 = arith.constant dense<0.000000e+00> : vector<32xf32>
    %170 = vector.multi_reduction <add>, %169, %cst_57 [1] : vector<32x16xf32> to vector<32xf32>
    %171 = vector.shape_cast %170 : vector<32xf32> to vector<32x1xf32>
    %172 = tpu.reciprocal %171 {approx = true} : vector<32x1xf32> -> vector<32x1xf32>
    %173 = vector.broadcast %172 : vector<32x1xf32> to vector<32x16xf32>
    %174 = arith.mulf %169, %173 : vector<32x16xf32>
    %175 = arith.truncf %174 : vector<32x16xf32> to vector<32x16xbf16>
    %176 = arith.truncf %161 : vector<16x32xf32> to vector<16x32xbf16>
    %cst_58 = arith.constant dense<0.000000e+00> : vector<32x32xf32>
    %177 = tpu.matmul %175, %176, %cst_58 {dimension_numbers = #tpu.dot_dimension_numbers<[1], [0], [0], [1], [0, 0, 1, 1], [], []>} : vector<32x16xbf16>, vector<16x32xbf16>, vector<32x32xf32> -> vector<32x32xf32>
    %c0_59 = arith.constant 0 : index
    %c32 = arith.constant 32 : index
    %178 = vector.load %arg17[%c0_59, %c32] : memref<32x128xf32, #tpu.memory_space<vmem>>, vector<32x32xf32>
    tpu.vector_store %arg17[%c0_59, %c32], %177 {strides = array<i32>} : memref<32x128xf32, #tpu.memory_space<vmem>>, vector<32x32xf32>,
    %179 = vector.extract_strided_slice %51 {offsets = [0, 64], sizes = [32, 32], strides = [1, 1]} : vector<32x128xf32> to vector<32x32xf32>
    %cst_60 = arith.constant dense<0.000000e+00> : vector<32xf32>
    %180 = vector.multi_reduction <add>, %179, %cst_60 [1] : vector<32x32xf32> to vector<32xf32>
    %181 = vector.shape_cast %180 : vector<32xf32> to vector<32x1xf32>
    %cst_61 = arith.constant 3.200000e+01 : f32
    %182 = vector.broadcast %cst_61 : f32 to vector<32x1xf32>
    %183 = arith.divf %181, %182 : vector<32x1xf32>
    %184 = vector.broadcast %183 : vector<32x1xf32> to vector<32x32xf32>
    %185 = arith.subf %179, %184 : vector<32x32xf32>
    %186 = arith.mulf %185, %185 : vector<32x32xf32>
    %cst_62 = arith.constant dense<0.000000e+00> : vector<32xf32>
    %187 = vector.multi_reduction <add>, %186, %cst_62 [1] : vector<32x32xf32> to vector<32xf32>
    %188 = vector.shape_cast %187 : vector<32xf32> to vector<32x1xf32>
    %cst_63 = arith.constant 3.200000e+01 : f32
    %189 = vector.broadcast %cst_63 : f32 to vector<32x1xf32>
    %190 = arith.divf %188, %189 : vector<32x1xf32>
    %cst_64 = arith.constant 9.99999997E-7 : f32
    %191 = vector.broadcast %cst_64 : f32 to vector<32x1xf32>
    %192 = arith.addf %190, %191 : vector<32x1xf32>
    %193 = math.rsqrt %192 : vector<32x1xf32>
    %194 = vector.broadcast %193 : vector<32x1xf32> to vector<32x32xf32>
    %195 = arith.mulf %185, %194 : vector<32x32xf32>
    %196 = vector.broadcast %55 : vector<1x32xf32> to vector<32x32xf32>
    %197 = arith.mulf %195, %196 : vector<32x32xf32>
    %198 = vector.broadcast %56 : vector<1x32xf32> to vector<32x32xf32>
    %199 = arith.addf %197, %198 : vector<32x32xf32>
    %200 = vector.extract_strided_slice %53 {offsets = [0, 64], sizes = [16, 32], strides = [1, 1]} : vector<16x256xf32> to vector<16x32xf32>
    %cst_65 = arith.constant dense<0.000000e+00> : vector<16xf32>
    %201 = vector.multi_reduction <add>, %200, %cst_65 [1] : vector<16x32xf32> to vector<16xf32>
    %202 = vector.shape_cast %201 : vector<16xf32> to vector<16x1xf32>
    %cst_66 = arith.constant 3.200000e+01 : f32
    %203 = vector.broadcast %cst_66 : f32 to vector<16x1xf32>
    %204 = arith.divf %202, %203 : vector<16x1xf32>
    %205 = vector.broadcast %204 : vector<16x1xf32> to vector<16x32xf32>
    %206 = arith.subf %200, %205 : vector<16x32xf32>
    %207 = arith.mulf %206, %206 : vector<16x32xf32>
    %cst_67 = arith.constant dense<0.000000e+00> : vector<16xf32>
    %208 = vector.multi_reduction <add>, %207, %cst_67 [1] : vector<16x32xf32> to vector<16xf32>
    %209 = vector.shape_cast %208 : vector<16xf32> to vector<16x1xf32>
    %cst_68 = arith.constant 3.200000e+01 : f32
    %210 = vector.broadcast %cst_68 : f32 to vector<16x1xf32>
    %211 = arith.divf %209, %210 : vector<16x1xf32>
    %cst_69 = arith.constant 9.99999997E-7 : f32
    %212 = vector.broadcast %cst_69 : f32 to vector<16x1xf32>
    %213 = arith.addf %211, %212 : vector<16x1xf32>
    %214 = math.rsqrt %213 : vector<16x1xf32>
    %215 = vector.broadcast %214 : vector<16x1xf32> to vector<16x32xf32>
    %216 = arith.mulf %206, %215 : vector<16x32xf32>
    %217 = vector.broadcast %57 : vector<1x32xf32> to vector<16x32xf32>
    %218 = arith.mulf %216, %217 : vector<16x32xf32>
    %219 = vector.broadcast %58 : vector<1x32xf32> to vector<16x32xf32>
    %220 = arith.addf %218, %219 : vector<16x32xf32>
    %221 = vector.extract_strided_slice %53 {offsets = [0, 192], sizes = [16, 32], strides = [1, 1]} : vector<16x256xf32> to vector<16x32xf32>
    %222 = arith.truncf %199 : vector<32x32xf32> to vector<32x32xbf16>
    %223 = arith.truncf %220 : vector<16x32xf32> to vector<16x32xbf16>
    %cst_70 = arith.constant dense<0.000000e+00> : vector<32x16xf32>
    %224 = tpu.matmul %222, %223, %cst_70 {dimension_numbers = #tpu.dot_dimension_numbers<[1], [1], [0], [0], [0, 0, 1, 0], [], []>} : vector<32x32xbf16>, vector<16x32xbf16>, vector<32x16xf32> -> vector<32x16xf32>
    %cst_71 = arith.constant dense<0xFF800000> : vector<32xf32>
    %225 = vector.multi_reduction <maximumf>, %224, %cst_71 [1] : vector<32x16xf32> to vector<32xf32>
    %226 = vector.shape_cast %225 : vector<32xf32> to vector<32x1xf32>
    %227 = vector.broadcast %226 : vector<32x1xf32> to vector<32x16xf32>
    %228 = arith.subf %224, %227 : vector<32x16xf32>
    %229 = math.exp %228 : vector<32x16xf32>
    %cst_72 = arith.constant dense<0.000000e+00> : vector<32xf32>
    %230 = vector.multi_reduction <add>, %229, %cst_72 [1] : vector<32x16xf32> to vector<32xf32>
    %231 = vector.shape_cast %230 : vector<32xf32> to vector<32x1xf32>
    %232 = tpu.reciprocal %231 {approx = true} : vector<32x1xf32> -> vector<32x1xf32>
    %233 = vector.broadcast %232 : vector<32x1xf32> to vector<32x16xf32>
    %234 = arith.mulf %229, %233 : vector<32x16xf32>
    %235 = arith.truncf %234 : vector<32x16xf32> to vector<32x16xbf16>
    %236 = arith.truncf %221 : vector<16x32xf32> to vector<16x32xbf16>
    %cst_73 = arith.constant dense<0.000000e+00> : vector<32x32xf32>
    %237 = tpu.matmul %235, %236, %cst_73 {dimension_numbers = #tpu.dot_dimension_numbers<[1], [0], [0], [1], [0, 0, 1, 1], [], []>} : vector<32x16xbf16>, vector<16x32xbf16>, vector<32x32xf32> -> vector<32x32xf32>
    %c0_74 = arith.constant 0 : index
    %c64 = arith.constant 64 : index
    %238 = vector.load %arg17[%c0_74, %c64] : memref<32x128xf32, #tpu.memory_space<vmem>>, vector<32x32xf32>
    tpu.vector_store %arg17[%c0_74, %c64], %237 {strides = array<i32>} : memref<32x128xf32, #tpu.memory_space<vmem>>, vector<32x32xf32>,
    %239 = vector.extract_strided_slice %51 {offsets = [0, 96], sizes = [32, 32], strides = [1, 1]} : vector<32x128xf32> to vector<32x32xf32>
    %cst_75 = arith.constant dense<0.000000e+00> : vector<32xf32>
    %240 = vector.multi_reduction <add>, %239, %cst_75 [1] : vector<32x32xf32> to vector<32xf32>
    %241 = vector.shape_cast %240 : vector<32xf32> to vector<32x1xf32>
    %cst_76 = arith.constant 3.200000e+01 : f32
    %242 = vector.broadcast %cst_76 : f32 to vector<32x1xf32>
    %243 = arith.divf %241, %242 : vector<32x1xf32>
    %244 = vector.broadcast %243 : vector<32x1xf32> to vector<32x32xf32>
    %245 = arith.subf %239, %244 : vector<32x32xf32>
    %246 = arith.mulf %245, %245 : vector<32x32xf32>
    %cst_77 = arith.constant dense<0.000000e+00> : vector<32xf32>
    %247 = vector.multi_reduction <add>, %246, %cst_77 [1] : vector<32x32xf32> to vector<32xf32>
    %248 = vector.shape_cast %247 : vector<32xf32> to vector<32x1xf32>
    %cst_78 = arith.constant 3.200000e+01 : f32
    %249 = vector.broadcast %cst_78 : f32 to vector<32x1xf32>
    %250 = arith.divf %248, %249 : vector<32x1xf32>
    %cst_79 = arith.constant 9.99999997E-7 : f32
    %251 = vector.broadcast %cst_79 : f32 to vector<32x1xf32>
    %252 = arith.addf %250, %251 : vector<32x1xf32>
    %253 = math.rsqrt %252 : vector<32x1xf32>
    %254 = vector.broadcast %253 : vector<32x1xf32> to vector<32x32xf32>
    %255 = arith.mulf %245, %254 : vector<32x32xf32>
    %256 = vector.broadcast %55 : vector<1x32xf32> to vector<32x32xf32>
    %257 = arith.mulf %255, %256 : vector<32x32xf32>
    %258 = vector.broadcast %56 : vector<1x32xf32> to vector<32x32xf32>
    %259 = arith.addf %257, %258 : vector<32x32xf32>
    %260 = vector.extract_strided_slice %53 {offsets = [0, 96], sizes = [16, 32], strides = [1, 1]} : vector<16x256xf32> to vector<16x32xf32>
    %cst_80 = arith.constant dense<0.000000e+00> : vector<16xf32>
    %261 = vector.multi_reduction <add>, %260, %cst_80 [1] : vector<16x32xf32> to vector<16xf32>
    %262 = vector.shape_cast %261 : vector<16xf32> to vector<16x1xf32>
    %cst_81 = arith.constant 3.200000e+01 : f32
    %263 = vector.broadcast %cst_81 : f32 to vector<16x1xf32>
    %264 = arith.divf %262, %263 : vector<16x1xf32>
    %265 = vector.broadcast %264 : vector<16x1xf32> to vector<16x32xf32>
    %266 = arith.subf %260, %265 : vector<16x32xf32>
    %267 = arith.mulf %266, %266 : vector<16x32xf32>
    %cst_82 = arith.constant dense<0.000000e+00> : vector<16xf32>
    %268 = vector.multi_reduction <add>, %267, %cst_82 [1] : vector<16x32xf32> to vector<16xf32>
    %269 = vector.shape_cast %268 : vector<16xf32> to vector<16x1xf32>
    %cst_83 = arith.constant 3.200000e+01 : f32
    %270 = vector.broadcast %cst_83 : f32 to vector<16x1xf32>
    %271 = arith.divf %269, %270 : vector<16x1xf32>
    %cst_84 = arith.constant 9.99999997E-7 : f32
    %272 = vector.broadcast %cst_84 : f32 to vector<16x1xf32>
    %273 = arith.addf %271, %272 : vector<16x1xf32>
    %274 = math.rsqrt %273 : vector<16x1xf32>
    %275 = vector.broadcast %274 : vector<16x1xf32> to vector<16x32xf32>
    %276 = arith.mulf %266, %275 : vector<16x32xf32>
    %277 = vector.broadcast %57 : vector<1x32xf32> to vector<16x32xf32>
    %278 = arith.mulf %276, %277 : vector<16x32xf32>
    %279 = vector.broadcast %58 : vector<1x32xf32> to vector<16x32xf32>
    %280 = arith.addf %278, %279 : vector<16x32xf32>
    %281 = vector.extract_strided_slice %53 {offsets = [0, 224], sizes = [16, 32], strides = [1, 1]} : vector<16x256xf32> to vector<16x32xf32>
    %282 = arith.truncf %259 : vector<32x32xf32> to vector<32x32xbf16>
    %283 = arith.truncf %280 : vector<16x32xf32> to vector<16x32xbf16>
    %cst_85 = arith.constant dense<0.000000e+00> : vector<32x16xf32>
    %284 = tpu.matmul %282, %283, %cst_85 {dimension_numbers = #tpu.dot_dimension_numbers<[1], [1], [0], [0], [0, 0, 1, 0], [], []>} : vector<32x32xbf16>, vector<16x32xbf16>, vector<32x16xf32> -> vector<32x16xf32>
    %cst_86 = arith.constant dense<0xFF800000> : vector<32xf32>
    %285 = vector.multi_reduction <maximumf>, %284, %cst_86 [1] : vector<32x16xf32> to vector<32xf32>
    %286 = vector.shape_cast %285 : vector<32xf32> to vector<32x1xf32>
    %287 = vector.broadcast %286 : vector<32x1xf32> to vector<32x16xf32>
    %288 = arith.subf %284, %287 : vector<32x16xf32>
    %289 = math.exp %288 : vector<32x16xf32>
    %cst_87 = arith.constant dense<0.000000e+00> : vector<32xf32>
    %290 = vector.multi_reduction <add>, %289, %cst_87 [1] : vector<32x16xf32> to vector<32xf32>
    %291 = vector.shape_cast %290 : vector<32xf32> to vector<32x1xf32>
    %292 = tpu.reciprocal %291 {approx = true} : vector<32x1xf32> -> vector<32x1xf32>
    %293 = vector.broadcast %292 : vector<32x1xf32> to vector<32x16xf32>
    %294 = arith.mulf %289, %293 : vector<32x16xf32>
    %295 = arith.truncf %294 : vector<32x16xf32> to vector<32x16xbf16>
    %296 = arith.truncf %281 : vector<16x32xf32> to vector<16x32xbf16>
    %cst_88 = arith.constant dense<0.000000e+00> : vector<32x32xf32>
    %297 = tpu.matmul %295, %296, %cst_88 {dimension_numbers = #tpu.dot_dimension_numbers<[1], [0], [0], [1], [0, 0, 1, 1], [], []>} : vector<32x16xbf16>, vector<16x32xbf16>, vector<32x32xf32> -> vector<32x32xf32>
    %c0_89 = arith.constant 0 : index
    %c96 = arith.constant 96 : index
    %298 = vector.load %arg17[%c0_89, %c96] : memref<32x128xf32, #tpu.memory_space<vmem>>, vector<32x32xf32>
    tpu.vector_store %arg17[%c0_89, %c96], %297 {strides = array<i32>} : memref<32x128xf32, #tpu.memory_space<vmem>>, vector<32x32xf32>,
    %c0_90 = arith.constant 0 : index
    %c0_91 = arith.constant 0 : index
    %299 = vector.load %arg17[%c0_90, %c0_91] : memref<32x128xf32, #tpu.memory_space<vmem>>, vector<32x128xf32>
    %300 = arith.truncf %299 : vector<32x128xf32> to vector<32x128xbf16>
    %c0_92 = arith.constant 0 : index
    %c0_93 = arith.constant 0 : index
    %301 = vector.load %arg10[%c0_92, %c0_93] : memref<128x128xbf16, #tpu.memory_space<vmem>>, vector<128x128xbf16>
    %cst_94 = arith.constant dense<0.000000e+00> : vector<32x128xf32>
    %302 = tpu.matmul %300, %301, %cst_94 {dimension_numbers = #tpu.dot_dimension_numbers<[1], [0], [0], [1], [0, 0, 1, 1], [], []>} : vector<32x128xbf16>, vector<128x128xbf16>, vector<32x128xf32> -> vector<32x128xf32>
    %c0_95 = arith.constant 0 : index
    %c0_96 = arith.constant 0 : index
    %303 = vector.load %arg11[%c0_95, %c0_96] : memref<1x128xf32, #tpu.memory_space<vmem>>, vector<1x128xf32>
    %304 = vector.broadcast %303 : vector<1x128xf32> to vector<32x128xf32>
    %305 = arith.addf %302, %304 : vector<32x128xf32>
    %306 = arith.addf %1, %305 : vector<32x128xf32>
    %c0_97 = arith.constant 0 : index
    %c0_98 = arith.constant 0 : index
    %307 = vector.load %arg6[%c0_97, %c0_98] : memref<2x128xf32, #tpu.memory_space<vmem>>, vector<1x128xf32>
    %c1_99 = arith.constant 1 : index
    %c0_100 = arith.constant 0 : index
    %308 = vector.load %arg6[%c1_99, %c0_100] : memref<2x128xf32, #tpu.memory_space<vmem>>, vector<1x128xf32>
    %cst_101 = arith.constant dense<0.000000e+00> : vector<32xf32>
    %309 = vector.multi_reduction <add>, %306, %cst_101 [1] : vector<32x128xf32> to vector<32xf32>
    %310 = vector.shape_cast %309 : vector<32xf32> to vector<32x1xf32>
    %cst_102 = arith.constant 1.280000e+02 : f32
    %311 = vector.broadcast %cst_102 : f32 to vector<32x1xf32>
    %312 = arith.divf %310, %311 : vector<32x1xf32>
    %313 = vector.broadcast %312 : vector<32x1xf32> to vector<32x128xf32>
    %314 = arith.subf %306, %313 : vector<32x128xf32>
    %315 = arith.mulf %314, %314 : vector<32x128xf32>
    %cst_103 = arith.constant dense<0.000000e+00> : vector<32xf32>
    %316 = vector.multi_reduction <add>, %315, %cst_103 [1] : vector<32x128xf32> to vector<32xf32>
    %317 = vector.shape_cast %316 : vector<32xf32> to vector<32x1xf32>
    %cst_104 = arith.constant 1.280000e+02 : f32
    %318 = vector.broadcast %cst_104 : f32 to vector<32x1xf32>
    %319 = arith.divf %317, %318 : vector<32x1xf32>
    %cst_105 = arith.constant 9.99999997E-7 : f32
    %320 = vector.broadcast %cst_105 : f32 to vector<32x1xf32>
    %321 = arith.addf %319, %320 : vector<32x1xf32>
    %322 = math.rsqrt %321 : vector<32x1xf32>
    %323 = vector.broadcast %322 : vector<32x1xf32> to vector<32x128xf32>
    %324 = arith.mulf %314, %323 : vector<32x128xf32>
    %325 = vector.broadcast %307 : vector<1x128xf32> to vector<32x128xf32>
    %326 = arith.mulf %324, %325 : vector<32x128xf32>
    %327 = vector.broadcast %308 : vector<1x128xf32> to vector<32x128xf32>
    %328 = arith.addf %326, %327 : vector<32x128xf32>
    %329 = arith.truncf %328 : vector<32x128xf32> to vector<32x128xbf16>
    %c0_106 = arith.constant 0 : index
    %c0_107 = arith.constant 0 : index
    %330 = vector.load %arg12[%c0_106, %c0_107] : memref<128x512xbf16, #tpu.memory_space<vmem>>, vector<128x512xbf16>
    %cst_108 = arith.constant dense<0.000000e+00> : vector<32x512xf32>
    %331 = tpu.matmul %329, %330, %cst_108 {dimension_numbers = #tpu.dot_dimension_numbers<[1], [0], [0], [1], [0, 0, 1, 1], [], []>} : vector<32x128xbf16>, vector<128x512xbf16>, vector<32x512xf32> -> vector<32x512xf32>
    %c0_109 = arith.constant 0 : index
    %c0_110 = arith.constant 0 : index
    %332 = vector.load %arg13[%c0_109, %c0_110] : memref<1x512xf32, #tpu.memory_space<vmem>>, vector<1x512xf32>
    %333 = vector.broadcast %332 : vector<1x512xf32> to vector<32x512xf32>
    %334 = arith.addf %331, %333 : vector<32x512xf32>
    %cst_111 = arith.constant 5.000000e-01 : f32
    %335 = vector.broadcast %cst_111 : f32 to vector<32x512xf32>
    %336 = arith.mulf %335, %334 : vector<32x512xf32>
    %cst_112 = arith.constant 4.471500e-02 : f32
    %337 = vector.broadcast %cst_112 : f32 to vector<32x512xf32>
    %338 = arith.mulf %337, %334 : vector<32x512xf32>
    %339 = arith.mulf %338, %334 : vector<32x512xf32>
    %340 = arith.mulf %339, %334 : vector<32x512xf32>
    %341 = arith.addf %334, %340 : vector<32x512xf32>
    %cst_113 = arith.constant 0.797884583 : f32
    %342 = vector.broadcast %cst_113 : f32 to vector<32x512xf32>
    %343 = arith.mulf %342, %341 : vector<32x512xf32>
    %344 = math.tanh %343 : vector<32x512xf32>
    %cst_114 = arith.constant 1.000000e+00 : f32
    %345 = vector.broadcast %cst_114 : f32 to vector<32x512xf32>
    %346 = arith.addf %345, %344 : vector<32x512xf32>
    %347 = arith.mulf %336, %346 : vector<32x512xf32>
    %348 = arith.truncf %347 : vector<32x512xf32> to vector<32x512xbf16>
    %c0_115 = arith.constant 0 : index
    %c0_116 = arith.constant 0 : index
    %349 = vector.load %arg14[%c0_115, %c0_116] : memref<512x128xbf16, #tpu.memory_space<vmem>>, vector<512x128xbf16>
    %cst_117 = arith.constant dense<0.000000e+00> : vector<32x128xf32>
    %350 = tpu.matmul %348, %349, %cst_117 {dimension_numbers = #tpu.dot_dimension_numbers<[1], [0], [0], [1], [0, 0, 1, 1], [], []>} : vector<32x512xbf16>, vector<512x128xbf16>, vector<32x128xf32> -> vector<32x128xf32>
    %c0_118 = arith.constant 0 : index
    %c0_119 = arith.constant 0 : index
    %351 = vector.load %arg15[%c0_118, %c0_119] : memref<1x128xf32, #tpu.memory_space<vmem>>, vector<1x128xf32>
    %352 = vector.broadcast %351 : vector<1x128xf32> to vector<32x128xf32>
    %353 = arith.addf %350, %352 : vector<32x128xf32>
    %354 = arith.addf %306, %353 : vector<32x128xf32>
    %c0_120 = arith.constant 0 : index
    %c0_121 = arith.constant 0 : index
    %c0_122 = arith.constant 0 : index
    %355 = vector.load %arg16[%c0_120, %c0_121, %c0_122] : memref<1x32x128xf32, #tpu.memory_space<vmem>>, vector<1x32x128xf32>
    %356 = vector.shape_cast %355 : vector<1x32x128xf32> to vector<32x128xf32>
    %357 = vector.shape_cast %354 : vector<32x128xf32> to vector<1x32x128xf32>
    tpu.vector_store %arg16[%c0_120, %c0_121, %c0_122], %357 {strides = array<i32>} : memref<1x32x128xf32, #tpu.memory_space<vmem>>, vector<1x32x128xf32>,
    return
  }
  func.func @transform_0(%arg0: i32, %arg1: i32) -> (i32, i32, i32) {
    %c0_i32 = arith.constant 0 : i32
    %c0_i32_0 = arith.constant 0 : i32
    return %arg0, %arg1, %c0_i32 : i32, i32, i32
  }
  func.func @transform_1(%arg0: i32, %arg1: i32) -> (i32, i32, i32) {
    %c0_i32 = arith.constant 0 : i32
    %c0_i32_0 = arith.constant 0 : i32
    %c0_i32_1 = arith.constant 0 : i32
    return %arg0, %c0_i32, %c0_i32_0 : i32, i32, i32
  }
  func.func @transform_2(%arg0: i32, %arg1: i32) -> (i32, i32) {
    %c0_i32 = arith.constant 0 : i32
    %c0_i32_0 = arith.constant 0 : i32
    %c0_i32_1 = arith.constant 0 : i32
    return %c0_i32, %c0_i32_0 : i32, i32
  }
  func.func @transform_3(%arg0: i32, %arg1: i32) -> (i32, i32) {
    %c0_i32 = arith.constant 0 : i32
    %c0_i32_0 = arith.constant 0 : i32
    %c0_i32_1 = arith.constant 0 : i32
    return %c0_i32, %c0_i32_0 : i32, i32
  }
  func.func @transform_4(%arg0: i32, %arg1: i32) -> (i32, i32) {
    %c0_i32 = arith.constant 0 : i32
    %c0_i32_0 = arith.constant 0 : i32
    %c0_i32_1 = arith.constant 0 : i32
    return %c0_i32, %c0_i32_0 : i32, i32
  }
  func.func @transform_5(%arg0: i32, %arg1: i32) -> (i32, i32) {
    %c0_i32 = arith.constant 0 : i32
    %c0_i32_0 = arith.constant 0 : i32
    %c0_i32_1 = arith.constant 0 : i32
    return %c0_i32, %c0_i32_0 : i32, i32
  }
  func.func @transform_6(%arg0: i32, %arg1: i32) -> (i32, i32) {
    %c0_i32 = arith.constant 0 : i32
    %c0_i32_0 = arith.constant 0 : i32
    %c0_i32_1 = arith.constant 0 : i32
    return %c0_i32, %c0_i32_0 : i32, i32
  }
  func.func @transform_7(%arg0: i32, %arg1: i32) -> (i32, i32) {
    %c0_i32 = arith.constant 0 : i32
    %c0_i32_0 = arith.constant 0 : i32
    %c0_i32_1 = arith.constant 0 : i32
    return %c0_i32, %c0_i32_0 : i32, i32
  }
  func.func @transform_8(%arg0: i32, %arg1: i32) -> (i32, i32) {
    %c0_i32 = arith.constant 0 : i32
    %c0_i32_0 = arith.constant 0 : i32
    %c0_i32_1 = arith.constant 0 : i32
    return %c0_i32, %c0_i32_0 : i32, i32
  }
  func.func @transform_9(%arg0: i32, %arg1: i32) -> (i32, i32) {
    %c0_i32 = arith.constant 0 : i32
    %c0_i32_0 = arith.constant 0 : i32
    %c0_i32_1 = arith.constant 0 : i32
    return %c0_i32, %c0_i32_0 : i32, i32
  }
  func.func @transform_10(%arg0: i32, %arg1: i32) -> (i32, i32) {
    %c0_i32 = arith.constant 0 : i32
    %c0_i32_0 = arith.constant 0 : i32
    %c0_i32_1 = arith.constant 0 : i32
    return %c0_i32, %c0_i32_0 : i32, i32
  }
  func.func @transform_11(%arg0: i32, %arg1: i32) -> (i32, i32) {
    %c0_i32 = arith.constant 0 : i32
    %c0_i32_0 = arith.constant 0 : i32
    %c0_i32_1 = arith.constant 0 : i32
    return %c0_i32, %c0_i32_0 : i32, i32
  }
  func.func @transform_12(%arg0: i32, %arg1: i32) -> (i32, i32) {
    %c0_i32 = arith.constant 0 : i32
    %c0_i32_0 = arith.constant 0 : i32
    %c0_i32_1 = arith.constant 0 : i32
    return %c0_i32, %c0_i32_0 : i32, i32
  }
  func.func @transform_13(%arg0: i32, %arg1: i32) -> (i32, i32) {
    %c0_i32 = arith.constant 0 : i32
    %c0_i32_0 = arith.constant 0 : i32
    %c0_i32_1 = arith.constant 0 : i32
    return %c0_i32, %c0_i32_0 : i32, i32
  }
  func.func @transform_14(%arg0: i32, %arg1: i32) -> (i32, i32, i32) {
    %c0_i32 = arith.constant 0 : i32
    %c0_i32_0 = arith.constant 0 : i32
    return %arg0, %arg1, %c0_i32 : i32, i32, i32
  }
}

</mosaic_0001>

<bundles_post_ra>
// kernel: tpu_custom_call.1
= control target key start
LH: loop header
LB: loop body
LE: loop exit
PB: predicated region body
PF: predicated region fallthrough
CT: control target
= control target key end

     0   :  { %s6240_s0 = inlined_call_operand.hbm [shape: f32[2,64,128], index: 0, kind: input, shape index: {}]   ;;  %s6241_s1 = inlined_call_operand.hbm [shape: f32[2,16,64], index: 1, kind: input, shape index: {}]   ;;  %s6242_s2 = inlined_call_operand.hbm [shape: f32[2,128], index: 2, kind: input, shape index: {}]   ;;  %s6243_s3 = inlined_call_operand.hbm [shape: f32[2,64], index: 3, kind: input, shape index: {}]   ;;  %s6244_s4 = inlined_call_operand.hbm [shape: f32[2,128], index: 4, kind: input, shape index: {}]   ;;  %s6245_s5 = inlined_call_operand.vmem [shape: f32[4,32], index: 5, kind: input, shape index: {}]   ;;  %s6246_s6 = inlined_call_operand.hbm [shape: bf16[128,128], index: 6, kind: input, shape index: {}]   ;;  %s6247_s7 = inlined_call_operand.hbm [shape: bf16[64,256], index: 7, kind: input, shape index: {}]   ;;  %s6248_s8 = inlined_call_operand.hbm [shape: bf16[128,128], index: 8, kind: input, shape index: {}]   ;;  %s6249_s9 = inlined_call_operand.hbm [shape: f32[1,128], index: 9, kind: input, shape index: {}]   ;;  %s6250_s10 = inlined_call_operand.hbm [shape: bf16[128,512], index: 10, kind: input, shape index: {}]   ;;  %s6251_s11 = inlined_call_operand.vmem [shape: f32[1,512], index: 11, kind: input, shape index: {}]   ;;  %s6252_s12 = inlined_call_operand.hbm [shape: bf16[512,128], index: 12, kind: input, shape index: {}]   ;;  %s6253_s13 = inlined_call_operand.vmem [shape: f32[1,128], index: 13, kind: input, shape index: {}]   ;;  %s6254_s14 = inlined_call_operand.hbm [shape: f32[2,64,128], index: 14, kind: output, shape index: {}]  }
   0x1   :  { %6263 = sst [smem:[#allocation36_spill]] %s6240_s0 }
   0x2   :  { %6264 = sst [smem:[#allocation37_spill]] %s6241_s1 }
   0x3   :  { %6265 = sst [smem:[#allocation38_spill]] %s6242_s2 }
   0x4   :  { %6266 = sst [smem:[#allocation39_spill]] %s6243_s3 }
   0x5   :  { %6267 = sst [smem:[#allocation40_spill]] %s6244_s4 }
   0x6   :  { %6268 = sst [smem:[#allocation41_spill]] %s6245_s5 }
   0x7   :  { %6269 = sst [smem:[#allocation42_spill]] %s6246_s6 }
   0x8   :  { %6270 = sst [smem:[#allocation43_spill]] %s6247_s7 }
   0x9   :  { %6271 = sst [smem:[#allocation44_spill]] %s6248_s8 }
   0xa   :  { %6272 = sst [smem:[#allocation45_spill]] %s6249_s9 }
   0xb   :  { %6273 = sst [smem:[#allocation46_spill]] %s6250_s10 }
   0xc   :  { %6274 = sst [smem:[#allocation47_spill]] %s6251_s11 }
   0xd   :  { %6275 = sst [smem:[#allocation48_spill]] %s6252_s12 }
   0xe   :  { %6276 = sst [smem:[#allocation49_spill]] %s6253_s13 }
   0xf   :  { %6277 = sst [smem:[#allocation50_spill]] %s6254_s14 }
  0x10   :  { %19 = vsyncpa [#allocation4], 0 }
  0x11   :  { %21 = vsyncpa [#allocation4 + $0x1], 0 }
  0x12   :  { %22 = vsyncpa [#allocation7], 0 }
  0x13   :  { %24 = vsyncpa [#allocation7 + $0x1], 0 }
  0x14   :  { %25 = vsyncpa [#allocation10], 0 }
  0x15   :  { %26 = vsyncpa [#allocation13], 0 }
  0x16   :  { %27 = vsyncpa [#allocation16], 0 }
  0x17   :  { %28 = vsyncpa [#allocation19], 0 }
  0x18   :  { %29 = vsyncpa [#allocation5], 0 }
  0x19   :  { %31 = vsyncpa [#allocation5 + $0x1], 0  ;;  %s4953_s29 = smov 0   ;;  %s4955_s30 = smov 0  }
  0x1a   :  { %s4957_s15 = smov 0   ;;  %s4959_s16 = smov 0  }
  0x1b   :  { %s4961_s17 = smov 0   ;;  %s4963_s18 = smov 0  }
  0x1c   :  { %s4965_s19 = smov 0   ;;  %s4967_s20 = smov 0  }
  0x1d   :  { %s4969_s21 = smov 0   ;;  %s4971_s22 = smov 0  }
  0x1e   :  { %s4973_s23 = smov 0  }
  0x1f LB: > { %6278 = sst [smem:[#allocation30_spill]] %s4813_s29  ;;  %s5009_s24 = sadd.s32 4294967295, %s4853_s23   ;;  %s4853_s23 = sphi %s4973_s23, %s37_s23   ;;  %s4849_s22 = sphi %s4971_s22, %s6331_s22   ;;  %s4845_s21 = sphi %s4969_s21, %s6330_s21   ;;  %s4841_s20 = sphi %s4967_s20, %s6329_s20   ;;  %s4837_s19 = sphi %s4965_s19, %s6328_s19   ;;  %s4833_s18 = sphi %s4963_s18, %s6327_s18   ;;  %s4829_s17 = sphi %s4961_s17, %s6326_s17   ;;  %s4825_s16 = sphi %s4959_s16, %s6325_s16   ;;  %s4821_s15 = sphi %s4957_s15, %s6324_s15   ;;  %s4817_s30 = sphi %s4955_s30, %s6323_s30   ;;  %s4813_s29 = sphi %s4953_s29, %s6322_s29  }
  0x20   : > { %6279 = sst [smem:[#allocation31_spill]] %s4837_s19  ;;  %p3479_p0 = scmp.ge.s32.totalorder %s4853_s23, 1 }
  0x21   : > { %6280 = sst [smem:[#allocation32_spill]] %s4841_s20  ;;  %p72_p1 = scmp.eq.s32.totalorder %s5009_s24, 0 }
  0x22   : > { %p388_p2 = scmp.lt.s32.totalorder %s4853_s23, 5  ;;  %s6281_s2 = sld [smem:[#allocation38_spill]] }
  0x23   : > { %s4855_s14 = smov [#allocation8]   ;;  %s6284_s3 = sld [smem:[#allocation39_spill]] }
  0x24   : > { %p5017_p3 = pnand %p3479_p0, %p388_p2  ;;  %s402_s20 = sshll.u32 %s4855_s14, 4  ;;  %s403_s20 = int_to_ptr.vmem [resolvable:$true] %s402_s20 }
  0x25   : > { %s6286_s6 = sld [smem:[#allocation42_spill]]  ;;  %s4857_s13 = smov [#allocation12]  }
  0x26   : > { %s6282_s28 = scalar_select %p5017_p3, 1, 0 }
  0x27   : > { %p4025_p4 = pneg %p5017_p3  ;;  %s440_s19 = sshll.u32 %s4857_s13, 4  ;;  %s441_s19 = int_to_ptr.vmem [resolvable:$true] %s440_s19 }
  0x28   : > { %s400_s27 = sshll.u32 %s6281_s2, 4  ;;  %6283 = sst [smem:[#allocation33_spill]] %s6282_s28  ;;  %s401_s27 = int_to_ptr.hbm [resolvable:$true] %s400_s27 }
  0x29   : > { %s412_s11 = sshll.u32 %s6284_s3, 4  ;;  %p5028_p5 = pnand %p4025_p4, %p72_p1  ;;  %s413_s11 = int_to_ptr.hbm [resolvable:$true] %s412_s11 }
  0x2a   : > { %s4856_s28 = smov [#allocation9]   ;;  %s6287_s8 = sld [smem:[#allocation44_spill]] }
  0x2b   : > { %s438_s2 = sshll.u32 %s6286_s6, 4  ;;  %s414_s14 = sshll.u32 %s4856_s28, 4  ;;  %s415_s14 = int_to_ptr.vmem [resolvable:$true] %s414_s14  ;;  %s439_s2 = int_to_ptr.hbm [resolvable:$true] %s438_s2 }
  0x2c   : > { %4028 = dma.hbm_to_vmem [thread:$0]  (!%p5028_p5), %s401_s27, 32, %s403_s20, [#allocation7]  }
  0x2d   : > { %4031 = dma.hbm_to_vmem [thread:$0]  (!%p5028_p5), %s413_s11, 32, %s415_s14, [#allocation10]  }
  0x2e   : > { %s4858_s29 = smov 64   ;;  %s4859_s25 = smov 4  }
  0x2f   : > { %4037 = dma.hbm_to_vmem [thread:$0]  (!%p5028_p5), %s439_s2, 1024, %s441_s19, [#allocation13], %s4858_s29, %s4858_s29, %s4859_s25  }
  0x30   : > { %s466_s0 = sshll.u32 %s6287_s8, 4  ;;  %s4860_s20 = smov [#allocation15]   ;;  %s467_s0 = int_to_ptr.hbm [resolvable:$true] %s466_s0 }
  0x31   : > { %s468_s27 = sshll.u32 %s4860_s20, 4  ;;  %s6288_s10 = sld [smem:[#allocation46_spill]]  ;;  %s469_s27 = int_to_ptr.vmem [resolvable:$true] %s468_s27 }
  0x32   : > { %4043 = dma.hbm_to_vmem [thread:$0]  (!%p5028_p5), %s467_s0, 1024, %s469_s27, [#allocation16], %s4858_s29, %s4858_s29, %s4859_s25  }
  0x33   : > { %s4861_s1 = smov [#allocation18]   ;;  %s6289_s4 = sld [smem:[#allocation40_spill]] }
  0x34   : > { %s494_s3 = sshll.u32 %s4861_s1, 4  ;;  %s4862_s19 = smov 256   ;;  %s495_s3 = int_to_ptr.vmem [resolvable:$true] %s494_s3 }
  0x35   : > { %s4863_s20 = smov 16   ;;  %s4864_s28 = smov [#allocation11]  }
  0x36   : > { %s426_s11 = sshll.u32 %s4864_s28, 4  ;;  %s6290_s7 = sld [smem:[#allocation43_spill]]  ;;  %s427_s11 = int_to_ptr.vmem [resolvable:$true] %s426_s11 }
  0x37   : > { %s492_s26 = sshll.u32 %s6288_s10, 4  ;;  %s4865_s0 = smov [#allocation14]   ;;  %s493_s26 = int_to_ptr.hbm [resolvable:$true] %s492_s26 }
  0x38   : > { %4049 = dma.hbm_to_vmem [thread:$0]  (!%p5028_p5), %s493_s26, 4096, %s495_s3, [#allocation19], %s4862_s19, %s4862_s19, %s4863_s20  }
  0x39   : > { %s424_s13 = sshll.u32 %s6289_s4, 4  ;;  %s454_s27 = sshll.u32 %s4865_s0, 4  ;;  %s425_s13 = int_to_ptr.hbm [resolvable:$true] %s424_s13  ;;  %s455_s27 = int_to_ptr.vmem [resolvable:$true] %s454_s27 }
  0x3a   : > { %4034 = dma.hbm_to_vmem [thread:$0]  (!%p5028_p5), %s425_s13, 32, %s427_s11, [#allocation10]  }
  0x3b   : > { %s6291_s9 = sld [smem:[#allocation45_spill]]  ;;  %s6257_s3 = smov 128  }
  0x3c   : > { %s452_s10 = sshll.u32 %s6290_s7, 4  ;;  %s6259_s2 = smov 8   ;;  %s453_s10 = int_to_ptr.hbm [resolvable:$true] %s452_s10 }
  0x3d   : > { %4040 = dma.hbm_to_vmem [thread:$0]  (!%p5028_p5), %s453_s10, 1024, %s455_s27, [#allocation13], %s6257_s3, %s6257_s3, %s6259_s2  }
  0x3e   : > { %s4868_s6 = smov [#allocation17]   ;;  %s6292_s12 = sld [smem:[#allocation48_spill]] }
  0x3f   : > { %s483_s8 = sshll.u32 %s4868_s6, 4  ;;  %s4869_s28 = smov [#allocation20]   ;;  %s484_s8 = int_to_ptr.vmem [resolvable:$true] %s483_s8 }
  0x40   : > { %s511_s10 = sshll.u32 %s4869_s28, 4  ;;  %s3478_s11 = sadd.s32 4294967294, %s4853_s23   ;;  %s512_s10 = int_to_ptr.vmem [resolvable:$true] %s511_s10 }
  0x41   : > { %s481_s26 = sshll.u32 %s6291_s9, 4  ;;  %s46_s0 = sadd.s32 1, %s4845_s21  ;;  %s482_s26 = int_to_ptr.hbm [resolvable:$true] %s481_s26 }
  0x42   : > { %4046 = dma.hbm_to_vmem [thread:$0]  (!%p5028_p5), %s482_s26, 16, %s484_s8, [#allocation16]  }
  0x43   : > { %s49_s27 = sadd.s32 1, %s4849_s22  ;;  %p47_p6 = scmp.ge.s32.totalorder %s46_s0, 2 }
  0x44   : > { %s509_s20 = sshll.u32 %s6292_s12, 4  ;;  %s58_s1 = sadd.s32 1, %s4833_s18  ;;  %s510_s20 = int_to_ptr.hbm [resolvable:$true] %s509_s20 }
  0x45   : > { %4052 = dma.hbm_to_vmem [thread:$0]  (!%p5028_p5), %s510_s20, 4096, %s512_s10, [#allocation19], %s4858_s29, %s4858_s29, %s4859_s25  }
  0x46   : > { %p65_p7 = scmp.ne.s32.totalorder %s4833_s18, %s4829_s17  ;;  %p66_p8 = scmp.eq.s32.totalorder %s4853_s23, 0 }
  0x47   : > { %s6333_s0 = smov (%p47_p6, %s46_s0), 0  ;;  %s6335_s27 = smov (!%p47_p6, %s49_s27), %s4849_s22 }
  0x48   : > { %6293 = sst [smem:[#allocation34_spill]] %s6333_s0  ;;  %s54_s5 = ssub.s32 %s4845_s21, %s6333_s0 }
  0x49   : > { %p5097_p9 = por %p66_p8, %p65_p7  ;;  %p51_p10 = scmp.ge.s32.totalorder %s6335_s27, 2 }
  0x4a   : > { %p71_p11 = scmp.ne.s32.totalorder %s4829_s17, %s4825_s16  ;;  %p375_p12 = scmp.eq.s32.totalorder %s5009_s24, 3 }
  0x4b   : > { %p381_p13 = scmp.eq.s32.totalorder %s3478_s11, 3  ;;  %s6337_s27 = smov (%p51_p10, %s6335_s27), 0 }
  0x4c   : > { %6295 = sst [smem:[#allocation35_spill]] %s6337_s27  ;;  %p5108_p0 = por %p72_p1, %p71_p11 }
  0x4d   : > { %p5112_p2 = por %p375_p12, %p65_p7  ;;  %s53_s26 = ssub.s32 %s4849_s22, %s6337_s27 }
  0x4e   : > { %p5118_p4 = por %p381_p13, %p71_p11  ;;  %s55_s8 = sor.u32 %s54_s5, %s53_s26 }
  0x4f   : > { %p82_p5 = scmp.eq.s32.totalorder %s53_s26, 0  ;;  %p56_p6 = scmp.eq.s32.totalorder %s55_s8, 0 }
  0x50   : > { %p4073_p10 = scmp.lt.s32.totalorder %s4853_s23, 4  ;;  %s528_s13 = sand.u32 1, %s4833_s18  }
  0x51   : > { %s3491_s19 = sshll.u32 %s4845_s21, 2  ;;  %s3490_s28 = sshll.u32 %s528_s13, 5 }
  0x52   : > { %s5126_s20 = scalar_select %p56_p6, %s4833_s18, %s58_s1  }
  0x53   : > { %s6299_s10 = sld [smem:[#allocation30_spill]]  ;;  %s3492_s11 = sshll.u32 %s4849_s22, 3 }
  0x54   : > { %s537_s3 = sadd.s32 %s3492_s11, %s3491_s19  ;;  %s532_s2 = scalar_lea.vmem [#allocation3], %s3490_s28 }
  0x55   : > { %s542_s5 = sshll.u32 %s532_s2, 4  ;;  %s3493_s8 = sshll.u32 %s537_s3, 3  ;;  %s543_s5 = int_to_ptr.vmem [resolvable:$true] %s542_s5 }
  0x56   : > { %s6300_s9 = sld [smem:[#allocation36_spill]]  ;;  %p4054_p7 = pnand %p4073_p10, %p5097_p9 }
  0x57   : > { %s529_s27 = scalar_lea.sflag [#allocation4], %s528_s13  ;;  %s6301_s0 = smov 8  }
  0x58   : > { %s6302_s19 = smov 128   ;;  %s84_s28 = sadd.s32 1, %s4821_s15 }
  0x59   : > { %s5142_s3 = scalar_select %p82_p5, %s4821_s15, %s84_s28  }
  0x5a   : > { %p91_p11 = scmp.ne.s32.totalorder %s4821_s15, %s4817_s30  ;;  %p97_p12 = scmp.ne.s32.totalorder %s4817_s30, %s6299_s10 }
  0x5b   : > { %s552_s4 = sand.u32 1, %s4853_s23   ;;  %s554_s7 = sand.u32 1, %s4821_s15  }
  0x5c   : > { %s539_s1 = scalar_lea.hbm %s6300_s9, %s3493_s8  ;;  %p93_p13 = por %p91_p11, %p66_p8 }
  0x5d   : > { %s540_s12 = sshll.u32 %s539_s1, 4  ;;  %p5154_p9 = por %p97_p12, %p72_p1  ;;  %s541_s12 = int_to_ptr.hbm [resolvable:$true] %s540_s12 }
  0x5e   : > { %4056 = dma.hbm_to_vmem [thread:$0]  (!%p4054_p7), %s541_s12, 512, %s543_s5, %s529_s27, %s6302_s19, %s6302_s19, %s6301_s0  }
  0x5f   : > { %s3494_s2 = sshll.u32 %s554_s7, 4  ;;  %s3886_s29 = sshll.u32 %s4849_s22, 4 }
  0x60   : > { %s6304_s27 = sld [smem:[#allocation37_spill]]  ;;  %s556_s11 = scalar_lea.vmem [#allocation6], %s3494_s2 }
  0x61   : > { %s564_s5 = sshll.u32 %s556_s11, 4  ;;  %p4057_p5 = pnand %p4073_p10, %p93_p13  ;;  %s565_s5 = int_to_ptr.vmem [resolvable:$true] %s564_s5 }
  0x62   : > { %s553_s10 = scalar_lea.sflag [#allocation7], %s552_s4  ;;  %s5170_s28 = sand.u32 (!%p5017_p3), 1, %s4829_s17  }
  0x63   : > { %s3498_s7 = sshll.u32 (!%p5017_p3), %s5170_s28, 5  ;;  %s579_s2 = scalar_lea.sflag (!%p5017_p3), [#allocation4], %s5170_s28 }
  0x64   : > { %576 = sbr.rel (%p5017_p3) target bundleno = 2839 (0xb17), region = 76 }
  0x66   : > { %s561_s26 = scalar_lea.hbm %s6304_s27, %s3886_s29  ;;  %s5176_s29 = scalar_lea.vmem (!%p5017_p3), [#allocation3], %s3498_s7 }
  0x67   : > { %s562_s8 = sshll.u32 %s561_s26, 4  ;;  %s563_s8 = int_to_ptr.hbm [resolvable:$true] %s562_s8 }
  0x68   : > { %4059 = dma.hbm_to_vmem [thread:$0]  (!%p4057_p5), %s563_s8, 256, %s565_s5, %s553_s10, %s6302_s19, %s6302_s19, %s6301_s0  }
  0x69   : > { %4780 = dma.done.wait (%p5108_p0), %s579_s2, 512  }
  0x6a   : > { %4782 = vsyncadd (%p5108_p0), %s579_s2, 4294966784  ;;  %s588_s0 = sand.u32 1, %s5009_s24   ;;  %s590_s19 = sand.u32 1, %s4817_s30  }
  0x6b   : > { %s3499_s4 = sshll.u32 %s590_s19, 4  ;;  %s589_s13 = scalar_lea.sflag [#allocation7], %s588_s0 }
  0x6c   : > { %s592_s12 = scalar_lea.vmem [#allocation6], %s3499_s4 }
  0x6d   : > { %4784 = dma.done.wait (%p5154_p9), %s589_s13, 256  }
  0x6e   : > { %4786 = vsyncadd (%p5154_p9), %s589_s13, 4294967040 }
  0x6f   : > { %4788 = dma.done.wait (%p72_p1), [#allocation7], 32  }
  0x70   : > { %4790 = vsyncadd (%p72_p1), [#allocation7], 4294967264 }
  0x71   : > { %4792 = dma.done.wait (%p72_p1), [#allocation10], 64  }
  0x72   : > { %4794 = vsyncadd (%p72_p1), [#allocation10], 4294967232 }
  0x73   : > { %4796 = dma.done.wait (%p72_p1), [#allocation13], 2048  }
  0x74   : > { %4798 = vsyncadd (%p72_p1), [#allocation13], 4294965248 }
  0x75   : > { %4800 = dma.done.wait (%p72_p1), [#allocation16], 1040  }
  0x76   : > { %4802 = vsyncadd (%p72_p1), [#allocation16], 4294966256 }
  0x77   : > { %4804 = dma.done.wait (%p72_p1), [#allocation19], 8192  }
  0x78   : > { %4806 = vsyncadd (%p72_p1), [#allocation19], 4294959104  ;;  %vm800_vm0 = vcmask 523264   ;;  %v693_v0 = vld [vmem:[%s5176_s29 + $0x10] sm:$0xff]  ;;  %v691_v1 = vld [vmem:[%s5176_s29] sm:$0xff]  ;;  %s6306_s9 = sld [smem:[#allocation41_spill]] }
  0x79   : > { %v695_v2 = vld [vmem:[%s592_s12] sm:$0xff]  ;;  %703 = vadd.xlane.f32.xlu2 %v693_v0  ;;  %699 = vadd.xlane.f32.xlu1 %v691_v1  ;;  %v696_v4 = vld [vmem:[%s592_s12 + $0x8] sm:$0xff]  ;;  %s4870_s27 = smov 32   ;;  %s4871_s26 = smov 96   ;;  %v4872_v13 = vmov 128.0   ;;  %v4873_v16 = vmov 64.0  }
  0x7a   : > { %v801_v3 = vsel %vm800_vm0, %v695_v2, 0.0  ;;  %v694_v5 = vld [vmem:[%s5176_s29 + $0x18] sm:$0xff]  ;;  %v692_v6 = vld [vmem:[%s5176_s29 + $0x8] sm:$0xff]  ;;  %v804_v7 = vsel %vm800_vm0, %v696_v4, 0.0  ;;  %4203 = vrcp.f32 %v4872_v13  ;;  %s4874_s11 = smov 64   ;;  %s6315_s10 = sld [smem:[#allocation47_spill]] }
  0x7b   : > { %802 = vadd.xlane.f32.xlu0 %v801_v3  ;;  %4205 = vrcp.f32 %v4873_v16  ;;  %v3894_v53 = vld [vmem:[#allocation12 + $0x38] sm:$0xff]  ;;  %v3893_v54 = vld [vmem:[#allocation12 + $0x30] sm:$0xff]  ;;  %v3892_v56 = vld [vmem:[#allocation12 + $0x28] sm:$0xff]  ;;  %s6317_s0 = sld [smem:[#allocation31_spill]]  ;;  %s6177_s4 = scalar_lea.vmem [#allocation21], %s3498_s7 }
  0x7c   : > { %923 = vmatpush.bf16.msra.mxu0 %v3894_v53  ;;  %v3891_v57 = vld [vmem:[#allocation12 + $0x20] sm:$0xff]  ;;  %v3890_v60 = vld [vmem:[#allocation12 + $0x18] sm:$0xff]  ;;  %v3889_v62 = vld [vmem:[#allocation12 + $0x10] sm:$0xff]  ;;  %s6318_s19 = sld [smem:[#allocation32_spill]]  ;;  %s3262_s8 = scalar_lea.sflag [#allocation5], %s5170_s28 }
  0x7d   : > { %v3568_v63 = vld [vmem:[#allocation14 + $0x30] sm:$0xf]  ;;  %v3888_v3 = vld [vmem:[#allocation12 + $0x8] sm:$0xff]  ;;  %v3899_v16 = vld [vmem:[#allocation14 + $0x24] sm:$0xf] }
  0x7e   : > { %v1021_v8 = vld [vmem:[%s6306_s9] sm:$0xf] }
  0x7f   : > { %v5217_v9 = vperm.slane %v1021_v8, 2  ;;  %v5219_v10 = vperm.slane %v1021_v8, 3  ;;  %v5221_v11 = vperm.slane %v1021_v8, 0  ;;  %v5229_v12 = vperm.slane %v1021_v8, 1 }
  0x80   : > { %v4204_v14 = vpop.eup %4203  ;;  %924 = vmatpush.bf16.msra.mxu0 %v3893_v54 }
  0x81   : > { %705 = vadd.xlane.f32.xlu2 %v694_v5  ;;  %701 = vadd.xlane.f32.xlu1 %v692_v6  ;;  %v708_v15 = vmul.f32 128.0, %v4204_v14  ;;  %v4206_v18 = vpop.eup %4205  ;;  %vm712_vm1 = vweird.f32 %v4204_v14  ;;  %s3881_s13 = sshll.u32 %s6317_s0, 2 }
  0x82   : > { %v808_v20 = vmul.f32 64.0, %v4206_v18  ;;  %vm812_vm2 = vweird.f32 %v4206_v18  ;;  %s3882_s7 = sshll.u32 %s6318_s19, 3 }
  0x83   : > { %805 = vadd.xlane.f32.xlu0 %v804_v7  ;;  %v709_v17 = vsub.f32 1.0, %v708_v15  ;;  %v3900_v15 = vld [vmem:[#allocation14 + $0x24] sm:$0xf0]  ;;  %s3273_s12 = sadd.s32 %s3882_s7, %s3881_s13 }
  0x84   : > { %v809_v22 = vsub.f32 1.0, %v808_v20  ;;  %925 = vmatpush.bf16.msra.mxu0 %v3892_v56  ;;  %s3883_s24 = sshll.u32 %s3273_s12, 3 }
  0x85   : > { %v710_v19 = vmul.f32 %v4204_v14, %v709_v17 }
  0x86   : > { %v810_v24 = vmul.f32 %v4206_v18, %v809_v22 }
  0x87   : > { %v711_v21 = vadd.f32 %v4204_v14, %v710_v19  ;;  %v3887_v19 = vld [vmem:[#allocation12] sm:$0xff] }
  0x88   : > { %v811_v30 = vadd.f32 %v4206_v18, %v810_v24  ;;  %926 = vmatpush.bf16.msra.mxu0 %v3891_v57  ;;  %v3552_v24 = vld [vmem:[#allocation14 + $0x10] sm:$0xf] }
  0x89   : > { %v5235_v23 = vsel %vm712_vm1, %v4204_v14, %v711_v21  ;;  %v3560_v14 = vld [vmem:[#allocation14 + $0x20] sm:$0xf]  ;;  %v3562_v21 = vld [vmem:[#allocation14 + $0x28] sm:$0xf0] }
  0x8a   : > { %v5247_v35 = vsel %vm812_vm2, %v4206_v18, %v811_v30  ;;  %v3561_v20 = vor.u32 %v3900_v15, %v3560_v14  ;;  %v3565_v22 = vor.u32 %v3899_v16, %v3562_v21 }
  0x8c   : > { %927 = vmatpush.bf16.msra.mxu0 %v3890_v60 }
  0x90   : > { %928 = vmatpush.bf16.msra.mxu0 %v3889_v62 }
  0x94   : > { %929 = vmatpush.bf16.msra.mxu0 %v3888_v3 }
  0x97   : > { %1483 = vrot.lane.b32.xlu0 %v5217_v9, %s4870_s27 }
  0x98   : > { %930 = vmatpush.bf16.msra.mxu0 %v3887_v19 }
  0x99   : > { %1489 = vrot.lane.b32.xlu2 %v5219_v10, %s4870_s27 }
  0x9a   : > { %1407 = vrot.lane.b32.xlu1 %v5221_v11, %s4870_s27 }
  0x9f   : > { %2151 = vrot.lane.b32.xlu0 %v5217_v9, %s4871_s26 }
  0xa2   : > { %1415 = vrot.lane.b32.xlu1 %v5229_v12, %s4870_s27 }
  0xec   : > { %v704_v25 = vpop.xlane.xlu2 %703  ;;  %v700_v26 = vpop.xlane.xlu1 %699 }
  0xed   : > { %v716_v27 = vmul.f32 %v5235_v23, %v704_v25  ;;  %v714_v28 = vmul.f32 %v5235_v23, %v700_v26  ;;  %v3898_v25 = vld [vmem:[#allocation14 + $0x14] sm:$0xf0]  ;;  %v3897_v26 = vld [vmem:[#allocation14 + $0x14] sm:$0xf] }
  0xee   : > { %v803_v29 = vpop.xlane.xlu0 %802 }
  0xef   : > { %v5239_v31 = vsub.f32 %v693_v0, %v716_v27  ;;  %v5241_v32 = vsub.f32 %v691_v1, %v714_v28  ;;  %v814_v36 = vmul.f32 %v5247_v35, %v803_v29  ;;  %v3902_v0 = vld [vmem:[#allocation14 + $0x34] sm:$0xf0]  ;;  %v3901_v1 = vld [vmem:[#allocation14 + $0x34] sm:$0xf]  ;;  %v3553_v28 = vor.u32 %v3898_v25, %v3552_v24  ;;  %v3554_v29 = vld [vmem:[#allocation14 + $0x18] sm:$0xf0] }
  0xf1   : > { %v724_v33 = vmul.f32 %v5239_v31, %v5239_v31  ;;  %v722_v34 = vmul.f32 %v5241_v32, %v5241_v32  ;;  %v5257_v45 = vsub.f32 %v695_v2, %v814_v36  ;;  %v3544_v36 = vld [vmem:[#allocation14] sm:$0xf] }
  0xf3   : > { %730 = vadd.xlane.f32.xlu1 %v724_v33  ;;  %726 = vadd.xlane.f32.xlu2 %v722_v34  ;;  %v818_v51 = vmul.f32 %v5257_v45, %v5257_v45  ;;  %v3557_v34 = vor.u32 %v3897_v26, %v3554_v29 }
  0xf4   : > { %v706_v37 = vpop.xlane.xlu2 %705  ;;  %v702_v38 = vpop.xlane.xlu1 %701 }
  0xf5   : > { %v717_v39 = vmul.f32 %v5235_v23, %v706_v37  ;;  %v715_v40 = vmul.f32 %v5235_v23, %v702_v38  ;;  %v820_v52 = vsel %vm800_vm0, %v818_v51, 0.0  ;;  %v3896_v37 = vld [vmem:[#allocation14 + $0x4] sm:$0xf0]  ;;  %v3895_v38 = vld [vmem:[#allocation14 + $0x4] sm:$0xf] }
  0xf6   : > { %v806_v41 = vpop.xlane.xlu0 %805 }
  0xf7   : > { %v815_v42 = vmul.f32 %v5247_v35, %v806_v41  ;;  %v5253_v43 = vsub.f32 %v694_v5, %v717_v39  ;;  %v5255_v44 = vsub.f32 %v692_v6, %v715_v40  ;;  %v3570_v5 = vld [vmem:[#allocation14 + $0x38] sm:$0xf0]  ;;  %v3545_v41 = vor.u32 %v3896_v37, %v3544_v36 }
  0xf8   : > { %v3573_v8 = vor.u32 %v3901_v1, %v3570_v5 }
  0xf9   : > { %v5259_v46 = vsub.f32 %v696_v4, %v815_v42  ;;  %v725_v47 = vmul.f32 %v5253_v43, %v5253_v43  ;;  %v723_v48 = vmul.f32 %v5255_v44, %v5255_v44  ;;  %v3569_v4 = vor.u32 %v3902_v0, %v3568_v63  ;;  %v3546_v42 = vld [vmem:[#allocation14 + $0x8] sm:$0xf0] }
  0xfa   : > { %1011 = vmatpush.bf16.msra.mxu2 %v3573_v8 }
  0xfb   : > { %v819_v49 = vmul.f32 %v5259_v46, %v5259_v46  ;;  %732 = vadd.xlane.f32.xlu2 %v725_v47  ;;  %728 = vadd.xlane.f32.xlu0 %v723_v48 }
  0xfc   : > { %v5277_v61 = vpop.permute.xlu2 %1489  ;;  %997 = vmatpush.bf16.msra.mxu1 %v3569_v4 }
  0xfd   : > { %v823_v50 = vsel %vm800_vm0, %v819_v49, 0.0 }
  0xfe   : > { %824 = vadd.xlane.f32.xlu1 %v823_v50  ;;  %1012 = vmatpush.bf16.msra.mxu2 %v3565_v22 }
 0x100   : > { %998 = vmatpush.bf16.msra.mxu1 %v3561_v20 }
 0x102   : > { %1013 = vmatpush.bf16.msra.mxu2 %v3557_v34 }
 0x103   : > { %821 = vadd.xlane.f32.xlu0 %v820_v52  ;;  %v3549_v52 = vor.u32 %v3895_v38, %v3546_v42 }
 0x104   : > { %999 = vmatpush.bf16.msra.mxu1 %v3553_v28  ;;  %v4195_v28 = vld [vmem:[#allocation8] ss:$0 sm:$0xff] }
 0x106   : > { %1014 = vmatpush.bf16.msra.mxu2 %v3549_v52 }
 0x108   : > { %1000 = vmatpush.bf16.msra.mxu1 %v3545_v41 }
 0x109   : > { %v5273_v58 = vpop.permute.xlu0 %1483 }
 0x10c   : > { %v5271_v55 = vpop.permute.xlu1 %1407 }
 0x111   : > { %v5279_v2 = vpop.permute.xlu0 %2151 }
 0x114   : > { %v5275_v59 = vpop.permute.xlu1 %1415 }
 0x166   : > { %v727_v6 = vpop.xlane.xlu2 %726  ;;  %v731_v7 = vpop.xlane.xlu1 %730 }
 0x167   : > { %v734_v13 = vmul.f32 %v727_v6, %v5235_v23  ;;  %v736_v18 = vmul.f32 %v731_v7, %v5235_v23 }
 0x169   : > { %v738_v17 = vadd.f32 1e-06, %v734_v13  ;;  %v5283_v27 = vadd.f32 1e-06, %v736_v18 }
 0x16b   : > { %4207 = vrsqrt.f32 %v738_v17  ;;  %vm748_vm4 = vweird.f32 %v738_v17  ;;  %vm768_vm1 = vweird.f32 %v5283_v27 }
 0x16c   : > { %4209 = vrsqrt.f32 %v5283_v27 }
 0x16e   : > { %v733_v30 = vpop.xlane.xlu2 %732  ;;  %v729_v33 = vpop.xlane.xlu0 %728 }
 0x16f   : > { %v737_v39 = vmul.f32 %v733_v30, %v5235_v23  ;;  %v735_v40 = vmul.f32 %v729_v33, %v5235_v23 }
 0x171   : > { %v825_v47 = vpop.xlane.xlu1 %824  ;;  %v4208_v48 = vpop.eup %4207  ;;  %v5287_v49 = vadd.f32 1e-06, %v737_v39  ;;  %v739_v50 = vadd.f32 1e-06, %v735_v40 }
 0x172   : > { %v827_v51 = vmul.f32 %v825_v47, %v5247_v35  ;;  %v743_v53 = vmul.f32 %v4208_v48, %v738_v17  ;;  %v5293_v63 = vpop.eup %4209  ;;  %vm749_vm3 = vweird.f32 %v4208_v48 }
 0x173   : > { %4211 = vrsqrt.f32 %v5287_v49  ;;  %v763_v7 = vmul.f32 %v5293_v63, %v5283_v27  ;;  %vm750_vm5 = vmor %vm748_vm4, %vm749_vm3  ;;  %vm758_vm9 = vweird.f32 %v739_v50  ;;  %vm778_vm14 = vweird.f32 %v5287_v49 }
 0x174   : > { %v744_v54 = vmul.f32 %v4208_v48, %v743_v53  ;;  %4213 = vrsqrt.f32 %v739_v50  ;;  %v829_v56 = vadd.f32 1e-06, %v827_v51  ;;  %vm769_vm2 = vweird.f32 %v5293_v63  ;;  %v4197_v53 = vld [vmem:[#allocation9] ss:$0 sm:$0xff] }
 0x175   : > { %v764_v16 = vmul.f32 %v5293_v63, %v763_v7 }
 0x176   : > { %v745_v57 = vmul.f32 0.5, %v744_v54  ;;  %4215 = vrsqrt.f32 %v829_v56  ;;  %v822_v60 = vpop.xlane.xlu0 %821  ;;  %vm846_vm7 = vweird.f32 %v829_v56 }
 0x177   : > { %v826_v62 = vmul.f32 %v822_v60, %v5247_v35  ;;  %v765_v29 = vmul.f32 0.5, %v764_v16 }
 0x178   : > { %v746_v0 = vsub.f32 1.5, %v745_v57 }
 0x179   : > { %v5295_v1 = vpop.eup %4211  ;;  %v828_v3 = vadd.f32 1e-06, %v826_v62  ;;  %v766_v47 = vsub.f32 1.5, %v765_v29 }
 0x17a   : > { %v4214_v4 = vpop.eup %4213  ;;  %v773_v5 = vmul.f32 %v5295_v1, %v5287_v49  ;;  %v747_v6 = vmul.f32 %v4208_v48, %v746_v0  ;;  %vm779_vm15 = vweird.f32 %v5295_v1 }
 0x17b   : > { %v753_v8 = vmul.f32 %v4214_v4, %v739_v50  ;;  %4217 = vrsqrt.f32 %v828_v3  ;;  %vm759_vm6 = vweird.f32 %v4214_v4  ;;  %vm836_vm12 = vweird.f32 %v828_v3  ;;  %vm780_vm4 = vmor %vm778_vm14, %vm779_vm15 }
 0x17c   : > { %v4216_v13 = vpop.eup %4215  ;;  %v774_v35 = vmul.f32 %v5295_v1, %v773_v5  ;;  %v751_v20 = vsel %vm750_vm5, %v4208_v48, %v747_v6  ;;  %vm760_vm10 = vmor %vm758_vm9, %vm759_vm6  ;;  %v767_v57 = vmul.f32 %v5293_v63, %v766_v47  ;;  %vm1022_vm6 = vcmask 261120  }
 0x17d   : > { %v754_v14 = vmul.f32 %v4214_v4, %v753_v8  ;;  %v841_v15 = vmul.f32 %v4216_v13, %v829_v56  ;;  %vm847_vm8 = vweird.f32 %v4216_v13  ;;  %v782_v17 = vmul.f32 %v751_v20, %v5241_v32  ;;  %v4196_v32 = vld [vmem:[#allocation8 + $0x1] ss:$0 sm:$0xff]  ;;  %vm770_vm5 = vmor %vm768_vm1, %vm769_vm2 }
 0x17e   : > { %v775_v22 = vmul.f32 0.5, %v774_v35  ;;  %vm5304_vm11 = vmor %vm846_vm7, %vm847_vm8 }
 0x17f   : > { %v755_v18 = vmul.f32 0.5, %v754_v14  ;;  %v842_v19 = vmul.f32 %v4216_v13, %v841_v15  ;;  %v787_v42 = vmul.f32 %v4195_v28, %v782_v17 }
 0x180   : > { %v776_v37 = vsub.f32 1.5, %v775_v22 }
 0x181   : > { %v4218_v21 = vpop.eup %4217  ;;  %v756_v24 = vsub.f32 1.5, %v755_v18  ;;  %v843_v25 = vmul.f32 0.5, %v842_v19  ;;  %v792_v54 = vadd.f32 %v4196_v32, %v787_v42 }
 0x182   : > { %v831_v26 = vmul.f32 %v4218_v21, %v828_v3  ;;  %vm837_vm13 = vweird.f32 %v4218_v21  ;;  %v777_v52 = vmul.f32 %v5295_v1, %v776_v37  ;;  %v771_v3 = vsel %vm770_vm5, %v5293_v63, %v767_v57 }
 0x183   : > { %v757_v30 = vmul.f32 %v4214_v4, %v756_v24  ;;  %v844_v33 = vsub.f32 1.5, %v843_v25  ;;  %vm838_vm3 = vmor %vm836_vm12, %vm837_vm13 }
 0x184   : > { %v832_v36 = vmul.f32 %v4218_v21, %v831_v26  ;;  %v781_v5 = vsel %vm780_vm4, %v5295_v1, %v777_v52 }
 0x185   : > { %v845_v38 = vmul.f32 %v4216_v13, %v844_v33  ;;  %v761_v39 = vsel %vm760_vm10, %v4214_v4, %v757_v30  ;;  %v4198_v4 = vld [vmem:[#allocation9 + $0x1] ss:$0 sm:$0xff]  ;;  %v785_v6 = vmul.f32 %v781_v5, %v5253_v43  ;;  %v4875_v30 = vmov 32.0  }
 0x186   : > { %v833_v40 = vmul.f32 0.5, %v832_v36  ;;  %v783_v41 = vmul.f32 %v761_v39, %v5255_v44  ;;  %4219 = vrcp.f32 %v4875_v30 }
 0x187   : > { %v849_v48 = vsel %vm5304_vm11, %v4216_v13, %v845_v38  ;;  %v784_v13 = vmul.f32 %v771_v3, %v5239_v31  ;;  %v790_v14 = vmul.f32 %v4195_v28, %v785_v6 }
 0x188   : > { %v834_v50 = vsub.f32 1.5, %v833_v40  ;;  %v788_v51 = vmul.f32 %v4195_v28, %v783_v41  ;;  %v851_v44 = vmul.f32 %v849_v48, %v5259_v46 }
 0x189   : > { %v795_v15 = vadd.f32 %v4196_v32, %v790_v14 }
 0x18a   : > { %v835_v49 = vmul.f32 %v4218_v21, %v834_v50  ;;  %v793_v56 = vadd.f32 %v4196_v32, %v788_v51  ;;  %v854_v0 = vmul.f32 %v4197_v53, %v851_v44 }
 0x18c   : > { %v839_v60 = vsel %vm838_vm3, %v4218_v21, %v835_v49  ;;  %v796_v62 = vpack.c.bf16 %v793_v56, %v792_v54  ;;  %v857_v8 = vadd.f32 %v4198_v4, %v854_v0  ;;  %v4220_v34 = vpop.eup %4219 }
 0x18d   : > { %v850_v27 = vmul.f32 %v839_v60, %v5257_v45  ;;  %v789_v45 = vmul.f32 %v4195_v28, %v784_v13  ;;  %v1036_v36 = vmul.f32 32.0, %v4220_v34 }
 0x18e   : > { %931 = vmatmul.bf16.vlgmr.msra.gmra.mxu0 %v796_v62 }
 0x18f   : > { %v853_v46 = vmul.f32 %v4197_v53, %v850_v27  ;;  %v794_v16 = vadd.f32 %v4196_v32, %v789_v45  ;;  %v1037_v37 = vsub.f32 1.0, %v1036_v36 }
 0x191   : > { %v856_v7 = vadd.f32 %v4198_v4, %v853_v46  ;;  %v797_v1 = vpack.c.bf16 %v795_v15, %v794_v16  ;;  %v1038_v40 = vmul.f32 %v4220_v34, %v1037_v37 }
 0x193   : > { %v858_v35 = vpack.c.bf16 %v857_v8, %v856_v7  ;;  %v1039_v42 = vadd.f32 %v4220_v34, %v1038_v40 }
 0x195   : > { %3574 = vmatmul.msk.bf16.vlgmr.msra.gmra.mxu1 %vm800_vm0, %v858_v35  ;;  %3575 = vmatmul.msk.bf16.vlgmr.msra.gmra.mxu2 %vm800_vm0, %v858_v35  ;;  %vm1040_vm0 = vweird.f32 %v4220_v34 }
 0x196   : > { %v5389_v47 = vsel %vm1040_vm0, %v4220_v34, %v1039_v42 }
 0x19e   : > { %936 = vmatmul.bf16.gmra.mxu0 %v797_v1 }
 0x20b   : > { %v5326_v18 = vpop.f32.mrf.mxu0 }
 0x20c   : > { %1630 = vrot.lane.b32.xlu0 %v5326_v18, %s4874_s11  ;;  %1290 = vrot.lane.b32.xlu2 %v5326_v18, %s4871_s26  ;;  %v1023_v24 = vsel %vm1022_vm6, %v5326_v18, 0.0 }
 0x212   : > { %v5332_v31 = vpop.f32.mrf.mxu1 }
 0x213   : > { %v1128_v43 = vsel %vm1022_vm6, %v5332_v31, 0.0  ;;  %v5342_v21 = vpop.f32.mrf.mxu0 }
 0x214   : > { %1963 = vrot.lane.b32.xlu2 %v5326_v18, %s4870_s27  ;;  %1129 = vadd.xlane.f32.xlu1 %v1128_v43  ;;  %v1026_v25 = vsel %vm1022_vm6, %v5342_v21, 0.0 }
 0x218   : > { %v1016_v63 = vpop.f32.mrf.mxu2 }
 0x21a   : > { %v5349_v22 = vpop.f32.mrf.mxu1 }
 0x21b   : > { %v5363_v26 = vpop.f32.mrf.mxu0  ;;  %v1131_v29 = vsel %vm1022_vm6, %v5349_v22, 0.0 }
 0x21c   : > { %1760 = vrot.lane.b32.xlu2 %v5332_v31, %s4874_s11  ;;  %v1029_v17 = vsel %vm1022_vm6, %v5363_v26, 0.0 }
 0x220   : > { %v1018_v19 = vpop.f32.mrf.mxu2 }
 0x221   : > { %v5340_v20 = vpack.c.bf16 %v1018_v19, %v1016_v63 }
 0x223   : > { %1270 = vmatpush.bf16.msrb.mxu1 %v5340_v20  ;;  %v5373_v28 = vpop.f32.mrf.mxu0 }
 0x224   : > { %1965 = vrot.lane.b32.xlu2 %v5342_v21, %s4870_s27  ;;  %v1032_v46 = vsel %vm1022_vm6, %v5373_v28, 0.0 }
 0x22d   : > { %1632 = vrot.lane.b32.xlu1 %v5342_v21, %s4874_s11 }
 0x235   : > { %1426 = vrot.lane.b32.xlu1 %v5349_v22, %s4871_s26 }
 0x236   : > { %1024 = vadd.xlane.f32.xlu0 %v1023_v24 }
 0x24a   : > { %1424 = vrot.lane.b32.xlu0 %v5332_v31, %s4871_s26 }
 0x24d   : > { %1027 = vadd.xlane.f32.xlu2 %v1026_v25 }
 0x252   : > { %2093 = vrot.lane.b32.xlu0 %v5332_v31, %s4870_s27 }
 0x25a   : > { %1292 = vrot.lane.b32.xlu0 %v5342_v21, %s4871_s26 }
 0x25f   : > { %1030 = vadd.xlane.f32.xlu1 %v1029_v17 }
 0x265   : > { %2095 = vrot.lane.b32.xlu2 %v5349_v22, %s4870_s27 }
 0x266   : > { %v1291_v33 = vpop.permute.xlu2 %1290 }
 0x267   : > { %v1302_v32 = vsel %vm1022_vm6, %v1291_v33, 0.0 }
 0x26d   : > { %1762 = vrot.lane.b32.xlu2 %v5349_v22, %s4874_s11 }
 0x26e   : > { %v1964_v38 = vpop.permute.xlu2 %1963 }
 0x26f   : > { %v1975_v41 = vsel %vm1022_vm6, %v1964_v38, 0.0 }
 0x275   : > { %1294 = vrot.lane.b32.xlu2 %v5363_v26, %s4871_s26 }
 0x276   : > { %v1761_v44 = vpop.permute.xlu2 %1760 }
 0x277   : > { %v1766_v35 = vsel %vm1022_vm6, %v1761_v44, 0.0 }
 0x278   : > { %1296 = vrot.lane.b32.xlu1 %v5373_v28, %s4871_s26 }
 0x27d   : > { %1636 = vrot.lane.b32.xlu2 %v5373_v28, %s4874_s11 }
 0x27e   : > { %v1631_v39 = vpop.permute.xlu0 %1630  ;;  %v1966_v54 = vpop.permute.xlu2 %1965 }
 0x27f   : > { %v1642_v52 = vsel %vm1022_vm6, %v1631_v39, 0.0  ;;  %v1978_v3 = vsel %vm1022_vm6, %v1966_v54, 0.0 }
 0x284   : > { %1132 = vadd.xlane.f32.xlu0 %v1131_v29 }
 0x287   : > { %v1130_v8 = vpop.xlane.xlu1 %1129 }
 0x288   : > { %v1134_v1 = vmul.f32 %v1130_v8, %v5389_v47 }
 0x28a   : > { %v5412_v63 = vsub.f32 %v5332_v31, %v1134_v1 }
 0x28c   : > { %v1138_v24 = vmul.f32 %v5412_v63, %v5412_v63 }
 0x28e   : > { %v1140_v29 = vsel %vm1022_vm6, %v1138_v24, 0.0 }
 0x298   : > { %1967 = vrot.lane.b32.xlu0 %v5363_v26, %s4870_s27 }
 0x29f   : > { %v1633_v45 = vpop.permute.xlu1 %1632 }
 0x2a0   : > { %1634 = vrot.lane.b32.xlu0 %v5363_v26, %s4874_s11  ;;  %v1645_v16 = vsel %vm1022_vm6, %v1633_v45, 0.0 }
 0x2a2   : > { %1976 = vadd.xlane.f32.xlu1 %v1975_v41 }
 0x2a6   : > { %1303 = vadd.xlane.f32.xlu2 %v1302_v32 }
 0x2a7   : > { %v1427_v43 = vpop.permute.xlu1 %1426 }
 0x2a8   : > { %1969 = vrot.lane.b32.xlu0 %v5373_v28, %s4870_s27  ;;  %v1433_v19 = vsel %vm1022_vm6, %v1427_v43, 0.0 }
 0x2a9   : > { %v1025_v48 = vpop.xlane.xlu0 %1024 }
 0x2aa   : > { %v1042_v50 = vmul.f32 %v5389_v47, %v1025_v48 }
 0x2ac   : > { %v5393_v51 = vsub.f32 %v5326_v18, %v1042_v50 }
 0x2ae   : > { %1643 = vadd.xlane.f32.xlu2 %v1642_v52  ;;  %v1050_v53 = vmul.f32 %v5393_v51, %v5393_v51 }
 0x2b0   : > { %v1054_v49 = vsel %vm1022_vm6, %v1050_v53, 0.0 }
 0x2b6   : > { %1055 = vadd.xlane.f32.xlu2 %v1054_v49 }
 0x2bc   : > { %v1425_v56 = vpop.permute.xlu0 %1424 }
 0x2bd   : > { %v1430_v57 = vsel %vm1022_vm6, %v1425_v56, 0.0 }
 0x2be   : > { %1431 = vadd.xlane.f32.xlu1 %v1430_v57 }
 0x2c0   : > { %v1028_v60 = vpop.xlane.xlu2 %1027 }
 0x2c1   : > { %v1043_v41 = vmul.f32 %v5389_v47, %v1028_v60 }
 0x2c3   : > { %v5431_v32 = vsub.f32 %v5342_v21, %v1043_v41 }
 0x2c4   : > { %v2094_v62 = vpop.permute.xlu0 %2093 }
 0x2c5   : > { %v2099_v7 = vsel %vm1022_vm6, %v2094_v62, 0.0  ;;  %v1051_v50 = vmul.f32 %v5431_v32, %v5431_v32 }
 0x2c7   : > { %v1057_v44 = vsel %vm1022_vm6, %v1051_v50, 0.0 }
 0x2c8   : > { %v2096_v27 = vpop.permute.xlu2 %2095 }
 0x2c9   : > { %v2102_v0 = vsel %vm1022_vm6, %v2096_v27, 0.0 }
 0x2ca   : > { %2103 = vadd.xlane.f32.xlu2 %v2102_v0 }
 0x2cc   : > { %v1293_v4 = vpop.permute.xlu0 %1292 }
 0x2cd   : > { %v1305_v5 = vsel %vm1022_vm6, %v1293_v4, 0.0 }
 0x2ce   : > { %1306 = vadd.xlane.f32.xlu1 %v1305_v5 }
 0x2d0   : > { %v1763_v6 = vpop.permute.xlu2 %1762 }
 0x2d1   : > { %v1769_v13 = vsel %vm1022_vm6, %v1763_v6, 0.0 }
 0x2d2   : > { %1033 = vadd.xlane.f32.xlu0 %v1032_v46  ;;  %v5422_v33 = vpop.xlane.xlu1 %1030 }
 0x2d6   : > { %1979 = vadd.xlane.f32.xlu1 %v1978_v3 }
 0x2d8   : > { %v1295_v14 = vpop.permute.xlu2 %1294 }
 0x2d9   : > { %v1308_v15 = vsel %vm1022_vm6, %v1295_v14, 0.0 }
 0x2da   : > { %2100 = vadd.xlane.f32.xlu0 %v2099_v7 }
 0x2de   : > { %1770 = vadd.xlane.f32.xlu1 %v1769_v13 }
 0x2e0   : > { %v1637_v49 = vpop.permute.xlu2 %1636 }
 0x2e1   : > { %v1651_v54 = vsel %vm1022_vm6, %v1637_v49, 0.0 }
 0x2e2   : > { %1767 = vadd.xlane.f32.xlu0 %v1766_v35 }
 0x2e6   : > { %1309 = vadd.xlane.f32.xlu1 %v1308_v15 }
 0x2ea   : > { %1646 = vadd.xlane.f32.xlu0 %v1645_v16  ;;  %v1297_v37 = vpop.permute.xlu1 %1296 }
 0x2eb   : > { %v1311_v38 = vsel %vm1022_vm6, %v1297_v37, 0.0 }
 0x2f2   : > { %1434 = vadd.xlane.f32.xlu0 %v1433_v19 }
 0x2f7   : > { %v1133_v25 = vpop.xlane.xlu0 %1132 }
 0x2f8   : > { %v1135_v17 = vmul.f32 %v1133_v25, %v5389_v47 }
 0x2fa   : > { %v5420_v30 = vsub.f32 %v5349_v22, %v1135_v17  ;;  %1141 = vadd.xlane.f32.xlu0 %v1140_v29 }
 0x2fc   : > { %v1139_v34 = vmul.f32 %v5420_v30, %v5420_v30 }
 0x2fe   : > { %v1143_v36 = vsel %vm1022_vm6, %v1139_v34, 0.0 }
 0x2ff   : > { %1144 = vadd.xlane.f32.xlu2 %v1143_v36 }
 0x307   : > { %1312 = vadd.xlane.f32.xlu2 %v1311_v38 }
 0x30a   : > { %v1968_v39 = vpop.permute.xlu0 %1967 }
 0x30b   : > { %v1981_v40 = vsel %vm1022_vm6, %v1968_v39, 0.0 }
 0x30c   : > { %1982 = vadd.xlane.f32.xlu1 %v1981_v40 }
 0x312   : > { %v1635_v42 = vpop.permute.xlu0 %1634 }
 0x313   : > { %v1648_v48 = vsel %vm1022_vm6, %v1635_v42, 0.0 }
 0x314   : > { %1649 = vadd.xlane.f32.xlu0 %v1648_v48 }
 0x315   : > { %v1977_v60 = vpop.xlane.xlu1 %1976 }
 0x316   : > { %v1987_v62 = vmul.f32 %v1977_v60, %v5389_v47 }
 0x318   : > { %v5445_v4 = vsub.f32 %v5326_v18, %v1987_v62 }
 0x319   : > { %v1304_v56 = vpop.xlane.xlu2 %1303 }
 0x31a   : > { %v1970_v52 = vpop.permute.xlu0 %1969  ;;  %v1314_v57 = vmul.f32 %v1304_v56, %v5389_v47  ;;  %v1995_v3 = vmul.f32 %v5445_v4, %v5445_v4 }
 0x31b   : > { %v1984_v53 = vsel %vm1022_vm6, %v1970_v52, 0.0 }
 0x31c   : > { %1058 = vadd.xlane.f32.xlu0 %v1057_v44  ;;  %1985 = vadd.xlane.f32.xlu2 %v1984_v53  ;;  %v5442_v27 = vsub.f32 %v5326_v18, %v1314_v57 }
 0x31e   : > { %v1322_v5 = vmul.f32 %v5442_v27, %v5442_v27 }
 0x321   : > { %v1644_v0 = vpop.xlane.xlu2 %1643 }
 0x322   : > { %v1654_v46 = vmul.f32 %v1644_v0, %v5389_v47 }
 0x324   : > { %1652 = vadd.xlane.f32.xlu0 %v1651_v54  ;;  %v5455_v7 = vsub.f32 %v5326_v18, %v1654_v46 }
 0x326   : > { %v1662_v35 = vmul.f32 %v5455_v7, %v5455_v7 }
 0x329   : > { %v5457_v8 = vpop.xlane.xlu2 %1055 }
 0x331   : > { %v1432_v6 = vpop.xlane.xlu1 %1431 }
 0x332   : > { %v1436_v13 = vmul.f32 %v1432_v6, %v5389_v47 }
 0x334   : > { %1330 = vrot.lane.b32.xlu2 %v1322_v5, %s4871_s26  ;;  %v5464_v45 = vsub.f32 %v5332_v31, %v1436_v13 }
 0x336   : > { %v1440_v24 = vmul.f32 %v5464_v45, %v5464_v45 }
 0x338   : > { %2003 = vrot.lane.b32.xlu0 %v1995_v3, %s4870_s27 }
 0x33d   : > { %v2104_v16 = vpop.xlane.xlu2 %2103 }
 0x33e   : > { %v2106_v43 = vmul.f32 %v2104_v16, %v5389_v47 }
 0x340   : > { %1670 = vrot.lane.b32.xlu0 %v1662_v35, %s4874_s11  ;;  %v5480_v17 = vsub.f32 %v5349_v22, %v2106_v43 }
 0x341   : > { %v1307_v14 = vpop.xlane.xlu1 %1306 }
 0x342   : > { %v1315_v15 = vmul.f32 %v1307_v14, %v5389_v47  ;;  %v2110_v39 = vmul.f32 %v5480_v17, %v5480_v17 }
 0x344   : > { %v5468_v1 = vsub.f32 %v5342_v21, %v1315_v15 }
 0x345   : > { %v5470_v18 = vpop.xlane.xlu0 %1033 }
 0x346   : > { %v1323_v19 = vmul.f32 %v5468_v1, %v5468_v1 }
 0x348   : > { %1332 = vrot.lane.b32.xlu1 %v1323_v19, %s4871_s26  ;;  %1444 = vrot.lane.b32.xlu0 %v1440_v24, %s4871_s26 }
 0x349   : > { %v1980_v25 = vpop.xlane.xlu1 %1979 }
 0x34a   : > { %v1988_v29 = vmul.f32 %v1980_v25, %v5389_v47  ;;  %v1066_v25 = vmul.f32 %v5457_v8, %v5389_v47 }
 0x34c   : > { %v5484_v34 = vsub.f32 %v5342_v21, %v1988_v29 }
 0x34d   : > { %v2101_v36 = vpop.xlane.xlu0 %2100 }
 0x34e   : > { %v2105_v37 = vmul.f32 %v2101_v36, %v5389_v47  ;;  %v1996_v38 = vmul.f32 %v5484_v34, %v5484_v34 }
 0x350   : > { %v5492_v40 = vsub.f32 %v5332_v31, %v2105_v37  ;;  %2005 = vrot.lane.b32.xlu1 %v1996_v38, %s4870_s27  ;;  %2115 = vrot.lane.b32.xlu0 %v2110_v39, %s4870_s27 }
 0x351   : > { %v1771_v41 = vpop.xlane.xlu1 %1770 }
 0x352   : > { %v1773_v42 = vmul.f32 %v1771_v41, %v5389_v47  ;;  %v2109_v48 = vmul.f32 %v5492_v40, %v5492_v40 }
 0x354   : > { %v5500_v50 = vsub.f32 %v5349_v22, %v1773_v42  ;;  %2113 = vrot.lane.b32.xlu2 %v2109_v48, %s4870_s27  ;;  %v1070_v42 = vadd.f32 1e-06, %v1066_v25 }
 0x355   : > { %v1768_v52 = vpop.xlane.xlu0 %1767 }
 0x356   : > { %v1772_v44 = vmul.f32 %v1768_v52, %v5389_v47  ;;  %v1777_v53 = vmul.f32 %v5500_v50, %v5500_v50  ;;  %vm1080_vm14 = vweird.f32 %v1070_v42 }
 0x358   : > { %v5507_v49 = vsub.f32 %v5332_v31, %v1772_v44  ;;  %1782 = vrot.lane.b32.xlu0 %v1777_v53, %s4874_s11 }
 0x359   : > { %v1310_v5 = vpop.xlane.xlu1 %1309 }
 0x35a   : > { %v1776_v54 = vmul.f32 %v5507_v49, %v5507_v49  ;;  %v1316_v3 = vmul.f32 %v1310_v5, %v5389_v47 }
 0x35c   : > { %1780 = vrot.lane.b32.xlu2 %v1776_v54, %s4874_s11  ;;  %v5529_v13 = vsub.f32 %v5363_v26, %v1316_v3 }
 0x35d   : > { %v1647_v56 = vpop.xlane.xlu0 %1646 }
 0x35e   : > { %v1655_v57 = vmul.f32 %v1647_v56, %v5389_v47 }
 0x360   : > { %v5515_v60 = vsub.f32 %v5342_v21, %v1655_v57 }
 0x362   : > { %v1663_v62 = vmul.f32 %v5515_v60, %v5515_v60 }
 0x364   : > { %1672 = vrot.lane.b32.xlu1 %v1663_v62, %s4874_s11 }
 0x365   : > { %v1435_v31 = vpop.xlane.xlu0 %1434 }
 0x366   : > { %v1437_v0 = vmul.f32 %v1435_v31, %v5389_v47 }
 0x368   : > { %v5522_v46 = vsub.f32 %v5349_v22, %v1437_v0  ;;  %v1324_v22 = vmul.f32 %v5529_v13, %v5529_v13 }
 0x36a   : > { %v1441_v6 = vmul.f32 %v5522_v46, %v5522_v46 }
 0x36c   : > { %1446 = vrot.lane.b32.xlu1 %v1441_v6, %s4871_s26 }
 0x36d   : > { %v1142_v21 = vpop.xlane.xlu0 %1141 }
 0x36e   : > { %v1146_v35 = vmul.f32 %v1142_v21, %v5389_v47 }
 0x370   : > { %v1148_v14 = vadd.f32 1e-06, %v1146_v35 }
 0x372   : > { %4221 = vrsqrt.f32 %v1148_v14  ;;  %v1145_v15 = vpop.xlane.xlu2 %1144  ;;  %vm1156_vm8 = vweird.f32 %v1148_v14 }
 0x373   : > { %v1147_v16 = vmul.f32 %v1145_v15, %v5389_v47 }
 0x374   : > { %1334 = vrot.lane.b32.xlu1 %v1324_v22, %s4871_s26 }
 0x375   : > { %v1149_v43 = vadd.f32 1e-06, %v1147_v16 }
 0x377   : > { %4223 = vrsqrt.f32 %v1149_v43  ;;  %vm1166_vm11 = vweird.f32 %v1149_v43 }
 0x378   : > { %v4222_v19 = vpop.eup %4221  ;;  %4225 = vrsqrt.f32 %v1070_v42 }
 0x379   : > { %v1151_v24 = vmul.f32 %v4222_v19, %v1148_v14  ;;  %vm1157_vm7 = vweird.f32 %v4222_v19 }
 0x37a   : > { %v1313_v29 = vpop.xlane.xlu2 %1312  ;;  %vm1158_vm9 = vmor %vm1156_vm8, %vm1157_vm7 }
 0x37b   : > { %v1152_v36 = vmul.f32 %v4222_v19, %v1151_v24  ;;  %v1317_v37 = vmul.f32 %v1313_v29, %v5389_v47 }
 0x37d   : > { %v4224_v38 = vpop.eup %4223  ;;  %v1153_v39 = vmul.f32 0.5, %v1152_v36  ;;  %v5540_v41 = vsub.f32 %v5373_v28, %v1317_v37 }
 0x37e   : > { %v1161_v48 = vmul.f32 %v4224_v38, %v1149_v43  ;;  %vm1167_vm10 = vweird.f32 %v4224_v38  ;;  %v4226_v35 = vpop.eup %4225 }
 0x37f   : > { %v1154_v52 = vsub.f32 1.5, %v1153_v39  ;;  %v1983_v44 = vpop.xlane.xlu1 %1982  ;;  %v1325_v53 = vmul.f32 %v5540_v41, %v5540_v41  ;;  %vm1168_vm12 = vmor %vm1166_vm11, %vm1167_vm10  ;;  %v1075_v24 = vmul.f32 %v4226_v35, %v1070_v42  ;;  %vm1081_vm13 = vweird.f32 %v4226_v35 }
 0x380   : > { %v1162_v54 = vmul.f32 %v4224_v38, %v1161_v48  ;;  %v1989_v8 = vmul.f32 %v1983_v44, %v5389_v47  ;;  %vm1082_vm15 = vmor %vm1080_vm14, %vm1081_vm13 }
 0x381   : > { %v1155_v56 = vmul.f32 %v4222_v19, %v1154_v52  ;;  %1336 = vrot.lane.b32.xlu0 %v1325_v53, %s4871_s26  ;;  %v1076_v36 = vmul.f32 %v4226_v35, %v1075_v24 }
 0x382   : > { %v1163_v57 = vmul.f32 0.5, %v1162_v54  ;;  %v5547_v62 = vsub.f32 %v5363_v26, %v1989_v8 }
 0x383   : > { %v1159_v31 = vsel %vm1158_vm9, %v4222_v19, %v1155_v56  ;;  %v1077_v54 = vmul.f32 0.5, %v1076_v36 }
 0x384   : > { %v1164_v0 = vsub.f32 1.5, %v1163_v57  ;;  %v1997_v5 = vmul.f32 %v5547_v62, %v5547_v62  ;;  %v1170_v3 = vmul.f32 %v1159_v31, %v5412_v63 }
 0x385   : > { %v1078_v56 = vsub.f32 1.5, %v1077_v54 }
 0x386   : > { %v1165_v6 = vmul.f32 %v4224_v38, %v1164_v0  ;;  %2007 = vrot.lane.b32.xlu2 %v1997_v5, %s4870_s27  ;;  %v1173_v16 = vmul.f32 %v5217_v9, %v1170_v3 }
 0x387   : > { %v1650_v21 = vpop.xlane.xlu0 %1649  ;;  %v1079_v3 = vmul.f32 %v4226_v35, %v1078_v56 }
 0x388   : > { %v1656_v14 = vmul.f32 %v1650_v21, %v5389_v47  ;;  %v1169_v15 = vsel %vm1168_vm12, %v4224_v38, %v1165_v6  ;;  %v1176_v25 = vadd.f32 %v5219_v10, %v1173_v16 }
 0x389   : > { %v1171_v22 = vmul.f32 %v1169_v15, %v5420_v30  ;;  %v1083_v15 = vsel %vm1082_vm15, %v4226_v35, %v1079_v3 }
 0x38a   : > { %v5557_v19 = vsub.f32 %v5363_v26, %v1656_v14  ;;  %v1114_v24 = vmul.f32 %v1083_v15, %v5393_v51 }
 0x38b   : > { %v1174_v63 = vmul.f32 %v5217_v9, %v1171_v22 }
 0x38c   : > { %v1664_v43 = vmul.f32 %v5557_v19, %v5557_v19 }
 0x38d   : > { %v1177_v29 = vadd.f32 %v5219_v10, %v1174_v63 }
 0x38e   : > { %1674 = vrot.lane.b32.xlu1 %v1664_v43, %s4874_s11 }
 0x38f   : > { %v1986_v37 = vpop.xlane.xlu2 %1985  ;;  %v1059_v30 = vpop.xlane.xlu0 %1058  ;;  %v1180_v38 = vpack.c.bf16 %v1177_v29, %v1176_v25  ;;  %v1119_v29 = vmul.f32 %v5221_v11, %v1114_v24 }
 0x390   : > { %v1990_v39 = vmul.f32 %v1986_v37, %v5389_v47  ;;  %v1067_v48 = vmul.f32 %v1059_v30, %v5389_v47 }
 0x391   : > { %v1188_v52 = vsel %vm1022_vm6, %v1180_v38, 0  ;;  %v1124_v37 = vadd.f32 %v5229_v12, %v1119_v29 }
 0x392   : > { %v5569_v44 = vsub.f32 %v5373_v28, %v1990_v39  ;;  %v1071_v53 = vadd.f32 1e-06, %v1067_v48  ;;  %1197 = vmatpush.bf16.xpose.msra.mxu3 %v1188_v52 }
 0x394   : > { %4227 = vrsqrt.f32 %v1071_v53  ;;  %v1998_v8 = vmul.f32 %v5569_v44, %v5569_v44  ;;  %vm1090_vm2 = vweird.f32 %v1071_v53 }
 0x396   : > { %2009 = vrot.lane.b32.xlu0 %v1998_v8, %s4870_s27 }
 0x397   : > { %v1653_v57 = vpop.xlane.xlu0 %1652  ;;  %v1331_v51 = vpop.permute.xlu2 %1330 }
 0x398   : > { %v1657_v31 = vmul.f32 %v1653_v57, %v5389_v47  ;;  %v1342_v39 = vsel %vm1022_vm6, %v1331_v51, 0.0  ;;  %v1045_v57 = vmul.f32 %v5389_v47, %v5470_v18 }
 0x39a   : > { %v4228_v0 = vpop.eup %4227  ;;  %v5576_v5 = vsub.f32 %v5373_v28, %v1657_v31 }
 0x39b   : > { %v1085_v6 = vmul.f32 %v4228_v0, %v1071_v53  ;;  %vm1091_vm1 = vweird.f32 %v4228_v0 }
 0x39c   : > { %v1665_v21 = vmul.f32 %v5576_v5, %v5576_v5  ;;  %vm1092_vm3 = vmor %vm1090_vm2, %vm1091_vm1 }
 0x39d   : > { %v1086_v14 = vmul.f32 %v4228_v0, %v1085_v6  ;;  %v5597_v6 = vsub.f32 %v5373_v28, %v1045_v57 }
 0x39e   : > { %1676 = vrot.lane.b32.xlu0 %v1665_v21, %s4874_s11 }
 0x39f   : > { %v1087_v22 = vmul.f32 0.5, %v1086_v14  ;;  %v1053_v15 = vmul.f32 %v5597_v6, %v5597_v6 }
 0x3a1   : > { %v1088_v16 = vsub.f32 1.5, %v1087_v22 }
 0x3a3   : > { %v1089_v63 = vmul.f32 %v4228_v0, %v1088_v16  ;;  %v1063_v16 = vsel %vm1022_vm6, %v1053_v15, 0.0 }
 0x3a5   : > { %v1093_v43 = vsel %vm1092_vm3, %v4228_v0, %v1089_v63 }
 0x3a6   : > { %v1115_v25 = vmul.f32 %v1093_v43, %v5431_v32  ;;  %v1044_v43 = vmul.f32 %v5389_v47, %v5422_v33 }
 0x3a8   : > { %v1120_v42 = vmul.f32 %v5221_v11, %v1115_v25  ;;  %v5617_v25 = vsub.f32 %v5363_v26, %v1044_v43 }
 0x3aa   : > { %v2004_v36 = vpop.permute.xlu0 %2003  ;;  %v1125_v35 = vadd.f32 %v5229_v12, %v1120_v42 }
 0x3ab   : > { %v2015_v52 = vsel %vm1022_vm6, %v2004_v36, 0.0 }
 0x3ac   : > { %v1178_v30 = vpack.c.bf16 %v1125_v35, %v1124_v37 }
 0x3ae   : > { %3576 = vmatmul.msk.bf16.vlgmr.msra.gmra.mxu3 %vm1022_vm6, %v1178_v30  ;;  %v2114_v53 = vpop.permute.xlu2 %2113 }
 0x3af   : > { %v2119_v54 = vsel %vm1022_vm6, %v2114_v53, 0.0 }
 0x3b2   : > { %v1671_v38 = vpop.permute.xlu0 %1670 }
 0x3b3   : > { %v1682_v56 = vsel %vm1022_vm6, %v1671_v38, 0.0 }
 0x3b6   : > { %v1781_v0 = vpop.permute.xlu2 %1780 }
 0x3b7   : > { %v1786_v21 = vsel %vm1022_vm6, %v1781_v0, 0.0 }
 0x3b8   : > { %1343 = vadd.xlane.f32.xlu1 %v1342_v39 }
 0x3ba   : > { %v1445_v48 = vpop.permute.xlu0 %1444  ;;  %v1333_v8 = vpop.permute.xlu1 %1332 }
 0x3bb   : > { %v1450_v32 = vsel %vm1022_vm6, %v1445_v48, 0.0  ;;  %v1345_v31 = vsel %vm1022_vm6, %v1333_v8, 0.0 }
 0x3bc   : > { %1451 = vadd.xlane.f32.xlu2 %v1450_v32 }
 0x3c0   : > { %2016 = vadd.xlane.f32.xlu1 %v2015_v52 }
 0x3c2   : > { %v2006_v3 = vpop.permute.xlu1 %2005  ;;  %v2116_v63 = vpop.permute.xlu0 %2115 }
 0x3c3   : > { %v2018_v14 = vsel %vm1022_vm6, %v2006_v3, 0.0  ;;  %v2122_v42 = vsel %vm1022_vm6, %v2116_v63, 0.0 }
 0x3c4   : > { %2120 = vadd.xlane.f32.xlu2 %v2119_v54 }
 0x3c8   : > { %1683 = vadd.xlane.f32.xlu0 %v1682_v56 }
 0x3ca   : > { %v1783_v29 = vpop.permute.xlu0 %1782 }
 0x3cb   : > { %v1789_v33 = vsel %vm1022_vm6, %v1783_v29, 0.0 }
 0x3cc   : > { %1346 = vadd.xlane.f32.xlu2 %v1345_v31 }
 0x3d0   : > { %1787 = vadd.xlane.f32.xlu0 %v1786_v21 }
 0x3d4   : > { %2019 = vadd.xlane.f32.xlu2 %v2018_v14 }
 0x3d6   : > { %v1673_v22 = vpop.permute.xlu1 %1672 }
 0x3d7   : > { %v1685_v18 = vsel %vm1022_vm6, %v1673_v22, 0.0 }
 0x3d8   : > { %1686 = vadd.xlane.f32.xlu1 %v1685_v18  ;;  %1064 = vadd.xlane.f32.xlu0 %v1063_v16 }
 0x3de   : > { %v1447_v24 = vpop.permute.xlu1 %1446 }
 0x3df   : > { %v1453_v28 = vsel %vm1022_vm6, %v1447_v24, 0.0 }
 0x3e0   : > { %1454 = vadd.xlane.f32.xlu1 %v1453_v28  ;;  %v2008_v35 = vpop.permute.xlu2 %2007 }
 0x3e1   : > { %v2021_v30 = vsel %vm1022_vm6, %v2008_v35, 0.0 }
 0x3e6   : > { %v1335_v38 = vpop.permute.xlu1 %1334 }
 0x3e7   : > { %v1348_v48 = vsel %vm1022_vm6, %v1335_v38, 0.0 }
 0x3ec   : > { %1818 = vrot.lane.b32.xlu0 %v5217_v9, %s4874_s11  ;;  %2079 = vrot.lane.b32.xlu2 %v5221_v11, %s4871_s26  ;;  %v1052_v9 = vmul.f32 %v5617_v25, %v5617_v25 }
 0x3ee   : > { %v1060_v36 = vsel %vm1022_vm6, %v1052_v9, 0.0 }
 0x3f3   : > { %v1337_v37 = vpop.permute.xlu0 %1336 }
 0x3f4   : > { %2086 = vrot.lane.b32.xlu2 %v5229_v12, %s4871_s26  ;;  %v1351_v51 = vsel %vm1022_vm6, %v1337_v37, 0.0 }
 0x3f9   : > { %2156 = vrot.lane.b32.xlu1 %v5219_v10, %s4871_s26 }
 0x400   : > { %v1675_v39 = vpop.permute.xlu1 %1674 }
 0x408   : > { %v5625_v26 = vpop.permute.xlu0 %2009 }
 0x410   : > { %v1677_v32 = vpop.permute.xlu0 %1676 }
 0x411   : > { %v1691_v53 = vsel %vm1022_vm6, %v1677_v32, 0.0 }
 0x416   : > { %2123 = vadd.xlane.f32.xlu0 %v2122_v42 }
 0x41d   : > { %1061 = vadd.xlane.f32.xlu2 %v1060_v36 }
 0x423   : > { %2022 = vadd.xlane.f32.xlu1 %v2021_v30 }
 0x425   : > { %1790 = vadd.xlane.f32.xlu2 %v1789_v33  ;;  %v1688_v33 = vsel %vm1022_vm6, %v1675_v39, 0.0 }
 0x42a   : > { %1746 = vrot.lane.b32.xlu0 %v5221_v11, %s4874_s11 }
 0x42b   : > { %1352 = vadd.xlane.f32.xlu1 %v1351_v51  ;;  %v1344_v54 = vpop.xlane.xlu1 %1343 }
 0x42c   : > { %v1354_v15 = vmul.f32 %v1344_v54, %v5389_v47 }
 0x42d   : > { %1349 = vadd.xlane.f32.xlu2 %v1348_v48 }
 0x42e   : > { %v5646_v24 = vadd.f32 1e-06, %v1354_v15 }
 0x42f   : > { %v1452_v52 = vpop.xlane.xlu2 %1451 }
 0x430   : > { %v1456_v57 = vmul.f32 %v1452_v52, %v5389_v47 }
 0x432   : > { %v1458_v3 = vadd.f32 1e-06, %v1456_v57 }
 0x433   : > { %1692 = vadd.xlane.f32.xlu1 %v1691_v53  ;;  %v2017_v56 = vpop.xlane.xlu1 %2016 }
 0x434   : > { %v2027_v0 = vmul.f32 %v2017_v56, %v5389_v47  ;;  %4229 = vrsqrt.f32 %v1458_v3  ;;  %vm1466_vm8 = vweird.f32 %v1458_v3 }
 0x436   : > { %v5637_v14 = vadd.f32 1e-06, %v2027_v0 }
 0x437   : > { %v5632_v8 = vpop.xlane.xlu2 %2120 }
 0x438   : > { %4231 = vrsqrt.f32 %v5637_v14  ;;  %vm2041_vm11 = vweird.f32 %v5637_v14 }
 0x43a   : > { %v4230_v43 = vpop.eup %4229 }
 0x43b   : > { %v1461_v29 = vmul.f32 %v4230_v43, %v1458_v3  ;;  %vm1467_vm7 = vweird.f32 %v4230_v43 }
 0x43c   : > { %vm1468_vm10 = vmor %vm1466_vm8, %vm1467_vm7 }
 0x43d   : > { %v1462_v35 = vmul.f32 %v4230_v43, %v1461_v29 }
 0x43f   : > { %v1347_v31 = vpop.xlane.xlu2 %1346  ;;  %v1463_v56 = vmul.f32 0.5, %v1462_v35 }
 0x440   : > { %v1355_v21 = vmul.f32 %v1347_v31, %v5389_v47 }
 0x441   : > { %v1464_v15 = vsub.f32 1.5, %v1463_v56 }
 0x442   : > { %v5642_v22 = vadd.f32 1e-06, %v1355_v21 }
 0x444   : > { %4233 = vrsqrt.f32 %v5642_v22  ;;  %vm1378_vm15 = vweird.f32 %v5642_v22 }
 0x445   : > { %1823 = vrot.lane.b32.xlu2 %v5219_v10, %s4874_s11  ;;  %v5652_v10 = vpop.eup %4231 }
 0x446   : > { %v2036_v9 = vmul.f32 %v5652_v10, %v5637_v14  ;;  %vm2042_vm9 = vweird.f32 %v5652_v10 }
 0x447   : > { %v2020_v18 = vpop.xlane.xlu2 %2019  ;;  %vm2043_vm12 = vmor %vm2041_vm11, %vm2042_vm9 }
 0x448   : > { %v2028_v16 = vmul.f32 %v2020_v18, %v5389_v47  ;;  %v2037_v48 = vmul.f32 %v5652_v10, %v2036_v9 }
 0x44a   : > { %v2032_v28 = vadd.f32 1e-06, %v2028_v16  ;;  %v5654_v42 = vpop.eup %4233  ;;  %v2038_v31 = vmul.f32 0.5, %v2037_v48 }
 0x44b   : > { %v5649_v63 = vpop.xlane.xlu1 %1686  ;;  %v1373_v32 = vmul.f32 %v5654_v42, %v5642_v22  ;;  %vm1379_vm13 = vweird.f32 %v5654_v42 }
 0x44c   : > { %4235 = vrsqrt.f32 %v2032_v28  ;;  %v2039_v16 = vsub.f32 1.5, %v2038_v31  ;;  %vm2051_vm5 = vweird.f32 %v2032_v28  ;;  %vm5685_vm2 = vmor %vm1378_vm15, %vm1379_vm13 }
 0x44d   : > { %4237 = vrsqrt.f32 %v5646_v24  ;;  %v1374_v0 = vmul.f32 %v5654_v42, %v1373_v32 }
 0x44e   : > { %v2040_v48 = vmul.f32 %v5652_v10, %v2039_v16 }
 0x44f   : > { %v1375_v29 = vmul.f32 0.5, %v1374_v0 }
 0x450   : > { %v2044_v31 = vsel %vm2043_vm12, %v5652_v10, %v2040_v48 }
 0x451   : > { %v1376_v32 = vsub.f32 1.5, %v1375_v29  ;;  %v2075_v10 = vmul.f32 %v2044_v31, %v5445_v4 }
 0x452   : > { %v4236_v36 = vpop.eup %4235 }
 0x453   : > { %v5658_v37 = vpop.eup %4237  ;;  %v2046_v30 = vmul.f32 %v4236_v36, %v2032_v28  ;;  %v1455_v38 = vpop.xlane.xlu1 %1454  ;;  %vm2052_vm4 = vweird.f32 %v4236_v36  ;;  %v1377_v3 = vmul.f32 %v5654_v42, %v1376_v32  ;;  %v2125_v32 = vmul.f32 %v5632_v8, %v5389_v47 }
 0x454   : > { %v1457_v51 = vmul.f32 %v1455_v38, %v5389_v47  ;;  %1689 = vadd.xlane.f32.xlu0 %v1688_v33  ;;  %v1363_v53 = vmul.f32 %v5658_v37, %v5646_v24  ;;  %vm2053_vm0 = vmor %vm2051_vm5, %vm2052_vm4  ;;  %v1465_v38 = vmul.f32 %v4230_v43, %v1464_v15  ;;  %v5669_v33 = vpop.permute.xlu2 %2079  ;;  %vm1369_vm1 = vweird.f32 %v5658_v37 }
 0x455   : > { %v2047_v52 = vmul.f32 %v4236_v36, %v2046_v30  ;;  %vm1368_vm5 = vweird.f32 %v5646_v24 }
 0x456   : > { %v1459_v54 = vadd.f32 1e-06, %v1457_v51  ;;  %v1364_v21 = vmul.f32 %v5658_v37, %v1363_v53  ;;  %v1469_v56 = vsel %vm1468_vm10, %v4230_v43, %v1465_v38 }
 0x457   : > { %v2048_v57 = vmul.f32 0.5, %v2047_v52 }
 0x458   : > { %4239 = vrsqrt.f32 %v1459_v54  ;;  %v1365_v30 = vmul.f32 0.5, %v1364_v21  ;;  %vm1476_vm3 = vweird.f32 %v1459_v54 }
 0x459   : > { %v2049_v39 = vsub.f32 1.5, %v2048_v57 }
 0x45a   : > { %v1366_v28 = vsub.f32 1.5, %v1365_v30 }
 0x45b   : > { %v2050_v18 = vmul.f32 %v4236_v36, %v2049_v39  ;;  %v1480_v39 = vmul.f32 %v1469_v56, %v5464_v45  ;;  %v1381_v45 = vsel %vm5685_vm2, %v5654_v42, %v1377_v3 }
 0x45c   : > { %v1367_v14 = vmul.f32 %v5658_v37, %v1366_v28  ;;  %v5696_v15 = vpop.permute.xlu2 %2086  ;;  %v1403_v24 = vmul.f32 %v1381_v45, %v5468_v1 }
 0x45d   : > { %v2054_v35 = vsel %vm2053_vm0, %v4236_v36, %v2050_v18  ;;  %v5675_v36 = vpop.xlane.xlu0 %1683  ;;  %vm1370_vm0 = vmor %vm1368_vm5, %vm1369_vm1  ;;  %v2082_v18 = vmul.f32 %v5669_v33, %v2075_v10  ;;  %v1486_v16 = vmul.f32 %v5273_v58, %v1480_v39 }
 0x45e   : > { %v4240_v9 = vpop.eup %4239  ;;  %v2076_v53 = vmul.f32 %v2054_v35, %v5484_v34  ;;  %v1371_v29 = vsel %vm1370_vm0, %v5658_v37, %v1367_v14  ;;  %v1411_v1 = vmul.f32 %v5271_v55, %v1403_v24 }
 0x45f   : > { %v1471_v51 = vmul.f32 %v4240_v9, %v1459_v54  ;;  %vm1477_vm14 = vweird.f32 %v4240_v9  ;;  %v2089_v30 = vadd.f32 %v5696_v15, %v2082_v18  ;;  %v1402_v38 = vmul.f32 %v1371_v29, %v5442_v27 }
 0x460   : > { %v2083_v34 = vmul.f32 %v5669_v33, %v2076_v53  ;;  %vm1478_vm4 = vmor %vm1476_vm3, %vm1477_vm14 }
 0x461   : > { %v1472_v52 = vmul.f32 %v4240_v9, %v1471_v51  ;;  %v1492_v51 = vadd.f32 %v5277_v61, %v1486_v16 }
 0x462   : > { %v2090_v4 = vadd.f32 %v5696_v15, %v2083_v34 }
 0x463   : > { %v1473_v57 = vmul.f32 0.5, %v1472_v52 }
 0x465   : > { %v1474_v0 = vsub.f32 1.5, %v1473_v57  ;;  %v1788_v35 = vpop.xlane.xlu0 %1787 }
 0x467   : > { %v1475_v21 = vmul.f32 %v4240_v9, %v1474_v0 }
 0x468   : > { %1753 = vrot.lane.b32.xlu0 %v5229_v12, %s4874_s11 }
 0x469   : > { %v1479_v22 = vsel %vm1478_vm4, %v4240_v9, %v1475_v21  ;;  %v2024_v9 = vsel %vm1022_vm6, %v5625_v26, 0.0  ;;  %v1419_v26 = vadd.f32 %v5275_v59, %v1411_v1 }
 0x46a   : > { %v1481_v54 = vmul.f32 %v1479_v22, %v5522_v46  ;;  %v2161_v46 = vpack.c.bf16 %v2090_v4, %v2089_v30  ;;  %v1792_v30 = vmul.f32 %v1788_v35, %v5389_v47 }
 0x46b   : > { %v5724_v21 = vpop.permute.xlu1 %2156 }
 0x46c   : > { %v1487_v42 = vmul.f32 %v5273_v58, %v1481_v54  ;;  %v1410_v58 = vmul.f32 %v5271_v55, %v1402_v38  ;;  %v5731_v1 = vadd.f32 1e-06, %v1792_v30 }
 0x46d   : > { %v1065_v52 = vpop.xlane.xlu0 %1064 }
 0x46e   : > { %2025 = vadd.xlane.f32.xlu2 %v2024_v9  ;;  %v1493_v48 = vadd.f32 %v5277_v61, %v1487_v42  ;;  %v1418_v27 = vadd.f32 %v5275_v59, %v1410_v58  ;;  %v2127_v61 = vadd.f32 1e-06, %v2125_v32  ;;  %v1069_v28 = vmul.f32 %v1065_v52, %v5389_v47 }
 0x470   : > { %2166 = vrot.lane.b32.xlu0 %v2161_v46, %s4870_s27  ;;  %v1496_v37 = vpack.c.bf16 %v1493_v48, %v1492_v51  ;;  %v1494_v53 = vpack.c.bf16 %v1419_v26, %v1418_v27  ;;  %4241 = vrsqrt.f32 %v2127_v61  ;;  %v1073_v56 = vadd.f32 1e-06, %v1069_v28 }
 0x471   : > { %vm2135_vm8 = vweird.f32 %v2127_v61 }
 0x472   : > { %1504 = vrot.lane.b32.xlu1 %v1496_v37, %s4871_s26  ;;  %4243 = vrsqrt.f32 %v1073_v56  ;;  %vm1110_vm13 = vweird.f32 %v1073_v56 }
 0x475   : > { %v5721_v57 = vpop.permute.xlu0 %1818 }
 0x476   : > { %v4242_v3 = vpop.eup %4241 }
 0x477   : > { %v2130_v31 = vmul.f32 %v4242_v3, %v2127_v61  ;;  %vm2136_vm7 = vweird.f32 %v4242_v3 }
 0x478   : > { %v4244_v0 = vpop.eup %4243  ;;  %vm5733_vm9 = vmor %vm2135_vm8, %vm2136_vm7 }
 0x479   : > { %v2131_v14 = vmul.f32 %v4242_v3, %v2130_v31  ;;  %v1105_v8 = vmul.f32 %v4244_v0, %v1073_v56  ;;  %vm1111_vm11 = vweird.f32 %v4244_v0 }
 0x47a   : > { %1499 = vrot.lane.b32.xlu1 %v1494_v53, %s4871_s26  ;;  %vm1112_vm15 = vmor %vm1110_vm13, %vm1111_vm11 }
 0x47b   : > { %v2132_v10 = vmul.f32 0.5, %v2131_v14  ;;  %v1106_v45 = vmul.f32 %v4244_v0, %v1105_v8 }
 0x47d   : > { %v2133_v16 = vsub.f32 1.5, %v2132_v10  ;;  %v1107_v29 = vmul.f32 0.5, %v1106_v45 }
 0x47f   : > { %v2134_v38 = vmul.f32 %v4242_v3, %v2133_v16  ;;  %v1108_v46 = vsub.f32 1.5, %v1107_v29 }
 0x481   : > { %v1109_v32 = vmul.f32 %v4244_v0, %v1108_v46  ;;  %v2138_v52 = vsel %vm5733_vm9, %v4242_v3, %v2134_v38 }
 0x483   : > { %v1113_v8 = vsel %vm1112_vm15, %v4244_v0, %v1109_v32 }
 0x484   : > { %v1117_v29 = vmul.f32 %v1113_v8, %v5597_v6 }
 0x489   : > { %v2124_v39 = vpop.xlane.xlu0 %2123 }
 0x48a   : > { %v2126_v34 = vmul.f32 %v2124_v39, %v5389_v47  ;;  %v2149_v39 = vmul.f32 %v2138_v52, %v5492_v40 }
 0x48c   : > { %v2128_v43 = vadd.f32 1e-06, %v2126_v34  ;;  %v2154_v40 = vmul.f32 %v5279_v2, %v2149_v39 }
 0x48e   : > { %4245 = vrsqrt.f32 %v2128_v43  ;;  %vm2145_vm12 = vweird.f32 %v2128_v43  ;;  %v2159_v30 = vadd.f32 %v5724_v21, %v2154_v40 }
 0x490   : > { %v1062_v22 = vpop.xlane.xlu2 %1061 }
 0x491   : > { %v1068_v18 = vmul.f32 %v1062_v22, %v5389_v47 }
 0x493   : > { %v1072_v54 = vadd.f32 1e-06, %v1068_v18 }
 0x494   : > { %v4246_v4 = vpop.eup %4245 }
 0x495   : > { %v2140_v24 = vmul.f32 %v4246_v4, %v2128_v43  ;;  %4247 = vrsqrt.f32 %v1072_v54  ;;  %vm2146_vm10 = vweird.f32 %v4246_v4  ;;  %vm1100_vm2 = vweird.f32 %v1072_v54 }
 0x496   : > { %v5728_v42 = vpop.xlane.xlu1 %2022  ;;  %vm2147_vm14 = vmor %vm2145_vm12, %vm2146_vm10 }
 0x497   : > { %v2141_v9 = vmul.f32 %v4246_v4, %v2140_v24 }
 0x498   : > { %v1791_v51 = vpop.xlane.xlu2 %1790 }
 0x499   : > { %v2142_v48 = vmul.f32 0.5, %v2141_v9  ;;  %v1793_v37 = vmul.f32 %v1791_v51, %v5389_v47 }
 0x49b   : > { %v4248_v58 = vpop.eup %4247  ;;  %v2143_v27 = vsub.f32 1.5, %v2142_v48  ;;  %v5737_v35 = vadd.f32 1e-06, %v1793_v37 }
 0x49c   : > { %v1095_v53 = vmul.f32 %v4248_v58, %v1072_v54  ;;  %vm1101_vm1 = vweird.f32 %v4248_v58  ;;  %v1122_v54 = vmul.f32 %v5221_v11, %v1117_v29 }
 0x49d   : > { %v2144_v28 = vmul.f32 %v4246_v4, %v2143_v27  ;;  %4249 = vrsqrt.f32 %v5737_v35  ;;  %vm1102_vm3 = vmor %vm1100_vm2, %vm1101_vm1  ;;  %vm1812_vm8 = vweird.f32 %v5737_v35 }
 0x49e   : > { %4251 = vrsqrt.f32 %v5731_v1  ;;  %v1096_v61 = vmul.f32 %v4248_v58, %v1095_v53  ;;  %v1353_v31 = vpop.xlane.xlu1 %1352  ;;  %v1127_v52 = vadd.f32 %v5229_v12, %v1122_v54 }
 0x49f   : > { %v2148_v34 = vsel %vm2147_vm14, %v4246_v4, %v2144_v28  ;;  %v1357_v14 = vmul.f32 %v1353_v31, %v5389_v47  ;;  %vm1802_vm14 = vweird.f32 %v5731_v1 }
 0x4a0   : > { %v2150_v3 = vmul.f32 %v2148_v34, %v5480_v17  ;;  %v1097_v10 = vmul.f32 0.5, %v1096_v61  ;;  %v1350_v45 = vpop.xlane.xlu2 %1349 }
 0x4a1   : > { %v1361_v43 = vadd.f32 1e-06, %v1357_v14  ;;  %v1356_v22 = vmul.f32 %v1350_v45, %v5389_v47 }
 0x4a2   : > { %v1098_v18 = vsub.f32 1.5, %v1097_v10  ;;  %v2155_v56 = vmul.f32 %v5279_v2, %v2150_v3 }
 0x4a3   : > { %v5748_v16 = vpop.eup %4249  ;;  %4253 = vrsqrt.f32 %v1361_v43  ;;  %v1360_v4 = vadd.f32 1e-06, %v1356_v22  ;;  %vm1398_vm0 = vweird.f32 %v1361_v43 }
 0x4a4   : > { %v5752_v0 = vpop.eup %4251  ;;  %v1099_v17 = vmul.f32 %v4248_v58, %v1098_v18  ;;  %v1807_v24 = vmul.f32 %v5748_v16, %v5737_v35  ;;  %v2160_v9 = vadd.f32 %v5724_v21, %v2155_v56  ;;  %vm1813_vm5 = vweird.f32 %v5748_v16 }
 0x4a5   : > { %4255 = vrsqrt.f32 %v1360_v4  ;;  %v1797_v2 = vmul.f32 %v5752_v0, %v5731_v1  ;;  %vm5780_vm10 = vmor %vm1812_vm8, %vm1813_vm5  ;;  %vm1388_vm11 = vweird.f32 %v1360_v4  ;;  %vm1803_vm13 = vweird.f32 %v5752_v0 }
 0x4a6   : > { %v1103_v38 = vsel %vm1102_vm3, %v4248_v58, %v1099_v17  ;;  %v1808_v6 = vmul.f32 %v5748_v16, %v1807_v24  ;;  %v2163_v51 = vpack.c.bf16 %v2160_v9, %v2159_v30  ;;  %vm1804_vm15 = vmor %vm1802_vm14, %vm1803_vm13 }
 0x4a7   : > { %v1116_v46 = vmul.f32 %v1103_v38, %v5617_v25  ;;  %v1798_v21 = vmul.f32 %v5752_v0, %v1797_v2  ;;  %v1694_v25 = vmul.f32 %v5675_v36, %v5389_v47 }
 0x4a8   : > { %2171 = vrot.lane.b32.xlu1 %v2163_v51, %s4870_s27  ;;  %v1809_v26 = vmul.f32 0.5, %v1808_v6 }
 0x4a9   : > { %v4254_v48 = vpop.eup %4253  ;;  %v1121_v37 = vmul.f32 %v5221_v11, %v1116_v46  ;;  %v1799_v14 = vmul.f32 0.5, %v1798_v21  ;;  %v1695_v11 = vmul.f32 %v5649_v63, %v5389_v47  ;;  %v5773_v10 = vadd.f32 1e-06, %v1694_v25 }
 0x4aa   : > { %v1393_v27 = vmul.f32 %v4254_v48, %v1361_v43  ;;  %v1810_v31 = vsub.f32 1.5, %v1809_v26  ;;  %vm1399_vm4 = vweird.f32 %v4254_v48  ;;  %v1824_v26 = vpop.permute.xlu2 %1823 }
 0x4ab   : > { %v4256_v32 = vpop.eup %4255  ;;  %v1126_v58 = vadd.f32 %v5229_v12, %v1121_v37  ;;  %v1693_v12 = vpop.xlane.xlu1 %1692  ;;  %v1800_v18 = vsub.f32 1.5, %v1799_v14  ;;  %v5777_v56 = vadd.f32 1e-06, %v1695_v11  ;;  %vm1400_vm9 = vmor %vm1398_vm0, %vm1399_vm4  ;;  %4257 = vrsqrt.f32 %v5773_v10 }
 0x4ac   : > { %v1394_v53 = vmul.f32 %v4254_v48, %v1393_v27  ;;  %v1383_v28 = vmul.f32 %v4256_v32, %v1360_v4  ;;  %v1811_v36 = vmul.f32 %v5748_v16, %v1810_v31  ;;  %vm1389_vm7 = vweird.f32 %v4256_v32 }
 0x4ad   : > { %v1179_v61 = vpack.c.bf16 %v1127_v52, %v1126_v58  ;;  %v1697_v43 = vmul.f32 %v1693_v12, %v5389_v47  ;;  %vm1390_vm12 = vmor %vm1388_vm11, %vm1389_vm7  ;;  %4259 = vrsqrt.f32 %v5777_v56  ;;  %v1801_v4 = vmul.f32 %v5752_v0, %v1800_v18 }
 0x4ae   : > { %v1395_v39 = vmul.f32 0.5, %v1394_v53  ;;  %v1384_v34 = vmul.f32 %v4256_v32, %v1383_v28  ;;  %v1815_v35 = vsel %vm5780_vm10, %v5748_v16, %v1811_v36  ;;  %vm1708_vm3 = vweird.f32 %v5773_v10 }
 0x4af   : > { %3577 = vmatmul.msk.bf16.gmra.mxu3 %vm1022_vm6, %v1179_v61  ;;  %v1701_v38 = vadd.f32 1e-06, %v1697_v43  ;;  %vm1718_vm5 = vweird.f32 %v5777_v56 }
 0x4b0   : > { %v1396_v8 = vsub.f32 1.5, %v1395_v39  ;;  %v1385_v3 = vmul.f32 0.5, %v1384_v34 }
 0x4b1   : > { %v4258_v46 = vpop.eup %4257  ;;  %4261 = vrsqrt.f32 %v1701_v38  ;;  %vm1738_vm8 = vweird.f32 %v1701_v38 }
 0x4b2   : > { %v1397_v45 = vmul.f32 %v4254_v48, %v1396_v8  ;;  %v1386_v22 = vsub.f32 1.5, %v1385_v3  ;;  %v1703_v37 = vmul.f32 %v4258_v46, %v5773_v10  ;;  %vm1709_vm1 = vweird.f32 %v4258_v46 }
 0x4b3   : > { %v4260_v51 = vpop.eup %4259  ;;  %vm1710_vm4 = vmor %vm1708_vm3, %vm1709_vm1 }
 0x4b4   : > { %v1401_v29 = vsel %vm1400_vm9, %v4254_v48, %v1397_v45  ;;  %v1387_v40 = vmul.f32 %v4256_v32, %v1386_v22  ;;  %v1713_v1 = vmul.f32 %v4260_v51, %v5777_v56  ;;  %vm1719_vm2 = vweird.f32 %v4260_v51 }
 0x4b5   : > { %v1405_v17 = vmul.f32 %v1401_v29, %v5540_v41  ;;  %v1817_v41 = vmul.f32 %v1815_v35, %v5500_v50  ;;  %vm1720_vm0 = vmor %vm1718_vm5, %vm1719_vm2  ;;  %vm1958_vm5 = vcmask 785920  }
 0x4b6   : > { %v1391_v24 = vsel %vm1390_vm12, %v4256_v32, %v1387_v40  ;;  %v1704_v32 = vmul.f32 %v4258_v46, %v1703_v37  ;;  %v1714_v58 = vmul.f32 %v4260_v51, %v1713_v1 }
 0x4b7   : > { %v1404_v30 = vmul.f32 %v1391_v24, %v5529_v13  ;;  %v1413_v9 = vmul.f32 %v5271_v55, %v1405_v17  ;;  %v1805_v13 = vsel %vm1804_vm15, %v5752_v0, %v1801_v4  ;;  %v1822_v54 = vmul.f32 %v5721_v57, %v1817_v41  ;;  %v4262_v0 = vpop.eup %4261 }
 0x4b8   : > { %v1816_v50 = vmul.f32 %v1805_v13, %v5507_v49  ;;  %v1733_v52 = vmul.f32 %v4262_v0, %v1701_v38  ;;  %v1705_v28 = vmul.f32 0.5, %v1704_v32  ;;  %v1715_v25 = vmul.f32 0.5, %v1714_v58 }
 0x4b9   : > { %v1412_v6 = vmul.f32 %v5271_v55, %v1404_v30  ;;  %v1421_v2 = vadd.f32 %v5275_v59, %v1413_v9  ;;  %v5804_v55 = vpop.permute.xlu0 %1746  ;;  %v1827_v27 = vadd.f32 %v1824_v26, %v1822_v54  ;;  %vm1739_vm7 = vweird.f32 %v4262_v0 }
 0x4ba   : > { %v1734_v31 = vmul.f32 %v4262_v0, %v1733_v52  ;;  %v1706_v34 = vsub.f32 1.5, %v1705_v28  ;;  %v1716_v14 = vsub.f32 1.5, %v1715_v25  ;;  %vm1740_vm9 = vmor %vm1738_vm8, %vm1739_vm7 }
 0x4bb   : > { %v1420_v16 = vadd.f32 %v5275_v59, %v1412_v6  ;;  %v1821_v59 = vmul.f32 %v5721_v57, %v1816_v50  ;;  %v2029_v57 = vmul.f32 %v5728_v42, %v5389_v47 }
 0x4bc   : > { %v1735_v11 = vmul.f32 0.5, %v1734_v31  ;;  %v1707_v8 = vmul.f32 %v4258_v46, %v1706_v34  ;;  %v1717_v3 = vmul.f32 %v4260_v51, %v1716_v14  ;;  %v1199_v34 = vpop.f32.mrf.mxu3 }
 0x4bd   : > { %v1495_v48 = vpack.c.bf16 %v1421_v2, %v1420_v16  ;;  %v1826_v21 = vadd.f32 %v1824_v26, %v1821_v59  ;;  %v2033_v12 = vadd.f32 1e-06, %v2029_v57 }
 0x4be   : > { %v1736_v36 = vsub.f32 1.5, %v1735_v11  ;;  %v1711_v22 = vsel %vm1710_vm4, %v4258_v46, %v1707_v8  ;;  %v1721_v63 = vsel %vm1720_vm0, %v4260_v51, %v1717_v3  ;;  %vm1209_vm4 = vcmask 130048  }
 0x4bf   : > { %1501 = vrot.lane.b32.xlu2 %v1495_v48, %s4871_s26  ;;  %v1830_v53 = vpack.c.bf16 %v1827_v27, %v1826_v21  ;;  %v1742_v40 = vmul.f32 %v1711_v22, %v5455_v7  ;;  %v1743_v43 = vmul.f32 %v1721_v63, %v5515_v60  ;;  %vm2061_vm14 = vweird.f32 %v2033_v12 }
 0x4c0   : > { %v1737_v42 = vmul.f32 %v4262_v0, %v1736_v36  ;;  %v1210_v3 = vsel %vm1209_vm4, %v1199_v34, -inf  ;;  %vm2291_vm0 = vcmask 1048320  }
 0x4c1   : > { %v1749_v10 = vmul.f32 %v5804_v55, %v1742_v40  ;;  %v1750_v24 = vmul.f32 %v5804_v55, %v1743_v43 }
 0x4c2   : > { %v1741_v56 = vsel %vm1740_vm9, %v4262_v0, %v1737_v42 }
 0x4c3   : > { %v1745_v7 = vmul.f32 %v1741_v56, %v5576_v5 }
 0x4c4   : > { %v1201_v8 = vpop.f32.mrf.mxu3 }
 0x4c5   : > { %v1752_v13 = vmul.f32 %v5804_v55, %v1745_v7 }
 0x4c7   : > { %1838 = vrot.lane.b32.xlu2 %v1830_v53, %s4874_s11  ;;  %v1690_v49 = vpop.xlane.xlu0 %1689 }
 0x4c8   : > { %v1696_v61 = vmul.f32 %v1690_v49, %v5389_v47 }
 0x4ca   : > { %v1700_v39 = vadd.f32 1e-06, %v1696_v61 }
 0x4cc   : > { %4263 = vrsqrt.f32 %v1700_v39  ;;  %vm1728_vm11 = vweird.f32 %v1700_v39 }
 0x4cd   : > { %4265 = vrsqrt.f32 %v2033_v12 }
 0x4d2   : > { %v4264_v45 = vpop.eup %4263 }
 0x4d3   : > { %v1723_v18 = vmul.f32 %v4264_v45, %v1700_v39  ;;  %vm1729_vm10 = vweird.f32 %v4264_v45  ;;  %v4266_v30 = vpop.eup %4265 }
 0x4d4   : > { %vm1730_vm12 = vmor %vm1728_vm11, %vm1729_vm10  ;;  %v2056_v60 = vmul.f32 %v4266_v30, %v2033_v12  ;;  %vm2062_vm13 = vweird.f32 %v4266_v30 }
 0x4d5   : > { %v1724_v29 = vmul.f32 %v4264_v45, %v1723_v18  ;;  %vm2063_vm15 = vmor %vm2061_vm14, %vm2062_vm13 }
 0x4d6   : > { %v2057_v51 = vmul.f32 %v4266_v30, %v2056_v60 }
 0x4d7   : > { %v1725_v17 = vmul.f32 0.5, %v1724_v29 }
 0x4d8   : > { %v2058_v59 = vmul.f32 0.5, %v2057_v51 }
 0x4d9   : > { %v1726_v35 = vsub.f32 1.5, %v1725_v17 }
 0x4da   : > { %v1754_v9 = vpop.permute.xlu0 %1753 }
 0x4db   : > { %v1727_v4 = vmul.f32 %v4264_v45, %v1726_v35  ;;  %v1756_v41 = vadd.f32 %v1754_v9, %v1749_v10  ;;  %v1757_v6 = vadd.f32 %v1754_v9, %v1750_v24  ;;  %v1759_v37 = vadd.f32 %v1754_v9, %v1752_v13 }
 0x4dd   : > { %v1731_v38 = vsel %vm1730_vm12, %v4264_v45, %v1727_v4  ;;  %v1828_v16 = vpack.c.bf16 %v1757_v6, %v1756_v41 }
 0x4de   : > { %v1744_v2 = vmul.f32 %v1731_v38, %v5557_v19  ;;  %v2059_v19 = vsub.f32 1.5, %v2058_v59 }
 0x4df   : > { %1833 = vrot.lane.b32.xlu1 %v1828_v16, %s4874_s11 }
 0x4e0   : > { %v1751_v46 = vmul.f32 %v5804_v55, %v1744_v2  ;;  %v2060_v55 = vmul.f32 %v4266_v30, %v2059_v19 }
 0x4e1   : > { %v2026_v54 = vpop.xlane.xlu2 %2025 }
 0x4e2   : > { %v1758_v48 = vadd.f32 %v1754_v9, %v1751_v46  ;;  %v2030_v50 = vmul.f32 %v2026_v54, %v5389_v47  ;;  %v2064_v58 = vsel %vm2063_vm15, %v4266_v30, %v2060_v55  ;;  %v2167_v45 = vpop.permute.xlu0 %2166 }
 0x4e3   : > { %v2077_v28 = vmul.f32 %v2064_v58, %v5547_v62  ;;  %v1213_v62 = vsel %vm1209_vm4, %v1201_v8, -inf }
 0x4e4   : > { %v2034_v1 = vadd.f32 1e-06, %v2030_v50  ;;  %v1505_v26 = vpop.permute.xlu1 %1504  ;;  %v1829_v5 = vpack.c.bf16 %v1759_v37, %v1758_v48 }
 0x4e5   : > { %v1513_v27 = vsel %vm1022_vm6, %v1505_v26, 0  ;;  %v2084_v31 = vmul.f32 %v5669_v33, %v2077_v28 }
 0x4e6   : > { %4267 = vrsqrt.f32 %v2034_v1  ;;  %1522 = vmatpush.bf16.xpose.msrb.mxu2 %v1513_v27  ;;  %1835 = vrot.lane.b32.xlu2 %v1829_v5, %s4874_s11  ;;  %vm2071_vm2 = vweird.f32 %v2034_v1 }
 0x4e7   : > { %v2091_v14 = vadd.f32 %v5696_v15, %v2084_v31 }
 0x4ec   : > { %v4268_v0 = vpop.eup %4267  ;;  %v1500_v32 = vpop.permute.xlu1 %1499 }
 0x4ed   : > { %v2066_v21 = vmul.f32 %v4268_v0, %v2034_v1  ;;  %3580 = vmatmul.msk.bf16.vlgmr.msrb.gmra.mxu2 %vm1022_vm6, %v1500_v32  ;;  %vm2072_vm1 = vweird.f32 %v4268_v0 }
 0x4ee   : > { %vm2073_vm3 = vmor %vm2071_vm2, %vm2072_vm1 }
 0x4ef   : > { %v2067_v47 = vmul.f32 %v4268_v0, %v2066_v21 }
 0x4f1   : > { %v2068_v52 = vmul.f32 0.5, %v2067_v47 }
 0x4f3   : > { %v2069_v53 = vsub.f32 1.5, %v2068_v52 }
 0x4f5   : > { %v2070_v49 = vmul.f32 %v4268_v0, %v2069_v53 }
 0x4f7   : > { %v2074_v25 = vsel %vm2073_vm3, %v4268_v0, %v2070_v49 }
 0x4f8   : > { %v2078_v61 = vmul.f32 %v2074_v25, %v5569_v44 }
 0x4fa   : > { %v2085_v39 = vmul.f32 %v5669_v33, %v2078_v61 }
 0x4fc   : > { %v2092_v57 = vadd.f32 %v5696_v15, %v2085_v39 }
 0x4fe   : > { %v2162_v11 = vpack.c.bf16 %v2092_v57, %v2091_v14 }
 0x500   : > { %2168 = vrot.lane.b32.xlu0 %v2162_v11, %s4870_s27 }
 0x509   : > { %1214 = vmax.xlane.f32.xlu1 %v1213_v62 }
 0x50f   : > { %1211 = vmax.xlane.f32.xlu2 %v1210_v3 }
 0x519   : > { %v1502_v44 = vpop.permute.xlu2 %1501 }
 0x51a   : > { %3581 = vmatmul.msk.bf16.gmra.mxu2 %vm1022_vm6, %v1502_v44  ;;  %v2172_v33 = vpop.permute.xlu1 %2171 }
 0x51b   : > { %v2180_v12 = vsel %vm1022_vm6, %v2172_v33, 0 }
 0x51c   : > { %2189 = vmatpush.bf16.xpose.msra.mxu2 %v2180_v12 }
 0x521   : > { %v1839_v36 = vpop.permute.xlu2 %1838 }
 0x522   : > { %v1847_v15 = vsel %vm1022_vm6, %v1839_v36, 0 }
 0x523   : > { %1856 = vmatpush.bf16.xpose.msrb.mxu0 %v1847_v15 }
 0x52a   : > { %3588 = vmatmul.msk.bf16.vlgmr.msra.gmra.mxu2 %vm1022_vm6, %v2167_v45 }
 0x532   : > { %v1204_v22 = vpop.f32.mrf.mxu3 }
 0x533   : > { %v1216_v18 = vsel %vm1209_vm4, %v1204_v22, -inf }
 0x534   : > { %1217 = vmax.xlane.f32.xlu1 %v1216_v18 }
 0x53a   : > { %v1206_v63 = vpop.f32.mrf.mxu3 }
 0x53b   : > { %v1219_v42 = vsel %vm1209_vm4, %v1206_v63, -inf }
 0x53c   : > { %1220 = vmax.xlane.f32.xlu0 %v1219_v42 }
 0x540   : > { %v1836_v40 = vpop.permute.xlu2 %1835 }
 0x551   : > { %v1834_v29 = vpop.permute.xlu1 %1833 }
 0x552   : > { %3584 = vmatmul.msk.bf16.vlgmr.msrb.gmra.mxu0 %vm1022_vm6, %v1834_v29 }
 0x562   : > { %3585 = vmatmul.msk.bf16.gmra.mxu0 %vm1022_vm6, %v1836_v40 }
 0x570   : > { %v5850_v41 = vpop.f32.mrf.mxu2 }
 0x571   : > { %v1534_v38 = vsel %vm1209_vm4, %v5850_v41, -inf }
 0x572   : > { %v2169_v43 = vpop.permute.xlu0 %2168 }
 0x573   : > { %3589 = vmatmul.msk.bf16.gmra.mxu2 %vm1022_vm6, %v2169_v43 }
 0x578   : > { %v5853_v60 = vpop.f32.mrf.mxu2 }
 0x579   : > { %v1537_v1 = vsel %vm1209_vm4, %v5853_v60, -inf }
 0x57c   : > { %v1215_v17 = vpop.xlane.xlu1 %1214 }
 0x57d   : > { %v1223_v10 = vsub.f32 %v1201_v8, %v1215_v17 }
 0x57f   : > { %v1228_v24 = vmul.f32 1.442695, %v1223_v10 }
 0x581   : > { %4269 = vpow2.f32 %v1228_v24 }
 0x582   : > { %v1212_v56 = vpop.xlane.xlu2 %1211 }
 0x583   : > { %v1222_v35 = vsub.f32 %v1199_v34, %v1212_v56 }
 0x585   : > { %v1226_v30 = vmul.f32 1.442695, %v1222_v35 }
 0x587   : > { %v5846_v9 = vpop.eup %4269  ;;  %4271 = vpow2.f32 %v1226_v30 }
 0x588   : > { %v1237_v4 = vsel %vm1209_vm4, %v5846_v9, 0.0 }
 0x589   : > { %1238 = vadd.xlane.f32.xlu0 %v1237_v4 }
 0x58d   : > { %v4272_v6 = vpop.eup %4271 }
 0x58e   : > { %v1234_v7 = vsel %vm1209_vm4, %v4272_v6, 0.0 }
 0x58f   : > { %1235 = vadd.xlane.f32.xlu1 %v1234_v7 }
 0x597   : > { %1535 = vmax.xlane.f32.xlu1 %v1534_v38 }
 0x59d   : > { %v5857_v16 = vpop.f32.mrf.mxu2 }
 0x59e   : > { %v1540_v19 = vsel %vm1209_vm4, %v5857_v16, -inf }
 0x5a5   : > { %v5859_v2 = vpop.f32.mrf.mxu2 }
 0x5a6   : > { %v1543_v55 = vsel %vm1209_vm4, %v5859_v2, -inf }
 0x5a7   : > { %v1218_v0 = vpop.xlane.xlu1 %1217 }
 0x5a8   : > { %v1224_v32 = vsub.f32 %v1204_v22, %v1218_v0 }
 0x5aa   : > { %v1230_v21 = vmul.f32 1.442695, %v1224_v32 }
 0x5ac   : > { %4273 = vpow2.f32 %v1230_v21 }
 0x5ad   : > { %v5861_v46 = vpop.f32.mrf.mxu2 }
 0x5ae   : > { %v2201_v28 = vsel %vm1209_vm4, %v5861_v46, -inf }
 0x5af   : > { %v1221_v47 = vpop.xlane.xlu0 %1220 }
 0x5b0   : > { %v1225_v58 = vsub.f32 %v1206_v63, %v1221_v47 }
 0x5b2   : > { %v1232_v49 = vmul.f32 1.442695, %v1225_v58  ;;  %v5889_v25 = vpop.eup %4273 }
 0x5b3   : > { %v1240_v39 = vsel %vm1209_vm4, %v5889_v25, 0.0 }
 0x5b4   : > { %4275 = vpow2.f32 %v1232_v49 }
 0x5b5   : > { %v5863_v13 = vpop.f32.mrf.mxu2 }
 0x5b6   : > { %v2204_v51 = vsel %vm1209_vm4, %v5863_v13, -inf }
 0x5b7   : > { %2205 = vmax.xlane.f32.xlu1 %v2204_v51 }
 0x5ba   : > { %v5897_v57 = vpop.eup %4275 }
 0x5bb   : > { %v1243_v8 = vsel %vm1209_vm4, %v5897_v57, 0.0 }
 0x5cf   : > { %v1858_v54 = vpop.f32.mrf.mxu0 }
 0x5d0   : > { %v1868_v48 = vsel %vm1209_vm4, %v1858_v54, -inf }
 0x5d1   : > { %1869 = vmax.xlane.f32.xlu0 %v1868_v48 }
 0x5d7   : > { %v1860_v37 = vpop.f32.mrf.mxu0 }
 0x5d8   : > { %v1871_v50 = vsel %vm1209_vm4, %v1860_v37, -inf }
 0x5d9   : > { %1872 = vmax.xlane.f32.xlu2 %v1871_v50  ;;  %1538 = vmax.xlane.f32.xlu0 %v1537_v1 }
 0x5df   : > { %v5871_v26 = vpop.f32.mrf.mxu0 }
 0x5e0   : > { %v1874_v5 = vsel %vm1209_vm4, %v5871_v26, -inf }
 0x5e1   : > { %1875 = vmax.xlane.f32.xlu0 %v1874_v5 }
 0x5e7   : > { %v5875_v59 = vpop.f32.mrf.mxu0 }
 0x5e8   : > { %v1877_v27 = vsel %vm1209_vm4, %v5875_v59, -inf }
 0x5e9   : > { %1878 = vmax.xlane.f32.xlu2 %v1877_v27  ;;  %1541 = vmax.xlane.f32.xlu0 %v1540_v19 }
 0x5f1   : > { %1544 = vmax.xlane.f32.xlu2 %v1543_v55 }
 0x5f6   : > { %v5883_v52 = vpop.f32.mrf.mxu2 }
 0x5f7   : > { %v2207_v53 = vsel %vm1209_vm4, %v5883_v52, -inf }
 0x5f8   : > { %2208 = vmax.xlane.f32.xlu1 %v2207_v53 }
 0x5f9   : > { %2202 = vmax.xlane.f32.xlu2 %v2201_v28 }
 0x5fc   : > { %v1239_v61 = vpop.xlane.xlu0 %1238 }
 0x5fd   : > { %4277 = vrcp.f32 %v1239_v61 }
 0x5fe   : > { %v5891_v31 = vpop.f32.mrf.mxu2 }
 0x5ff   : > { %v2210_v34 = vsel %vm1209_vm4, %v5891_v31, -inf }
 0x600   : > { %1241 = vadd.xlane.f32.xlu1 %v1240_v39  ;;  %2211 = vmax.xlane.f32.xlu0 %v2210_v34 }
 0x602   : > { %v1236_v14 = vpop.xlane.xlu1 %1235 }
 0x603   : > { %4279 = vrcp.f32 %v1236_v14  ;;  %v4278_v11 = vpop.eup %4277 }
 0x604   : > { %v1251_v3 = vmul.f32 %v4278_v11, %v5846_v9 }
 0x608   : > { %1244 = vadd.xlane.f32.xlu0 %v1243_v8 }
 0x609   : > { %v4280_v62 = vpop.eup %4279 }
 0x60a   : > { %v1250_v44 = vmul.f32 %v4280_v62, %v4272_v6  ;;  %v1536_v33 = vpop.xlane.xlu1 %1535 }
 0x60b   : > { %v1546_v12 = vsub.f32 %v5850_v41, %v1536_v33 }
 0x60c   : > { %v1254_v36 = vpack.c.bf16 %v1251_v3, %v1250_v44 }
 0x60d   : > { %v1550_v15 = vmul.f32 1.442695, %v1546_v12 }
 0x60e   : > { %3578 = vmatmul.msk.bf16.vlgmr.msrb.gmra.mxu1 %vm1209_vm4, %v1254_v36 }
 0x60f   : > { %4281 = vpow2.f32 %v1550_v15 }
 0x615   : > { %v5904_v45 = vpop.eup %4281 }
 0x616   : > { %v1558_v22 = vsel %vm1209_vm4, %v5904_v45, 0.0 }
 0x617   : > { %1559 = vadd.xlane.f32.xlu2 %v1558_v22 }
 0x62a   : > { %v2206_v5 = vpop.xlane.xlu1 %2205 }
 0x62f   : > { %1581 = vrot.lane.b32.xlu2 %v5340_v20, %s4871_s26 }
 0x644   : > { %v1870_v18 = vpop.xlane.xlu0 %1869 }
 0x645   : > { %v1880_v63 = vsub.f32 %v1858_v54, %v1870_v18 }
 0x647   : > { %v1884_v42 = vmul.f32 1.442695, %v1880_v63 }
 0x649   : > { %4283 = vpow2.f32 %v1884_v42 }
 0x64c   : > { %v1873_v29 = vpop.xlane.xlu2 %1872  ;;  %v1539_v40 = vpop.xlane.xlu0 %1538 }
 0x64d   : > { %v1881_v43 = vsub.f32 %v1860_v37, %v1873_v29  ;;  %v1547_v10 = vsub.f32 %v5853_v60, %v1539_v40 }
 0x64f   : > { %v1886_v17 = vmul.f32 1.442695, %v1881_v43  ;;  %v1552_v24 = vmul.f32 1.442695, %v1547_v10  ;;  %v5911_v56 = vpop.eup %4283 }
 0x650   : > { %v1892_v41 = vsel %vm1209_vm4, %v5911_v56, 0.0 }
 0x651   : > { %4285 = vpow2.f32 %v1886_v17 }
 0x652   : > { %4287 = vpow2.f32 %v1552_v24 }
 0x654   : > { %v1876_v35 = vpop.xlane.xlu0 %1875 }
 0x655   : > { %v1882_v30 = vsub.f32 %v5871_v26, %v1876_v35 }
 0x657   : > { %v5914_v9 = vpop.eup %4285  ;;  %v1888_v4 = vmul.f32 1.442695, %v1882_v30 }
 0x658   : > { %1893 = vadd.xlane.f32.xlu2 %v1892_v41  ;;  %v1895_v6 = vsel %vm1209_vm4, %v5914_v9, 0.0  ;;  %v5920_v38 = vpop.eup %4287 }
 0x659   : > { %4289 = vpow2.f32 %v1888_v4  ;;  %1896 = vadd.xlane.f32.xlu1 %v1895_v6  ;;  %v1561_v1 = vsel %vm1209_vm4, %v5920_v38, 0.0 }
 0x65c   : > { %v1879_v7 = vpop.xlane.xlu2 %1878  ;;  %v1542_v60 = vpop.xlane.xlu0 %1541 }
 0x65d   : > { %v1883_v51 = vsub.f32 %v5875_v59, %v1879_v7  ;;  %v1548_v54 = vsub.f32 %v5857_v16, %v1542_v60  ;;  %v2214_v16 = vsub.f32 %v5863_v13, %v2206_v5 }
 0x65f   : > { %v5924_v48 = vpop.eup %4289  ;;  %v1890_v37 = vmul.f32 1.442695, %v1883_v51  ;;  %v1554_v50 = vmul.f32 1.442695, %v1548_v54  ;;  %v2219_v47 = vmul.f32 1.442695, %v2214_v16 }
 0x660   : > { %v1898_v26 = vsel %vm1209_vm4, %v5924_v48, 0.0 }
 0x661   : > { %4291 = vpow2.f32 %v1890_v37  ;;  %1562 = vadd.xlane.f32.xlu1 %v1561_v1  ;;  %1899 = vadd.xlane.f32.xlu2 %v1898_v26 }
 0x662   : > { %4293 = vpow2.f32 %v1554_v50 }
 0x664   : > { %v1545_v27 = vpop.xlane.xlu2 %1544 }
 0x665   : > { %v1549_v59 = vsub.f32 %v5859_v2, %v1545_v27 }
 0x667   : > { %v5931_v19 = vpop.eup %4291  ;;  %v1556_v0 = vmul.f32 1.442695, %v1549_v59 }
 0x668   : > { %v5934_v32 = vpop.eup %4293  ;;  %v1901_v55 = vsel %vm1209_vm4, %v5931_v19, 0.0 }
 0x669   : > { %4295 = vpow2.f32 %v1556_v0  ;;  %1902 = vadd.xlane.f32.xlu2 %v1901_v55  ;;  %v1564_v21 = vsel %vm1209_vm4, %v5934_v32, 0.0 }
 0x66a   : > { %1565 = vadd.xlane.f32.xlu1 %v1564_v21  ;;  %4297 = vpow2.f32 %v2219_v47 }
 0x66b   : > { %v2209_v53 = vpop.xlane.xlu1 %2208 }
 0x66c   : > { %v2203_v58 = vpop.xlane.xlu2 %2202 }
 0x66d   : > { %v2213_v2 = vsub.f32 %v5861_v46, %v2203_v58 }
 0x66f   : > { %v4296_v28 = vpop.eup %4295  ;;  %v2217_v13 = vmul.f32 1.442695, %v2213_v2 }
 0x670   : > { %v1567_v49 = vsel %vm1209_vm4, %v4296_v28, 0.0  ;;  %v5942_v39 = vpop.eup %4297 }
 0x671   : > { %4299 = vpow2.f32 %v2217_v13  ;;  %1568 = vadd.xlane.f32.xlu0 %v1567_v49  ;;  %v2228_v11 = vsel %vm1209_vm4, %v5942_v39, 0.0 }
 0x673   : > { %v2212_v61 = vpop.xlane.xlu0 %2211  ;;  %v1242_v14 = vpop.xlane.xlu1 %1241 }
 0x674   : > { %4301 = vrcp.f32 %v1242_v14  ;;  %v2216_v63 = vsub.f32 %v5891_v31, %v2212_v61 }
 0x676   : > { %v2223_v42 = vmul.f32 1.442695, %v2216_v63 }
 0x677   : > { %v5944_v34 = vpop.eup %4299 }
 0x678   : > { %v2225_v8 = vsel %vm1209_vm4, %v5944_v34, 0.0 }
 0x679   : > { %2229 = vadd.xlane.f32.xlu0 %v2228_v11  ;;  %2226 = vadd.xlane.f32.xlu1 %v2225_v8 }
 0x67a   : > { %v4302_v62 = vpop.eup %4301 }
 0x67b   : > { %v1245_v46 = vpop.xlane.xlu0 %1244  ;;  %v1252_v44 = vmul.f32 %v4302_v62, %v5889_v25  ;;  %v2215_v25 = vsub.f32 %v5883_v52, %v2209_v53 }
 0x67c   : > { %4303 = vrcp.f32 %v1245_v46 }
 0x682   : > { %v4304_v3 = vpop.eup %4303 }
 0x683   : > { %v1253_v33 = vmul.f32 %v4304_v3, %v5897_v57  ;;  %v2221_v57 = vmul.f32 1.442695, %v2215_v25 }
 0x685   : > { %v1255_v12 = vpack.c.bf16 %v1253_v33, %v1252_v44  ;;  %4305 = vpow2.f32 %v2221_v57  ;;  %v3910_v57 = vld [vmem:[#allocation15 + $0x38] sm:$0xff] }
 0x686   : > { %4307 = vpow2.f32 %v2223_v42  ;;  %2370 = vmatpush.bf16.msra.mxu0 %v3910_v57  ;;  %v3909_v42 = vld [vmem:[#allocation15 + $0x30] sm:$0xff] }
 0x687   : > { %3579 = vmatmul.msk.bf16.gmra.mxu1 %vm1209_vm4, %v1255_v12 }
 0x68a   : > { %v1560_v36 = vpop.xlane.xlu2 %1559  ;;  %2371 = vmatpush.bf16.msra.mxu0 %v3909_v42  ;;  %v3746_v42 = vld [vmem:[#allocation18 + $0xe8] sm:$0xf] }
 0x68b   : > { %v1272_v15 = vpop.f32.mrf.mxu1  ;;  %v5961_v29 = vpop.eup %4305  ;;  %4309 = vrcp.f32 %v1560_v36 }
 0x68c   : > { %1282 = vst.msk [vmem:[#allocation2] sm:$0xff] %vm1022_vm6, %v1272_v15  ;;  %v2231_v40 = vsel %vm1209_vm4, %v5961_v29, 0.0  ;;  %v5965_v43 = vpop.eup %4307 }
 0x68d   : > { %2247 = vrot.lane.b32.xlu0 %v5340_v20, %s4870_s27 }
 0x691   : > { %v4310_v31 = vpop.eup %4309 }
 0x692   : > { %v1582_v22 = vpop.permute.xlu2 %1581  ;;  %1914 = vrot.lane.b32.xlu1 %v5340_v20, %s4874_s11  ;;  %v2234_v20 = vsel %vm1209_vm4, %v5965_v43, 0.0  ;;  %v1574_v24 = vmul.f32 %v4310_v31, %v5904_v45  ;;  %v3903_v31 = vld [vmem:[#allocation15] sm:$0xff] }
 0x693   : > { %v1274_v18 = vpop.f32.mrf.mxu1  ;;  %1597 = vmatpush.bf16.msrb.mxu3 %v1582_v22 }
 0x694   : > { %1283 = vst.msk [vmem:[#allocation2 + $0x8] sm:$0xff] %vm1022_vm6, %v1274_v18 }
 0x6b7   : > { %2232 = vadd.xlane.f32.xlu0 %v2231_v40  ;;  %v3907_v40 = vld [vmem:[#allocation15 + $0x20] sm:$0xff] }
 0x6bc   : > { %2235 = vadd.xlane.f32.xlu1 %v2234_v20  ;;  %v3905_v20 = vld [vmem:[#allocation15 + $0x10] sm:$0xff] }
 0x6cb   : > { %v1894_v45 = vpop.xlane.xlu2 %1893 }
 0x6cc   : > { %v1897_v17 = vpop.xlane.xlu1 %1896 }
 0x6d4   : > { %v1563_v52 = vpop.xlane.xlu1 %1562  ;;  %v1900_v26 = vpop.xlane.xlu2 %1899 }
 0x6d5   : > { %4311 = vrcp.f32 %v1563_v52 }
 0x6db   : > { %v4312_v10 = vpop.eup %4311 }
 0x6dc   : > { %v1575_v35 = vmul.f32 %v4312_v10, %v5920_v38  ;;  %v1903_v2 = vpop.xlane.xlu2 %1902 }
 0x6dd   : > { %v1566_v4 = vpop.xlane.xlu1 %1565 }
 0x6de   : > { %v1578_v30 = vpack.c.bf16 %v1575_v35, %v1574_v24  ;;  %4313 = vrcp.f32 %v1566_v4 }
 0x6e0   : > { %3582 = vmatmul.msk.bf16.vlgmr.msrb.gmra.mxu3 %vm1209_vm4, %v1578_v30 }
 0x6e4   : > { %v1569_v41 = vpop.xlane.xlu0 %1568  ;;  %v4314_v6 = vpop.eup %4313 }
 0x6e5   : > { %4315 = vrcp.f32 %v1569_v41  ;;  %v1576_v60 = vmul.f32 %v4314_v6, %v5934_v32 }
 0x6eb   : > { %v4316_v7 = vpop.eup %4315 }
 0x6ec   : > { %v1577_v51 = vmul.f32 %v4316_v7, %v4296_v28  ;;  %v2227_v37 = vpop.xlane.xlu1 %2226  ;;  %v2230_v50 = vpop.xlane.xlu0 %2229 }
 0x6ed   : > { %4317 = vrcp.f32 %v2227_v37 }
 0x6ee   : > { %v1579_v54 = vpack.c.bf16 %v1577_v51, %v1576_v60  ;;  %4319 = vrcp.f32 %v2230_v50 }
 0x6ef   : > { %4321 = vrcp.f32 %v1894_v45 }
 0x6f0   : > { %3583 = vmatmul.msk.bf16.gmra.mxu3 %vm1209_vm4, %v1579_v54  ;;  %4323 = vrcp.f32 %v1897_v17  ;;  %v3904_v17 = vld [vmem:[#allocation15 + $0x8] sm:$0xff] }
 0x6f1   : > { %4325 = vrcp.f32 %v1903_v2  ;;  %v4375_v2 = vld [vmem:[%s5176_s29 + $0x10] sm:$0xff] }
 0x6f2   : > { %4327 = vrcp.f32 %v1900_v26 }
 0x6f3   : > { %v4318_v38 = vpop.eup %4317 }
 0x6f4   : > { %v4320_v1 = vpop.eup %4319  ;;  %v2241_v5 = vmul.f32 %v4318_v38, %v5944_v34 }
 0x6f5   : > { %v2242_v27 = vmul.f32 %v4320_v1, %v5942_v39  ;;  %v4322_v59 = vpop.eup %4321 }
 0x6f6   : > { %v4324_v16 = vpop.eup %4323  ;;  %v1908_v55 = vmul.f32 %v4322_v59, %v5911_v56 }
 0x6f7   : > { %v2245_v32 = vpack.c.bf16 %v2242_v27, %v2241_v5  ;;  %v1909_v21 = vmul.f32 %v4324_v16, %v5914_v9  ;;  %v4326_v13 = vpop.eup %4325  ;;  %v4199_v5 = vld [vmem:[#allocation17] ss:$0 sm:$0xff] }
 0x6f8   : > { %v4328_v56 = vpop.eup %4327  ;;  %v1911_v9 = vmul.f32 %v4326_v13, %v5931_v19  ;;  %v4373_v16 = vld [vmem:[%s5176_s29] sm:$0xff] }
 0x6f9   : > { %v1912_v53 = vpack.c.bf16 %v1909_v21, %v1908_v55  ;;  %v1910_v49 = vmul.f32 %v4328_v56, %v5924_v48  ;;  %v4374_v21 = vld [vmem:[%s5176_s29 + $0x8] sm:$0xff] }
 0x6fb   : > { %v1913_v61 = vpack.c.bf16 %v1911_v9, %v1910_v49  ;;  %v4376_v9 = vld [vmem:[%s5176_s29 + $0x18] sm:$0xff]  ;;  %s6316_s29 = sld [smem:[#allocation49_spill]] }
 0x6ff   : > { %v2248_v0 = vpop.permute.xlu0 %2247 }
 0x700   : > { %2263 = vmatpush.bf16.msra.mxu3 %v2248_v0 }
 0x703   : > { %3590 = vmatmul.msk.bf16.vlgmr.msra.gmra.mxu3 %vm1209_vm4, %v2245_v32 }
 0x704   : > { %v1915_v47 = vpop.permute.xlu1 %1914  ;;  %v1277_v58 = vpop.f32.mrf.mxu1 }
 0x705   : > { %1284 = vst.msk [vmem:[#allocation2 + $0x10] sm:$0xff] %vm1022_vm6, %v1277_v58  ;;  %1930 = vmatpush.bf16.msra.mxu1 %v1915_v47 }
 0x708   : > { %3586 = vmatmul.msk.bf16.vlgmr.msra.gmra.mxu1 %vm1209_vm4, %v1912_v53 }
 0x70c   : > { %v1279_v28 = vpop.f32.mrf.mxu1 }
 0x70d   : > { %1285 = vst.msk [vmem:[#allocation2 + $0x18] sm:$0xff] %vm1022_vm6, %v1279_v28  ;;  %vm1625_vm6 = vcmask 523520  }
 0x718   : > { %3587 = vmatmul.msk.bf16.gmra.mxu1 %vm1209_vm4, %v1913_v61 }
 0x72a   : > { %v2233_v39 = vpop.xlane.xlu0 %2232 }
 0x72b   : > { %4329 = vrcp.f32 %v2233_v39 }
 0x72f   : > { %v2236_v34 = vpop.xlane.xlu1 %2235 }
 0x730   : > { %4331 = vrcp.f32 %v2236_v34 }
 0x731   : > { %v4330_v14 = vpop.eup %4329 }
 0x732   : > { %v2243_v8 = vmul.f32 %v4330_v14, %v5961_v29  ;;  %v3908_v29 = vld [vmem:[#allocation15 + $0x28] sm:$0xff] }
 0x733   : > { %2372 = vmatpush.bf16.msra.mxu0 %v3908_v29  ;;  %v3942_v29 = vld [vmem:[#allocation18 + $0xf4] sm:$0xf0] }
 0x736   : > { %v4332_v11 = vpop.eup %4331 }
 0x737   : > { %v2244_v46 = vmul.f32 %v4332_v11, %v5965_v43  ;;  %2373 = vmatpush.bf16.msra.mxu0 %v3907_v40  ;;  %v3906_v43 = vld [vmem:[#allocation15 + $0x18] sm:$0xff] }
 0x739   : > { %v2246_v62 = vpack.c.bf16 %v2244_v46, %v2243_v8 }
 0x73b   : > { %3591 = vmatmul.msk.bf16.gmra.mxu3 %vm1209_vm4, %v2246_v62  ;;  %2374 = vmatpush.bf16.msra.mxu0 %v3906_v43  ;;  %v3747_v43 = vor.u32 %v3942_v29, %v3746_v42  ;;  %v3658_v42 = vld [vmem:[#allocation18 + $0x40] sm:$0xf]  ;;  %v3921_v29 = vld [vmem:[#allocation18 + $0x4c] sm:$0xf0] }
 0x73d   : > { %2727 = vmatpush.bf16.msrb.mxu3 %v3747_v43  ;;  %v3659_v43 = vor.u32 %v3921_v29, %v3658_v42  ;;  %v4200_v42 = vld [vmem:[#allocation11] ss:$0 sm:$0xff] }
 0x73f   : > { %2375 = vmatpush.bf16.msra.mxu0 %v3905_v20  ;;  %v3940_v20 = vld [vmem:[#allocation18 + $0xec] sm:$0xf] }
 0x743   : > { %2376 = vmatpush.bf16.msra.mxu0 %v3904_v17  ;;  %v3748_v17 = vld [vmem:[#allocation18 + $0xf8] sm:$0xf0] }
 0x747   : > { %2377 = vmatpush.bf16.msra.mxu0 %v3903_v31  ;;  %v3722_v31 = vld [vmem:[#allocation18 + $0xc0] sm:$0xf] }
 0x763   : > { %v1599_v3 = vpop.f32.mrf.mxu3 }
 0x76b   : > { %v1601_v19 = vpop.f32.mrf.mxu3 }
 0x76c   : > { %1615 = vrot.lane.b32.xlu0 %v1601_v19, %s4870_s27 }
 0x773   : > { %v1604_v48 = vpop.f32.mrf.mxu3 }
 0x77b   : > { %v1606_v44 = vpop.f32.mrf.mxu3 }
 0x785   : > { %v1932_v33 = vpop.f32.mrf.mxu1 }
 0x786   : > { %1946 = vrot.lane.b32.xlu1 %v1932_v33, %s4874_s11  ;;  %v2265_v12 = vpop.f32.mrf.mxu3 }
 0x787   : > { %2279 = vrot.lane.b32.xlu0 %v2265_v12, %s4871_s26 }
 0x78d   : > { %v1934_v36 = vpop.f32.mrf.mxu1 }
 0x78e   : > { %1948 = vrot.lane.b32.xlu2 %v1934_v36, %s4874_s11  ;;  %v2267_v22 = vpop.f32.mrf.mxu3 }
 0x78f   : > { %1617 = vrot.lane.b32.xlu0 %v1604_v48, %s4870_s27 }
 0x795   : > { %v1937_v15 = vpop.f32.mrf.mxu1 }
 0x796   : > { %1613 = vrot.lane.b32.xlu2 %v1599_v3, %s4870_s27  ;;  %1950 = vrot.lane.b32.xlu1 %v1937_v15, %s4874_s11 }
 0x79d   : > { %v1939_v18 = vpop.f32.mrf.mxu1 }
 0x79e   : > { %1952 = vrot.lane.b32.xlu0 %v1939_v18, %s4874_s11  ;;  %2281 = vrot.lane.b32.xlu2 %v2267_v22, %s4871_s26  ;;  %v3738_v22 = vld [vmem:[#allocation18 + $0xe0] sm:$0xf]  ;;  %v3941_v18 = vld [vmem:[#allocation18 + $0xec] sm:$0xf0]  ;;  %s3276_s11 = sshll.u32 %s6177_s4, 4  ;;  %s3277_s11 = int_to_ptr.vmem [resolvable:$true] %s3276_s11 }
 0x79f   : > { %v3739_v57 = vor.u32 %v3941_v18, %v3738_v22 }
 0x7a1   : > { %2689 = vmatpush.bf16.msrb.mxu1 %v3739_v57  ;;  %v3684_v57 = vld [vmem:[#allocation18 + $0x78] sm:$0xf0] }
 0x7a6   : > { %1619 = vrot.lane.b32.xlu2 %v1606_v44, %s4870_s27  ;;  %s6319_s27 = sld [smem:[#allocation50_spill]] }
 0x7ac   : > { %s4727_s0 = scalar_lea.hbm %s6319_s27, 128 }
 0x7be   : > { %v2270_v25 = vpop.f32.mrf.mxu3 }
 0x7bf   : > { %2283 = vrot.lane.b32.xlu2 %v2270_v25, %s4871_s26  ;;  %v3939_v25 = vld [vmem:[#allocation18 + $0xe4] sm:$0xf] }
 0x7c6   : > { %v2272_v63 = vpop.f32.mrf.mxu3 }
 0x7c7   : > { %2285 = vrot.lane.b32.xlu1 %v2272_v63, %s4871_s26  ;;  %v3740_v63 = vld [vmem:[#allocation18 + $0xf0] sm:$0xf0]  ;;  %s3275_s26 = scalar_lea.hbm %s6319_s27, %s3883_s24 }
 0x7c8   : > { %v3743_v40 = vor.u32 %v3939_v25, %v3740_v63  ;;  %v3924_v25 = vld [vmem:[#allocation18 + $0x6c] sm:$0xf]  ;;  %s3278_s5 = sshll.u32 %s3275_s26, 4  ;;  %s3279_s5 = int_to_ptr.hbm [resolvable:$true] %s3278_s5 }
 0x7c9   : > { %v3687_v63 = vor.u32 %v3924_v25, %v3684_v57 }
 0x7ca   : > { %2708 = vmatpush.bf16.msrb.mxu2 %v3743_v40  ;;  %v3919_v40 = vld [vmem:[#allocation18 + $0x44] sm:$0xf] }
 0x7de   : > { %v1616_v52 = vpop.permute.xlu0 %1615 }
 0x7df   : > { %1627 = vst.msk [vmem:[#allocation2 + $0x8] sm:$0xff] %vm1625_vm6, %v1616_v52  ;;  %v3751_v52 = vor.u32 %v3940_v20, %v3748_v17  ;;  %v3660_v20 = vld [vmem:[#allocation18 + $0x50] sm:$0xf0]  ;;  %v3666_v17 = vld [vmem:[#allocation18 + $0x48] sm:$0xf] }
 0x7e1   : > { %2746 = vmatpush.bf16.msrb.mxu0 %v3751_v52  ;;  %v3922_v52 = vld [vmem:[#allocation18 + $0x54] sm:$0xf0] }
 0x7e8   : > { %v1949_v10 = vpop.permute.xlu2 %1948 }
 0x7e9   : > { %1960 = vst.msk [vmem:[#allocation2 + $0x8] sm:$0xff] %vm1958_vm5, %v1949_v10  ;;  %v3937_v10 = vld [vmem:[#allocation18 + $0xcc] sm:$0xf0] }
 0x7f0   : > { %v1614_v24 = vpop.permute.xlu2 %1613 }
 0x7f1   : > { %1626 = vst.msk [vmem:[#allocation2] sm:$0xff] %vm1625_vm6, %v1614_v24  ;;  %v3935_v24 = vld [vmem:[#allocation18 + $0xc4] sm:$0xf] }
 0x7f8   : > { %v1947_v35 = vpop.permute.xlu1 %1946  ;;  %v2282_v30 = vpop.permute.xlu2 %2281 }
 0x7f9   : > { %1959 = vst.msk [vmem:[#allocation2] sm:$0xff] %vm1958_vm5, %v1947_v35  ;;  %v2280_v4 = vpop.permute.xlu0 %2279  ;;  %v3723_v35 = vor.u32 %v3937_v10, %v3722_v31  ;;  %v3663_v31 = vor.u32 %v3919_v40, %v3660_v20  ;;  %v3667_v10 = vor.u32 %v3922_v52, %v3666_v17  ;;  %v4201_v17 = vld [vmem:[#allocation11 + $0x1] ss:$0 sm:$0xff] }
 0x7fa   : > { %2293 = vst.msk [vmem:[#allocation2 + $0x8] sm:$0xff] %vm2291_vm0, %v2282_v30  ;;  %v3724_v30 = vld [vmem:[#allocation18 + $0xd0] sm:$0xf0] }
 0x7fb   : > { %2292 = vst.msk [vmem:[#allocation2] sm:$0xff] %vm2291_vm0, %v2280_v4  ;;  %v3730_v4 = vld [vmem:[#allocation18 + $0xc8] sm:$0xf]  ;;  %2690 = vmatpush.bf16.msrb.mxu1 %v3723_v35  ;;  %v3668_v35 = vld [vmem:[#allocation18 + $0x58] sm:$0xf0] }
 0x800   : > { %v1620_v41 = vpop.permute.xlu2 %1619 }
 0x801   : > { %1629 = vst.msk [vmem:[#allocation2 + $0x18] sm:$0xff] %vm1625_vm6, %v1620_v41  ;;  %v1618_v6 = vpop.permute.xlu0 %1617  ;;  %v2297_v7 = vld [vmem:[#allocation2 + $0x8] sm:$0xff]  ;;  %v3938_v41 = vld [vmem:[#allocation18 + $0xd4] sm:$0xf0] }
 0x802   : > { %1628 = vst.msk [vmem:[#allocation2 + $0x10] sm:$0xff] %vm1625_vm6, %v1618_v6  ;;  %v2296_v60 = vld [vmem:[#allocation2] sm:$0xff]  ;;  %v3727_v6 = vor.u32 %v3935_v24, %v3724_v30  ;;  %v3920_v24 = vld [vmem:[#allocation18 + $0x4c] sm:$0xf] }
 0x803   : > { %v2300_v51 = vpack.c.bf16 %v2297_v7, %v2296_v60  ;;  %v3731_v7 = vor.u32 %v3938_v41, %v3730_v4  ;;  %v3936_v60 = vld [vmem:[#allocation18 + $0xcc] sm:$0xf]  ;;  %v3671_v30 = vor.u32 %v3920_v24, %v3668_v35  ;;  %v3642_v4 = vld [vmem:[#allocation18 + $0x20] sm:$0xf]  ;;  %v3917_v41 = vld [vmem:[#allocation18 + $0x2c] sm:$0xf0] }
 0x804   : > { %2709 = vmatpush.bf16.msrb.mxu2 %v3727_v6  ;;  %v3915_v6 = vld [vmem:[#allocation18 + $0x24] sm:$0xf] }
 0x805   : > { %2378 = vmatmul.bf16.vlgmr.msra.gmra.mxu0 %v2300_v51  ;;  %v3732_v51 = vld [vmem:[#allocation18 + $0xd8] sm:$0xf0]  ;;  %2728 = vmatpush.bf16.msrb.mxu3 %v3731_v7  ;;  %v3643_v7 = vor.u32 %v3917_v41, %v3642_v4 }
 0x808   : > { %v1951_v54 = vpop.permute.xlu1 %1950 }
 0x809   : > { %1961 = vst.msk [vmem:[#allocation2 + $0x10] sm:$0xff] %vm1958_vm5, %v1951_v54  ;;  %v3735_v54 = vor.u32 %v3936_v60, %v3732_v51  ;;  %v3644_v60 = vld [vmem:[#allocation18 + $0x30] sm:$0xf0]  ;;  %v3650_v51 = vld [vmem:[#allocation18 + $0x28] sm:$0xf] }
 0x80b   : > { %2747 = vmatpush.bf16.msrb.mxu0 %v3735_v54  ;;  %v3918_v54 = vld [vmem:[#allocation18 + $0x34] sm:$0xf0] }
 0x810   : > { %v1953_v37 = vpop.permute.xlu0 %1952 }
 0x811   : > { %1962 = vst.msk [vmem:[#allocation2 + $0x18] sm:$0xff] %vm1958_vm5, %v1953_v37  ;;  %v3706_v37 = vld [vmem:[#allocation18 + $0xa0] sm:$0xf] }
 0x819   : > { %v2284_v50 = vpop.permute.xlu2 %2283 }
 0x81a   : > { %2294 = vst.msk [vmem:[#allocation2 + $0x10] sm:$0xff] %vm2291_vm0, %v2284_v50  ;;  %v3933_v50 = vld [vmem:[#allocation18 + $0xac] sm:$0xf0] }
 0x821   : > { %v2298_v38 = vld [vmem:[#allocation2 + $0x10] sm:$0xff] }
 0x839   : > { %v2286_v45 = vpop.permute.xlu1 %2285 }
 0x83a   : > { %2295 = vst.msk [vmem:[#allocation2 + $0x18] sm:$0xff] %vm2291_vm0, %v2286_v45  ;;  %v3931_v45 = vld [vmem:[#allocation18 + $0xa4] sm:$0xf] }
 0x841   : > { %v2299_v1 = vld [vmem:[#allocation2 + $0x18] sm:$0xff] }
 0x842   : > { %v2301_v26 = vpack.c.bf16 %v2299_v1, %v2298_v38  ;;  %v3707_v38 = vor.u32 %v3933_v50, %v3706_v37  ;;  %v3708_v1 = vld [vmem:[#allocation18 + $0xb0] sm:$0xf0]  ;;  %v3647_v50 = vor.u32 %v3915_v6, %v3644_v60 }
 0x844   : > { %2383 = vmatmul.bf16.gmra.mxu0 %v2301_v26  ;;  %v3714_v26 = vld [vmem:[#allocation18 + $0xa8] sm:$0xf]  ;;  %2691 = vmatpush.bf16.msrb.mxu1 %v3707_v38  ;;  %v3916_v38 = vld [vmem:[#allocation18 + $0x2c] sm:$0xf] }
 0x882   : > { %v2379_v27 = vpop.f32.mrf.mxu0 }
 0x883   : > { %v2380_v59 = vadd.f32 %v4199_v5, %v2379_v27  ;;  %v3711_v27 = vor.u32 %v3931_v45, %v3708_v1  ;;  %v3651_v45 = vor.u32 %v3918_v54, %v3650_v51  ;;  %v3652_v1 = vld [vmem:[#allocation18 + $0x38] sm:$0xf0] }
 0x885   : > { %v6013_v0 = vadd.f32 %v4373_v16, %v2380_v59  ;;  %v3932_v16 = vld [vmem:[#allocation18 + $0xac] sm:$0xf]  ;;  %2710 = vmatpush.bf16.msrb.mxu2 %v3711_v27  ;;  %v3655_v27 = vor.u32 %v3916_v38, %v3652_v1 }
 0x887   : > { %2395 = vadd.xlane.f32.xlu0 %v6013_v0 }
 0x88a   : > { %v2381_v32 = vpop.f32.mrf.mxu0 }
 0x88b   : > { %v2382_v55 = vadd.f32 %v4199_v5, %v2381_v32  ;;  %v3716_v32 = vld [vmem:[#allocation18 + $0xb8] sm:$0xf0] }
 0x88d   : > { %v6017_v47 = vadd.f32 %v4374_v21, %v2382_v55  ;;  %v3719_v55 = vor.u32 %v3932_v16, %v3716_v32  ;;  %v3690_v21 = vld [vmem:[#allocation18 + $0x80] sm:$0xf]  ;;  %v3911_v16 = vld [vmem:[#allocation18 + $0x4] sm:$0xf]  ;;  %v3628_v32 = vld [vmem:[#allocation18 + $0x10] sm:$0xf0] }
 0x88f   : > { %2397 = vadd.xlane.f32.xlu2 %v6017_v47  ;;  %2748 = vmatpush.bf16.msrb.mxu0 %v3719_v55 }
 0x8c1   : > { %v2384_v58 = vpop.f32.mrf.mxu0 }
 0x8c2   : > { %v2385_v53 = vadd.f32 %v4199_v5, %v2384_v58  ;;  %v3929_v58 = vld [vmem:[#allocation18 + $0x8c] sm:$0xf0] }
 0x8c4   : > { %v6021_v28 = vadd.f32 %v4375_v2, %v2385_v53  ;;  %v3927_v53 = vld [vmem:[#allocation18 + $0x84] sm:$0xf]  ;;  %v3691_v2 = vor.u32 %v3929_v58, %v3690_v21  ;;  %v3631_v21 = vor.u32 %v3911_v16, %v3628_v32  ;;  %v3634_v58 = vld [vmem:[#allocation18 + $0x8] sm:$0xf] }
 0x8c6   : > { %2399 = vadd.xlane.f32.xlu1 %v6021_v28  ;;  %2692 = vmatpush.bf16.msrb.mxu1 %v3691_v2  ;;  %v3912_v2 = vld [vmem:[#allocation18 + $0xc] sm:$0xf] }
 0x8c9   : > { %v2386_v13 = vpop.f32.mrf.mxu0 }
 0x8ca   : > { %v2387_v56 = vadd.f32 %v4199_v5, %v2386_v13  ;;  %v3934_v5 = vld [vmem:[#allocation18 + $0xb4] sm:$0xf0]  ;;  %v3692_v13 = vld [vmem:[#allocation18 + $0x90] sm:$0xf0] }
 0x8cb   : > { %v3715_v59 = vor.u32 %v3934_v5, %v3714_v26  ;;  %v3626_v26 = vld [vmem:[#allocation18] sm:$0xf] }
 0x8cc   : > { %v6025_v49 = vadd.f32 %v4376_v9, %v2387_v56  ;;  %v3698_v56 = vld [vmem:[#allocation18 + $0x88] sm:$0xf]  ;;  %v3930_v9 = vld [vmem:[#allocation18 + $0x94] sm:$0xf0] }
 0x8cd   : > { %2729 = vmatpush.bf16.msrb.mxu3 %v3715_v59  ;;  %v3913_v59 = vld [vmem:[#allocation18 + $0xc] sm:$0xf0] }
 0x8ce   : > { %2401 = vadd.xlane.f32.xlu0 %v6025_v49  ;;  %v3627_v55 = vor.u32 %v3913_v59, %v3626_v26 }
 0x8fa   : > { %v2396_v61 = vpop.xlane.xlu0 %2395 }
 0x8fb   : > { %v2403_v39 = vmul.f32 %v2396_v61, %v5235_v23  ;;  %v3695_v61 = vor.u32 %v3927_v53, %v3692_v13  ;;  %v3914_v53 = vld [vmem:[#allocation18 + $0x14] sm:$0xf0] }
 0x8fd   : > { %v6030_v34 = vsub.f32 %v6013_v0, %v2403_v39  ;;  %v3699_v39 = vor.u32 %v3930_v9, %v3698_v56  ;;  %2711 = vmatpush.bf16.msrb.mxu2 %v3695_v61  ;;  %v3635_v56 = vor.u32 %v3914_v53, %v3634_v58  ;;  %v3636_v9 = vld [vmem:[#allocation18 + $0x18] sm:$0xf0] }
 0x8fe   : > { %v3639_v61 = vor.u32 %v3912_v2, %v3636_v9  ;;  %v3950_v2 = vld [vmem:[#allocation20 + $0x38] sm:$0xff] }
 0x8ff   : > { %v2411_v14 = vmul.f32 %v6030_v34, %v6030_v34  ;;  %2730 = vmatpush.bf16.msrb.mxu3 %v3699_v39  ;;  %v3958_v9 = vld [vmem:[#allocation20 + $0x78] sm:$0xff] }
 0x901   : > { %2415 = vadd.xlane.f32.xlu2 %v2411_v14  ;;  %v3928_v14 = vld [vmem:[#allocation18 + $0x8c] sm:$0xf] }
 0x902   : > { %v2398_v11 = vpop.xlane.xlu2 %2397 }
 0x903   : > { %v2404_v8 = vmul.f32 %v2398_v11, %v5235_v23  ;;  %v3700_v11 = vld [vmem:[#allocation18 + $0x98] sm:$0xf0] }
 0x905   : > { %v6036_v46 = vsub.f32 %v6017_v47, %v2404_v8  ;;  %v3703_v8 = vor.u32 %v3928_v14, %v3700_v11 }
 0x907   : > { %v2412_v62 = vmul.f32 %v6036_v46, %v6036_v46  ;;  %2749 = vmatpush.bf16.msrb.mxu0 %v3703_v8 }
 0x909   : > { %2417 = vadd.xlane.f32.xlu1 %v2412_v62  ;;  %v3674_v62 = vld [vmem:[#allocation18 + $0x60] sm:$0xf] }
 0x90b   : > { %2750 = vmatpush.bf16.msrb.mxu0 %v3687_v63 }
 0x90f   : > { %2751 = vmatpush.bf16.msrb.mxu0 %v3671_v30 }
 0x913   : > { %2752 = vmatpush.bf16.msrb.mxu0 %v3655_v27 }
 0x917   : > { %2753 = vmatpush.bf16.msrb.mxu0 %v3639_v61  ;;  %v3966_v61 = vld [vmem:[#allocation20 + $0xb8] sm:$0xff] }
 0x939   : > { %v2400_v3 = vpop.xlane.xlu1 %2399 }
 0x93a   : > { %v2405_v19 = vmul.f32 %v2400_v3, %v5235_v23  ;;  %v3925_v3 = vld [vmem:[#allocation18 + $0x6c] sm:$0xf0] }
 0x93c   : > { %v6042_v48 = vsub.f32 %v6021_v28, %v2405_v19  ;;  %v3923_v19 = vld [vmem:[#allocation18 + $0x64] sm:$0xf] }
 0x93e   : > { %v2413_v44 = vmul.f32 %v6042_v48, %v6042_v48 }
 0x940   : > { %2419 = vadd.xlane.f32.xlu0 %v2413_v44  ;;  %v3675_v44 = vor.u32 %v3925_v3, %v3674_v62 }
 0x941   : > { %v2402_v33 = vpop.xlane.xlu0 %2401 }
 0x942   : > { %v2406_v12 = vmul.f32 %v2402_v33, %v5235_v23  ;;  %v3676_v33 = vld [vmem:[#allocation18 + $0x70] sm:$0xf0]  ;;  %2693 = vmatpush.bf16.msrb.mxu1 %v3675_v44 }
 0x943   : > { %v3679_v22 = vor.u32 %v3923_v19, %v3676_v33 }
 0x944   : > { %v6048_v36 = vsub.f32 %v6025_v49, %v2406_v12  ;;  %v3682_v12 = vld [vmem:[#allocation18 + $0x68] sm:$0xf] }
 0x945   : > { %2712 = vmatpush.bf16.msrb.mxu2 %v3679_v22 }
 0x946   : > { %v2414_v15 = vmul.f32 %v6048_v36, %v6048_v36  ;;  %2694 = vmatpush.bf16.msrb.mxu1 %v3659_v43 }
 0x948   : > { %2421 = vadd.xlane.f32.xlu2 %v2414_v15  ;;  %v3926_v15 = vld [vmem:[#allocation18 + $0x74] sm:$0xf0] }
 0x949   : > { %v3683_v18 = vor.u32 %v3926_v15, %v3682_v12  ;;  %2713 = vmatpush.bf16.msrb.mxu2 %v3663_v31 }
 0x94a   : > { %2695 = vmatpush.bf16.msrb.mxu1 %v3643_v7 }
 0x94b   : > { %2731 = vmatpush.bf16.msrb.mxu3 %v3683_v18 }
 0x94d   : > { %2714 = vmatpush.bf16.msrb.mxu2 %v3647_v50 }
 0x94e   : > { %2696 = vmatpush.bf16.msrb.mxu1 %v3627_v55 }
 0x94f   : > { %2732 = vmatpush.bf16.msrb.mxu3 %v3667_v10 }
 0x951   : > { %2715 = vmatpush.bf16.msrb.mxu2 %v3631_v21 }
 0x952   : > { %3177 = vmatpush.bf16.msra.mxu1 %v3950_v2 }
 0x953   : > { %2733 = vmatpush.bf16.msrb.mxu3 %v3651_v45 }
 0x955   : > { %3196 = vmatpush.bf16.msra.mxu2 %v3958_v9 }
 0x957   : > { %2734 = vmatpush.bf16.msrb.mxu3 %v3635_v56  ;;  %v6060_v56 = vld [vmem:[#allocation20 + $0xf0] sm:$0xff] }
 0x95b   : > { %3215 = vmatpush.bf16.msra.mxu3 %v3966_v61 }
 0x974   : > { %v2416_v37 = vpop.xlane.xlu2 %2415 }
 0x975   : > { %v2423_v5 = vmul.f32 %v2416_v37, %v5235_v23 }
 0x977   : > { %v2427_v13 = vadd.f32 1e-06, %v2423_v5 }
 0x979   : > { %4333 = vrsqrt.f32 %v2427_v13  ;;  %vm2437_vm8 = vweird.f32 %v2427_v13 }
 0x97c   : > { %v2418_v39 = vpop.xlane.xlu1 %2417 }
 0x97d   : > { %v2424_v14 = vmul.f32 %v2418_v39, %v5235_v23  ;;  %v6063_v39 = vld [vmem:[#allocation20 + $0xe8] sm:$0xff] }
 0x97f   : > { %v4334_v11 = vpop.eup %4333  ;;  %v2428_v8 = vadd.f32 1e-06, %v2424_v14  ;;  %v3957_v14 = vld [vmem:[#allocation20 + $0x70] sm:$0xff] }
 0x980   : > { %v2432_v62 = vmul.f32 %v4334_v11, %v2427_v13  ;;  %vm2438_vm7 = vweird.f32 %v4334_v11  ;;  %v3949_v13 = vld [vmem:[#allocation20 + $0x30] sm:$0xff]  ;;  %3197 = vmatpush.bf16.msra.mxu2 %v3957_v14 }
 0x981   : > { %4335 = vrsqrt.f32 %v2428_v8  ;;  %vm2439_vm9 = vmor %vm2437_vm8, %vm2438_vm7  ;;  %vm2447_vm11 = vweird.f32 %v2428_v8  ;;  %3178 = vmatpush.bf16.msra.mxu1 %v3949_v13 }
 0x982   : > { %v2433_v3 = vmul.f32 %v4334_v11, %v2432_v62  ;;  %v6066_v62 = vld [vmem:[#allocation20 + $0xe0] sm:$0xff] }
 0x984   : > { %v2434_v19 = vmul.f32 0.5, %v2433_v3  ;;  %v3956_v3 = vld [vmem:[#allocation20 + $0x68] sm:$0xff] }
 0x985   : > { %3198 = vmatpush.bf16.msra.mxu2 %v3956_v3 }
 0x986   : > { %v2435_v44 = vsub.f32 1.5, %v2434_v19  ;;  %v3964_v19 = vld [vmem:[#allocation20 + $0xa8] sm:$0xff] }
 0x987   : > { %v4336_v33 = vpop.eup %4335 }
 0x988   : > { %v2436_v12 = vmul.f32 %v4334_v11, %v2435_v44  ;;  %v2442_v15 = vmul.f32 %v4336_v33, %v2428_v8  ;;  %vm2448_vm10 = vweird.f32 %v4336_v33  ;;  %v3947_v8 = vld [vmem:[#allocation20 + $0x20] sm:$0xff]  ;;  %v3946_v44 = vld [vmem:[#allocation20 + $0x18] sm:$0xff] }
 0x989   : > { %vm2449_vm12 = vmor %vm2447_vm11, %vm2448_vm10 }
 0x98a   : > { %v2443_v22 = vmul.f32 %v4336_v33, %v2442_v15  ;;  %v2440_v18 = vsel %vm2439_vm9, %v4334_v11, %v2436_v12  ;;  %v3965_v11 = vld [vmem:[#allocation20 + $0xb0] sm:$0xff]  ;;  %v3955_v12 = vld [vmem:[#allocation20 + $0x60] sm:$0xff] }
 0x98b   : > { %v2471_v63 = vmul.f32 %v2440_v18, %v6030_v34  ;;  %3216 = vmatpush.bf16.msra.mxu3 %v3965_v11  ;;  %v3963_v15 = vld [vmem:[#allocation20 + $0xa0] sm:$0xff]  ;;  %3199 = vmatpush.bf16.msra.mxu2 %v3955_v12  ;;  %v6072_v18 = vld [vmem:[#allocation20 + $0xd0] sm:$0xff] }
 0x98c   : > { %v2444_v25 = vmul.f32 0.5, %v2443_v22  ;;  %v3945_v22 = vld [vmem:[#allocation20 + $0x10] sm:$0xff] }
 0x98d   : > { %v2476_v20 = vmul.f32 %v4200_v42, %v2471_v63  ;;  %v2519_v63 = vld [vmem:[%s6315_s10] sm:$0xf]  ;;  %s4721_s10 = sshra.s32 %s3279_s5, 4  ;;  %s4722_s10 = int_to_ptr.hbm [resolvable:$true] %s4721_s10 }
 0x98e   : > { %v2445_v57 = vsub.f32 1.5, %v2444_v25  ;;  %v3954_v25 = vld [vmem:[#allocation20 + $0x58] sm:$0xff]  ;;  %s4723_s1 = scalar_lea.hbm %s4722_s10, 32  ;;  %p4728_p0 = scmp.lt.s32.totalorder %s4722_s10, %s6319_s27 }
 0x98f   : > { %v2481_v31 = vadd.f32 %v4201_v17, %v2476_v20  ;;  %3217 = vmatpush.bf16.msra.mxu3 %v3964_v19  ;;  %3200 = vmatpush.bf16.msra.mxu2 %v3954_v25  ;;  %v3943_v20 = vld [vmem:[#allocation20] sm:$0xff]  ;;  %p4724_p1 = scmp.ne.s32.totalorder %s4722_s10, %s4723_s1  ;;  %p4729_p6 = scmp.lt.s32.totalorder %s4727_s0, %s4723_s1 }
 0x990   : > { %v2446_v29 = vmul.f32 %v4336_v33, %v2445_v57  ;;  %v3962_v57 = vld [vmem:[#allocation20 + $0x98] sm:$0xff] }
 0x991   : > { %p4725_p3 = pnand %p4724_p1, %p5112_p2  ;;  %p4730_p10 = por %p4729_p6, %p4728_p0 }
 0x992   : > { %v2450_v40 = vsel %vm2449_vm12, %v4336_v33, %v2446_v29  ;;  %v6069_v33 = vld [vmem:[#allocation20 + $0xd8] sm:$0xff]  ;;  %v6078_v29 = vld [vmem:[#allocation20 + $0xc8] sm:$0xff] }
 0x993   : > { %v2472_v43 = vmul.f32 %v2450_v40, %v6036_v46  ;;  %3218 = vmatpush.bf16.msra.mxu3 %v3963_v15  ;;  %v3953_v40 = vld [vmem:[#allocation20 + $0x50] sm:$0xff]  ;;  %p4726_p8 = pneg %p4725_p3 }
 0x994   : > { %3201 = vmatpush.bf16.msra.mxu2 %v3953_v40 }
 0x995   : > { %v2477_v52 = vmul.f32 %v4200_v42, %v2472_v43  ;;  %v3961_v43 = vld [vmem:[#allocation20 + $0x90] sm:$0xff]  ;;  %p4731_p7 = pnand %p4730_p10, %p4726_p8 }
 0x997   : > { %v2482_v10 = vadd.f32 %v4201_v17, %v2477_v52  ;;  %3219 = vmatpush.bf16.msra.mxu3 %v3962_v57  ;;  %v6083_v52 = vperm.slane %v2519_v63, 0 }
 0x999   : > { %v2485_v24 = vpack.c.bf16 %v2482_v10, %v2481_v31  ;;  %v6085_v31 = vperm.slane %v2519_v63, 3  ;;  %v3952_v10 = vld [vmem:[#allocation20 + $0x48] sm:$0xff] }
 0x99a   : > { %3202 = vmatpush.bf16.msra.mxu2 %v3952_v10 }
 0x99b   : > { %2697 = vmatmul.bf16.vlgmr.msrb.gmra.mxu1 %v2485_v24  ;;  %2716 = vmatmul.bf16.vlgmr.msrb.gmra.mxu2 %v2485_v24 }
 0x99c   : > { %2735 = vmatmul.bf16.vlgmr.msrb.gmra.mxu3 %v2485_v24  ;;  %2754 = vmatmul.bf16.vlgmr.msrb.gmra.mxu0 %v2485_v24  ;;  %v3960_v24 = vld [vmem:[#allocation20 + $0x88] sm:$0xff] }
 0x99d   : > { %3220 = vmatpush.bf16.msra.mxu3 %v3961_v43 }
 0x9a1   : > { %3221 = vmatpush.bf16.msra.mxu3 %v3960_v24 }
 0x9b3   : > { %v2420_v35 = vpop.xlane.xlu0 %2419 }
 0x9b4   : > { %v2425_v34 = vmul.f32 %v2420_v35, %v5235_v23 }
 0x9b6   : > { %v2429_v30 = vadd.f32 1e-06, %v2425_v34 }
 0x9b8   : > { %4337 = vrsqrt.f32 %v2429_v30  ;;  %vm2457_vm14 = vweird.f32 %v2429_v30 }
 0x9bb   : > { %v2422_v4 = vpop.xlane.xlu2 %2421 }
 0x9bc   : > { %v2426_v41 = vmul.f32 %v2422_v4, %v5235_v23 }
 0x9be   : > { %v4338_v6 = vpop.eup %4337  ;;  %v2430_v46 = vadd.f32 1e-06, %v2426_v41 }
 0x9bf   : > { %v2452_v7 = vmul.f32 %v4338_v6, %v2429_v30  ;;  %vm2458_vm13 = vweird.f32 %v4338_v6 }
 0x9c0   : > { %4339 = vrsqrt.f32 %v2430_v46  ;;  %vm2459_vm15 = vmor %vm2457_vm14, %vm2458_vm13  ;;  %vm2467_vm2 = vweird.f32 %v2430_v46 }
 0x9c1   : > { %v2453_v60 = vmul.f32 %v4338_v6, %v2452_v7  ;;  %v3959_v7 = vld [vmem:[#allocation20 + $0x80] sm:$0xff] }
 0x9c2   : > { %3222 = vmatpush.bf16.msra.mxu3 %v3959_v7 }
 0x9c3   : > { %v2454_v51 = vmul.f32 0.5, %v2453_v60 }
 0x9c5   : > { %v2455_v54 = vsub.f32 1.5, %v2454_v51  ;;  %v6098_v51 = vperm.slane %v2519_v63, 2 }
 0x9c6   : > { %v4340_v37 = vpop.eup %4339 }
 0x9c7   : > { %v2456_v50 = vmul.f32 %v4338_v6, %v2455_v54  ;;  %v2462_v45 = vmul.f32 %v4340_v37, %v2430_v46  ;;  %vm2468_vm1 = vweird.f32 %v4340_v37  ;;  %v3951_v46 = vld [vmem:[#allocation20 + $0x40] sm:$0xff] }
 0x9c8   : > { %vm2469_vm3 = vmor %vm2467_vm2, %vm2468_vm1  ;;  %3203 = vmatpush.bf16.msra.mxu2 %v3951_v46 }
 0x9c9   : > { %v2460_v38 = vsel %vm2459_vm15, %v4338_v6, %v2456_v50  ;;  %v2463_v1 = vmul.f32 %v4340_v37, %v2462_v45  ;;  %v6095_v6 = vperm.slane %v2519_v63, 1 }
 0x9ca   : > { %v2473_v26 = vmul.f32 %v2460_v38, %v6042_v48  ;;  %v3974_v48 = vld [vmem:[#allocation20 + $0xf8] sm:$0xff] }
 0x9cb   : > { %v2464_v5 = vmul.f32 0.5, %v2463_v1  ;;  %3234 = vmatpush.bf16.msra.mxu0 %v3974_v48 }
 0x9cc   : > { %v2478_v27 = vmul.f32 %v4200_v42, %v2473_v26 }
 0x9cd   : > { %v2465_v23 = vsub.f32 1.5, %v2464_v5 }
 0x9ce   : > { %v2483_v59 = vadd.f32 %v4201_v17, %v2478_v27 }
 0x9cf   : > { %v2466_v16 = vmul.f32 %v4340_v37, %v2465_v23  ;;  %3235 = vmatpush.bf16.msra.mxu0 %v6060_v56 }
 0x9d1   : > { %v2470_v32 = vsel %vm2469_vm3, %v4340_v37, %v2466_v16 }
 0x9d2   : > { %v2474_v55 = vmul.f32 %v2470_v32, %v6048_v36  ;;  %v3948_v36 = vld [vmem:[#allocation20 + $0x28] sm:$0xff] }
 0x9d3   : > { %3179 = vmatpush.bf16.msra.mxu1 %v3948_v36  ;;  %3236 = vmatpush.bf16.msra.mxu0 %v6063_v39 }
 0x9d4   : > { %v2479_v21 = vmul.f32 %v4200_v42, %v2474_v55  ;;  %v3944_v42 = vld [vmem:[#allocation20 + $0x8] sm:$0xff] }
 0x9d6   : > { %v2484_v58 = vadd.f32 %v4201_v17, %v2479_v21  ;;  %v6081_v17 = vld [vmem:[#allocation20 + $0xc0] sm:$0xff] }
 0x9d7   : > { %3180 = vmatpush.bf16.msra.mxu1 %v3947_v8  ;;  %3237 = vmatpush.bf16.msra.mxu0 %v6066_v62 }
 0x9d8   : > { %v2486_v53 = vpack.c.bf16 %v2484_v58, %v2483_v59 }
 0x9da   : > { %2702 = vmatmul.bf16.gmra.mxu1 %v2486_v53  ;;  %2721 = vmatmul.bf16.gmra.mxu2 %v2486_v53 }
 0x9db   : > { %2740 = vmatmul.bf16.gmra.mxu3 %v2486_v53  ;;  %2759 = vmatmul.bf16.gmra.mxu0 %v2486_v53 }
 0x9dc   : > { %3181 = vmatpush.bf16.msra.mxu1 %v3946_v44  ;;  %3238 = vmatpush.bf16.msra.mxu0 %v6069_v33 }
 0x9e0   : > { %3182 = vmatpush.bf16.msra.mxu1 %v3945_v22  ;;  %3239 = vmatpush.bf16.msra.mxu0 %v6072_v18 }
 0x9e4   : > { %3183 = vmatpush.bf16.msra.mxu1 %v3944_v42  ;;  %3240 = vmatpush.bf16.msra.mxu0 %v6078_v29 }
 0x9e8   : > { %3184 = vmatpush.bf16.msra.mxu1 %v3943_v20  ;;  %3241 = vmatpush.bf16.msra.mxu0 %v6081_v17 }
 0x9ec   : > { %3975 = vmatpush.bf16.msrb.mxu1 %v3974_v48 }
 0x9f0   : > { %3976 = vmatpush.bf16.msrb.mxu1 %v6060_v56 }
 0x9f4   : > { %3977 = vmatpush.bf16.msrb.mxu1 %v6063_v39 }
 0x9f8   : > { %3978 = vmatpush.bf16.msrb.mxu1 %v6066_v62 }
 0x9fc   : > { %3979 = vmatpush.bf16.msrb.mxu1 %v6069_v33 }
 0xa00   : > { %3980 = vmatpush.bf16.msrb.mxu1 %v6072_v18 }
 0xa04   : > { %3981 = vmatpush.bf16.msrb.mxu1 %v6078_v29 }
 0xa08   : > { %3982 = vmatpush.bf16.msrb.mxu1 %v6081_v17 }
 0xa18   : > { %v2698_v35 = vpop.f32.mrf.mxu1 }
 0xa19   : > { %v6089_v34 = vadd.f32 %v2698_v35, %v6083_v52  ;;  %v2755_v30 = vpop.f32.mrf.mxu0 }
 0xa1a   : > { %v6092_v4 = vadd.f32 %v2755_v30, %v6085_v31 }
 0xa1b   : > { %v2781_v41 = vmul.f32 0.044715, %v6089_v34 }
 0xa1c   : > { %v2784_v60 = vmul.f32 0.044715, %v6092_v4 }
 0xa1d   : > { %v2797_v54 = vmul.f32 %v2781_v41, %v6089_v34 }
 0xa1e   : > { %v2800_v37 = vmul.f32 %v2784_v60, %v6092_v4  ;;  %v2717_v50 = vpop.f32.mrf.mxu2 }
 0xa1f   : > { %v2813_v45 = vmul.f32 %v2797_v54, %v6089_v34  ;;  %v6105_v38 = vadd.f32 %v2717_v50, %v6095_v6  ;;  %v2736_v1 = vpop.f32.mrf.mxu3 }
 0xa20   : > { %v2816_v26 = vmul.f32 %v2800_v37, %v6092_v4  ;;  %v6109_v5 = vadd.f32 %v2736_v1, %v6098_v51  ;;  %v2700_v27 = vpop.f32.mrf.mxu1 }
 0xa21   : > { %v2829_v23 = vadd.f32 %v2813_v45, %v6089_v34  ;;  %v2782_v59 = vmul.f32 0.044715, %v6105_v38  ;;  %v2701_v16 = vadd.f32 %v2700_v27, %v6083_v52  ;;  %v2757_v32 = vpop.f32.mrf.mxu0 }
 0xa22   : > { %v2832_v55 = vadd.f32 %v2816_v26, %v6092_v4  ;;  %v2783_v21 = vmul.f32 0.044715, %v6109_v5  ;;  %v2758_v58 = vadd.f32 %v2757_v32, %v6085_v31  ;;  %v2765_v26 = vmul.f32 0.5, %v6089_v34 }
 0xa23   : > { %v2798_v53 = vmul.f32 %v2782_v59, %v6105_v38  ;;  %v2785_v2 = vmul.f32 0.044715, %v2701_v16  ;;  %v2845_v56 = vmul.f32 0.7978846, %v2829_v23  ;;  %v2769_v18 = vmul.f32 0.5, %v2701_v16 }
 0xa24   : > { %v2799_v48 = vmul.f32 %v2783_v21, %v6109_v5  ;;  %v2788_v13 = vmul.f32 0.044715, %v2758_v58  ;;  %v2848_v36 = vmul.f32 0.7978846, %v2832_v55  ;;  %v2768_v59 = vmul.f32 0.5, %v6092_v4 }
 0xa25   : > { %v2814_v9 = vmul.f32 %v2798_v53, %v6105_v38  ;;  %v2801_v61 = vmul.f32 %v2785_v2, %v2701_v16  ;;  %4341 = vtanh.f32 %v2845_v56  ;;  %v2772_v32 = vmul.f32 0.5, %v2758_v58 }
 0xa26   : > { %v2815_v39 = vmul.f32 %v2799_v48, %v6109_v5  ;;  %v2804_v14 = vmul.f32 %v2788_v13, %v2758_v58  ;;  %v2719_v11 = vpop.f32.mrf.mxu2  ;;  %4343 = vtanh.f32 %v2848_v36  ;;  %v2766_v36 = vmul.f32 0.5, %v6105_v38 }
 0xa27   : > { %v2830_v8 = vadd.f32 %v2814_v9, %v6105_v38  ;;  %v2817_v3 = vmul.f32 %v2801_v61, %v2701_v16  ;;  %v2720_v19 = vadd.f32 %v2719_v11, %v6095_v6  ;;  %v2738_v44 = vpop.f32.mrf.mxu3 }
 0xa28   : > { %v2831_v12 = vadd.f32 %v2815_v39, %v6109_v5  ;;  %v2820_v15 = vmul.f32 %v2804_v14, %v2758_v58  ;;  %v2739_v22 = vadd.f32 %v2738_v44, %v6098_v51 }
 0xa29   : > { %v2833_v25 = vadd.f32 %v2817_v3, %v2701_v16  ;;  %v2786_v57 = vmul.f32 0.044715, %v2720_v19  ;;  %v2846_v42 = vmul.f32 0.7978846, %v2830_v8  ;;  %v2770_v39 = vmul.f32 0.5, %v2720_v19 }
 0xa2a   : > { %v2836_v62 = vadd.f32 %v2820_v15, %v2758_v58  ;;  %v2787_v63 = vmul.f32 0.044715, %v2739_v22  ;;  %v2847_v20 = vmul.f32 0.7978846, %v2831_v12  ;;  %v2767_v58 = vmul.f32 0.5, %v6109_v5 }
 0xa2b   : > { %v2849_v40 = vmul.f32 0.7978846, %v2833_v25  ;;  %v2802_v43 = vmul.f32 %v2786_v57, %v2720_v19  ;;  %v4342_v41 = vpop.eup %4341  ;;  %v2771_v17 = vmul.f32 0.5, %v2739_v22 }
 0xa2c   : > { %v2852_v10 = vmul.f32 0.7978846, %v2836_v62  ;;  %v2803_v24 = vmul.f32 %v2787_v63, %v2739_v22  ;;  %v4344_v7 = vpop.eup %4343  ;;  %v2877_v37 = vadd.f32 1.0, %v4342_v41 }
 0xa2d   : > { %v2818_v35 = vmul.f32 %v2802_v43, %v2720_v19  ;;  %4345 = vtanh.f32 %v2849_v40  ;;  %v2880_v45 = vadd.f32 1.0, %v4344_v7 }
 0xa2e   : > { %v2819_v30 = vmul.f32 %v2803_v24, %v2739_v22  ;;  %4347 = vtanh.f32 %v2852_v10  ;;  %v2893_v29 = vmul.f32 %v2877_v37, %v2765_v26 }
 0xa2f   : > { %v2834_v46 = vadd.f32 %v2818_v35, %v2720_v19  ;;  %4349 = vtanh.f32 %v2846_v42  ;;  %v2896_v2 = vmul.f32 %v2880_v45, %v2768_v59 }
 0xa30   : > { %v2835_v33 = vadd.f32 %v2819_v30, %v2739_v22  ;;  %4351 = vtanh.f32 %v2847_v20 }
 0xa31   : > { %v2850_v60 = vmul.f32 0.7978846, %v2834_v46 }
 0xa32   : > { %v2851_v54 = vmul.f32 0.7978846, %v2835_v33 }
 0xa33   : > { %v4346_v50 = vpop.eup %4345  ;;  %4353 = vtanh.f32 %v2850_v60 }
 0xa34   : > { %v4348_v1 = vpop.eup %4347  ;;  %v2881_v27 = vadd.f32 1.0, %v4346_v50  ;;  %4355 = vtanh.f32 %v2851_v54 }
 0xa35   : > { %v4350_v23 = vpop.eup %4349  ;;  %v2884_v55 = vadd.f32 1.0, %v4348_v1 }
 0xa36   : > { %v4352_v21 = vpop.eup %4351  ;;  %v2897_v53 = vmul.f32 %v2881_v27, %v2769_v18  ;;  %v2878_v56 = vadd.f32 1.0, %v4350_v23 }
 0xa37   : > { %v2900_v48 = vmul.f32 %v2884_v55, %v2772_v32  ;;  %v2879_v34 = vadd.f32 1.0, %v4352_v21 }
 0xa38   : > { %v2909_v13 = vpack.c.bf16 %v2897_v53, %v2893_v29  ;;  %v2894_v11 = vmul.f32 %v2878_v56, %v2766_v36 }
 0xa39   : > { %v4354_v9 = vpop.eup %4353  ;;  %v2912_v61 = vpack.c.bf16 %v2900_v48, %v2896_v2  ;;  %v2895_v3 = vmul.f32 %v2879_v34, %v2767_v58 }
 0xa3a   : > { %v4356_v16 = vpop.eup %4355  ;;  %3185 = vmatmul.bf16.vlgmr.msra.gmra.mxu1 %v2909_v13  ;;  %v2882_v4 = vadd.f32 1.0, %v4354_v9 }
 0xa3b   : > { %3242 = vmatmul.bf16.vlgmr.msra.gmra.mxu0 %v2912_v61  ;;  %v2883_v14 = vadd.f32 1.0, %v4356_v16 }
 0xa3c   : > { %v2898_v8 = vmul.f32 %v2882_v4, %v2770_v39 }
 0xa3d   : > { %v2899_v44 = vmul.f32 %v2883_v14, %v2771_v17 }
 0xa3e   : > { %v2910_v12 = vpack.c.bf16 %v2898_v8, %v2894_v11 }
 0xa3f   : > { %v2911_v15 = vpack.c.bf16 %v2899_v44, %v2895_v3 }
 0xa40   : > { %3204 = vmatmul.bf16.vlgmr.msra.gmra.mxu2 %v2910_v12 }
 0xa41   : > { %3223 = vmatmul.bf16.vlgmr.msra.gmra.mxu3 %v2911_v15 }
 0xa57   : > { %v2703_v25 = vpop.f32.mrf.mxu1 }
 0xa58   : > { %v2704_v57 = vadd.f32 %v2703_v25, %v6083_v52  ;;  %v2760_v62 = vpop.f32.mrf.mxu0 }
 0xa59   : > { %v6143_v20 = vadd.f32 %v2760_v62, %v6085_v31 }
 0xa5a   : > { %v2789_v38 = vmul.f32 0.044715, %v2704_v57  ;;  %v2773_v12 = vmul.f32 0.5, %v2704_v57 }
 0xa5b   : > { %v2792_v37 = vmul.f32 0.044715, %v6143_v20 }
 0xa5c   : > { %v2805_v19 = vmul.f32 %v2789_v38, %v2704_v57 }
 0xa5d   : > { %v2722_v63 = vpop.f32.mrf.mxu2  ;;  %v2808_v21 = vmul.f32 %v2792_v37, %v6143_v20 }
 0xa5e   : > { %v6137_v42 = vadd.f32 %v2722_v63, %v6095_v6  ;;  %v2741_v5 = vpop.f32.mrf.mxu3  ;;  %v2821_v22 = vmul.f32 %v2805_v19, %v2704_v57 }
 0xa5f   : > { %v6140_v40 = vadd.f32 %v2741_v5, %v6098_v51  ;;  %v2705_v43 = vpop.f32.mrf.mxu1  ;;  %v2824_v34 = vmul.f32 %v2808_v21, %v6143_v20  ;;  %v4202_v21 = vld [vmem:[%s6316_s29] ss:$0 sm:$0xff] }
 0xa60   : > { %v2790_v10 = vmul.f32 0.044715, %v6137_v42  ;;  %v2706_v24 = vadd.f32 %v2705_v43, %v6083_v52  ;;  %v2762_v35 = vpop.f32.mrf.mxu0  ;;  %v2837_v30 = vadd.f32 %v2821_v22, %v2704_v57 }
 0xa61   : > { %v2791_v41 = vmul.f32 0.044715, %v6140_v40  ;;  %v6149_v46 = vadd.f32 %v2762_v35, %v6085_v31  ;;  %v2840_v17 = vadd.f32 %v2824_v34, %v6143_v20 }
 0xa62   : > { %v2793_v7 = vmul.f32 0.044715, %v2706_v24  ;;  %v2806_v33 = vmul.f32 %v2790_v10, %v6137_v42  ;;  %v2853_v45 = vmul.f32 0.7978846, %v2837_v30  ;;  %v2777_v15 = vmul.f32 0.5, %v2706_v24 }
 0xa63   : > { %v2796_v60 = vmul.f32 0.044715, %v6149_v46  ;;  %v2807_v54 = vmul.f32 %v2791_v41, %v6140_v40  ;;  %v2856_v38 = vmul.f32 0.7978846, %v2840_v17  ;;  %v2774_v41 = vmul.f32 0.5, %v6137_v42 }
 0xa64   : > { %v2809_v50 = vmul.f32 %v2793_v7, %v2706_v24  ;;  %v2822_v52 = vmul.f32 %v2806_v33, %v6137_v42  ;;  %4357 = vtanh.f32 %v2853_v45 }
 0xa65   : > { %v2724_v1 = vpop.f32.mrf.mxu2  ;;  %v2823_v26 = vmul.f32 %v2807_v54, %v6140_v40  ;;  %v2812_v18 = vmul.f32 %v2796_v60, %v6149_v46 }
 0xa66   : > { %v2725_v31 = vadd.f32 %v2724_v1, %v6095_v6  ;;  %v2743_v27 = vpop.f32.mrf.mxu3  ;;  %v2825_v23 = vmul.f32 %v2809_v50, %v2706_v24  ;;  %v2838_v59 = vadd.f32 %v2822_v52, %v6137_v42 }
 0xa67   : > { %v2744_v32 = vadd.f32 %v2743_v27, %v6098_v51  ;;  %v2839_v55 = vadd.f32 %v2823_v26, %v6140_v40  ;;  %v2828_v48 = vmul.f32 %v2812_v18, %v6149_v46 }
 0xa68   : > { %v2794_v29 = vmul.f32 0.044715, %v2725_v31  ;;  %v2841_v53 = vadd.f32 %v2825_v23, %v2706_v24  ;;  %v2854_v9 = vmul.f32 0.7978846, %v2838_v59  ;;  %v2778_v7 = vmul.f32 0.5, %v2725_v31 }
 0xa69   : > { %v2795_v2 = vmul.f32 0.044715, %v2744_v32  ;;  %v2855_v61 = vmul.f32 0.7978846, %v2839_v55  ;;  %v2844_v39 = vadd.f32 %v2828_v48, %v6149_v46  ;;  %v2775_v24 = vmul.f32 0.5, %v6140_v40 }
 0xa6a   : > { %v2857_v13 = vmul.f32 0.7978846, %v2841_v53  ;;  %v2810_v56 = vmul.f32 %v2794_v29, %v2725_v31  ;;  %v4358_v36 = vpop.eup %4357  ;;  %v2779_v33 = vmul.f32 0.5, %v2744_v32  ;;  %v2780_v23 = vmul.f32 0.5, %v6149_v46 }
 0xa6b   : > { %v2811_v6 = vmul.f32 %v2795_v2, %v2744_v32  ;;  %v2885_v11 = vadd.f32 1.0, %v4358_v36  ;;  %v2860_v44 = vmul.f32 0.7978846, %v2844_v39 }
 0xa6c   : > { %4359 = vtanh.f32 %v2857_v13  ;;  %v2826_v16 = vmul.f32 %v2810_v56, %v2725_v31 }
 0xa6d   : > { %v2827_v51 = vmul.f32 %v2811_v6, %v2744_v32  ;;  %4361 = vtanh.f32 %v2854_v9  ;;  %v2901_v63 = vmul.f32 %v2885_v11, %v2773_v12 }
 0xa6e   : > { %v2842_v4 = vadd.f32 %v2826_v16, %v2725_v31  ;;  %4363 = vtanh.f32 %v2855_v61  ;;  %v2776_v31 = vmul.f32 0.5, %v6143_v20 }
 0xa6f   : > { %v2843_v58 = vadd.f32 %v2827_v51, %v2744_v32 }
 0xa70   : > { %v2858_v14 = vmul.f32 0.7978846, %v2842_v4 }
 0xa71   : > { %v2859_v8 = vmul.f32 0.7978846, %v2843_v58 }
 0xa72   : > { %v4360_v3 = vpop.eup %4359  ;;  %4365 = vtanh.f32 %v2858_v14 }
 0xa73   : > { %v2889_v25 = vadd.f32 1.0, %v4360_v3  ;;  %4367 = vtanh.f32 %v2859_v8  ;;  %v4362_v62 = vpop.eup %4361 }
 0xa74   : > { %v4364_v19 = vpop.eup %4363  ;;  %4369 = vtanh.f32 %v2860_v44  ;;  %v2886_v43 = vadd.f32 1.0, %v4362_v62 }
 0xa75   : > { %v2905_v5 = vmul.f32 %v2889_v25, %v2777_v15  ;;  %v2887_v35 = vadd.f32 1.0, %v4364_v19  ;;  %4371 = vtanh.f32 %v2856_v38 }
 0xa76   : > { %v2902_v54 = vmul.f32 %v2886_v43, %v2774_v41 }
 0xa77   : > { %v2913_v22 = vpack.c.bf16 %v2905_v5, %v2901_v63  ;;  %v2903_v45 = vmul.f32 %v2887_v35, %v2775_v24 }
 0xa78   : > { %v4366_v10 = vpop.eup %4365 }
 0xa79   : > { %v4368_v30 = vpop.eup %4367  ;;  %3190 = vmatmul.bf16.gmra.mxu1 %v2913_v22  ;;  %v2890_v57 = vadd.f32 1.0, %v4366_v10 }
 0xa7a   : > { %v2891_v60 = vadd.f32 1.0, %v4368_v30  ;;  %v4370_v50 = vpop.eup %4369 }
 0xa7b   : > { %v2906_v37 = vmul.f32 %v2890_v57, %v2778_v7  ;;  %v4372_v26 = vpop.eup %4371  ;;  %v2892_v27 = vadd.f32 1.0, %v4370_v50 }
 0xa7c   : > { %v2907_v52 = vmul.f32 %v2891_v60, %v2779_v33  ;;  %v2888_v42 = vadd.f32 1.0, %v4372_v26 }
 0xa7d   : > { %v2914_v1 = vpack.c.bf16 %v2906_v37, %v2902_v54  ;;  %v2908_v59 = vmul.f32 %v2892_v27, %v2780_v23 }
 0xa7e   : > { %v2915_v18 = vpack.c.bf16 %v2907_v52, %v2903_v45  ;;  %v2904_v40 = vmul.f32 %v2888_v42, %v2776_v31 }
 0xa7f   : > { %3209 = vmatmul.bf16.gmra.mxu2 %v2914_v1 }
 0xa80   : > { %3228 = vmatmul.bf16.gmra.mxu3 %v2915_v18  ;;  %v2916_v32 = vpack.c.bf16 %v2908_v59, %v2904_v40 }
 0xa89   : > { %3247 = vmatmul.bf16.vlgmr.msrb.gmra.mxu1 %v2916_v32 }
 0xab7   : > { %v3186_v55 = vpop.f32.mrf.mxu1 }
 0xab8   : > { %v3187_v29 = vadd.f32 %v4202_v21, %v3186_v55  ;;  %v3243_v13 = vpop.f32.mrf.mxu0 }
 0xabf   : > { %v3188_v46 = vpop.f32.mrf.mxu1 }
 0xac0   : > { %v3189_v6 = vadd.f32 %v4202_v21, %v3188_v46  ;;  %v3245_v36 = vpop.f32.mrf.mxu0 }
 0xac3   : > { %v3205_v53 = vpop.f32.mrf.mxu2 }
 0xac4   : > { %v3206_v2 = vadd.f32 %v3205_v53, %v3187_v29  ;;  %v3224_v48 = vpop.f32.mrf.mxu3 }
 0xac6   : > { %v3225_v56 = vadd.f32 %v3224_v48, %v3206_v2 }
 0xac8   : > { %v3244_v9 = vadd.f32 %v3243_v13, %v3225_v56 }
 0xaca   : > { %v3253_v20 = vadd.f32 %v3244_v9, %v6013_v0 }
 0xacb   : > { %v3207_v61 = vpop.f32.mrf.mxu2 }
 0xacc   : > { %3257 = vst [vmem:[%s6177_s4] sm:$0xff] %v3253_v20  ;;  %v3208_v34 = vadd.f32 %v3207_v61, %v3189_v6  ;;  %v3226_v16 = vpop.f32.mrf.mxu3 }
 0xace   : > { %v3227_v51 = vadd.f32 %v3226_v16, %v3208_v34 }
 0xad0   : > { %v3246_v39 = vadd.f32 %v3245_v36, %v3227_v51 }
 0xad2   : > { %v3254_v4 = vadd.f32 %v3246_v39, %v6017_v47 }
 0xad4   : > { %3258 = vst [vmem:[%s6177_s4 + $0x8] sm:$0xff] %v3254_v4 }
 0xaf6   : > { %v3191_v58 = vpop.f32.mrf.mxu1 }
 0xaf7   : > { %v3192_v0 = vadd.f32 %v4202_v21, %v3191_v58 }
 0xafe   : > { %v3193_v17 = vpop.f32.mrf.mxu1 }
 0xaff   : > { %v3194_v15 = vadd.f32 %v4202_v21, %v3193_v17 }
 0xb02   : > { %v3210_v14 = vpop.f32.mrf.mxu2 }
 0xb03   : > { %v3211_v11 = vadd.f32 %v3210_v14, %v3192_v0  ;;  %v3229_v8 = vpop.f32.mrf.mxu3 }
 0xb05   : > { %v3230_v3 = vadd.f32 %v3229_v8, %v3211_v11 }
 0xb06   : > { %v3248_v44 = vpop.f32.mrf.mxu1 }
 0xb07   : > { %v3249_v12 = vadd.f32 %v3248_v44, %v3230_v3 }
 0xb09   : > { %v3255_v47 = vadd.f32 %v3249_v12, %v6021_v28 }
 0xb0a   : > { %v3212_v25 = vpop.f32.mrf.mxu2 }
 0xb0b   : > { %3259 = vst [vmem:[%s6177_s4 + $0x10] sm:$0xff] %v3255_v47  ;;  %v3213_v62 = vadd.f32 %v3212_v25, %v3194_v15  ;;  %v3231_v38 = vpop.f32.mrf.mxu3 }
 0xb0d   : > { %v3232_v19 = vadd.f32 %v3231_v38, %v3213_v62 }
 0xb0e   : > { %v3250_v63 = vpop.f32.mrf.mxu1 }
 0xb0f   : > { %v3251_v5 = vadd.f32 %v3250_v63, %v3232_v19 }
 0xb11   : > { %v3256_v22 = vadd.f32 %v3251_v5, %v6025_v49 }
 0xb13   : > { %3260 = vst [vmem:[%s6177_s4 + $0x18] sm:$0xff] %v3256_v22 }
 0xb14   : > { %4734 = shalt.err (!%p4731_p7)
}
 0xb15   : > { %s4876_s28 = smov 128   ;;  %s4877_s4 = smov 8  }
 0xb16   : > { %4023 = dma.vmem_to_hbm [thread:$0]  (%p5112_p2), %s3277_s11, 512, %s3279_s5, %s3262_s8, %s4876_s28, %s4876_s28, %s4877_s4  }
 0xb17 PF: > { %p4083_p11 = scmp.ge.s32.totalorder %s4853_s23, 2  ;;  %s3293_s7 = sand.u32 1, %s4825_s16  }
 0xb18   : > { %s3294_s12 = scalar_lea.sflag [#allocation5], %s3293_s7 }
 0xb19   : > { %p4061_p12 = pnand %p4083_p11, %p5118_p4 }
 0xb1b   : > { %p4062_p13 = pneg %p4061_p12 }
 0xb1d   : > { %4808 = dma.done.wait (%p4062_p13), %s3294_s12, 512  }
 0xb1e   : > { %4810 = vsyncadd (%p4062_p13), %s3294_s12, 4294966784  ;;  %s37_s23 = sadd.s32 1, %s4853_s23   ;;  %s6320_s14 = sld [smem:[#allocation34_spill]] }
 0xb1f   : > { %p34_p9 = scmp.ge.s32.totalorder %s37_s23, 6   ;;  %s6321_s24 = sld [smem:[#allocation35_spill]] }
 0xb20   : > { %s6322_s29 = smov %s4817_s30  ;;  %s6323_s30 = smov %s4821_s15 }
 0xb21   : > { %s6324_s15 = smov %s5142_s3  ;;  %s6325_s16 = smov %s4829_s17 }
 0xb22   : > { %s6326_s17 = smov %s4833_s18  ;;  %s6327_s18 = smov %s5126_s20 }
 0xb23   : > { %s6328_s19 = smov %s4845_s21  ;;  %s6329_s20 = smov %s4849_s22 }
 0xb24   : > { %s6330_s21 = smov %s6320_s14  ;;  %36 = sbr.rel (!%p34_p9) target bundleno = 31 (0x1f), region = 170 }
 0xb25   : > { %s6331_s22 = smov %s6321_s24 }
 0xb29   :  { %3300 = vsyncpa [#allocation4], 1 }
 0xb2a   :  { %3302 = vsyncpa [#allocation4 + $0x1], 1 }
 0xb2b   :  { %3303 = vsyncpa [#allocation7], 1 }
 0xb2c   :  { %3305 = vsyncpa [#allocation7 + $0x1], 1 }
 0xb2d   :  { %3306 = vsyncpa [#allocation10], 1 }
 0xb2e   :  { %3307 = vsyncpa [#allocation13], 1 }
 0xb2f   :  { %3308 = vsyncpa [#allocation16], 1 }
 0xb30   :  { %3309 = vsyncpa [#allocation19], 1 }
 0xb31   :  { %3310 = vsyncpa [#allocation5], 1 }
 0xb32   :  { %3312 = vsyncpa [#allocation5 + $0x1], 1 }

// kernel: tpu_custom_call.1
= control target key start
LH: loop header
LB: loop body
LE: loop exit
PB: predicated region body
PF: predicated region fallthrough
CT: control target
= control target key end

     0   :  { %s6240_s0 = inlined_call_operand.hbm [shape: f32[2,64,128], index: 0, kind: input, shape index: {}]   ;;  %s6241_s1 = inlined_call_operand.hbm [shape: f32[2,16,64], index: 1, kind: input, shape index: {}]   ;;  %s6242_s2 = inlined_call_operand.hbm [shape: f32[2,128], index: 2, kind: input, shape index: {}]   ;;  %s6243_s3 = inlined_call_operand.hbm [shape: f32[2,64], index: 3, kind: input, shape index: {}]   ;;  %s6244_s4 = inlined_call_operand.hbm [shape: f32[2,128], index: 4, kind: input, shape index: {}]   ;;  %s6245_s5 = inlined_call_operand.vmem [shape: f32[4,32], index: 5, kind: input, shape index: {}]   ;;  %s6246_s6 = inlined_call_operand.hbm [shape: bf16[128,128], index: 6, kind: input, shape index: {}]   ;;  %s6247_s7 = inlined_call_operand.hbm [shape: bf16[64,256], index: 7, kind: input, shape index: {}]   ;;  %s6248_s8 = inlined_call_operand.hbm [shape: bf16[128,128], index: 8, kind: input, shape index: {}]   ;;  %s6249_s9 = inlined_call_operand.hbm [shape: f32[1,128], index: 9, kind: input, shape index: {}]   ;;  %s6250_s10 = inlined_call_operand.hbm [shape: bf16[128,512], index: 10, kind: input, shape index: {}]   ;;  %s6251_s11 = inlined_call_operand.vmem [shape: f32[1,512], index: 11, kind: input, shape index: {}]   ;;  %s6252_s12 = inlined_call_operand.hbm [shape: bf16[512,128], index: 12, kind: input, shape index: {}]   ;;  %s6253_s13 = inlined_call_operand.vmem [shape: f32[1,128], index: 13, kind: input, shape index: {}]   ;;  %s6254_s14 = inlined_call_operand.hbm [shape: f32[2,64,128], index: 14, kind: output, shape index: {}]  }
   0x1   :  { %6263 = sst [smem:[#allocation36_spill]] %s6240_s0 }
   0x2   :  { %6264 = sst [smem:[#allocation37_spill]] %s6241_s1 }
   0x3   :  { %6265 = sst [smem:[#allocation38_spill]] %s6242_s2 }
   0x4   :  { %6266 = sst [smem:[#allocation39_spill]] %s6243_s3 }
   0x5   :  { %6267 = sst [smem:[#allocation40_spill]] %s6244_s4 }
   0x6   :  { %6268 = sst [smem:[#allocation41_spill]] %s6245_s5 }
   0x7   :  { %6269 = sst [smem:[#allocation42_spill]] %s6246_s6 }
   0x8   :  { %6270 = sst [smem:[#allocation43_spill]] %s6247_s7 }
   0x9   :  { %6271 = sst [smem:[#allocation44_spill]] %s6248_s8 }
   0xa   :  { %6272 = sst [smem:[#allocation45_spill]] %s6249_s9 }
   0xb   :  { %6273 = sst [smem:[#allocation46_spill]] %s6250_s10 }
   0xc   :  { %6274 = sst [smem:[#allocation47_spill]] %s6251_s11 }
   0xd   :  { %6275 = sst [smem:[#allocation48_spill]] %s6252_s12 }
   0xe   :  { %6276 = sst [smem:[#allocation49_spill]] %s6253_s13 }
   0xf   :  { %6277 = sst [smem:[#allocation50_spill]] %s6254_s14 }
  0x10   :  { %19 = vsyncpa [#allocation4], 0 }
  0x11   :  { %21 = vsyncpa [#allocation4 + $0x1], 0 }
  0x12   :  { %22 = vsyncpa [#allocation7], 0 }
  0x13   :  { %24 = vsyncpa [#allocation7 + $0x1], 0 }
  0x14   :  { %25 = vsyncpa [#allocation10], 0 }
  0x15   :  { %26 = vsyncpa [#allocation13], 0 }
  0x16   :  { %27 = vsyncpa [#allocation16], 0 }
  0x17   :  { %28 = vsyncpa [#allocation19], 0 }
  0x18   :  { %29 = vsyncpa [#allocation5], 0 }
  0x19   :  { %31 = vsyncpa [#allocation5 + $0x1], 0  ;;  %s4953_s29 = smov 0   ;;  %s4955_s30 = smov 0  }
  0x1a   :  { %s4957_s15 = smov 0   ;;  %s4959_s16 = smov 0  }
  0x1b   :  { %s4961_s17 = smov 0   ;;  %s4963_s18 = smov 0  }
  0x1c   :  { %s4965_s19 = smov 0   ;;  %s4967_s20 = smov 0  }
  0x1d   :  { %s4969_s21 = smov 0   ;;  %s4971_s22 = smov 0  }
  0x1e   :  { %s4973_s23 = smov 0  }
  0x1f LB: > { %6278 = sst [smem:[#allocation30_spill]] %s4813_s29  ;;  %s5009_s24 = sadd.s32 4294967295, %s4853_s23   ;;  %s4853_s23 = sphi %s4973_s23, %s37_s23   ;;  %s4849_s22 = sphi %s4971_s22, %s6331_s22   ;;  %s4845_s21 = sphi %s4969_s21, %s6330_s21   ;;  %s4841_s20 = sphi %s4967_s20, %s6329_s20   ;;  %s4837_s19 = sphi %s4965_s19, %s6328_s19   ;;  %s4833_s18 = sphi %s4963_s18, %s6327_s18   ;;  %s4829_s17 = sphi %s4961_s17, %s6326_s17   ;;  %s4825_s16 = sphi %s4959_s16, %s6325_s16   ;;  %s4821_s15 = sphi %s4957_s15, %s6324_s15   ;;  %s4817_s30 = sphi %s4955_s30, %s6323_s30   ;;  %s4813_s29 = sphi %s4953_s29, %s6322_s29  }
  0x20   : > { %6279 = sst [smem:[#allocation31_spill]] %s4837_s19  ;;  %p3479_p0 = scmp.ge.s32.totalorder %s4853_s23, 1 }
  0x21   : > { %6280 = sst [smem:[#allocation32_spill]] %s4841_s20  ;;  %p72_p1 = scmp.eq.s32.totalorder %s5009_s24, 0 }
  0x22   : > { %p388_p2 = scmp.lt.s32.totalorder %s4853_s23, 5  ;;  %s6281_s2 = sld [smem:[#allocation38_spill]] }
  0x23   : > { %s4855_s14 = smov [#allocation8]   ;;  %s6284_s3 = sld [smem:[#allocation39_spill]] }
  0x24   : > { %p5017_p3 = pnand %p3479_p0, %p388_p2  ;;  %s402_s20 = sshll.u32 %s4855_s14, 4  ;;  %s403_s20 = int_to_ptr.vmem [resolvable:$true] %s402_s20 }
  0x25   : > { %s6286_s6 = sld [smem:[#allocation42_spill]]  ;;  %s4857_s13 = smov [#allocation12]  }
  0x26   : > { %s6282_s28 = scalar_select %p5017_p3, 1, 0 }
  0x27   : > { %p4025_p4 = pneg %p5017_p3  ;;  %s440_s19 = sshll.u32 %s4857_s13, 4  ;;  %s441_s19 = int_to_ptr.vmem [resolvable:$true] %s440_s19 }
  0x28   : > { %s400_s27 = sshll.u32 %s6281_s2, 4  ;;  %6283 = sst [smem:[#allocation33_spill]] %s6282_s28  ;;  %s401_s27 = int_to_ptr.hbm [resolvable:$true] %s400_s27 }
  0x29   : > { %s412_s11 = sshll.u32 %s6284_s3, 4  ;;  %p5028_p5 = pnand %p4025_p4, %p72_p1  ;;  %s413_s11 = int_to_ptr.hbm [resolvable:$true] %s412_s11 }
  0x2a   : > { %s4856_s28 = smov [#allocation9]   ;;  %s6287_s8 = sld [smem:[#allocation44_spill]] }
  0x2b   : > { %s438_s2 = sshll.u32 %s6286_s6, 4  ;;  %s414_s14 = sshll.u32 %s4856_s28, 4  ;;  %s415_s14 = int_to_ptr.vmem [resolvable:$true] %s414_s14  ;;  %s439_s2 = int_to_ptr.hbm [resolvable:$true] %s438_s2 }
  0x2c   : > { %4028 = dma.hbm_to_vmem [thread:$0]  (!%p5028_p5), %s401_s27, 32, %s403_s20, [#allocation7]  }
  0x2d   : > { %4031 = dma.hbm_to_vmem [thread:$0]  (!%p5028_p5), %s413_s11, 32, %s415_s14, [#allocation10]  }
  0x2e   : > { %s4858_s29 = smov 64   ;;  %s4859_s25 = smov 4  }
  0x2f   : > { %4037 = dma.hbm_to_vmem [thread:$0]  (!%p5028_p5), %s439_s2, 1024, %s441_s19, [#allocation13], %s4858_s29, %s4858_s29, %s4859_s25  }
  0x30   : > { %s466_s0 = sshll.u32 %s6287_s8, 4  ;;  %s4860_s20 = smov [#allocation15]   ;;  %s467_s0 = int_to_ptr.hbm [resolvable:$true] %s466_s0 }
  0x31   : > { %s468_s27 = sshll.u32 %s4860_s20, 4  ;;  %s6288_s10 = sld [smem:[#allocation46_spill]]  ;;  %s469_s27 = int_to_ptr.vmem [resolvable:$true] %s468_s27 }
  0x32   : > { %4043 = dma.hbm_to_vmem [thread:$0]  (!%p5028_p5), %s467_s0, 1024, %s469_s27, [#allocation16], %s4858_s29, %s4858_s29, %s4859_s25  }
  0x33   : > { %s4861_s1 = smov [#allocation18]   ;;  %s6289_s4 = sld [smem:[#allocation40_spill]] }
  0x34   : > { %s494_s3 = sshll.u32 %s4861_s1, 4  ;;  %s4862_s19 = smov 256   ;;  %s495_s3 = int_to_ptr.vmem [resolvable:$true] %s494_s3 }
  0x35   : > { %s4863_s20 = smov 16   ;;  %s4864_s28 = smov [#allocation11]  }
  0x36   : > { %s426_s11 = sshll.u32 %s4864_s28, 4  ;;  %s6290_s7 = sld [smem:[#allocation43_spill]]  ;;  %s427_s11 = int_to_ptr.vmem [resolvable:$true] %s426_s11 }
  0x37   : > { %s492_s26 = sshll.u32 %s6288_s10, 4  ;;  %s4865_s0 = smov [#allocation14]   ;;  %s493_s26 = int_to_ptr.hbm [resolvable:$true] %s492_s26 }
  0x38   : > { %4049 = dma.hbm_to_vmem [thread:$0]  (!%p5028_p5), %s493_s26, 4096, %s495_s3, [#allocation19], %s4862_s19, %s4862_s19, %s4863_s20  }
  0x39   : > { %s424_s13 = sshll.u32 %s6289_s4, 4  ;;  %s454_s27 = sshll.u32 %s4865_s0, 4  ;;  %s425_s13 = int_to_ptr.hbm [resolvable:$true] %s424_s13  ;;  %s455_s27 = int_to_ptr.vmem [resolvable:$true] %s454_s27 }
  0x3a   : > { %4034 = dma.hbm_to_vmem [thread:$0]  (!%p5028_p5), %s425_s13, 32, %s427_s11, [#allocation10]  }
  0x3b   : > { %s6291_s9 = sld [smem:[#allocation45_spill]]  ;;  %s6257_s3 = smov 128  }
  0x3c   : > { %s452_s10 = sshll.u32 %s6290_s7, 4  ;;  %s6259_s2 = smov 8   ;;  %s453_s10 = int_to_ptr.hbm [resolvable:$true] %s452_s10 }
  0x3d   : > { %4040 = dma.hbm_to_vmem [thread:$0]  (!%p5028_p5), %s453_s10, 1024, %s455_s27, [#allocation13], %s6257_s3, %s6257_s3, %s6259_s2  }
  0x3e   : > { %s4868_s6 = smov [#allocation17]   ;;  %s6292_s12 = sld [smem:[#allocation48_spill]] }
  0x3f   : > { %s483_s8 = sshll.u32 %s4868_s6, 4  ;;  %s4869_s28 = smov [#allocation20]   ;;  %s484_s8 = int_to_ptr.vmem [resolvable:$true] %s483_s8 }
  0x40   : > { %s511_s10 = sshll.u32 %s4869_s28, 4  ;;  %s3478_s11 = sadd.s32 4294967294, %s4853_s23   ;;  %s512_s10 = int_to_ptr.vmem [resolvable:$true] %s511_s10 }
  0x41   : > { %s481_s26 = sshll.u32 %s6291_s9, 4  ;;  %s46_s0 = sadd.s32 1, %s4845_s21  ;;  %s482_s26 = int_to_ptr.hbm [resolvable:$true] %s481_s26 }
  0x42   : > { %4046 = dma.hbm_to_vmem [thread:$0]  (!%p5028_p5), %s482_s26, 16, %s484_s8, [#allocation16]  }
  0x43   : > { %s49_s27 = sadd.s32 1, %s4849_s22  ;;  %p47_p6 = scmp.ge.s32.totalorder %s46_s0, 2 }
  0x44   : > { %s509_s20 = sshll.u32 %s6292_s12, 4  ;;  %s58_s1 = sadd.s32 1, %s4833_s18  ;;  %s510_s20 = int_to_ptr.hbm [resolvable:$true] %s509_s20 }
  0x45   : > { %4052 = dma.hbm_to_vmem [thread:$0]  (!%p5028_p5), %s510_s20, 4096, %s512_s10, [#allocation19], %s4858_s29, %s4858_s29, %s4859_s25  }
  0x46   : > { %p65_p7 = scmp.ne.s32.totalorder %s4833_s18, %s4829_s17  ;;  %p66_p8 = scmp.eq.s32.totalorder %s4853_s23, 0 }
  0x47   : > { %s6333_s0 = smov (%p47_p6, %s46_s0), 0  ;;  %s6335_s27 = smov (!%p47_p6, %s49_s27), %s4849_s22 }
  0x48   : > { %6293 = sst [smem:[#allocation34_spill]] %s6333_s0  ;;  %s54_s5 = ssub.s32 %s4845_s21, %s6333_s0 }
  0x49   : > { %p5097_p9 = por %p66_p8, %p65_p7  ;;  %p51_p10 = scmp.ge.s32.totalorder %s6335_s27, 2 }
  0x4a   : > { %p71_p11 = scmp.ne.s32.totalorder %s4829_s17, %s4825_s16  ;;  %p375_p12 = scmp.eq.s32.totalorder %s5009_s24, 3 }
  0x4b   : > { %p381_p13 = scmp.eq.s32.totalorder %s3478_s11, 3  ;;  %s6337_s27 = smov (%p51_p10, %s6335_s27), 0 }
  0x4c   : > { %6295 = sst [smem:[#allocation35_spill]] %s6337_s27  ;;  %p5108_p0 = por %p72_p1, %p71_p11 }
  0x4d   : > { %p5112_p2 = por %p375_p12, %p65_p7  ;;  %s53_s26 = ssub.s32 %s4849_s22, %s6337_s27 }
  0x4e   : > { %p5118_p4 = por %p381_p13, %p71_p11  ;;  %s55_s8 = sor.u32 %s54_s5, %s53_s26 }
  0x4f   : > { %p82_p5 = scmp.eq.s32.totalorder %s53_s26, 0  ;;  %p56_p6 = scmp.eq.s32.totalorder %s55_s8, 0 }
  0x50   : > { %p4073_p10 = scmp.lt.s32.totalorder %s4853_s23, 4  ;;  %s528_s13 = sand.u32 1, %s4833_s18  }
  0x51   : > { %s3491_s19 = sshll.u32 %s4845_s21, 2  ;;  %s3490_s28 = sshll.u32 %s528_s13, 5 }
  0x52   : > { %s5126_s20 = scalar_select %p56_p6, %s4833_s18, %s58_s1  }
  0x53   : > { %s6299_s10 = sld [smem:[#allocation30_spill]]  ;;  %s3492_s11 = sshll.u32 %s4849_s22, 3 }
  0x54   : > { %s537_s3 = sadd.s32 %s3492_s11, %s3491_s19  ;;  %s532_s2 = scalar_lea.vmem [#allocation3], %s3490_s28 }
  0x55   : > { %s542_s5 = sshll.u32 %s532_s2, 4  ;;  %s3493_s8 = sshll.u32 %s537_s3, 3  ;;  %s543_s5 = int_to_ptr.vmem [resolvable:$true] %s542_s5 }
  0x56   : > { %s6300_s9 = sld [smem:[#allocation36_spill]]  ;;  %p4054_p7 = pnand %p4073_p10, %p5097_p9 }
  0x57   : > { %s529_s27 = scalar_lea.sflag [#allocation4], %s528_s13  ;;  %s6301_s0 = smov 8  }
  0x58   : > { %s6302_s19 = smov 128   ;;  %s84_s28 = sadd.s32 1, %s4821_s15 }
  0x59   : > { %s5142_s3 = scalar_select %p82_p5, %s4821_s15, %s84_s28  }
  0x5a   : > { %p91_p11 = scmp.ne.s32.totalorder %s4821_s15, %s4817_s30  ;;  %p97_p12 = scmp.ne.s32.totalorder %s4817_s30, %s6299_s10 }
  0x5b   : > { %s552_s4 = sand.u32 1, %s4853_s23   ;;  %s554_s7 = sand.u32 1, %s4821_s15  }
  0x5c   : > { %s539_s1 = scalar_lea.hbm %s6300_s9, %s3493_s8  ;;  %p93_p13 = por %p91_p11, %p66_p8 }
  0x5d   : > { %s540_s12 = sshll.u32 %s539_s1, 4  ;;  %p5154_p9 = por %p97_p12, %p72_p1  ;;  %s541_s12 = int_to_ptr.hbm [resolvable:$true] %s540_s12 }
  0x5e   : > { %4056 = dma.hbm_to_vmem [thread:$0]  (!%p4054_p7), %s541_s12, 512, %s543_s5, %s529_s27, %s6302_s19, %s6302_s19, %s6301_s0  }
  0x5f   : > { %s3494_s2 = sshll.u32 %s554_s7, 4  ;;  %s3886_s29 = sshll.u32 %s4849_s22, 4 }
  0x60   : > { %s6304_s27 = sld [smem:[#allocation37_spill]]  ;;  %s556_s11 = scalar_lea.vmem [#allocation6], %s3494_s2 }
  0x61   : > { %s564_s5 = sshll.u32 %s556_s11, 4  ;;  %p4057_p5 = pnand %p4073_p10, %p93_p13  ;;  %s565_s5 = int_to_ptr.vmem [resolvable:$true] %s564_s5 }
  0x62   : > { %s553_s10 = scalar_lea.sflag [#allocation7], %s552_s4  ;;  %s5170_s28 = sand.u32 (!%p5017_p3), 1, %s4829_s17  }
  0x63   : > { %s3498_s7 = sshll.u32 (!%p5017_p3), %s5170_s28, 5  ;;  %s579_s2 = scalar_lea.sflag (!%p5017_p3), [#allocation4], %s5170_s28 }
  0x64   : > { %576 = sbr.rel (%p5017_p3) target bundleno = 2839 (0xb17), region = 76 }
  0x66   : > { %s561_s26 = scalar_lea.hbm %s6304_s27, %s3886_s29  ;;  %s5176_s29 = scalar_lea.vmem (!%p5017_p3), [#allocation3], %s3498_s7 }
  0x67   : > { %s562_s8 = sshll.u32 %s561_s26, 4  ;;  %s563_s8 = int_to_ptr.hbm [resolvable:$true] %s562_s8 }
  0x68   : > { %4059 = dma.hbm_to_vmem [thread:$0]  (!%p4057_p5), %s563_s8, 256, %s565_s5, %s553_s10, %s6302_s19, %s6302_s19, %s6301_s0  }
  0x69   : > { %4780 = dma.done.wait (%p5108_p0), %s579_s2, 512  }
  0x6a   : > { %4782 = vsyncadd (%p5108_p0), %s579_s2, 4294966784  ;;  %s588_s0 = sand.u32 1, %s5009_s24   ;;  %s590_s19 = sand.u32 1, %s4817_s30  }
  0x6b   : > { %s3499_s4 = sshll.u32 %s590_s19, 4  ;;  %s589_s13 = scalar_lea.sflag [#allocation7], %s588_s0 }
  0x6c   : > { %s592_s12 = scalar_lea.vmem [#allocation6], %s3499_s4 }
  0x6d   : > { %4784 = dma.done.wait (%p5154_p9), %s589_s13, 256  }
  0x6e   : > { %4786 = vsyncadd (%p5154_p9), %s589_s13, 4294967040 }
  0x6f   : > { %4788 = dma.done.wait (%p72_p1), [#allocation7], 32  }
  0x70   : > { %4790 = vsyncadd (%p72_p1), [#allocation7], 4294967264 }
  0x71   : > { %4792 = dma.done.wait (%p72_p1), [#allocation10], 64  }
  0x72   : > { %4794 = vsyncadd (%p72_p1), [#allocation10], 4294967232 }
  0x73   : > { %4796 = dma.done.wait (%p72_p1), [#allocation13], 2048  }
  0x74   : > { %4798 = vsyncadd (%p72_p1), [#allocation13], 4294965248 }
  0x75   : > { %4800 = dma.done.wait (%p72_p1), [#allocation16], 1040  }
  0x76   : > { %4802 = vsyncadd (%p72_p1), [#allocation16], 4294966256 }
  0x77   : > { %4804 = dma.done.wait (%p72_p1), [#allocation19], 8192  }
  0x78   : > { %4806 = vsyncadd (%p72_p1), [#allocation19], 4294959104  ;;  %vm800_vm0 = vcmask 523264   ;;  %v693_v0 = vld [vmem:[%s5176_s29 + $0x10] sm:$0xff]  ;;  %v691_v1 = vld [vmem:[%s5176_s29] sm:$0xff]  ;;  %s6306_s9 = sld [smem:[#allocation41_spill]] }
  0x79   : > { %v695_v2 = vld [vmem:[%s592_s12] sm:$0xff]  ;;  %703 = vadd.xlane.f32.xlu2 %v693_v0  ;;  %699 = vadd.xlane.f32.xlu1 %v691_v1  ;;  %v696_v4 = vld [vmem:[%s592_s12 + $0x8] sm:$0xff]  ;;  %s4870_s27 = smov 32   ;;  %s4871_s26 = smov 96   ;;  %v4872_v13 = vmov 128.0   ;;  %v4873_v16 = vmov 64.0  }
  0x7a   : > { %v801_v3 = vsel %vm800_vm0, %v695_v2, 0.0  ;;  %v694_v5 = vld [vmem:[%s5176_s29 + $0x18] sm:$0xff]  ;;  %v692_v6 = vld [vmem:[%s5176_s29 + $0x8] sm:$0xff]  ;;  %v804_v7 = vsel %vm800_vm0, %v696_v4, 0.0  ;;  %4203 = vrcp.f32 %v4872_v13  ;;  %s4874_s11 = smov 64   ;;  %s6315_s10 = sld [smem:[#allocation47_spill]] }
  0x7b   : > { %802 = vadd.xlane.f32.xlu0 %v801_v3  ;;  %4205 = vrcp.f32 %v4873_v16  ;;  %v3894_v53 = vld [vmem:[#allocation12 + $0x38] sm:$0xff]  ;;  %v3893_v54 = vld [vmem:[#allocation12 + $0x30] sm:$0xff]  ;;  %v3892_v56 = vld [vmem:[#allocation12 + $0x28] sm:$0xff]  ;;  %s6317_s0 = sld [smem:[#allocation31_spill]]  ;;  %s6177_s4 = scalar_lea.vmem [#allocation21], %s3498_s7 }
  0x7c   : > { %923 = vmatpush.bf16.msra.mxu0 %v3894_v53  ;;  %v3891_v57 = vld [vmem:[#allocation12 + $0x20] sm:$0xff]  ;;  %v3890_v60 = vld [vmem:[#allocation12 + $0x18] sm:$0xff]  ;;  %v3889_v62 = vld [vmem:[#allocation12 + $0x10] sm:$0xff]  ;;  %s6318_s19 = sld [smem:[#allocation32_spill]]  ;;  %s3262_s8 = scalar_lea.sflag [#allocation5], %s5170_s28 }
  0x7d   : > { %v3568_v63 = vld [vmem:[#allocation14 + $0x30] sm:$0xf]  ;;  %v3888_v3 = vld [vmem:[#allocation12 + $0x8] sm:$0xff]  ;;  %v3899_v16 = vld [vmem:[#allocation14 + $0x24] sm:$0xf] }
  0x7e   : > { %v1021_v8 = vld [vmem:[%s6306_s9] sm:$0xf] }
  0x7f   : > { %v5217_v9 = vperm.slane %v1021_v8, 2  ;;  %v5219_v10 = vperm.slane %v1021_v8, 3  ;;  %v5221_v11 = vperm.slane %v1021_v8, 0  ;;  %v5229_v12 = vperm.slane %v1021_v8, 1 }
  0x80   : > { %v4204_v14 = vpop.eup %4203  ;;  %924 = vmatpush.bf16.msra.mxu0 %v3893_v54 }
  0x81   : > { %705 = vadd.xlane.f32.xlu2 %v694_v5  ;;  %701 = vadd.xlane.f32.xlu1 %v692_v6  ;;  %v708_v15 = vmul.f32 128.0, %v4204_v14  ;;  %v4206_v18 = vpop.eup %4205  ;;  %vm712_vm1 = vweird.f32 %v4204_v14  ;;  %s3881_s13 = sshll.u32 %s6317_s0, 2 }
  0x82   : > { %v808_v20 = vmul.f32 64.0, %v4206_v18  ;;  %vm812_vm2 = vweird.f32 %v4206_v18  ;;  %s3882_s7 = sshll.u32 %s6318_s19, 3 }
  0x83   : > { %805 = vadd.xlane.f32.xlu0 %v804_v7  ;;  %v709_v17 = vsub.f32 1.0, %v708_v15  ;;  %v3900_v15 = vld [vmem:[#allocation14 + $0x24] sm:$0xf0]  ;;  %s3273_s12 = sadd.s32 %s3882_s7, %s3881_s13 }
  0x84   : > { %v809_v22 = vsub.f32 1.0, %v808_v20  ;;  %925 = vmatpush.bf16.msra.mxu0 %v3892_v56  ;;  %s3883_s24 = sshll.u32 %s3273_s12, 3 }
  0x85   : > { %v710_v19 = vmul.f32 %v4204_v14, %v709_v17 }
  0x86   : > { %v810_v24 = vmul.f32 %v4206_v18, %v809_v22 }
  0x87   : > { %v711_v21 = vadd.f32 %v4204_v14, %v710_v19  ;;  %v3887_v19 = vld [vmem:[#allocation12] sm:$0xff] }
  0x88   : > { %v811_v30 = vadd.f32 %v4206_v18, %v810_v24  ;;  %926 = vmatpush.bf16.msra.mxu0 %v3891_v57  ;;  %v3552_v24 = vld [vmem:[#allocation14 + $0x10] sm:$0xf] }
  0x89   : > { %v5235_v23 = vsel %vm712_vm1, %v4204_v14, %v711_v21  ;;  %v3560_v14 = vld [vmem:[#allocation14 + $0x20] sm:$0xf]  ;;  %v3562_v21 = vld [vmem:[#allocation14 + $0x28] sm:$0xf0] }
  0x8a   : > { %v5247_v35 = vsel %vm812_vm2, %v4206_v18, %v811_v30  ;;  %v3561_v20 = vor.u32 %v3900_v15, %v3560_v14  ;;  %v3565_v22 = vor.u32 %v3899_v16, %v3562_v21 }
  0x8c   : > { %927 = vmatpush.bf16.msra.mxu0 %v3890_v60 }
  0x90   : > { %928 = vmatpush.bf16.msra.mxu0 %v3889_v62 }
  0x94   : > { %929 = vmatpush.bf16.msra.mxu0 %v3888_v3 }
  0x97   : > { %1483 = vrot.lane.b32.xlu0 %v5217_v9, %s4870_s27 }
  0x98   : > { %930 = vmatpush.bf16.msra.mxu0 %v3887_v19 }
  0x99   : > { %1489 = vrot.lane.b32.xlu2 %v5219_v10, %s4870_s27 }
  0x9a   : > { %1407 = vrot.lane.b32.xlu1 %v5221_v11, %s4870_s27 }
  0x9f   : > { %2151 = vrot.lane.b32.xlu0 %v5217_v9, %s4871_s26 }
  0xa2   : > { %1415 = vrot.lane.b32.xlu1 %v5229_v12, %s4870_s27 }
  0xec   : > { %v704_v25 = vpop.xlane.xlu2 %703  ;;  %v700_v26 = vpop.xlane.xlu1 %699 }
  0xed   : > { %v716_v27 = vmul.f32 %v5235_v23, %v704_v25  ;;  %v714_v28 = vmul.f32 %v5235_v23, %v700_v26  ;;  %v3898_v25 = vld [vmem:[#allocation14 + $0x14] sm:$0xf0]  ;;  %v3897_v26 = vld [vmem:[#allocation14 + $0x14] sm:$0xf] }
  0xee   : > { %v803_v29 = vpop.xlane.xlu0 %802 }
  0xef   : > { %v5239_v31 = vsub.f32 %v693_v0, %v716_v27  ;;  %v5241_v32 = vsub.f32 %v691_v1, %v714_v28  ;;  %v814_v36 = vmul.f32 %v5247_v35, %v803_v29  ;;  %v3902_v0 = vld [vmem:[#allocation14 + $0x34] sm:$0xf0]  ;;  %v3901_v1 = vld [vmem:[#allocation14 + $0x34] sm:$0xf]  ;;  %v3553_v28 = vor.u32 %v3898_v25, %v3552_v24  ;;  %v3554_v29 = vld [vmem:[#allocation14 + $0x18] sm:$0xf0] }
  0xf1   : > { %v724_v33 = vmul.f32 %v5239_v31, %v5239_v31  ;;  %v722_v34 = vmul.f32 %v5241_v32, %v5241_v32  ;;  %v5257_v45 = vsub.f32 %v695_v2, %v814_v36  ;;  %v3544_v36 = vld [vmem:[#allocation14] sm:$0xf] }
  0xf3   : > { %730 = vadd.xlane.f32.xlu1 %v724_v33  ;;  %726 = vadd.xlane.f32.xlu2 %v722_v34  ;;  %v818_v51 = vmul.f32 %v5257_v45, %v5257_v45  ;;  %v3557_v34 = vor.u32 %v3897_v26, %v3554_v29 }
  0xf4   : > { %v706_v37 = vpop.xlane.xlu2 %705  ;;  %v702_v38 = vpop.xlane.xlu1 %701 }
  0xf5   : > { %v717_v39 = vmul.f32 %v5235_v23, %v706_v37  ;;  %v715_v40 = vmul.f32 %v5235_v23, %v702_v38  ;;  %v820_v52 = vsel %vm800_vm0, %v818_v51, 0.0  ;;  %v3896_v37 = vld [vmem:[#allocation14 + $0x4] sm:$0xf0]  ;;  %v3895_v38 = vld [vmem:[#allocation14 + $0x4] sm:$0xf] }
  0xf6   : > { %v806_v41 = vpop.xlane.xlu0 %805 }
  0xf7   : > { %v815_v42 = vmul.f32 %v5247_v35, %v806_v41  ;;  %v5253_v43 = vsub.f32 %v694_v5, %v717_v39  ;;  %v5255_v44 = vsub.f32 %v692_v6, %v715_v40  ;;  %v3570_v5 = vld [vmem:[#allocation14 + $0x38] sm:$0xf0]  ;;  %v3545_v41 = vor.u32 %v3896_v37, %v3544_v36 }
  0xf8   : > { %v3573_v8 = vor.u32 %v3901_v1, %v3570_v5 }
  0xf9   : > { %v5259_v46 = vsub.f32 %v696_v4, %v815_v42  ;;  %v725_v47 = vmul.f32 %v5253_v43, %v5253_v43  ;;  %v723_v48 = vmul.f32 %v5255_v44, %v5255_v44  ;;  %v3569_v4 = vor.u32 %v3902_v0, %v3568_v63  ;;  %v3546_v42 = vld [vmem:[#allocation14 + $0x8] sm:$0xf0] }
  0xfa   : > { %1011 = vmatpush.bf16.msra.mxu2 %v3573_v8 }
  0xfb   : > { %v819_v49 = vmul.f32 %v5259_v46, %v5259_v46  ;;  %732 = vadd.xlane.f32.xlu2 %v725_v47  ;;  %728 = vadd.xlane.f32.xlu0 %v723_v48 }
  0xfc   : > { %v5277_v61 = vpop.permute.xlu2 %1489  ;;  %997 = vmatpush.bf16.msra.mxu1 %v3569_v4 }
  0xfd   : > { %v823_v50 = vsel %vm800_vm0, %v819_v49, 0.0 }
  0xfe   : > { %824 = vadd.xlane.f32.xlu1 %v823_v50  ;;  %1012 = vmatpush.bf16.msra.mxu2 %v3565_v22 }
 0x100   : > { %998 = vmatpush.bf16.msra.mxu1 %v3561_v20 }
 0x102   : > { %1013 = vmatpush.bf16.msra.mxu2 %v3557_v34 }
 0x103   : > { %821 = vadd.xlane.f32.xlu0 %v820_v52  ;;  %v3549_v52 = vor.u32 %v3895_v38, %v3546_v42 }
 0x104   : > { %999 = vmatpush.bf16.msra.mxu1 %v3553_v28  ;;  %v4195_v28 = vld [vmem:[#allocation8] ss:$0 sm:$0xff] }
 0x106   : > { %1014 = vmatpush.bf16.msra.mxu2 %v3549_v52 }
 0x108   : > { %1000 = vmatpush.bf16.msra.mxu1 %v3545_v41 }
 0x109   : > { %v5273_v58 = vpop.permute.xlu0 %1483 }
 0x10c   : > { %v5271_v55 = vpop.permute.xlu1 %1407 }
 0x111   : > { %v5279_v2 = vpop.permute.xlu0 %2151 }
 0x114   : > { %v5275_v59 = vpop.permute.xlu1 %1415 }
 0x166   : > { %v727_v6 = vpop.xlane.xlu2 %726  ;;  %v731_v7 = vpop.xlane.xlu1 %730 }
 0x167   : > { %v734_v13 = vmul.f32 %v727_v6, %v5235_v23  ;;  %v736_v18 = vmul.f32 %v731_v7, %v5235_v23 }
 0x169   : > { %v738_v17 = vadd.f32 1e-06, %v734_v13  ;;  %v5283_v27 = vadd.f32 1e-06, %v736_v18 }
 0x16b   : > { %4207 = vrsqrt.f32 %v738_v17  ;;  %vm748_vm4 = vweird.f32 %v738_v17  ;;  %vm768_vm1 = vweird.f32 %v5283_v27 }
 0x16c   : > { %4209 = vrsqrt.f32 %v5283_v27 }
 0x16e   : > { %v733_v30 = vpop.xlane.xlu2 %732  ;;  %v729_v33 = vpop.xlane.xlu0 %728 }
 0x16f   : > { %v737_v39 = vmul.f32 %v733_v30, %v5235_v23  ;;  %v735_v40 = vmul.f32 %v729_v33, %v5235_v23 }
 0x171   : > { %v825_v47 = vpop.xlane.xlu1 %824  ;;  %v4208_v48 = vpop.eup %4207  ;;  %v5287_v49 = vadd.f32 1e-06, %v737_v39  ;;  %v739_v50 = vadd.f32 1e-06, %v735_v40 }
 0x172   : > { %v827_v51 = vmul.f32 %v825_v47, %v5247_v35  ;;  %v743_v53 = vmul.f32 %v4208_v48, %v738_v17  ;;  %v5293_v63 = vpop.eup %4209  ;;  %vm749_vm3 = vweird.f32 %v4208_v48 }
 0x173   : > { %4211 = vrsqrt.f32 %v5287_v49  ;;  %v763_v7 = vmul.f32 %v5293_v63, %v5283_v27  ;;  %vm750_vm5 = vmor %vm748_vm4, %vm749_vm3  ;;  %vm758_vm9 = vweird.f32 %v739_v50  ;;  %vm778_vm14 = vweird.f32 %v5287_v49 }
 0x174   : > { %v744_v54 = vmul.f32 %v4208_v48, %v743_v53  ;;  %4213 = vrsqrt.f32 %v739_v50  ;;  %v829_v56 = vadd.f32 1e-06, %v827_v51  ;;  %vm769_vm2 = vweird.f32 %v5293_v63  ;;  %v4197_v53 = vld [vmem:[#allocation9] ss:$0 sm:$0xff] }
 0x175   : > { %v764_v16 = vmul.f32 %v5293_v63, %v763_v7 }
 0x176   : > { %v745_v57 = vmul.f32 0.5, %v744_v54  ;;  %4215 = vrsqrt.f32 %v829_v56  ;;  %v822_v60 = vpop.xlane.xlu0 %821  ;;  %vm846_vm7 = vweird.f32 %v829_v56 }
 0x177   : > { %v826_v62 = vmul.f32 %v822_v60, %v5247_v35  ;;  %v765_v29 = vmul.f32 0.5, %v764_v16 }
 0x178   : > { %v746_v0 = vsub.f32 1.5, %v745_v57 }
 0x179   : > { %v5295_v1 = vpop.eup %4211  ;;  %v828_v3 = vadd.f32 1e-06, %v826_v62  ;;  %v766_v47 = vsub.f32 1.5, %v765_v29 }
 0x17a   : > { %v4214_v4 = vpop.eup %4213  ;;  %v773_v5 = vmul.f32 %v5295_v1, %v5287_v49  ;;  %v747_v6 = vmul.f32 %v4208_v48, %v746_v0  ;;  %vm779_vm15 = vweird.f32 %v5295_v1 }
 0x17b   : > { %v753_v8 = vmul.f32 %v4214_v4, %v739_v50  ;;  %4217 = vrsqrt.f32 %v828_v3  ;;  %vm759_vm6 = vweird.f32 %v4214_v4  ;;  %vm836_vm12 = vweird.f32 %v828_v3  ;;  %vm780_vm4 = vmor %vm778_vm14, %vm779_vm15 }
 0x17c   : > { %v4216_v13 = vpop.eup %4215  ;;  %v774_v35 = vmul.f32 %v5295_v1, %v773_v5  ;;  %v751_v20 = vsel %vm750_vm5, %v4208_v48, %v747_v6  ;;  %vm760_vm10 = vmor %vm758_vm9, %vm759_vm6  ;;  %v767_v57 = vmul.f32 %v5293_v63, %v766_v47  ;;  %vm1022_vm6 = vcmask 261120  }
 0x17d   : > { %v754_v14 = vmul.f32 %v4214_v4, %v753_v8  ;;  %v841_v15 = vmul.f32 %v4216_v13, %v829_v56  ;;  %vm847_vm8 = vweird.f32 %v4216_v13  ;;  %v782_v17 = vmul.f32 %v751_v20, %v5241_v32  ;;  %v4196_v32 = vld [vmem:[#allocation8 + $0x1] ss:$0 sm:$0xff]  ;;  %vm770_vm5 = vmor %vm768_vm1, %vm769_vm2 }
 0x17e   : > { %v775_v22 = vmul.f32 0.5, %v774_v35  ;;  %vm5304_vm11 = vmor %vm846_vm7, %vm847_vm8 }
 0x17f   : > { %v755_v18 = vmul.f32 0.5, %v754_v14  ;;  %v842_v19 = vmul.f32 %v4216_v13, %v841_v15  ;;  %v787_v42 = vmul.f32 %v4195_v28, %v782_v17 }
 0x180   : > { %v776_v37 = vsub.f32 1.5, %v775_v22 }
 0x181   : > { %v4218_v21 = vpop.eup %4217  ;;  %v756_v24 = vsub.f32 1.5, %v755_v18  ;;  %v843_v25 = vmul.f32 0.5, %v842_v19  ;;  %v792_v54 = vadd.f32 %v4196_v32, %v787_v42 }
 0x182   : > { %v831_v26 = vmul.f32 %v4218_v21, %v828_v3  ;;  %vm837_vm13 = vweird.f32 %v4218_v21  ;;  %v777_v52 = vmul.f32 %v5295_v1, %v776_v37  ;;  %v771_v3 = vsel %vm770_vm5, %v5293_v63, %v767_v57 }
 0x183   : > { %v757_v30 = vmul.f32 %v4214_v4, %v756_v24  ;;  %v844_v33 = vsub.f32 1.5, %v843_v25  ;;  %vm838_vm3 = vmor %vm836_vm12, %vm837_vm13 }
 0x184   : > { %v832_v36 = vmul.f32 %v4218_v21, %v831_v26  ;;  %v781_v5 = vsel %vm780_vm4, %v5295_v1, %v777_v52 }
 0x185   : > { %v845_v38 = vmul.f32 %v4216_v13, %v844_v33  ;;  %v761_v39 = vsel %vm760_vm10, %v4214_v4, %v757_v30  ;;  %v4198_v4 = vld [vmem:[#allocation9 + $0x1] ss:$0 sm:$0xff]  ;;  %v785_v6 = vmul.f32 %v781_v5, %v5253_v43  ;;  %v4875_v30 = vmov 32.0  }
 0x186   : > { %v833_v40 = vmul.f32 0.5, %v832_v36  ;;  %v783_v41 = vmul.f32 %v761_v39, %v5255_v44  ;;  %4219 = vrcp.f32 %v4875_v30 }
 0x187   : > { %v849_v48 = vsel %vm5304_vm11, %v4216_v13, %v845_v38  ;;  %v784_v13 = vmul.f32 %v771_v3, %v5239_v31  ;;  %v790_v14 = vmul.f32 %v4195_v28, %v785_v6 }
 0x188   : > { %v834_v50 = vsub.f32 1.5, %v833_v40  ;;  %v788_v51 = vmul.f32 %v4195_v28, %v783_v41  ;;  %v851_v44 = vmul.f32 %v849_v48, %v5259_v46 }
 0x189   : > { %v795_v15 = vadd.f32 %v4196_v32, %v790_v14 }
 0x18a   : > { %v835_v49 = vmul.f32 %v4218_v21, %v834_v50  ;;  %v793_v56 = vadd.f32 %v4196_v32, %v788_v51  ;;  %v854_v0 = vmul.f32 %v4197_v53, %v851_v44 }
 0x18c   : > { %v839_v60 = vsel %vm838_vm3, %v4218_v21, %v835_v49  ;;  %v796_v62 = vpack.c.bf16 %v793_v56, %v792_v54  ;;  %v857_v8 = vadd.f32 %v4198_v4, %v854_v0  ;;  %v4220_v34 = vpop.eup %4219 }
 0x18d   : > { %v850_v27 = vmul.f32 %v839_v60, %v5257_v45  ;;  %v789_v45 = vmul.f32 %v4195_v28, %v784_v13  ;;  %v1036_v36 = vmul.f32 32.0, %v4220_v34 }
 0x18e   : > { %931 = vmatmul.bf16.vlgmr.msra.gmra.mxu0 %v796_v62 }
 0x18f   : > { %v853_v46 = vmul.f32 %v4197_v53, %v850_v27  ;;  %v794_v16 = vadd.f32 %v4196_v32, %v789_v45  ;;  %v1037_v37 = vsub.f32 1.0, %v1036_v36 }
 0x191   : > { %v856_v7 = vadd.f32 %v4198_v4, %v853_v46  ;;  %v797_v1 = vpack.c.bf16 %v795_v15, %v794_v16  ;;  %v1038_v40 = vmul.f32 %v4220_v34, %v1037_v37 }
 0x193   : > { %v858_v35 = vpack.c.bf16 %v857_v8, %v856_v7  ;;  %v1039_v42 = vadd.f32 %v4220_v34, %v1038_v40 }
 0x195   : > { %3574 = vmatmul.msk.bf16.vlgmr.msra.gmra.mxu1 %vm800_vm0, %v858_v35  ;;  %3575 = vmatmul.msk.bf16.vlgmr.msra.gmra.mxu2 %vm800_vm0, %v858_v35  ;;  %vm1040_vm0 = vweird.f32 %v4220_v34 }
 0x196   : > { %v5389_v47 = vsel %vm1040_vm0, %v4220_v34, %v1039_v42 }
 0x19e   : > { %936 = vmatmul.bf16.gmra.mxu0 %v797_v1 }
 0x20b   : > { %v5326_v18 = vpop.f32.mrf.mxu0 }
 0x20c   : > { %1630 = vrot.lane.b32.xlu0 %v5326_v18, %s4874_s11  ;;  %1290 = vrot.lane.b32.xlu2 %v5326_v18, %s4871_s26  ;;  %v1023_v24 = vsel %vm1022_vm6, %v5326_v18, 0.0 }
 0x212   : > { %v5332_v31 = vpop.f32.mrf.mxu1 }
 0x213   : > { %v1128_v43 = vsel %vm1022_vm6, %v5332_v31, 0.0  ;;  %v5342_v21 = vpop.f32.mrf.mxu0 }
 0x214   : > { %1963 = vrot.lane.b32.xlu2 %v5326_v18, %s4870_s27  ;;  %1129 = vadd.xlane.f32.xlu1 %v1128_v43  ;;  %v1026_v25 = vsel %vm1022_vm6, %v5342_v21, 0.0 }
 0x218   : > { %v1016_v63 = vpop.f32.mrf.mxu2 }
 0x21a   : > { %v5349_v22 = vpop.f32.mrf.mxu1 }
 0x21b   : > { %v5363_v26 = vpop.f32.mrf.mxu0  ;;  %v1131_v29 = vsel %vm1022_vm6, %v5349_v22, 0.0 }
 0x21c   : > { %1760 = vrot.lane.b32.xlu2 %v5332_v31, %s4874_s11  ;;  %v1029_v17 = vsel %vm1022_vm6, %v5363_v26, 0.0 }
 0x220   : > { %v1018_v19 = vpop.f32.mrf.mxu2 }
 0x221   : > { %v5340_v20 = vpack.c.bf16 %v1018_v19, %v1016_v63 }
 0x223   : > { %1270 = vmatpush.bf16.msrb.mxu1 %v5340_v20  ;;  %v5373_v28 = vpop.f32.mrf.mxu0 }
 0x224   : > { %1965 = vrot.lane.b32.xlu2 %v5342_v21, %s4870_s27  ;;  %v1032_v46 = vsel %vm1022_vm6, %v5373_v28, 0.0 }
 0x22d   : > { %1632 = vrot.lane.b32.xlu1 %v5342_v21, %s4874_s11 }
 0x235   : > { %1426 = vrot.lane.b32.xlu1 %v5349_v22, %s4871_s26 }
 0x236   : > { %1024 = vadd.xlane.f32.xlu0 %v1023_v24 }
 0x24a   : > { %1424 = vrot.lane.b32.xlu0 %v5332_v31, %s4871_s26 }
 0x24d   : > { %1027 = vadd.xlane.f32.xlu2 %v1026_v25 }
 0x252   : > { %2093 = vrot.lane.b32.xlu0 %v5332_v31, %s4870_s27 }
 0x25a   : > { %1292 = vrot.lane.b32.xlu0 %v5342_v21, %s4871_s26 }
 0x25f   : > { %1030 = vadd.xlane.f32.xlu1 %v1029_v17 }
 0x265   : > { %2095 = vrot.lane.b32.xlu2 %v5349_v22, %s4870_s27 }
 0x266   : > { %v1291_v33 = vpop.permute.xlu2 %1290 }
 0x267   : > { %v1302_v32 = vsel %vm1022_vm6, %v1291_v33, 0.0 }
 0x26d   : > { %1762 = vrot.lane.b32.xlu2 %v5349_v22, %s4874_s11 }
 0x26e   : > { %v1964_v38 = vpop.permute.xlu2 %1963 }
 0x26f   : > { %v1975_v41 = vsel %vm1022_vm6, %v1964_v38, 0.0 }
 0x275   : > { %1294 = vrot.lane.b32.xlu2 %v5363_v26, %s4871_s26 }
 0x276   : > { %v1761_v44 = vpop.permute.xlu2 %1760 }
 0x277   : > { %v1766_v35 = vsel %vm1022_vm6, %v1761_v44, 0.0 }
 0x278   : > { %1296 = vrot.lane.b32.xlu1 %v5373_v28, %s4871_s26 }
 0x27d   : > { %1636 = vrot.lane.b32.xlu2 %v5373_v28, %s4874_s11 }
 0x27e   : > { %v1631_v39 = vpop.permute.xlu0 %1630  ;;  %v1966_v54 = vpop.permute.xlu2 %1965 }
 0x27f   : > { %v1642_v52 = vsel %vm1022_vm6, %v1631_v39, 0.0  ;;  %v1978_v3 = vsel %vm1022_vm6, %v1966_v54, 0.0 }
 0x284   : > { %1132 = vadd.xlane.f32.xlu0 %v1131_v29 }
 0x287   : > { %v1130_v8 = vpop.xlane.xlu1 %1129 }
 0x288   : > { %v1134_v1 = vmul.f32 %v1130_v8, %v5389_v47 }
 0x28a   : > { %v5412_v63 = vsub.f32 %v5332_v31, %v1134_v1 }
 0x28c   : > { %v1138_v24 = vmul.f32 %v5412_v63, %v5412_v63 }
 0x28e   : > { %v1140_v29 = vsel %vm1022_vm6, %v1138_v24, 0.0 }
 0x298   : > { %1967 = vrot.lane.b32.xlu0 %v5363_v26, %s4870_s27 }
 0x29f   : > { %v1633_v45 = vpop.permute.xlu1 %1632 }
 0x2a0   : > { %1634 = vrot.lane.b32.xlu0 %v5363_v26, %s4874_s11  ;;  %v1645_v16 = vsel %vm1022_vm6, %v1633_v45, 0.0 }
 0x2a2   : > { %1976 = vadd.xlane.f32.xlu1 %v1975_v41 }
 0x2a6   : > { %1303 = vadd.xlane.f32.xlu2 %v1302_v32 }
 0x2a7   : > { %v1427_v43 = vpop.permute.xlu1 %1426 }
 0x2a8   : > { %1969 = vrot.lane.b32.xlu0 %v5373_v28, %s4870_s27  ;;  %v1433_v19 = vsel %vm1022_vm6, %v1427_v43, 0.0 }
 0x2a9   : > { %v1025_v48 = vpop.xlane.xlu0 %1024 }
 0x2aa   : > { %v1042_v50 = vmul.f32 %v5389_v47, %v1025_v48 }
 0x2ac   : > { %v5393_v51 = vsub.f32 %v5326_v18, %v1042_v50 }
 0x2ae   : > { %1643 = vadd.xlane.f32.xlu2 %v1642_v52  ;;  %v1050_v53 = vmul.f32 %v5393_v51, %v5393_v51 }
 0x2b0   : > { %v1054_v49 = vsel %vm1022_vm6, %v1050_v53, 0.0 }
 0x2b6   : > { %1055 = vadd.xlane.f32.xlu2 %v1054_v49 }
 0x2bc   : > { %v1425_v56 = vpop.permute.xlu0 %1424 }
 0x2bd   : > { %v1430_v57 = vsel %vm1022_vm6, %v1425_v56, 0.0 }
 0x2be   : > { %1431 = vadd.xlane.f32.xlu1 %v1430_v57 }
 0x2c0   : > { %v1028_v60 = vpop.xlane.xlu2 %1027 }
 0x2c1   : > { %v1043_v41 = vmul.f32 %v5389_v47, %v1028_v60 }
 0x2c3   : > { %v5431_v32 = vsub.f32 %v5342_v21, %v1043_v41 }
 0x2c4   : > { %v2094_v62 = vpop.permute.xlu0 %2093 }
 0x2c5   : > { %v2099_v7 = vsel %vm1022_vm6, %v2094_v62, 0.0  ;;  %v1051_v50 = vmul.f32 %v5431_v32, %v5431_v32 }
 0x2c7   : > { %v1057_v44 = vsel %vm1022_vm6, %v1051_v50, 0.0 }
 0x2c8   : > { %v2096_v27 = vpop.permute.xlu2 %2095 }
 0x2c9   : > { %v2102_v0 = vsel %vm1022_vm6, %v2096_v27, 0.0 }
 0x2ca   : > { %2103 = vadd.xlane.f32.xlu2 %v2102_v0 }
 0x2cc   : > { %v1293_v4 = vpop.permute.xlu0 %1292 }
 0x2cd   : > { %v1305_v5 = vsel %vm1022_vm6, %v1293_v4, 0.0 }
 0x2ce   : > { %1306 = vadd.xlane.f32.xlu1 %v1305_v5 }
 0x2d0   : > { %v1763_v6 = vpop.permute.xlu2 %1762 }
 0x2d1   : > { %v1769_v13 = vsel %vm1022_vm6, %v1763_v6, 0.0 }
 0x2d2   : > { %1033 = vadd.xlane.f32.xlu0 %v1032_v46  ;;  %v5422_v33 = vpop.xlane.xlu1 %1030 }
 0x2d6   : > { %1979 = vadd.xlane.f32.xlu1 %v1978_v3 }
 0x2d8   : > { %v1295_v14 = vpop.permute.xlu2 %1294 }
 0x2d9   : > { %v1308_v15 = vsel %vm1022_vm6, %v1295_v14, 0.0 }
 0x2da   : > { %2100 = vadd.xlane.f32.xlu0 %v2099_v7 }
 0x2de   : > { %1770 = vadd.xlane.f32.xlu1 %v1769_v13 }
 0x2e0   : > { %v1637_v49 = vpop.permute.xlu2 %1636 }
 0x2e1   : > { %v1651_v54 = vsel %vm1022_vm6, %v1637_v49, 0.0 }
 0x2e2   : > { %1767 = vadd.xlane.f32.xlu0 %v1766_v35 }
 0x2e6   : > { %1309 = vadd.xlane.f32.xlu1 %v1308_v15 }
 0x2ea   : > { %1646 = vadd.xlane.f32.xlu0 %v1645_v16  ;;  %v1297_v37 = vpop.permute.xlu1 %1296 }
 0x2eb   : > { %v1311_v38 = vsel %vm1022_vm6, %v1297_v37, 0.0 }
 0x2f2   : > { %1434 = vadd.xlane.f32.xlu0 %v1433_v19 }
 0x2f7   : > { %v1133_v25 = vpop.xlane.xlu0 %1132 }
 0x2f8   : > { %v1135_v17 = vmul.f32 %v1133_v25, %v5389_v47 }
 0x2fa   : > { %v5420_v30 = vsub.f32 %v5349_v22, %v1135_v17  ;;  %1141 = vadd.xlane.f32.xlu0 %v1140_v29 }
 0x2fc   : > { %v1139_v34 = vmul.f32 %v5420_v30, %v5420_v30 }
 0x2fe   : > { %v1143_v36 = vsel %vm1022_vm6, %v1139_v34, 0.0 }
 0x2ff   : > { %1144 = vadd.xlane.f32.xlu2 %v1143_v36 }
 0x307   : > { %1312 = vadd.xlane.f32.xlu2 %v1311_v38 }
 0x30a   : > { %v1968_v39 = vpop.permute.xlu0 %1967 }
 0x30b   : > { %v1981_v40 = vsel %vm1022_vm6, %v1968_v39, 0.0 }
 0x30c   : > { %1982 = vadd.xlane.f32.xlu1 %v1981_v40 }
 0x312   : > { %v1635_v42 = vpop.permute.xlu0 %1634 }
 0x313   : > { %v1648_v48 = vsel %vm1022_vm6, %v1635_v42, 0.0 }
 0x314   : > { %1649 = vadd.xlane.f32.xlu0 %v1648_v48 }
 0x315   : > { %v1977_v60 = vpop.xlane.xlu1 %1976 }
 0x316   : > { %v1987_v62 = vmul.f32 %v1977_v60, %v5389_v47 }
 0x318   : > { %v5445_v4 = vsub.f32 %v5326_v18, %v1987_v62 }
 0x319   : > { %v1304_v56 = vpop.xlane.xlu2 %1303 }
 0x31a   : > { %v1970_v52 = vpop.permute.xlu0 %1969  ;;  %v1314_v57 = vmul.f32 %v1304_v56, %v5389_v47  ;;  %v1995_v3 = vmul.f32 %v5445_v4, %v5445_v4 }
 0x31b   : > { %v1984_v53 = vsel %vm1022_vm6, %v1970_v52, 0.0 }
 0x31c   : > { %1058 = vadd.xlane.f32.xlu0 %v1057_v44  ;;  %1985 = vadd.xlane.f32.xlu2 %v1984_v53  ;;  %v5442_v27 = vsub.f32 %v5326_v18, %v1314_v57 }
 0x31e   : > { %v1322_v5 = vmul.f32 %v5442_v27, %v5442_v27 }
 0x321   : > { %v1644_v0 = vpop.xlane.xlu2 %1643 }
 0x322   : > { %v1654_v46 = vmul.f32 %v1644_v0, %v5389_v47 }
 0x324   : > { %1652 = vadd.xlane.f32.xlu0 %v1651_v54  ;;  %v5455_v7 = vsub.f32 %v5326_v18, %v1654_v46 }
 0x326   : > { %v1662_v35 = vmul.f32 %v5455_v7, %v5455_v7 }
 0x329   : > { %v5457_v8 = vpop.xlane.xlu2 %1055 }
 0x331   : > { %v1432_v6 = vpop.xlane.xlu1 %1431 }
 0x332   : > { %v1436_v13 = vmul.f32 %v1432_v6, %v5389_v47 }
 0x334   : > { %1330 = vrot.lane.b32.xlu2 %v1322_v5, %s4871_s26  ;;  %v5464_v45 = vsub.f32 %v5332_v31, %v1436_v13 }
 0x336   : > { %v1440_v24 = vmul.f32 %v5464_v45, %v5464_v45 }
 0x338   : > { %2003 = vrot.lane.b32.xlu0 %v1995_v3, %s4870_s27 }
 0x33d   : > { %v2104_v16 = vpop.xlane.xlu2 %2103 }
 0x33e   : > { %v2106_v43 = vmul.f32 %v2104_v16, %v5389_v47 }
 0x340   : > { %1670 = vrot.lane.b32.xlu0 %v1662_v35, %s4874_s11  ;;  %v5480_v17 = vsub.f32 %v5349_v22, %v2106_v43 }
 0x341   : > { %v1307_v14 = vpop.xlane.xlu1 %1306 }
 0x342   : > { %v1315_v15 = vmul.f32 %v1307_v14, %v5389_v47  ;;  %v2110_v39 = vmul.f32 %v5480_v17, %v5480_v17 }
 0x344   : > { %v5468_v1 = vsub.f32 %v5342_v21, %v1315_v15 }
 0x345   : > { %v5470_v18 = vpop.xlane.xlu0 %1033 }
 0x346   : > { %v1323_v19 = vmul.f32 %v5468_v1, %v5468_v1 }
 0x348   : > { %1332 = vrot.lane.b32.xlu1 %v1323_v19, %s4871_s26  ;;  %1444 = vrot.lane.b32.xlu0 %v1440_v24, %s4871_s26 }
 0x349   : > { %v1980_v25 = vpop.xlane.xlu1 %1979 }
 0x34a   : > { %v1988_v29 = vmul.f32 %v1980_v25, %v5389_v47  ;;  %v1066_v25 = vmul.f32 %v5457_v8, %v5389_v47 }
 0x34c   : > { %v5484_v34 = vsub.f32 %v5342_v21, %v1988_v29 }
 0x34d   : > { %v2101_v36 = vpop.xlane.xlu0 %2100 }
 0x34e   : > { %v2105_v37 = vmul.f32 %v2101_v36, %v5389_v47  ;;  %v1996_v38 = vmul.f32 %v5484_v34, %v5484_v34 }
 0x350   : > { %v5492_v40 = vsub.f32 %v5332_v31, %v2105_v37  ;;  %2005 = vrot.lane.b32.xlu1 %v1996_v38, %s4870_s27  ;;  %2115 = vrot.lane.b32.xlu0 %v2110_v39, %s4870_s27 }
 0x351   : > { %v1771_v41 = vpop.xlane.xlu1 %1770 }
 0x352   : > { %v1773_v42 = vmul.f32 %v1771_v41, %v5389_v47  ;;  %v2109_v48 = vmul.f32 %v5492_v40, %v5492_v40 }
 0x354   : > { %v5500_v50 = vsub.f32 %v5349_v22, %v1773_v42  ;;  %2113 = vrot.lane.b32.xlu2 %v2109_v48, %s4870_s27  ;;  %v1070_v42 = vadd.f32 1e-06, %v1066_v25 }
 0x355   : > { %v1768_v52 = vpop.xlane.xlu0 %1767 }
 0x356   : > { %v1772_v44 = vmul.f32 %v1768_v52, %v5389_v47  ;;  %v1777_v53 = vmul.f32 %v5500_v50, %v5500_v50  ;;  %vm1080_vm14 = vweird.f32 %v1070_v42 }
 0x358   : > { %v5507_v49 = vsub.f32 %v5332_v31, %v1772_v44  ;;  %1782 = vrot.lane.b32.xlu0 %v1777_v53, %s4874_s11 }
 0x359   : > { %v1310_v5 = vpop.xlane.xlu1 %1309 }
 0x35a   : > { %v1776_v54 = vmul.f32 %v5507_v49, %v5507_v49  ;;  %v1316_v3 = vmul.f32 %v1310_v5, %v5389_v47 }
 0x35c   : > { %1780 = vrot.lane.b32.xlu2 %v1776_v54, %s4874_s11  ;;  %v5529_v13 = vsub.f32 %v5363_v26, %v1316_v3 }
 0x35d   : > { %v1647_v56 = vpop.xlane.xlu0 %1646 }
 0x35e   : > { %v1655_v57 = vmul.f32 %v1647_v56, %v5389_v47 }
 0x360   : > { %v5515_v60 = vsub.f32 %v5342_v21, %v1655_v57 }
 0x362   : > { %v1663_v62 = vmul.f32 %v5515_v60, %v5515_v60 }
 0x364   : > { %1672 = vrot.lane.b32.xlu1 %v1663_v62, %s4874_s11 }
 0x365   : > { %v1435_v31 = vpop.xlane.xlu0 %1434 }
 0x366   : > { %v1437_v0 = vmul.f32 %v1435_v31, %v5389_v47 }
 0x368   : > { %v5522_v46 = vsub.f32 %v5349_v22, %v1437_v0  ;;  %v1324_v22 = vmul.f32 %v5529_v13, %v5529_v13 }
 0x36a   : > { %v1441_v6 = vmul.f32 %v5522_v46, %v5522_v46 }
 0x36c   : > { %1446 = vrot.lane.b32.xlu1 %v1441_v6, %s4871_s26 }
 0x36d   : > { %v1142_v21 = vpop.xlane.xlu0 %1141 }
 0x36e   : > { %v1146_v35 = vmul.f32 %v1142_v21, %v5389_v47 }
 0x370   : > { %v1148_v14 = vadd.f32 1e-06, %v1146_v35 }
 0x372   : > { %4221 = vrsqrt.f32 %v1148_v14  ;;  %v1145_v15 = vpop.xlane.xlu2 %1144  ;;  %vm1156_vm8 = vweird.f32 %v1148_v14 }
 0x373   : > { %v1147_v16 = vmul.f32 %v1145_v15, %v5389_v47 }
 0x374   : > { %1334 = vrot.lane.b32.xlu1 %v1324_v22, %s4871_s26 }
 0x375   : > { %v1149_v43 = vadd.f32 1e-06, %v1147_v16 }
 0x377   : > { %4223 = vrsqrt.f32 %v1149_v43  ;;  %vm1166_vm11 = vweird.f32 %v1149_v43 }
 0x378   : > { %v4222_v19 = vpop.eup %4221  ;;  %4225 = vrsqrt.f32 %v1070_v42 }
 0x379   : > { %v1151_v24 = vmul.f32 %v4222_v19, %v1148_v14  ;;  %vm1157_vm7 = vweird.f32 %v4222_v19 }
 0x37a   : > { %v1313_v29 = vpop.xlane.xlu2 %1312  ;;  %vm1158_vm9 = vmor %vm1156_vm8, %vm1157_vm7 }
 0x37b   : > { %v1152_v36 = vmul.f32 %v4222_v19, %v1151_v24  ;;  %v1317_v37 = vmul.f32 %v1313_v29, %v5389_v47 }
 0x37d   : > { %v4224_v38 = vpop.eup %4223  ;;  %v1153_v39 = vmul.f32 0.5, %v1152_v36  ;;  %v5540_v41 = vsub.f32 %v5373_v28, %v1317_v37 }
 0x37e   : > { %v1161_v48 = vmul.f32 %v4224_v38, %v1149_v43  ;;  %vm1167_vm10 = vweird.f32 %v4224_v38  ;;  %v4226_v35 = vpop.eup %4225 }
 0x37f   : > { %v1154_v52 = vsub.f32 1.5, %v1153_v39  ;;  %v1983_v44 = vpop.xlane.xlu1 %1982  ;;  %v1325_v53 = vmul.f32 %v5540_v41, %v5540_v41  ;;  %vm1168_vm12 = vmor %vm1166_vm11, %vm1167_vm10  ;;  %v1075_v24 = vmul.f32 %v4226_v35, %v1070_v42  ;;  %vm1081_vm13 = vweird.f32 %v4226_v35 }
 0x380   : > { %v1162_v54 = vmul.f32 %v4224_v38, %v1161_v48  ;;  %v1989_v8 = vmul.f32 %v1983_v44, %v5389_v47  ;;  %vm1082_vm15 = vmor %vm1080_vm14, %vm1081_vm13 }
 0x381   : > { %v1155_v56 = vmul.f32 %v4222_v19, %v1154_v52  ;;  %1336 = vrot.lane.b32.xlu0 %v1325_v53, %s4871_s26  ;;  %v1076_v36 = vmul.f32 %v4226_v35, %v1075_v24 }
 0x382   : > { %v1163_v57 = vmul.f32 0.5, %v1162_v54  ;;  %v5547_v62 = vsub.f32 %v5363_v26, %v1989_v8 }
 0x383   : > { %v1159_v31 = vsel %vm1158_vm9, %v4222_v19, %v1155_v56  ;;  %v1077_v54 = vmul.f32 0.5, %v1076_v36 }
 0x384   : > { %v1164_v0 = vsub.f32 1.5, %v1163_v57  ;;  %v1997_v5 = vmul.f32 %v5547_v62, %v5547_v62  ;;  %v1170_v3 = vmul.f32 %v1159_v31, %v5412_v63 }
 0x385   : > { %v1078_v56 = vsub.f32 1.5, %v1077_v54 }
 0x386   : > { %v1165_v6 = vmul.f32 %v4224_v38, %v1164_v0  ;;  %2007 = vrot.lane.b32.xlu2 %v1997_v5, %s4870_s27  ;;  %v1173_v16 = vmul.f32 %v5217_v9, %v1170_v3 }
 0x387   : > { %v1650_v21 = vpop.xlane.xlu0 %1649  ;;  %v1079_v3 = vmul.f32 %v4226_v35, %v1078_v56 }
 0x388   : > { %v1656_v14 = vmul.f32 %v1650_v21, %v5389_v47  ;;  %v1169_v15 = vsel %vm1168_vm12, %v4224_v38, %v1165_v6  ;;  %v1176_v25 = vadd.f32 %v5219_v10, %v1173_v16 }
 0x389   : > { %v1171_v22 = vmul.f32 %v1169_v15, %v5420_v30  ;;  %v1083_v15 = vsel %vm1082_vm15, %v4226_v35, %v1079_v3 }
 0x38a   : > { %v5557_v19 = vsub.f32 %v5363_v26, %v1656_v14  ;;  %v1114_v24 = vmul.f32 %v1083_v15, %v5393_v51 }
 0x38b   : > { %v1174_v63 = vmul.f32 %v5217_v9, %v1171_v22 }
 0x38c   : > { %v1664_v43 = vmul.f32 %v5557_v19, %v5557_v19 }
 0x38d   : > { %v1177_v29 = vadd.f32 %v5219_v10, %v1174_v63 }
 0x38e   : > { %1674 = vrot.lane.b32.xlu1 %v1664_v43, %s4874_s11 }
 0x38f   : > { %v1986_v37 = vpop.xlane.xlu2 %1985  ;;  %v1059_v30 = vpop.xlane.xlu0 %1058  ;;  %v1180_v38 = vpack.c.bf16 %v1177_v29, %v1176_v25  ;;  %v1119_v29 = vmul.f32 %v5221_v11, %v1114_v24 }
 0x390   : > { %v1990_v39 = vmul.f32 %v1986_v37, %v5389_v47  ;;  %v1067_v48 = vmul.f32 %v1059_v30, %v5389_v47 }
 0x391   : > { %v1188_v52 = vsel %vm1022_vm6, %v1180_v38, 0  ;;  %v1124_v37 = vadd.f32 %v5229_v12, %v1119_v29 }
 0x392   : > { %v5569_v44 = vsub.f32 %v5373_v28, %v1990_v39  ;;  %v1071_v53 = vadd.f32 1e-06, %v1067_v48  ;;  %1197 = vmatpush.bf16.xpose.msra.mxu3 %v1188_v52 }
 0x394   : > { %4227 = vrsqrt.f32 %v1071_v53  ;;  %v1998_v8 = vmul.f32 %v5569_v44, %v5569_v44  ;;  %vm1090_vm2 = vweird.f32 %v1071_v53 }
 0x396   : > { %2009 = vrot.lane.b32.xlu0 %v1998_v8, %s4870_s27 }
 0x397   : > { %v1653_v57 = vpop.xlane.xlu0 %1652  ;;  %v1331_v51 = vpop.permute.xlu2 %1330 }
 0x398   : > { %v1657_v31 = vmul.f32 %v1653_v57, %v5389_v47  ;;  %v1342_v39 = vsel %vm1022_vm6, %v1331_v51, 0.0  ;;  %v1045_v57 = vmul.f32 %v5389_v47, %v5470_v18 }
 0x39a   : > { %v4228_v0 = vpop.eup %4227  ;;  %v5576_v5 = vsub.f32 %v5373_v28, %v1657_v31 }
 0x39b   : > { %v1085_v6 = vmul.f32 %v4228_v0, %v1071_v53  ;;  %vm1091_vm1 = vweird.f32 %v4228_v0 }
 0x39c   : > { %v1665_v21 = vmul.f32 %v5576_v5, %v5576_v5  ;;  %vm1092_vm3 = vmor %vm1090_vm2, %vm1091_vm1 }
 0x39d   : > { %v1086_v14 = vmul.f32 %v4228_v0, %v1085_v6  ;;  %v5597_v6 = vsub.f32 %v5373_v28, %v1045_v57 }
 0x39e   : > { %1676 = vrot.lane.b32.xlu0 %v1665_v21, %s4874_s11 }
 0x39f   : > { %v1087_v22 = vmul.f32 0.5, %v1086_v14  ;;  %v1053_v15 = vmul.f32 %v5597_v6, %v5597_v6 }
 0x3a1   : > { %v1088_v16 = vsub.f32 1.5, %v1087_v22 }
 0x3a3   : > { %v1089_v63 = vmul.f32 %v4228_v0, %v1088_v16  ;;  %v1063_v16 = vsel %vm1022_vm6, %v1053_v15, 0.0 }
 0x3a5   : > { %v1093_v43 = vsel %vm1092_vm3, %v4228_v0, %v1089_v63 }
 0x3a6   : > { %v1115_v25 = vmul.f32 %v1093_v43, %v5431_v32  ;;  %v1044_v43 = vmul.f32 %v5389_v47, %v5422_v33 }
 0x3a8   : > { %v1120_v42 = vmul.f32 %v5221_v11, %v1115_v25  ;;  %v5617_v25 = vsub.f32 %v5363_v26, %v1044_v43 }
 0x3aa   : > { %v2004_v36 = vpop.permute.xlu0 %2003  ;;  %v1125_v35 = vadd.f32 %v5229_v12, %v1120_v42 }
 0x3ab   : > { %v2015_v52 = vsel %vm1022_vm6, %v2004_v36, 0.0 }
 0x3ac   : > { %v1178_v30 = vpack.c.bf16 %v1125_v35, %v1124_v37 }
 0x3ae   : > { %3576 = vmatmul.msk.bf16.vlgmr.msra.gmra.mxu3 %vm1022_vm6, %v1178_v30  ;;  %v2114_v53 = vpop.permute.xlu2 %2113 }
 0x3af   : > { %v2119_v54 = vsel %vm1022_vm6, %v2114_v53, 0.0 }
 0x3b2   : > { %v1671_v38 = vpop.permute.xlu0 %1670 }
 0x3b3   : > { %v1682_v56 = vsel %vm1022_vm6, %v1671_v38, 0.0 }
 0x3b6   : > { %v1781_v0 = vpop.permute.xlu2 %1780 }
 0x3b7   : > { %v1786_v21 = vsel %vm1022_vm6, %v1781_v0, 0.0 }
 0x3b8   : > { %1343 = vadd.xlane.f32.xlu1 %v1342_v39 }
 0x3ba   : > { %v1445_v48 = vpop.permute.xlu0 %1444  ;;  %v1333_v8 = vpop.permute.xlu1 %1332 }
 0x3bb   : > { %v1450_v32 = vsel %vm1022_vm6, %v1445_v48, 0.0  ;;  %v1345_v31 = vsel %vm1022_vm6, %v1333_v8, 0.0 }
 0x3bc   : > { %1451 = vadd.xlane.f32.xlu2 %v1450_v32 }
 0x3c0   : > { %2016 = vadd.xlane.f32.xlu1 %v2015_v52 }
 0x3c2   : > { %v2006_v3 = vpop.permute.xlu1 %2005  ;;  %v2116_v63 = vpop.permute.xlu0 %2115 }
 0x3c3   : > { %v2018_v14 = vsel %vm1022_vm6, %v2006_v3, 0.0  ;;  %v2122_v42 = vsel %vm1022_vm6, %v2116_v63, 0.0 }
 0x3c4   : > { %2120 = vadd.xlane.f32.xlu2 %v2119_v54 }
 0x3c8   : > { %1683 = vadd.xlane.f32.xlu0 %v1682_v56 }
 0x3ca   : > { %v1783_v29 = vpop.permute.xlu0 %1782 }
 0x3cb   : > { %v1789_v33 = vsel %vm1022_vm6, %v1783_v29, 0.0 }
 0x3cc   : > { %1346 = vadd.xlane.f32.xlu2 %v1345_v31 }
 0x3d0   : > { %1787 = vadd.xlane.f32.xlu0 %v1786_v21 }
 0x3d4   : > { %2019 = vadd.xlane.f32.xlu2 %v2018_v14 }
 0x3d6   : > { %v1673_v22 = vpop.permute.xlu1 %1672 }
 0x3d7   : > { %v1685_v18 = vsel %vm1022_vm6, %v1673_v22, 0.0 }
 0x3d8   : > { %1686 = vadd.xlane.f32.xlu1 %v1685_v18  ;;  %1064 = vadd.xlane.f32.xlu0 %v1063_v16 }
 0x3de   : > { %v1447_v24 = vpop.permute.xlu1 %1446 }
 0x3df   : > { %v1453_v28 = vsel %vm1022_vm6, %v1447_v24, 0.0 }
 0x3e0   : > { %1454 = vadd.xlane.f32.xlu1 %v1453_v28  ;;  %v2008_v35 = vpop.permute.xlu2 %2007 }
 0x3e1   : > { %v2021_v30 = vsel %vm1022_vm6, %v2008_v35, 0.0 }
 0x3e6   : > { %v1335_v38 = vpop.permute.xlu1 %1334 }
 0x3e7   : > { %v1348_v48 = vsel %vm1022_vm6, %v1335_v38, 0.0 }
 0x3ec   : > { %1818 = vrot.lane.b32.xlu0 %v5217_v9, %s4874_s11  ;;  %2079 = vrot.lane.b32.xlu2 %v5221_v11, %s4871_s26  ;;  %v1052_v9 = vmul.f32 %v5617_v25, %v5617_v25 }
 0x3ee   : > { %v1060_v36 = vsel %vm1022_vm6, %v1052_v9, 0.0 }
 0x3f3   : > { %v1337_v37 = vpop.permute.xlu0 %1336 }
 0x3f4   : > { %2086 = vrot.lane.b32.xlu2 %v5229_v12, %s4871_s26  ;;  %v1351_v51 = vsel %vm1022_vm6, %v1337_v37, 0.0 }
 0x3f9   : > { %2156 = vrot.lane.b32.xlu1 %v5219_v10, %s4871_s26 }
 0x400   : > { %v1675_v39 = vpop.permute.xlu1 %1674 }
 0x408   : > { %v5625_v26 = vpop.permute.xlu0 %2009 }
 0x410   : > { %v1677_v32 = vpop.permute.xlu0 %1676 }
 0x411   : > { %v1691_v53 = vsel %vm1022_vm6, %v1677_v32, 0.0 }
 0x416   : > { %2123 = vadd.xlane.f32.xlu0 %v2122_v42 }
 0x41d   : > { %1061 = vadd.xlane.f32.xlu2 %v1060_v36 }
 0x423   : > { %2022 = vadd.xlane.f32.xlu1 %v2021_v30 }
 0x425   : > { %1790 = vadd.xlane.f32.xlu2 %v1789_v33  ;;  %v1688_v33 = vsel %vm1022_vm6, %v1675_v39, 0.0 }
 0x42a   : > { %1746 = vrot.lane.b32.xlu0 %v5221_v11, %s4874_s11 }
 0x42b   : > { %1352 = vadd.xlane.f32.xlu1 %v1351_v51  ;;  %v1344_v54 = vpop.xlane.xlu1 %1343 }
 0x42c   : > { %v1354_v15 = vmul.f32 %v1344_v54, %v5389_v47 }
 0x42d   : > { %1349 = vadd.xlane.f32.xlu2 %v1348_v48 }
 0x42e   : > { %v5646_v24 = vadd.f32 1e-06, %v1354_v15 }
 0x42f   : > { %v1452_v52 = vpop.xlane.xlu2 %1451 }
 0x430   : > { %v1456_v57 = vmul.f32 %v1452_v52, %v5389_v47 }
 0x432   : > { %v1458_v3 = vadd.f32 1e-06, %v1456_v57 }
 0x433   : > { %1692 = vadd.xlane.f32.xlu1 %v1691_v53  ;;  %v2017_v56 = vpop.xlane.xlu1 %2016 }
 0x434   : > { %v2027_v0 = vmul.f32 %v2017_v56, %v5389_v47  ;;  %4229 = vrsqrt.f32 %v1458_v3  ;;  %vm1466_vm8 = vweird.f32 %v1458_v3 }
 0x436   : > { %v5637_v14 = vadd.f32 1e-06, %v2027_v0 }
 0x437   : > { %v5632_v8 = vpop.xlane.xlu2 %2120 }
 0x438   : > { %4231 = vrsqrt.f32 %v5637_v14  ;;  %vm2041_vm11 = vweird.f32 %v5637_v14 }
 0x43a   : > { %v4230_v43 = vpop.eup %4229 }
 0x43b   : > { %v1461_v29 = vmul.f32 %v4230_v43, %v1458_v3  ;;  %vm1467_vm7 = vweird.f32 %v4230_v43 }
 0x43c   : > { %vm1468_vm10 = vmor %vm1466_vm8, %vm1467_vm7 }
 0x43d   : > { %v1462_v35 = vmul.f32 %v4230_v43, %v1461_v29 }
 0x43f   : > { %v1347_v31 = vpop.xlane.xlu2 %1346  ;;  %v1463_v56 = vmul.f32 0.5, %v1462_v35 }
 0x440   : > { %v1355_v21 = vmul.f32 %v1347_v31, %v5389_v47 }
 0x441   : > { %v1464_v15 = vsub.f32 1.5, %v1463_v56 }
 0x442   : > { %v5642_v22 = vadd.f32 1e-06, %v1355_v21 }
 0x444   : > { %4233 = vrsqrt.f32 %v5642_v22  ;;  %vm1378_vm15 = vweird.f32 %v5642_v22 }
 0x445   : > { %1823 = vrot.lane.b32.xlu2 %v5219_v10, %s4874_s11  ;;  %v5652_v10 = vpop.eup %4231 }
 0x446   : > { %v2036_v9 = vmul.f32 %v5652_v10, %v5637_v14  ;;  %vm2042_vm9 = vweird.f32 %v5652_v10 }
 0x447   : > { %v2020_v18 = vpop.xlane.xlu2 %2019  ;;  %vm2043_vm12 = vmor %vm2041_vm11, %vm2042_vm9 }
 0x448   : > { %v2028_v16 = vmul.f32 %v2020_v18, %v5389_v47  ;;  %v2037_v48 = vmul.f32 %v5652_v10, %v2036_v9 }
 0x44a   : > { %v2032_v28 = vadd.f32 1e-06, %v2028_v16  ;;  %v5654_v42 = vpop.eup %4233  ;;  %v2038_v31 = vmul.f32 0.5, %v2037_v48 }
 0x44b   : > { %v5649_v63 = vpop.xlane.xlu1 %1686  ;;  %v1373_v32 = vmul.f32 %v5654_v42, %v5642_v22  ;;  %vm1379_vm13 = vweird.f32 %v5654_v42 }
 0x44c   : > { %4235 = vrsqrt.f32 %v2032_v28  ;;  %v2039_v16 = vsub.f32 1.5, %v2038_v31  ;;  %vm2051_vm5 = vweird.f32 %v2032_v28  ;;  %vm5685_vm2 = vmor %vm1378_vm15, %vm1379_vm13 }
 0x44d   : > { %4237 = vrsqrt.f32 %v5646_v24  ;;  %v1374_v0 = vmul.f32 %v5654_v42, %v1373_v32 }
 0x44e   : > { %v2040_v48 = vmul.f32 %v5652_v10, %v2039_v16 }
 0x44f   : > { %v1375_v29 = vmul.f32 0.5, %v1374_v0 }
 0x450   : > { %v2044_v31 = vsel %vm2043_vm12, %v5652_v10, %v2040_v48 }
 0x451   : > { %v1376_v32 = vsub.f32 1.5, %v1375_v29  ;;  %v2075_v10 = vmul.f32 %v2044_v31, %v5445_v4 }
 0x452   : > { %v4236_v36 = vpop.eup %4235 }
 0x453   : > { %v5658_v37 = vpop.eup %4237  ;;  %v2046_v30 = vmul.f32 %v4236_v36, %v2032_v28  ;;  %v1455_v38 = vpop.xlane.xlu1 %1454  ;;  %vm2052_vm4 = vweird.f32 %v4236_v36  ;;  %v1377_v3 = vmul.f32 %v5654_v42, %v1376_v32  ;;  %v2125_v32 = vmul.f32 %v5632_v8, %v5389_v47 }
 0x454   : > { %v1457_v51 = vmul.f32 %v1455_v38, %v5389_v47  ;;  %1689 = vadd.xlane.f32.xlu0 %v1688_v33  ;;  %v1363_v53 = vmul.f32 %v5658_v37, %v5646_v24  ;;  %vm2053_vm0 = vmor %vm2051_vm5, %vm2052_vm4  ;;  %v1465_v38 = vmul.f32 %v4230_v43, %v1464_v15  ;;  %v5669_v33 = vpop.permute.xlu2 %2079  ;;  %vm1369_vm1 = vweird.f32 %v5658_v37 }
 0x455   : > { %v2047_v52 = vmul.f32 %v4236_v36, %v2046_v30  ;;  %vm1368_vm5 = vweird.f32 %v5646_v24 }
 0x456   : > { %v1459_v54 = vadd.f32 1e-06, %v1457_v51  ;;  %v1364_v21 = vmul.f32 %v5658_v37, %v1363_v53  ;;  %v1469_v56 = vsel %vm1468_vm10, %v4230_v43, %v1465_v38 }
 0x457   : > { %v2048_v57 = vmul.f32 0.5, %v2047_v52 }
 0x458   : > { %4239 = vrsqrt.f32 %v1459_v54  ;;  %v1365_v30 = vmul.f32 0.5, %v1364_v21  ;;  %vm1476_vm3 = vweird.f32 %v1459_v54 }
 0x459   : > { %v2049_v39 = vsub.f32 1.5, %v2048_v57 }
 0x45a   : > { %v1366_v28 = vsub.f32 1.5, %v1365_v30 }
 0x45b   : > { %v2050_v18 = vmul.f32 %v4236_v36, %v2049_v39  ;;  %v1480_v39 = vmul.f32 %v1469_v56, %v5464_v45  ;;  %v1381_v45 = vsel %vm5685_vm2, %v5654_v42, %v1377_v3 }
 0x45c   : > { %v1367_v14 = vmul.f32 %v5658_v37, %v1366_v28  ;;  %v5696_v15 = vpop.permute.xlu2 %2086  ;;  %v1403_v24 = vmul.f32 %v1381_v45, %v5468_v1 }
 0x45d   : > { %v2054_v35 = vsel %vm2053_vm0, %v4236_v36, %v2050_v18  ;;  %v5675_v36 = vpop.xlane.xlu0 %1683  ;;  %vm1370_vm0 = vmor %vm1368_vm5, %vm1369_vm1  ;;  %v2082_v18 = vmul.f32 %v5669_v33, %v2075_v10  ;;  %v1486_v16 = vmul.f32 %v5273_v58, %v1480_v39 }
 0x45e   : > { %v4240_v9 = vpop.eup %4239  ;;  %v2076_v53 = vmul.f32 %v2054_v35, %v5484_v34  ;;  %v1371_v29 = vsel %vm1370_vm0, %v5658_v37, %v1367_v14  ;;  %v1411_v1 = vmul.f32 %v5271_v55, %v1403_v24 }
 0x45f   : > { %v1471_v51 = vmul.f32 %v4240_v9, %v1459_v54  ;;  %vm1477_vm14 = vweird.f32 %v4240_v9  ;;  %v2089_v30 = vadd.f32 %v5696_v15, %v2082_v18  ;;  %v1402_v38 = vmul.f32 %v1371_v29, %v5442_v27 }
 0x460   : > { %v2083_v34 = vmul.f32 %v5669_v33, %v2076_v53  ;;  %vm1478_vm4 = vmor %vm1476_vm3, %vm1477_vm14 }
 0x461   : > { %v1472_v52 = vmul.f32 %v4240_v9, %v1471_v51  ;;  %v1492_v51 = vadd.f32 %v5277_v61, %v1486_v16 }
 0x462   : > { %v2090_v4 = vadd.f32 %v5696_v15, %v2083_v34 }
 0x463   : > { %v1473_v57 = vmul.f32 0.5, %v1472_v52 }
 0x465   : > { %v1474_v0 = vsub.f32 1.5, %v1473_v57  ;;  %v1788_v35 = vpop.xlane.xlu0 %1787 }
 0x467   : > { %v1475_v21 = vmul.f32 %v4240_v9, %v1474_v0 }
 0x468   : > { %1753 = vrot.lane.b32.xlu0 %v5229_v12, %s4874_s11 }
 0x469   : > { %v1479_v22 = vsel %vm1478_vm4, %v4240_v9, %v1475_v21  ;;  %v2024_v9 = vsel %vm1022_vm6, %v5625_v26, 0.0  ;;  %v1419_v26 = vadd.f32 %v5275_v59, %v1411_v1 }
 0x46a   : > { %v1481_v54 = vmul.f32 %v1479_v22, %v5522_v46  ;;  %v2161_v46 = vpack.c.bf16 %v2090_v4, %v2089_v30  ;;  %v1792_v30 = vmul.f32 %v1788_v35, %v5389_v47 }
 0x46b   : > { %v5724_v21 = vpop.permute.xlu1 %2156 }
 0x46c   : > { %v1487_v42 = vmul.f32 %v5273_v58, %v1481_v54  ;;  %v1410_v58 = vmul.f32 %v5271_v55, %v1402_v38  ;;  %v5731_v1 = vadd.f32 1e-06, %v1792_v30 }
 0x46d   : > { %v1065_v52 = vpop.xlane.xlu0 %1064 }
 0x46e   : > { %2025 = vadd.xlane.f32.xlu2 %v2024_v9  ;;  %v1493_v48 = vadd.f32 %v5277_v61, %v1487_v42  ;;  %v1418_v27 = vadd.f32 %v5275_v59, %v1410_v58  ;;  %v2127_v61 = vadd.f32 1e-06, %v2125_v32  ;;  %v1069_v28 = vmul.f32 %v1065_v52, %v5389_v47 }
 0x470   : > { %2166 = vrot.lane.b32.xlu0 %v2161_v46, %s4870_s27  ;;  %v1496_v37 = vpack.c.bf16 %v1493_v48, %v1492_v51  ;;  %v1494_v53 = vpack.c.bf16 %v1419_v26, %v1418_v27  ;;  %4241 = vrsqrt.f32 %v2127_v61  ;;  %v1073_v56 = vadd.f32 1e-06, %v1069_v28 }
 0x471   : > { %vm2135_vm8 = vweird.f32 %v2127_v61 }
 0x472   : > { %1504 = vrot.lane.b32.xlu1 %v1496_v37, %s4871_s26  ;;  %4243 = vrsqrt.f32 %v1073_v56  ;;  %vm1110_vm13 = vweird.f32 %v1073_v56 }
 0x475   : > { %v5721_v57 = vpop.permute.xlu0 %1818 }
 0x476   : > { %v4242_v3 = vpop.eup %4241 }
 0x477   : > { %v2130_v31 = vmul.f32 %v4242_v3, %v2127_v61  ;;  %vm2136_vm7 = vweird.f32 %v4242_v3 }
 0x478   : > { %v4244_v0 = vpop.eup %4243  ;;  %vm5733_vm9 = vmor %vm2135_vm8, %vm2136_vm7 }
 0x479   : > { %v2131_v14 = vmul.f32 %v4242_v3, %v2130_v31  ;;  %v1105_v8 = vmul.f32 %v4244_v0, %v1073_v56  ;;  %vm1111_vm11 = vweird.f32 %v4244_v0 }
 0x47a   : > { %1499 = vrot.lane.b32.xlu1 %v1494_v53, %s4871_s26  ;;  %vm1112_vm15 = vmor %vm1110_vm13, %vm1111_vm11 }
 0x47b   : > { %v2132_v10 = vmul.f32 0.5, %v2131_v14  ;;  %v1106_v45 = vmul.f32 %v4244_v0, %v1105_v8 }
 0x47d   : > { %v2133_v16 = vsub.f32 1.5, %v2132_v10  ;;  %v1107_v29 = vmul.f32 0.5, %v1106_v45 }
 0x47f   : > { %v2134_v38 = vmul.f32 %v4242_v3, %v2133_v16  ;;  %v1108_v46 = vsub.f32 1.5, %v1107_v29 }
 0x481   : > { %v1109_v32 = vmul.f32 %v4244_v0, %v1108_v46  ;;  %v2138_v52 = vsel %vm5733_vm9, %v4242_v3, %v2134_v38 }
 0x483   : > { %v1113_v8 = vsel %vm1112_vm15, %v4244_v0, %v1109_v32 }
 0x484   : > { %v1117_v29 = vmul.f32 %v1113_v8, %v5597_v6 }
 0x489   : > { %v2124_v39 = vpop.xlane.xlu0 %2123 }
 0x48a   : > { %v2126_v34 = vmul.f32 %v2124_v39, %v5389_v47  ;;  %v2149_v39 = vmul.f32 %v2138_v52, %v5492_v40 }
 0x48c   : > { %v2128_v43 = vadd.f32 1e-06, %v2126_v34  ;;  %v2154_v40 = vmul.f32 %v5279_v2, %v2149_v39 }
 0x48e   : > { %4245 = vrsqrt.f32 %v2128_v43  ;;  %vm2145_vm12 = vweird.f32 %v2128_v43  ;;  %v2159_v30 = vadd.f32 %v5724_v21, %v2154_v40 }
 0x490   : > { %v1062_v22 = vpop.xlane.xlu2 %1061 }
 0x491   : > { %v1068_v18 = vmul.f32 %v1062_v22, %v5389_v47 }
 0x493   : > { %v1072_v54 = vadd.f32 1e-06, %v1068_v18 }
 0x494   : > { %v4246_v4 = vpop.eup %4245 }
 0x495   : > { %v2140_v24 = vmul.f32 %v4246_v4, %v2128_v43  ;;  %4247 = vrsqrt.f32 %v1072_v54  ;;  %vm2146_vm10 = vweird.f32 %v4246_v4  ;;  %vm1100_vm2 = vweird.f32 %v1072_v54 }
 0x496   : > { %v5728_v42 = vpop.xlane.xlu1 %2022  ;;  %vm2147_vm14 = vmor %vm2145_vm12, %vm2146_vm10 }
 0x497   : > { %v2141_v9 = vmul.f32 %v4246_v4, %v2140_v24 }
 0x498   : > { %v1791_v51 = vpop.xlane.xlu2 %1790 }
 0x499   : > { %v2142_v48 = vmul.f32 0.5, %v2141_v9  ;;  %v1793_v37 = vmul.f32 %v1791_v51, %v5389_v47 }
 0x49b   : > { %v4248_v58 = vpop.eup %4247  ;;  %v2143_v27 = vsub.f32 1.5, %v2142_v48  ;;  %v5737_v35 = vadd.f32 1e-06, %v1793_v37 }
 0x49c   : > { %v1095_v53 = vmul.f32 %v4248_v58, %v1072_v54  ;;  %vm1101_vm1 = vweird.f32 %v4248_v58  ;;  %v1122_v54 = vmul.f32 %v5221_v11, %v1117_v29 }
 0x49d   : > { %v2144_v28 = vmul.f32 %v4246_v4, %v2143_v27  ;;  %4249 = vrsqrt.f32 %v5737_v35  ;;  %vm1102_vm3 = vmor %vm1100_vm2, %vm1101_vm1  ;;  %vm1812_vm8 = vweird.f32 %v5737_v35 }
 0x49e   : > { %4251 = vrsqrt.f32 %v5731_v1  ;;  %v1096_v61 = vmul.f32 %v4248_v58, %v1095_v53  ;;  %v1353_v31 = vpop.xlane.xlu1 %1352  ;;  %v1127_v52 = vadd.f32 %v5229_v12, %v1122_v54 }
 0x49f   : > { %v2148_v34 = vsel %vm2147_vm14, %v4246_v4, %v2144_v28  ;;  %v1357_v14 = vmul.f32 %v1353_v31, %v5389_v47  ;;  %vm1802_vm14 = vweird.f32 %v5731_v1 }
 0x4a0   : > { %v2150_v3 = vmul.f32 %v2148_v34, %v5480_v17  ;;  %v1097_v10 = vmul.f32 0.5, %v1096_v61  ;;  %v1350_v45 = vpop.xlane.xlu2 %1349 }
 0x4a1   : > { %v1361_v43 = vadd.f32 1e-06, %v1357_v14  ;;  %v1356_v22 = vmul.f32 %v1350_v45, %v5389_v47 }
 0x4a2   : > { %v1098_v18 = vsub.f32 1.5, %v1097_v10  ;;  %v2155_v56 = vmul.f32 %v5279_v2, %v2150_v3 }
 0x4a3   : > { %v5748_v16 = vpop.eup %4249  ;;  %4253 = vrsqrt.f32 %v1361_v43  ;;  %v1360_v4 = vadd.f32 1e-06, %v1356_v22  ;;  %vm1398_vm0 = vweird.f32 %v1361_v43 }
 0x4a4   : > { %v5752_v0 = vpop.eup %4251  ;;  %v1099_v17 = vmul.f32 %v4248_v58, %v1098_v18  ;;  %v1807_v24 = vmul.f32 %v5748_v16, %v5737_v35  ;;  %v2160_v9 = vadd.f32 %v5724_v21, %v2155_v56  ;;  %vm1813_vm5 = vweird.f32 %v5748_v16 }
 0x4a5   : > { %4255 = vrsqrt.f32 %v1360_v4  ;;  %v1797_v2 = vmul.f32 %v5752_v0, %v5731_v1  ;;  %vm5780_vm10 = vmor %vm1812_vm8, %vm1813_vm5  ;;  %vm1388_vm11 = vweird.f32 %v1360_v4  ;;  %vm1803_vm13 = vweird.f32 %v5752_v0 }
 0x4a6   : > { %v1103_v38 = vsel %vm1102_vm3, %v4248_v58, %v1099_v17  ;;  %v1808_v6 = vmul.f32 %v5748_v16, %v1807_v24  ;;  %v2163_v51 = vpack.c.bf16 %v2160_v9, %v2159_v30  ;;  %vm1804_vm15 = vmor %vm1802_vm14, %vm1803_vm13 }
 0x4a7   : > { %v1116_v46 = vmul.f32 %v1103_v38, %v5617_v25  ;;  %v1798_v21 = vmul.f32 %v5752_v0, %v1797_v2  ;;  %v1694_v25 = vmul.f32 %v5675_v36, %v5389_v47 }
 0x4a8   : > { %2171 = vrot.lane.b32.xlu1 %v2163_v51, %s4870_s27  ;;  %v1809_v26 = vmul.f32 0.5, %v1808_v6 }
 0x4a9   : > { %v4254_v48 = vpop.eup %4253  ;;  %v1121_v37 = vmul.f32 %v5221_v11, %v1116_v46  ;;  %v1799_v14 = vmul.f32 0.5, %v1798_v21  ;;  %v1695_v11 = vmul.f32 %v5649_v63, %v5389_v47  ;;  %v5773_v10 = vadd.f32 1e-06, %v1694_v25 }
 0x4aa   : > { %v1393_v27 = vmul.f32 %v4254_v48, %v1361_v43  ;;  %v1810_v31 = vsub.f32 1.5, %v1809_v26  ;;  %vm1399_vm4 = vweird.f32 %v4254_v48  ;;  %v1824_v26 = vpop.permute.xlu2 %1823 }
 0x4ab   : > { %v4256_v32 = vpop.eup %4255  ;;  %v1126_v58 = vadd.f32 %v5229_v12, %v1121_v37  ;;  %v1693_v12 = vpop.xlane.xlu1 %1692  ;;  %v1800_v18 = vsub.f32 1.5, %v1799_v14  ;;  %v5777_v56 = vadd.f32 1e-06, %v1695_v11  ;;  %vm1400_vm9 = vmor %vm1398_vm0, %vm1399_vm4  ;;  %4257 = vrsqrt.f32 %v5773_v10 }
 0x4ac   : > { %v1394_v53 = vmul.f32 %v4254_v48, %v1393_v27  ;;  %v1383_v28 = vmul.f32 %v4256_v32, %v1360_v4  ;;  %v1811_v36 = vmul.f32 %v5748_v16, %v1810_v31  ;;  %vm1389_vm7 = vweird.f32 %v4256_v32 }
 0x4ad   : > { %v1179_v61 = vpack.c.bf16 %v1127_v52, %v1126_v58  ;;  %v1697_v43 = vmul.f32 %v1693_v12, %v5389_v47  ;;  %vm1390_vm12 = vmor %vm1388_vm11, %vm1389_vm7  ;;  %4259 = vrsqrt.f32 %v5777_v56  ;;  %v1801_v4 = vmul.f32 %v5752_v0, %v1800_v18 }
 0x4ae   : > { %v1395_v39 = vmul.f32 0.5, %v1394_v53  ;;  %v1384_v34 = vmul.f32 %v4256_v32, %v1383_v28  ;;  %v1815_v35 = vsel %vm5780_vm10, %v5748_v16, %v1811_v36  ;;  %vm1708_vm3 = vweird.f32 %v5773_v10 }
 0x4af   : > { %3577 = vmatmul.msk.bf16.gmra.mxu3 %vm1022_vm6, %v1179_v61  ;;  %v1701_v38 = vadd.f32 1e-06, %v1697_v43  ;;  %vm1718_vm5 = vweird.f32 %v5777_v56 }
 0x4b0   : > { %v1396_v8 = vsub.f32 1.5, %v1395_v39  ;;  %v1385_v3 = vmul.f32 0.5, %v1384_v34 }
 0x4b1   : > { %v4258_v46 = vpop.eup %4257  ;;  %4261 = vrsqrt.f32 %v1701_v38  ;;  %vm1738_vm8 = vweird.f32 %v1701_v38 }
 0x4b2   : > { %v1397_v45 = vmul.f32 %v4254_v48, %v1396_v8  ;;  %v1386_v22 = vsub.f32 1.5, %v1385_v3  ;;  %v1703_v37 = vmul.f32 %v4258_v46, %v5773_v10  ;;  %vm1709_vm1 = vweird.f32 %v4258_v46 }
 0x4b3   : > { %v4260_v51 = vpop.eup %4259  ;;  %vm1710_vm4 = vmor %vm1708_vm3, %vm1709_vm1 }
 0x4b4   : > { %v1401_v29 = vsel %vm1400_vm9, %v4254_v48, %v1397_v45  ;;  %v1387_v40 = vmul.f32 %v4256_v32, %v1386_v22  ;;  %v1713_v1 = vmul.f32 %v4260_v51, %v5777_v56  ;;  %vm1719_vm2 = vweird.f32 %v4260_v51 }
 0x4b5   : > { %v1405_v17 = vmul.f32 %v1401_v29, %v5540_v41  ;;  %v1817_v41 = vmul.f32 %v1815_v35, %v5500_v50  ;;  %vm1720_vm0 = vmor %vm1718_vm5, %vm1719_vm2  ;;  %vm1958_vm5 = vcmask 785920  }
 0x4b6   : > { %v1391_v24 = vsel %vm1390_vm12, %v4256_v32, %v1387_v40  ;;  %v1704_v32 = vmul.f32 %v4258_v46, %v1703_v37  ;;  %v1714_v58 = vmul.f32 %v4260_v51, %v1713_v1 }
 0x4b7   : > { %v1404_v30 = vmul.f32 %v1391_v24, %v5529_v13  ;;  %v1413_v9 = vmul.f32 %v5271_v55, %v1405_v17  ;;  %v1805_v13 = vsel %vm1804_vm15, %v5752_v0, %v1801_v4  ;;  %v1822_v54 = vmul.f32 %v5721_v57, %v1817_v41  ;;  %v4262_v0 = vpop.eup %4261 }
 0x4b8   : > { %v1816_v50 = vmul.f32 %v1805_v13, %v5507_v49  ;;  %v1733_v52 = vmul.f32 %v4262_v0, %v1701_v38  ;;  %v1705_v28 = vmul.f32 0.5, %v1704_v32  ;;  %v1715_v25 = vmul.f32 0.5, %v1714_v58 }
 0x4b9   : > { %v1412_v6 = vmul.f32 %v5271_v55, %v1404_v30  ;;  %v1421_v2 = vadd.f32 %v5275_v59, %v1413_v9  ;;  %v5804_v55 = vpop.permute.xlu0 %1746  ;;  %v1827_v27 = vadd.f32 %v1824_v26, %v1822_v54  ;;  %vm1739_vm7 = vweird.f32 %v4262_v0 }
 0x4ba   : > { %v1734_v31 = vmul.f32 %v4262_v0, %v1733_v52  ;;  %v1706_v34 = vsub.f32 1.5, %v1705_v28  ;;  %v1716_v14 = vsub.f32 1.5, %v1715_v25  ;;  %vm1740_vm9 = vmor %vm1738_vm8, %vm1739_vm7 }
 0x4bb   : > { %v1420_v16 = vadd.f32 %v5275_v59, %v1412_v6  ;;  %v1821_v59 = vmul.f32 %v5721_v57, %v1816_v50  ;;  %v2029_v57 = vmul.f32 %v5728_v42, %v5389_v47 }
 0x4bc   : > { %v1735_v11 = vmul.f32 0.5, %v1734_v31  ;;  %v1707_v8 = vmul.f32 %v4258_v46, %v1706_v34  ;;  %v1717_v3 = vmul.f32 %v4260_v51, %v1716_v14  ;;  %v1199_v34 = vpop.f32.mrf.mxu3 }
 0x4bd   : > { %v1495_v48 = vpack.c.bf16 %v1421_v2, %v1420_v16  ;;  %v1826_v21 = vadd.f32 %v1824_v26, %v1821_v59  ;;  %v2033_v12 = vadd.f32 1e-06, %v2029_v57 }
 0x4be   : > { %v1736_v36 = vsub.f32 1.5, %v1735_v11  ;;  %v1711_v22 = vsel %vm1710_vm4, %v4258_v46, %v1707_v8  ;;  %v1721_v63 = vsel %vm1720_vm0, %v4260_v51, %v1717_v3  ;;  %vm1209_vm4 = vcmask 130048  }
 0x4bf   : > { %1501 = vrot.lane.b32.xlu2 %v1495_v48, %s4871_s26  ;;  %v1830_v53 = vpack.c.bf16 %v1827_v27, %v1826_v21  ;;  %v1742_v40 = vmul.f32 %v1711_v22, %v5455_v7  ;;  %v1743_v43 = vmul.f32 %v1721_v63, %v5515_v60  ;;  %vm2061_vm14 = vweird.f32 %v2033_v12 }
 0x4c0   : > { %v1737_v42 = vmul.f32 %v4262_v0, %v1736_v36  ;;  %v1210_v3 = vsel %vm1209_vm4, %v1199_v34, -inf  ;;  %vm2291_vm0 = vcmask 1048320  }
 0x4c1   : > { %v1749_v10 = vmul.f32 %v5804_v55, %v1742_v40  ;;  %v1750_v24 = vmul.f32 %v5804_v55, %v1743_v43 }
 0x4c2   : > { %v1741_v56 = vsel %vm1740_vm9, %v4262_v0, %v1737_v42 }
 0x4c3   : > { %v1745_v7 = vmul.f32 %v1741_v56, %v5576_v5 }
 0x4c4   : > { %v1201_v8 = vpop.f32.mrf.mxu3 }
 0x4c5   : > { %v1752_v13 = vmul.f32 %v5804_v55, %v1745_v7 }
 0x4c7   : > { %1838 = vrot.lane.b32.xlu2 %v1830_v53, %s4874_s11  ;;  %v1690_v49 = vpop.xlane.xlu0 %1689 }
 0x4c8   : > { %v1696_v61 = vmul.f32 %v1690_v49, %v5389_v47 }
 0x4ca   : > { %v1700_v39 = vadd.f32 1e-06, %v1696_v61 }
 0x4cc   : > { %4263 = vrsqrt.f32 %v1700_v39  ;;  %vm1728_vm11 = vweird.f32 %v1700_v39 }
 0x4cd   : > { %4265 = vrsqrt.f32 %v2033_v12 }
 0x4d2   : > { %v4264_v45 = vpop.eup %4263 }
 0x4d3   : > { %v1723_v18 = vmul.f32 %v4264_v45, %v1700_v39  ;;  %vm1729_vm10 = vweird.f32 %v4264_v45  ;;  %v4266_v30 = vpop.eup %4265 }
 0x4d4   : > { %vm1730_vm12 = vmor %vm1728_vm11, %vm1729_vm10  ;;  %v2056_v60 = vmul.f32 %v4266_v30, %v2033_v12  ;;  %vm2062_vm13 = vweird.f32 %v4266_v30 }
 0x4d5   : > { %v1724_v29 = vmul.f32 %v4264_v45, %v1723_v18  ;;  %vm2063_vm15 = vmor %vm2061_vm14, %vm2062_vm13 }
 0x4d6   : > { %v2057_v51 = vmul.f32 %v4266_v30, %v2056_v60 }
 0x4d7   : > { %v1725_v17 = vmul.f32 0.5, %v1724_v29 }
 0x4d8   : > { %v2058_v59 = vmul.f32 0.5, %v2057_v51 }
 0x4d9   : > { %v1726_v35 = vsub.f32 1.5, %v1725_v17 }
 0x4da   : > { %v1754_v9 = vpop.permute.xlu0 %1753 }
 0x4db   : > { %v1727_v4 = vmul.f32 %v4264_v45, %v1726_v35  ;;  %v1756_v41 = vadd.f32 %v1754_v9, %v1749_v10  ;;  %v1757_v6 = vadd.f32 %v1754_v9, %v1750_v24  ;;  %v1759_v37 = vadd.f32 %v1754_v9, %v1752_v13 }
 0x4dd   : > { %v1731_v38 = vsel %vm1730_vm12, %v4264_v45, %v1727_v4  ;;  %v1828_v16 = vpack.c.bf16 %v1757_v6, %v1756_v41 }
 0x4de   : > { %v1744_v2 = vmul.f32 %v1731_v38, %v5557_v19  ;;  %v2059_v19 = vsub.f32 1.5, %v2058_v59 }
 0x4df   : > { %1833 = vrot.lane.b32.xlu1 %v1828_v16, %s4874_s11 }
 0x4e0   : > { %v1751_v46 = vmul.f32 %v5804_v55, %v1744_v2  ;;  %v2060_v55 = vmul.f32 %v4266_v30, %v2059_v19 }
 0x4e1   : > { %v2026_v54 = vpop.xlane.xlu2 %2025 }
 0x4e2   : > { %v1758_v48 = vadd.f32 %v1754_v9, %v1751_v46  ;;  %v2030_v50 = vmul.f32 %v2026_v54, %v5389_v47  ;;  %v2064_v58 = vsel %vm2063_vm15, %v4266_v30, %v2060_v55  ;;  %v2167_v45 = vpop.permute.xlu0 %2166 }
 0x4e3   : > { %v2077_v28 = vmul.f32 %v2064_v58, %v5547_v62  ;;  %v1213_v62 = vsel %vm1209_vm4, %v1201_v8, -inf }
 0x4e4   : > { %v2034_v1 = vadd.f32 1e-06, %v2030_v50  ;;  %v1505_v26 = vpop.permute.xlu1 %1504  ;;  %v1829_v5 = vpack.c.bf16 %v1759_v37, %v1758_v48 }
 0x4e5   : > { %v1513_v27 = vsel %vm1022_vm6, %v1505_v26, 0  ;;  %v2084_v31 = vmul.f32 %v5669_v33, %v2077_v28 }
 0x4e6   : > { %4267 = vrsqrt.f32 %v2034_v1  ;;  %1522 = vmatpush.bf16.xpose.msrb.mxu2 %v1513_v27  ;;  %1835 = vrot.lane.b32.xlu2 %v1829_v5, %s4874_s11  ;;  %vm2071_vm2 = vweird.f32 %v2034_v1 }
 0x4e7   : > { %v2091_v14 = vadd.f32 %v5696_v15, %v2084_v31 }
 0x4ec   : > { %v4268_v0 = vpop.eup %4267  ;;  %v1500_v32 = vpop.permute.xlu1 %1499 }
 0x4ed   : > { %v2066_v21 = vmul.f32 %v4268_v0, %v2034_v1  ;;  %3580 = vmatmul.msk.bf16.vlgmr.msrb.gmra.mxu2 %vm1022_vm6, %v1500_v32  ;;  %vm2072_vm1 = vweird.f32 %v4268_v0 }
 0x4ee   : > { %vm2073_vm3 = vmor %vm2071_vm2, %vm2072_vm1 }
 0x4ef   : > { %v2067_v47 = vmul.f32 %v4268_v0, %v2066_v21 }
 0x4f1   : > { %v2068_v52 = vmul.f32 0.5, %v2067_v47 }
 0x4f3   : > { %v2069_v53 = vsub.f32 1.5, %v2068_v52 }
 0x4f5   : > { %v2070_v49 = vmul.f32 %v4268_v0, %v2069_v53 }
 0x4f7   : > { %v2074_v25 = vsel %vm2073_vm3, %v4268_v0, %v2070_v49 }
 0x4f8   : > { %v2078_v61 = vmul.f32 %v2074_v25, %v5569_v44 }
 0x4fa   : > { %v2085_v39 = vmul.f32 %v5669_v33, %v2078_v61 }
 0x4fc   : > { %v2092_v57 = vadd.f32 %v5696_v15, %v2085_v39 }
 0x4fe   : > { %v2162_v11 = vpack.c.bf16 %v2092_v57, %v2091_v14 }
 0x500   : > { %2168 = vrot.lane.b32.xlu0 %v2162_v11, %s4870_s27 }
 0x509   : > { %1214 = vmax.xlane.f32.xlu1 %v1213_v62 }
 0x50f   : > { %1211 = vmax.xlane.f32.xlu2 %v1210_v3 }
 0x519   : > { %v1502_v44 = vpop.permute.xlu2 %1501 }
 0x51a   : > { %3581 = vmatmul.msk.bf16.gmra.mxu2 %vm1022_vm6, %v1502_v44  ;;  %v2172_v33 = vpop.permute.xlu1 %2171 }
 0x51b   : > { %v2180_v12 = vsel %vm1022_vm6, %v2172_v33, 0 }
 0x51c   : > { %2189 = vmatpush.bf16.xpose.msra.mxu2 %v2180_v12 }
 0x521   : > { %v1839_v36 = vpop.permute.xlu2 %1838 }
 0x522   : > { %v1847_v15 = vsel %vm1022_vm6, %v1839_v36, 0 }
 0x523   : > { %1856 = vmatpush.bf16.xpose.msrb.mxu0 %v1847_v15 }
 0x52a   : > { %3588 = vmatmul.msk.bf16.vlgmr.msra.gmra.mxu2 %vm1022_vm6, %v2167_v45 }
 0x532   : > { %v1204_v22 = vpop.f32.mrf.mxu3 }
 0x533   : > { %v1216_v18 = vsel %vm1209_vm4, %v1204_v22, -inf }
 0x534   : > { %1217 = vmax.xlane.f32.xlu1 %v1216_v18 }
 0x53a   : > { %v1206_v63 = vpop.f32.mrf.mxu3 }
 0x53b   : > { %v1219_v42 = vsel %vm1209_vm4, %v1206_v63, -inf }
 0x53c   : > { %1220 = vmax.xlane.f32.xlu0 %v1219_v42 }
 0x540   : > { %v1836_v40 = vpop.permute.xlu2 %1835 }
 0x551   : > { %v1834_v29 = vpop.permute.xlu1 %1833 }
 0x552   : > { %3584 = vmatmul.msk.bf16.vlgmr.msrb.gmra.mxu0 %vm1022_vm6, %v1834_v29 }
 0x562   : > { %3585 = vmatmul.msk.bf16.gmra.mxu0 %vm1022_vm6, %v1836_v40 }
 0x570   : > { %v5850_v41 = vpop.f32.mrf.mxu2 }
 0x571   : > { %v1534_v38 = vsel %vm1209_vm4, %v5850_v41, -inf }
 0x572   : > { %v2169_v43 = vpop.permute.xlu0 %2168 }
 0x573   : > { %3589 = vmatmul.msk.bf16.gmra.mxu2 %vm1022_vm6, %v2169_v43 }
 0x578   : > { %v5853_v60 = vpop.f32.mrf.mxu2 }
 0x579   : > { %v1537_v1 = vsel %vm1209_vm4, %v5853_v60, -inf }
 0x57c   : > { %v1215_v17 = vpop.xlane.xlu1 %1214 }
 0x57d   : > { %v1223_v10 = vsub.f32 %v1201_v8, %v1215_v17 }
 0x57f   : > { %v1228_v24 = vmul.f32 1.442695, %v1223_v10 }
 0x581   : > { %4269 = vpow2.f32 %v1228_v24 }
 0x582   : > { %v1212_v56 = vpop.xlane.xlu2 %1211 }
 0x583   : > { %v1222_v35 = vsub.f32 %v1199_v34, %v1212_v56 }
 0x585   : > { %v1226_v30 = vmul.f32 1.442695, %v1222_v35 }
 0x587   : > { %v5846_v9 = vpop.eup %4269  ;;  %4271 = vpow2.f32 %v1226_v30 }
 0x588   : > { %v1237_v4 = vsel %vm1209_vm4, %v5846_v9, 0.0 }
 0x589   : > { %1238 = vadd.xlane.f32.xlu0 %v1237_v4 }
 0x58d   : > { %v4272_v6 = vpop.eup %4271 }
 0x58e   : > { %v1234_v7 = vsel %vm1209_vm4, %v4272_v6, 0.0 }
 0x58f   : > { %1235 = vadd.xlane.f32.xlu1 %v1234_v7 }
 0x597   : > { %1535 = vmax.xlane.f32.xlu1 %v1534_v38 }
 0x59d   : > { %v5857_v16 = vpop.f32.mrf.mxu2 }
 0x59e   : > { %v1540_v19 = vsel %vm1209_vm4, %v5857_v16, -inf }
 0x5a5   : > { %v5859_v2 = vpop.f32.mrf.mxu2 }
 0x5a6   : > { %v1543_v55 = vsel %vm1209_vm4, %v5859_v2, -inf }
 0x5a7   : > { %v1218_v0 = vpop.xlane.xlu1 %1217 }
 0x5a8   : > { %v1224_v32 = vsub.f32 %v1204_v22, %v1218_v0 }
 0x5aa   : > { %v1230_v21 = vmul.f32 1.442695, %v1224_v32 }
 0x5ac   : > { %4273 = vpow2.f32 %v1230_v21 }
 0x5ad   : > { %v5861_v46 = vpop.f32.mrf.mxu2 }
 0x5ae   : > { %v2201_v28 = vsel %vm1209_vm4, %v5861_v46, -inf }
 0x5af   : > { %v1221_v47 = vpop.xlane.xlu0 %1220 }
 0x5b0   : > { %v1225_v58 = vsub.f32 %v1206_v63, %v1221_v47 }
 0x5b2   : > { %v1232_v49 = vmul.f32 1.442695, %v1225_v58  ;;  %v5889_v25 = vpop.eup %4273 }
 0x5b3   : > { %v1240_v39 = vsel %vm1209_vm4, %v5889_v25, 0.0 }
 0x5b4   : > { %4275 = vpow2.f32 %v1232_v49 }
 0x5b5   : > { %v5863_v13 = vpop.f32.mrf.mxu2 }
 0x5b6   : > { %v2204_v51 = vsel %vm1209_vm4, %v5863_v13, -inf }
 0x5b7   : > { %2205 = vmax.xlane.f32.xlu1 %v2204_v51 }
 0x5ba   : > { %v5897_v57 = vpop.eup %4275 }
 0x5bb   : > { %v1243_v8 = vsel %vm1209_vm4, %v5897_v57, 0.0 }
 0x5cf   : > { %v1858_v54 = vpop.f32.mrf.mxu0 }
 0x5d0   : > { %v1868_v48 = vsel %vm1209_vm4, %v1858_v54, -inf }
 0x5d1   : > { %1869 = vmax.xlane.f32.xlu0 %v1868_v48 }
 0x5d7   : > { %v1860_v37 = vpop.f32.mrf.mxu0 }
 0x5d8   : > { %v1871_v50 = vsel %vm1209_vm4, %v1860_v37, -inf }
 0x5d9   : > { %1872 = vmax.xlane.f32.xlu2 %v1871_v50  ;;  %1538 = vmax.xlane.f32.xlu0 %v1537_v1 }
 0x5df   : > { %v5871_v26 = vpop.f32.mrf.mxu0 }
 0x5e0   : > { %v1874_v5 = vsel %vm1209_vm4, %v5871_v26, -inf }
 0x5e1   : > { %1875 = vmax.xlane.f32.xlu0 %v1874_v5 }
 0x5e7   : > { %v5875_v59 = vpop.f32.mrf.mxu0 }
 0x5e8   : > { %v1877_v27 = vsel %vm1209_vm4, %v5875_v59, -inf }
 0x5e9   : > { %1878 = vmax.xlane.f32.xlu2 %v1877_v27  ;;  %1541 = vmax.xlane.f32.xlu0 %v1540_v19 }
 0x5f1   : > { %1544 = vmax.xlane.f32.xlu2 %v1543_v55 }
 0x5f6   : > { %v5883_v52 = vpop.f32.mrf.mxu2 }
 0x5f7   : > { %v2207_v53 = vsel %vm1209_vm4, %v5883_v52, -inf }
 0x5f8   : > { %2208 = vmax.xlane.f32.xlu1 %v2207_v53 }
 0x5f9   : > { %2202 = vmax.xlane.f32.xlu2 %v2201_v28 }
 0x5fc   : > { %v1239_v61 = vpop.xlane.xlu0 %1238 }
 0x5fd   : > { %4277 = vrcp.f32 %v1239_v61 }
 0x5fe   : > { %v5891_v31 = vpop.f32.mrf.mxu2 }
 0x5ff   : > { %v2210_v34 = vsel %vm1209_vm4, %v5891_v31, -inf }
 0x600   : > { %1241 = vadd.xlane.f32.xlu1 %v1240_v39  ;;  %2211 = vmax.xlane.f32.xlu0 %v2210_v34 }
 0x602   : > { %v1236_v14 = vpop.xlane.xlu1 %1235 }
 0x603   : > { %4279 = vrcp.f32 %v1236_v14  ;;  %v4278_v11 = vpop.eup %4277 }
 0x604   : > { %v1251_v3 = vmul.f32 %v4278_v11, %v5846_v9 }
 0x608   : > { %1244 = vadd.xlane.f32.xlu0 %v1243_v8 }
 0x609   : > { %v4280_v62 = vpop.eup %4279 }
 0x60a   : > { %v1250_v44 = vmul.f32 %v4280_v62, %v4272_v6  ;;  %v1536_v33 = vpop.xlane.xlu1 %1535 }
 0x60b   : > { %v1546_v12 = vsub.f32 %v5850_v41, %v1536_v33 }
 0x60c   : > { %v1254_v36 = vpack.c.bf16 %v1251_v3, %v1250_v44 }
 0x60d   : > { %v1550_v15 = vmul.f32 1.442695, %v1546_v12 }
 0x60e   : > { %3578 = vmatmul.msk.bf16.vlgmr.msrb.gmra.mxu1 %vm1209_vm4, %v1254_v36 }
 0x60f   : > { %4281 = vpow2.f32 %v1550_v15 }
 0x615   : > { %v5904_v45 = vpop.eup %4281 }
 0x616   : > { %v1558_v22 = vsel %vm1209_vm4, %v5904_v45, 0.0 }
 0x617   : > { %1559 = vadd.xlane.f32.xlu2 %v1558_v22 }
 0x62a   : > { %v2206_v5 = vpop.xlane.xlu1 %2205 }
 0x62f   : > { %1581 = vrot.lane.b32.xlu2 %v5340_v20, %s4871_s26 }
 0x644   : > { %v1870_v18 = vpop.xlane.xlu0 %1869 }
 0x645   : > { %v1880_v63 = vsub.f32 %v1858_v54, %v1870_v18 }
 0x647   : > { %v1884_v42 = vmul.f32 1.442695, %v1880_v63 }
 0x649   : > { %4283 = vpow2.f32 %v1884_v42 }
 0x64c   : > { %v1873_v29 = vpop.xlane.xlu2 %1872  ;;  %v1539_v40 = vpop.xlane.xlu0 %1538 }
 0x64d   : > { %v1881_v43 = vsub.f32 %v1860_v37, %v1873_v29  ;;  %v1547_v10 = vsub.f32 %v5853_v60, %v1539_v40 }
 0x64f   : > { %v1886_v17 = vmul.f32 1.442695, %v1881_v43  ;;  %v1552_v24 = vmul.f32 1.442695, %v1547_v10  ;;  %v5911_v56 = vpop.eup %4283 }
 0x650   : > { %v1892_v41 = vsel %vm1209_vm4, %v5911_v56, 0.0 }
 0x651   : > { %4285 = vpow2.f32 %v1886_v17 }
 0x652   : > { %4287 = vpow2.f32 %v1552_v24 }
 0x654   : > { %v1876_v35 = vpop.xlane.xlu0 %1875 }
 0x655   : > { %v1882_v30 = vsub.f32 %v5871_v26, %v1876_v35 }
 0x657   : > { %v5914_v9 = vpop.eup %4285  ;;  %v1888_v4 = vmul.f32 1.442695, %v1882_v30 }
 0x658   : > { %1893 = vadd.xlane.f32.xlu2 %v1892_v41  ;;  %v1895_v6 = vsel %vm1209_vm4, %v5914_v9, 0.0  ;;  %v5920_v38 = vpop.eup %4287 }
 0x659   : > { %4289 = vpow2.f32 %v1888_v4  ;;  %1896 = vadd.xlane.f32.xlu1 %v1895_v6  ;;  %v1561_v1 = vsel %vm1209_vm4, %v5920_v38, 0.0 }
 0x65c   : > { %v1879_v7 = vpop.xlane.xlu2 %1878  ;;  %v1542_v60 = vpop.xlane.xlu0 %1541 }
 0x65d   : > { %v1883_v51 = vsub.f32 %v5875_v59, %v1879_v7  ;;  %v1548_v54 = vsub.f32 %v5857_v16, %v1542_v60  ;;  %v2214_v16 = vsub.f32 %v5863_v13, %v2206_v5 }
 0x65f   : > { %v5924_v48 = vpop.eup %4289  ;;  %v1890_v37 = vmul.f32 1.442695, %v1883_v51  ;;  %v1554_v50 = vmul.f32 1.442695, %v1548_v54  ;;  %v2219_v47 = vmul.f32 1.442695, %v2214_v16 }
 0x660   : > { %v1898_v26 = vsel %vm1209_vm4, %v5924_v48, 0.0 }
 0x661   : > { %4291 = vpow2.f32 %v1890_v37  ;;  %1562 = vadd.xlane.f32.xlu1 %v1561_v1  ;;  %1899 = vadd.xlane.f32.xlu2 %v1898_v26 }
 0x662   : > { %4293 = vpow2.f32 %v1554_v50 }
 0x664   : > { %v1545_v27 = vpop.xlane.xlu2 %1544 }
 0x665   : > { %v1549_v59 = vsub.f32 %v5859_v2, %v1545_v27 }
 0x667   : > { %v5931_v19 = vpop.eup %4291  ;;  %v1556_v0 = vmul.f32 1.442695, %v1549_v59 }
 0x668   : > { %v5934_v32 = vpop.eup %4293  ;;  %v1901_v55 = vsel %vm1209_vm4, %v5931_v19, 0.0 }
 0x669   : > { %4295 = vpow2.f32 %v1556_v0  ;;  %1902 = vadd.xlane.f32.xlu2 %v1901_v55  ;;  %v1564_v21 = vsel %vm1209_vm4, %v5934_v32, 0.0 }
 0x66a   : > { %1565 = vadd.xlane.f32.xlu1 %v1564_v21  ;;  %4297 = vpow2.f32 %v2219_v47 }
 0x66b   : > { %v2209_v53 = vpop.xlane.xlu1 %2208 }
 0x66c   : > { %v2203_v58 = vpop.xlane.xlu2 %2202 }
 0x66d   : > { %v2213_v2 = vsub.f32 %v5861_v46, %v2203_v58 }
 0x66f   : > { %v4296_v28 = vpop.eup %4295  ;;  %v2217_v13 = vmul.f32 1.442695, %v2213_v2 }
 0x670   : > { %v1567_v49 = vsel %vm1209_vm4, %v4296_v28, 0.0  ;;  %v5942_v39 = vpop.eup %4297 }
 0x671   : > { %4299 = vpow2.f32 %v2217_v13  ;;  %1568 = vadd.xlane.f32.xlu0 %v1567_v49  ;;  %v2228_v11 = vsel %vm1209_vm4, %v5942_v39, 0.0 }
 0x673   : > { %v2212_v61 = vpop.xlane.xlu0 %2211  ;;  %v1242_v14 = vpop.xlane.xlu1 %1241 }
 0x674   : > { %4301 = vrcp.f32 %v1242_v14  ;;  %v2216_v63 = vsub.f32 %v5891_v31, %v2212_v61 }
 0x676   : > { %v2223_v42 = vmul.f32 1.442695, %v2216_v63 }
 0x677   : > { %v5944_v34 = vpop.eup %4299 }
 0x678   : > { %v2225_v8 = vsel %vm1209_vm4, %v5944_v34, 0.0 }
 0x679   : > { %2229 = vadd.xlane.f32.xlu0 %v2228_v11  ;;  %2226 = vadd.xlane.f32.xlu1 %v2225_v8 }
 0x67a   : > { %v4302_v62 = vpop.eup %4301 }
 0x67b   : > { %v1245_v46 = vpop.xlane.xlu0 %1244  ;;  %v1252_v44 = vmul.f32 %v4302_v62, %v5889_v25  ;;  %v2215_v25 = vsub.f32 %v5883_v52, %v2209_v53 }
 0x67c   : > { %4303 = vrcp.f32 %v1245_v46 }
 0x682   : > { %v4304_v3 = vpop.eup %4303 }
 0x683   : > { %v1253_v33 = vmul.f32 %v4304_v3, %v5897_v57  ;;  %v2221_v57 = vmul.f32 1.442695, %v2215_v25 }
 0x685   : > { %v1255_v12 = vpack.c.bf16 %v1253_v33, %v1252_v44  ;;  %4305 = vpow2.f32 %v2221_v57  ;;  %v3910_v57 = vld [vmem:[#allocation15 + $0x38] sm:$0xff] }
 0x686   : > { %4307 = vpow2.f32 %v2223_v42  ;;  %2370 = vmatpush.bf16.msra.mxu0 %v3910_v57  ;;  %v3909_v42 = vld [vmem:[#allocation15 + $0x30] sm:$0xff] }
 0x687   : > { %3579 = vmatmul.msk.bf16.gmra.mxu1 %vm1209_vm4, %v1255_v12 }
 0x68a   : > { %v1560_v36 = vpop.xlane.xlu2 %1559  ;;  %2371 = vmatpush.bf16.msra.mxu0 %v3909_v42  ;;  %v3746_v42 = vld [vmem:[#allocation18 + $0xe8] sm:$0xf] }
 0x68b   : > { %v1272_v15 = vpop.f32.mrf.mxu1  ;;  %v5961_v29 = vpop.eup %4305  ;;  %4309 = vrcp.f32 %v1560_v36 }
 0x68c   : > { %1282 = vst.msk [vmem:[#allocation2] sm:$0xff] %vm1022_vm6, %v1272_v15  ;;  %v2231_v40 = vsel %vm1209_vm4, %v5961_v29, 0.0  ;;  %v5965_v43 = vpop.eup %4307 }
 0x68d   : > { %2247 = vrot.lane.b32.xlu0 %v5340_v20, %s4870_s27 }
 0x691   : > { %v4310_v31 = vpop.eup %4309 }
 0x692   : > { %v1582_v22 = vpop.permute.xlu2 %1581  ;;  %1914 = vrot.lane.b32.xlu1 %v5340_v20, %s4874_s11  ;;  %v2234_v20 = vsel %vm1209_vm4, %v5965_v43, 0.0  ;;  %v1574_v24 = vmul.f32 %v4310_v31, %v5904_v45  ;;  %v3903_v31 = vld [vmem:[#allocation15] sm:$0xff] }
 0x693   : > { %v1274_v18 = vpop.f32.mrf.mxu1  ;;  %1597 = vmatpush.bf16.msrb.mxu3 %v1582_v22 }
 0x694   : > { %1283 = vst.msk [vmem:[#allocation2 + $0x8] sm:$0xff] %vm1022_vm6, %v1274_v18 }
 0x6b7   : > { %2232 = vadd.xlane.f32.xlu0 %v2231_v40  ;;  %v3907_v40 = vld [vmem:[#allocation15 + $0x20] sm:$0xff] }
 0x6bc   : > { %2235 = vadd.xlane.f32.xlu1 %v2234_v20  ;;  %v3905_v20 = vld [vmem:[#allocation15 + $0x10] sm:$0xff] }
 0x6cb   : > { %v1894_v45 = vpop.xlane.xlu2 %1893 }
 0x6cc   : > { %v1897_v17 = vpop.xlane.xlu1 %1896 }
 0x6d4   : > { %v1563_v52 = vpop.xlane.xlu1 %1562  ;;  %v1900_v26 = vpop.xlane.xlu2 %1899 }
 0x6d5   : > { %4311 = vrcp.f32 %v1563_v52 }
 0x6db   : > { %v4312_v10 = vpop.eup %4311 }
 0x6dc   : > { %v1575_v35 = vmul.f32 %v4312_v10, %v5920_v38  ;;  %v1903_v2 = vpop.xlane.xlu2 %1902 }
 0x6dd   : > { %v1566_v4 = vpop.xlane.xlu1 %1565 }
 0x6de   : > { %v1578_v30 = vpack.c.bf16 %v1575_v35, %v1574_v24  ;;  %4313 = vrcp.f32 %v1566_v4 }
 0x6e0   : > { %3582 = vmatmul.msk.bf16.vlgmr.msrb.gmra.mxu3 %vm1209_vm4, %v1578_v30 }
 0x6e4   : > { %v1569_v41 = vpop.xlane.xlu0 %1568  ;;  %v4314_v6 = vpop.eup %4313 }
 0x6e5   : > { %4315 = vrcp.f32 %v1569_v41  ;;  %v1576_v60 = vmul.f32 %v4314_v6, %v5934_v32 }
 0x6eb   : > { %v4316_v7 = vpop.eup %4315 }
 0x6ec   : > { %v1577_v51 = vmul.f32 %v4316_v7, %v4296_v28  ;;  %v2227_v37 = vpop.xlane.xlu1 %2226  ;;  %v2230_v50 = vpop.xlane.xlu0 %2229 }
 0x6ed   : > { %4317 = vrcp.f32 %v2227_v37 }
 0x6ee   : > { %v1579_v54 = vpack.c.bf16 %v1577_v51, %v1576_v60  ;;  %4319 = vrcp.f32 %v2230_v50 }
 0x6ef   : > { %4321 = vrcp.f32 %v1894_v45 }
 0x6f0   : > { %3583 = vmatmul.msk.bf16.gmra.mxu3 %vm1209_vm4, %v1579_v54  ;;  %4323 = vrcp.f32 %v1897_v17  ;;  %v3904_v17 = vld [vmem:[#allocation15 + $0x8] sm:$0xff] }
 0x6f1   : > { %4325 = vrcp.f32 %v1903_v2  ;;  %v4375_v2 = vld [vmem:[%s5176_s29 + $0x10] sm:$0xff] }
 0x6f2   : > { %4327 = vrcp.f32 %v1900_v26 }
 0x6f3   : > { %v4318_v38 = vpop.eup %4317 }
 0x6f4   : > { %v4320_v1 = vpop.eup %4319  ;;  %v2241_v5 = vmul.f32 %v4318_v38, %v5944_v34 }
 0x6f5   : > { %v2242_v27 = vmul.f32 %v4320_v1, %v5942_v39  ;;  %v4322_v59 = vpop.eup %4321 }
 0x6f6   : > { %v4324_v16 = vpop.eup %4323  ;;  %v1908_v55 = vmul.f32 %v4322_v59, %v5911_v56 }
 0x6f7   : > { %v2245_v32 = vpack.c.bf16 %v2242_v27, %v2241_v5  ;;  %v1909_v21 = vmul.f32 %v4324_v16, %v5914_v9  ;;  %v4326_v13 = vpop.eup %4325  ;;  %v4199_v5 = vld [vmem:[#allocation17] ss:$0 sm:$0xff] }
 0x6f8   : > { %v4328_v56 = vpop.eup %4327  ;;  %v1911_v9 = vmul.f32 %v4326_v13, %v5931_v19  ;;  %v4373_v16 = vld [vmem:[%s5176_s29] sm:$0xff] }
 0x6f9   : > { %v1912_v53 = vpack.c.bf16 %v1909_v21, %v1908_v55  ;;  %v1910_v49 = vmul.f32 %v4328_v56, %v5924_v48  ;;  %v4374_v21 = vld [vmem:[%s5176_s29 + $0x8] sm:$0xff] }
 0x6fb   : > { %v1913_v61 = vpack.c.bf16 %v1911_v9, %v1910_v49  ;;  %v4376_v9 = vld [vmem:[%s5176_s29 + $0x18] sm:$0xff]  ;;  %s6316_s29 = sld [smem:[#allocation49_spill]] }
 0x6ff   : > { %v2248_v0 = vpop.permute.xlu0 %2247 }
 0x700   : > { %2263 = vmatpush.bf16.msra.mxu3 %v2248_v0 }
 0x703   : > { %3590 = vmatmul.msk.bf16.vlgmr.msra.gmra.mxu3 %vm1209_vm4, %v2245_v32 }
 0x704   : > { %v1915_v47 = vpop.permute.xlu1 %1914  ;;  %v1277_v58 = vpop.f32.mrf.mxu1 }
 0x705   : > { %1284 = vst.msk [vmem:[#allocation2 + $0x10] sm:$0xff] %vm1022_vm6, %v1277_v58  ;;  %1930 = vmatpush.bf16.msra.mxu1 %v1915_v47 }
 0x708   : > { %3586 = vmatmul.msk.bf16.vlgmr.msra.gmra.mxu1 %vm1209_vm4, %v1912_v53 }
 0x70c   : > { %v1279_v28 = vpop.f32.mrf.mxu1 }
 0x70d   : > { %1285 = vst.msk [vmem:[#allocation2 + $0x18] sm:$0xff] %vm1022_vm6, %v1279_v28  ;;  %vm1625_vm6 = vcmask 523520  }
 0x718   : > { %3587 = vmatmul.msk.bf16.gmra.mxu1 %vm1209_vm4, %v1913_v61 }
 0x72a   : > { %v2233_v39 = vpop.xlane.xlu0 %2232 }
 0x72b   : > { %4329 = vrcp.f32 %v2233_v39 }
 0x72f   : > { %v2236_v34 = vpop.xlane.xlu1 %2235 }
 0x730   : > { %4331 = vrcp.f32 %v2236_v34 }
 0x731   : > { %v4330_v14 = vpop.eup %4329 }
 0x732   : > { %v2243_v8 = vmul.f32 %v4330_v14, %v5961_v29  ;;  %v3908_v29 = vld [vmem:[#allocation15 + $0x28] sm:$0xff] }
 0x733   : > { %2372 = vmatpush.bf16.msra.mxu0 %v3908_v29  ;;  %v3942_v29 = vld [vmem:[#allocation18 + $0xf4] sm:$0xf0] }
 0x736   : > { %v4332_v11 = vpop.eup %4331 }
 0x737   : > { %v2244_v46 = vmul.f32 %v4332_v11, %v5965_v43  ;;  %2373 = vmatpush.bf16.msra.mxu0 %v3907_v40  ;;  %v3906_v43 = vld [vmem:[#allocation15 + $0x18] sm:$0xff] }
 0x739   : > { %v2246_v62 = vpack.c.bf16 %v2244_v46, %v2243_v8 }
 0x73b   : > { %3591 = vmatmul.msk.bf16.gmra.mxu3 %vm1209_vm4, %v2246_v62  ;;  %2374 = vmatpush.bf16.msra.mxu0 %v3906_v43  ;;  %v3747_v43 = vor.u32 %v3942_v29, %v3746_v42  ;;  %v3658_v42 = vld [vmem:[#allocation18 + $0x40] sm:$0xf]  ;;  %v3921_v29 = vld [vmem:[#allocation18 + $0x4c] sm:$0xf0] }
 0x73d   : > { %2727 = vmatpush.bf16.msrb.mxu3 %v3747_v43  ;;  %v3659_v43 = vor.u32 %v3921_v29, %v3658_v42  ;;  %v4200_v42 = vld [vmem:[#allocation11] ss:$0 sm:$0xff] }
 0x73f   : > { %2375 = vmatpush.bf16.msra.mxu0 %v3905_v20  ;;  %v3940_v20 = vld [vmem:[#allocation18 + $0xec] sm:$0xf] }
 0x743   : > { %2376 = vmatpush.bf16.msra.mxu0 %v3904_v17  ;;  %v3748_v17 = vld [vmem:[#allocation18 + $0xf8] sm:$0xf0] }
 0x747   : > { %2377 = vmatpush.bf16.msra.mxu0 %v3903_v31  ;;  %v3722_v31 = vld [vmem:[#allocation18 + $0xc0] sm:$0xf] }
 0x763   : > { %v1599_v3 = vpop.f32.mrf.mxu3 }
 0x76b   : > { %v1601_v19 = vpop.f32.mrf.mxu3 }
 0x76c   : > { %1615 = vrot.lane.b32.xlu0 %v1601_v19, %s4870_s27 }
 0x773   : > { %v1604_v48 = vpop.f32.mrf.mxu3 }
 0x77b   : > { %v1606_v44 = vpop.f32.mrf.mxu3 }
 0x785   : > { %v1932_v33 = vpop.f32.mrf.mxu1 }
 0x786   : > { %1946 = vrot.lane.b32.xlu1 %v1932_v33, %s4874_s11  ;;  %v2265_v12 = vpop.f32.mrf.mxu3 }
 0x787   : > { %2279 = vrot.lane.b32.xlu0 %v2265_v12, %s4871_s26 }
 0x78d   : > { %v1934_v36 = vpop.f32.mrf.mxu1 }
 0x78e   : > { %1948 = vrot.lane.b32.xlu2 %v1934_v36, %s4874_s11  ;;  %v2267_v22 = vpop.f32.mrf.mxu3 }
 0x78f   : > { %1617 = vrot.lane.b32.xlu0 %v1604_v48, %s4870_s27 }
 0x795   : > { %v1937_v15 = vpop.f32.mrf.mxu1 }
 0x796   : > { %1613 = vrot.lane.b32.xlu2 %v1599_v3, %s4870_s27  ;;  %1950 = vrot.lane.b32.xlu1 %v1937_v15, %s4874_s11 }
 0x79d   : > { %v1939_v18 = vpop.f32.mrf.mxu1 }
 0x79e   : > { %1952 = vrot.lane.b32.xlu0 %v1939_v18, %s4874_s11  ;;  %2281 = vrot.lane.b32.xlu2 %v2267_v22, %s4871_s26  ;;  %v3738_v22 = vld [vmem:[#allocation18 + $0xe0] sm:$0xf]  ;;  %v3941_v18 = vld [vmem:[#allocation18 + $0xec] sm:$0xf0]  ;;  %s3276_s11 = sshll.u32 %s6177_s4, 4  ;;  %s3277_s11 = int_to_ptr.vmem [resolvable:$true] %s3276_s11 }
 0x79f   : > { %v3739_v57 = vor.u32 %v3941_v18, %v3738_v22 }
 0x7a1   : > { %2689 = vmatpush.bf16.msrb.mxu1 %v3739_v57  ;;  %v3684_v57 = vld [vmem:[#allocation18 + $0x78] sm:$0xf0] }
 0x7a6   : > { %1619 = vrot.lane.b32.xlu2 %v1606_v44, %s4870_s27  ;;  %s6319_s27 = sld [smem:[#allocation50_spill]] }
 0x7ac   : > { %s4727_s0 = scalar_lea.hbm %s6319_s27, 128 }
 0x7be   : > { %v2270_v25 = vpop.f32.mrf.mxu3 }
 0x7bf   : > { %2283 = vrot.lane.b32.xlu2 %v2270_v25, %s4871_s26  ;;  %v3939_v25 = vld [vmem:[#allocation18 + $0xe4] sm:$0xf] }
 0x7c6   : > { %v2272_v63 = vpop.f32.mrf.mxu3 }
 0x7c7   : > { %2285 = vrot.lane.b32.xlu1 %v2272_v63, %s4871_s26  ;;  %v3740_v63 = vld [vmem:[#allocation18 + $0xf0] sm:$0xf0]  ;;  %s3275_s26 = scalar_lea.hbm %s6319_s27, %s3883_s24 }
 0x7c8   : > { %v3743_v40 = vor.u32 %v3939_v25, %v3740_v63  ;;  %v3924_v25 = vld [vmem:[#allocation18 + $0x6c] sm:$0xf]  ;;  %s3278_s5 = sshll.u32 %s3275_s26, 4  ;;  %s3279_s5 = int_to_ptr.hbm [resolvable:$true] %s3278_s5 }
 0x7c9   : > { %v3687_v63 = vor.u32 %v3924_v25, %v3684_v57 }
 0x7ca   : > { %2708 = vmatpush.bf16.msrb.mxu2 %v3743_v40  ;;  %v3919_v40 = vld [vmem:[#allocation18 + $0x44] sm:$0xf] }
 0x7de   : > { %v1616_v52 = vpop.permute.xlu0 %1615 }
 0x7df   : > { %1627 = vst.msk [vmem:[#allocation2 + $0x8] sm:$0xff] %vm1625_vm6, %v1616_v52  ;;  %v3751_v52 = vor.u32 %v3940_v20, %v3748_v17  ;;  %v3660_v20 = vld [vmem:[#allocation18 + $0x50] sm:$0xf0]  ;;  %v3666_v17 = vld [vmem:[#allocation18 + $0x48] sm:$0xf] }
 0x7e1   : > { %2746 = vmatpush.bf16.msrb.mxu0 %v3751_v52  ;;  %v3922_v52 = vld [vmem:[#allocation18 + $0x54] sm:$0xf0] }
 0x7e8   : > { %v1949_v10 = vpop.permute.xlu2 %1948 }
 0x7e9   : > { %1960 = vst.msk [vmem:[#allocation2 + $0x8] sm:$0xff] %vm1958_vm5, %v1949_v10  ;;  %v3937_v10 = vld [vmem:[#allocation18 + $0xcc] sm:$0xf0] }
 0x7f0   : > { %v1614_v24 = vpop.permute.xlu2 %1613 }
 0x7f1   : > { %1626 = vst.msk [vmem:[#allocation2] sm:$0xff] %vm1625_vm6, %v1614_v24  ;;  %v3935_v24 = vld [vmem:[#allocation18 + $0xc4] sm:$0xf] }
 0x7f8   : > { %v1947_v35 = vpop.permute.xlu1 %1946  ;;  %v2282_v30 = vpop.permute.xlu2 %2281 }
 0x7f9   : > { %1959 = vst.msk [vmem:[#allocation2] sm:$0xff] %vm1958_vm5, %v1947_v35  ;;  %v2280_v4 = vpop.permute.xlu0 %2279  ;;  %v3723_v35 = vor.u32 %v3937_v10, %v3722_v31  ;;  %v3663_v31 = vor.u32 %v3919_v40, %v3660_v20  ;;  %v3667_v10 = vor.u32 %v3922_v52, %v3666_v17  ;;  %v4201_v17 = vld [vmem:[#allocation11 + $0x1] ss:$0 sm:$0xff] }
 0x7fa   : > { %2293 = vst.msk [vmem:[#allocation2 + $0x8] sm:$0xff] %vm2291_vm0, %v2282_v30  ;;  %v3724_v30 = vld [vmem:[#allocation18 + $0xd0] sm:$0xf0] }
 0x7fb   : > { %2292 = vst.msk [vmem:[#allocation2] sm:$0xff] %vm2291_vm0, %v2280_v4  ;;  %v3730_v4 = vld [vmem:[#allocation18 + $0xc8] sm:$0xf]  ;;  %2690 = vmatpush.bf16.msrb.mxu1 %v3723_v35  ;;  %v3668_v35 = vld [vmem:[#allocation18 + $0x58] sm:$0xf0] }
 0x800   : > { %v1620_v41 = vpop.permute.xlu2 %1619 }
 0x801   : > { %1629 = vst.msk [vmem:[#allocation2 + $0x18] sm:$0xff] %vm1625_vm6, %v1620_v41  ;;  %v1618_v6 = vpop.permute.xlu0 %1617  ;;  %v2297_v7 = vld [vmem:[#allocation2 + $0x8] sm:$0xff]  ;;  %v3938_v41 = vld [vmem:[#allocation18 + $0xd4] sm:$0xf0] }
 0x802   : > { %1628 = vst.msk [vmem:[#allocation2 + $0x10] sm:$0xff] %vm1625_vm6, %v1618_v6  ;;  %v2296_v60 = vld [vmem:[#allocation2] sm:$0xff]  ;;  %v3727_v6 = vor.u32 %v3935_v24, %v3724_v30  ;;  %v3920_v24 = vld [vmem:[#allocation18 + $0x4c] sm:$0xf] }
 0x803   : > { %v2300_v51 = vpack.c.bf16 %v2297_v7, %v2296_v60  ;;  %v3731_v7 = vor.u32 %v3938_v41, %v3730_v4  ;;  %v3936_v60 = vld [vmem:[#allocation18 + $0xcc] sm:$0xf]  ;;  %v3671_v30 = vor.u32 %v3920_v24, %v3668_v35  ;;  %v3642_v4 = vld [vmem:[#allocation18 + $0x20] sm:$0xf]  ;;  %v3917_v41 = vld [vmem:[#allocation18 + $0x2c] sm:$0xf0] }
 0x804   : > { %2709 = vmatpush.bf16.msrb.mxu2 %v3727_v6  ;;  %v3915_v6 = vld [vmem:[#allocation18 + $0x24] sm:$0xf] }
 0x805   : > { %2378 = vmatmul.bf16.vlgmr.msra.gmra.mxu0 %v2300_v51  ;;  %v3732_v51 = vld [vmem:[#allocation18 + $0xd8] sm:$0xf0]  ;;  %2728 = vmatpush.bf16.msrb.mxu3 %v3731_v7  ;;  %v3643_v7 = vor.u32 %v3917_v41, %v3642_v4 }
 0x808   : > { %v1951_v54 = vpop.permute.xlu1 %1950 }
 0x809   : > { %1961 = vst.msk [vmem:[#allocation2 + $0x10] sm:$0xff] %vm1958_vm5, %v1951_v54  ;;  %v3735_v54 = vor.u32 %v3936_v60, %v3732_v51  ;;  %v3644_v60 = vld [vmem:[#allocation18 + $0x30] sm:$0xf0]  ;;  %v3650_v51 = vld [vmem:[#allocation18 + $0x28] sm:$0xf] }
 0x80b   : > { %2747 = vmatpush.bf16.msrb.mxu0 %v3735_v54  ;;  %v3918_v54 = vld [vmem:[#allocation18 + $0x34] sm:$0xf0] }
 0x810   : > { %v1953_v37 = vpop.permute.xlu0 %1952 }
 0x811   : > { %1962 = vst.msk [vmem:[#allocation2 + $0x18] sm:$0xff] %vm1958_vm5, %v1953_v37  ;;  %v3706_v37 = vld [vmem:[#allocation18 + $0xa0] sm:$0xf] }
 0x819   : > { %v2284_v50 = vpop.permute.xlu2 %2283 }
 0x81a   : > { %2294 = vst.msk [vmem:[#allocation2 + $0x10] sm:$0xff] %vm2291_vm0, %v2284_v50  ;;  %v3933_v50 = vld [vmem:[#allocation18 + $0xac] sm:$0xf0] }
 0x821   : > { %v2298_v38 = vld [vmem:[#allocation2 + $0x10] sm:$0xff] }
 0x839   : > { %v2286_v45 = vpop.permute.xlu1 %2285 }
 0x83a   : > { %2295 = vst.msk [vmem:[#allocation2 + $0x18] sm:$0xff] %vm2291_vm0, %v2286_v45  ;;  %v3931_v45 = vld [vmem:[#allocation18 + $0xa4] sm:$0xf] }
 0x841   : > { %v2299_v1 = vld [vmem:[#allocation2 + $0x18] sm:$0xff] }
 0x842   : > { %v2301_v26 = vpack.c.bf16 %v2299_v1, %v2298_v38  ;;  %v3707_v38 = vor.u32 %v3933_v50, %v3706_v37  ;;  %v3708_v1 = vld [vmem:[#allocation18 + $0xb0] sm:$0xf0]  ;;  %v3647_v50 = vor.u32 %v3915_v6, %v3644_v60 }
 0x844   : > { %2383 = vmatmul.bf16.gmra.mxu0 %v2301_v26  ;;  %v3714_v26 = vld [vmem:[#allocation18 + $0xa8] sm:$0xf]  ;;  %2691 = vmatpush.bf16.msrb.mxu1 %v3707_v38  ;;  %v3916_v38 = vld [vmem:[#allocation18 + $0x2c] sm:$0xf] }
 0x882   : > { %v2379_v27 = vpop.f32.mrf.mxu0 }
 0x883   : > { %v2380_v59 = vadd.f32 %v4199_v5, %v2379_v27  ;;  %v3711_v27 = vor.u32 %v3931_v45, %v3708_v1  ;;  %v3651_v45 = vor.u32 %v3918_v54, %v3650_v51  ;;  %v3652_v1 = vld [vmem:[#allocation18 + $0x38] sm:$0xf0] }
 0x885   : > { %v6013_v0 = vadd.f32 %v4373_v16, %v2380_v59  ;;  %v3932_v16 = vld [vmem:[#allocation18 + $0xac] sm:$0xf]  ;;  %2710 = vmatpush.bf16.msrb.mxu2 %v3711_v27  ;;  %v3655_v27 = vor.u32 %v3916_v38, %v3652_v1 }
 0x887   : > { %2395 = vadd.xlane.f32.xlu0 %v6013_v0 }
 0x88a   : > { %v2381_v32 = vpop.f32.mrf.mxu0 }
 0x88b   : > { %v2382_v55 = vadd.f32 %v4199_v5, %v2381_v32  ;;  %v3716_v32 = vld [vmem:[#allocation18 + $0xb8] sm:$0xf0] }
 0x88d   : > { %v6017_v47 = vadd.f32 %v4374_v21, %v2382_v55  ;;  %v3719_v55 = vor.u32 %v3932_v16, %v3716_v32  ;;  %v3690_v21 = vld [vmem:[#allocation18 + $0x80] sm:$0xf]  ;;  %v3911_v16 = vld [vmem:[#allocation18 + $0x4] sm:$0xf]  ;;  %v3628_v32 = vld [vmem:[#allocation18 + $0x10] sm:$0xf0] }
 0x88f   : > { %2397 = vadd.xlane.f32.xlu2 %v6017_v47  ;;  %2748 = vmatpush.bf16.msrb.mxu0 %v3719_v55 }
 0x8c1   : > { %v2384_v58 = vpop.f32.mrf.mxu0 }
 0x8c2   : > { %v2385_v53 = vadd.f32 %v4199_v5, %v2384_v58  ;;  %v3929_v58 = vld [vmem:[#allocation18 + $0x8c] sm:$0xf0] }
 0x8c4   : > { %v6021_v28 = vadd.f32 %v4375_v2, %v2385_v53  ;;  %v3927_v53 = vld [vmem:[#allocation18 + $0x84] sm:$0xf]  ;;  %v3691_v2 = vor.u32 %v3929_v58, %v3690_v21  ;;  %v3631_v21 = vor.u32 %v3911_v16, %v3628_v32  ;;  %v3634_v58 = vld [vmem:[#allocation18 + $0x8] sm:$0xf] }
 0x8c6   : > { %2399 = vadd.xlane.f32.xlu1 %v6021_v28  ;;  %2692 = vmatpush.bf16.msrb.mxu1 %v3691_v2  ;;  %v3912_v2 = vld [vmem:[#allocation18 + $0xc] sm:$0xf] }
 0x8c9   : > { %v2386_v13 = vpop.f32.mrf.mxu0 }
 0x8ca   : > { %v2387_v56 = vadd.f32 %v4199_v5, %v2386_v13  ;;  %v3934_v5 = vld [vmem:[#allocation18 + $0xb4] sm:$0xf0]  ;;  %v3692_v13 = vld [vmem:[#allocation18 + $0x90] sm:$0xf0] }
 0x8cb   : > { %v3715_v59 = vor.u32 %v3934_v5, %v3714_v26  ;;  %v3626_v26 = vld [vmem:[#allocation18] sm:$0xf] }
 0x8cc   : > { %v6025_v49 = vadd.f32 %v4376_v9, %v2387_v56  ;;  %v3698_v56 = vld [vmem:[#allocation18 + $0x88] sm:$0xf]  ;;  %v3930_v9 = vld [vmem:[#allocation18 + $0x94] sm:$0xf0] }
 0x8cd   : > { %2729 = vmatpush.bf16.msrb.mxu3 %v3715_v59  ;;  %v3913_v59 = vld [vmem:[#allocation18 + $0xc] sm:$0xf0] }
 0x8ce   : > { %2401 = vadd.xlane.f32.xlu0 %v6025_v49  ;;  %v3627_v55 = vor.u32 %v3913_v59, %v3626_v26 }
 0x8fa   : > { %v2396_v61 = vpop.xlane.xlu0 %2395 }
 0x8fb   : > { %v2403_v39 = vmul.f32 %v2396_v61, %v5235_v23  ;;  %v3695_v61 = vor.u32 %v3927_v53, %v3692_v13  ;;  %v3914_v53 = vld [vmem:[#allocation18 + $0x14] sm:$0xf0] }
 0x8fd   : > { %v6030_v34 = vsub.f32 %v6013_v0, %v2403_v39  ;;  %v3699_v39 = vor.u32 %v3930_v9, %v3698_v56  ;;  %2711 = vmatpush.bf16.msrb.mxu2 %v3695_v61  ;;  %v3635_v56 = vor.u32 %v3914_v53, %v3634_v58  ;;  %v3636_v9 = vld [vmem:[#allocation18 + $0x18] sm:$0xf0] }
 0x8fe   : > { %v3639_v61 = vor.u32 %v3912_v2, %v3636_v9  ;;  %v3950_v2 = vld [vmem:[#allocation20 + $0x38] sm:$0xff] }
 0x8ff   : > { %v2411_v14 = vmul.f32 %v6030_v34, %v6030_v34  ;;  %2730 = vmatpush.bf16.msrb.mxu3 %v3699_v39  ;;  %v3958_v9 = vld [vmem:[#allocation20 + $0x78] sm:$0xff] }
 0x901   : > { %2415 = vadd.xlane.f32.xlu2 %v2411_v14  ;;  %v3928_v14 = vld [vmem:[#allocation18 + $0x8c] sm:$0xf] }
 0x902   : > { %v2398_v11 = vpop.xlane.xlu2 %2397 }
 0x903   : > { %v2404_v8 = vmul.f32 %v2398_v11, %v5235_v23  ;;  %v3700_v11 = vld [vmem:[#allocation18 + $0x98] sm:$0xf0] }
 0x905   : > { %v6036_v46 = vsub.f32 %v6017_v47, %v2404_v8  ;;  %v3703_v8 = vor.u32 %v3928_v14, %v3700_v11 }
 0x907   : > { %v2412_v62 = vmul.f32 %v6036_v46, %v6036_v46  ;;  %2749 = vmatpush.bf16.msrb.mxu0 %v3703_v8 }
 0x909   : > { %2417 = vadd.xlane.f32.xlu1 %v2412_v62  ;;  %v3674_v62 = vld [vmem:[#allocation18 + $0x60] sm:$0xf] }
 0x90b   : > { %2750 = vmatpush.bf16.msrb.mxu0 %v3687_v63 }
 0x90f   : > { %2751 = vmatpush.bf16.msrb.mxu0 %v3671_v30 }
 0x913   : > { %2752 = vmatpush.bf16.msrb.mxu0 %v3655_v27 }
 0x917   : > { %2753 = vmatpush.bf16.msrb.mxu0 %v3639_v61  ;;  %v3966_v61 = vld [vmem:[#allocation20 + $0xb8] sm:$0xff] }
 0x939   : > { %v2400_v3 = vpop.xlane.xlu1 %2399 }
 0x93a   : > { %v2405_v19 = vmul.f32 %v2400_v3, %v5235_v23  ;;  %v3925_v3 = vld [vmem:[#allocation18 + $0x6c] sm:$0xf0] }
 0x93c   : > { %v6042_v48 = vsub.f32 %v6021_v28, %v2405_v19  ;;  %v3923_v19 = vld [vmem:[#allocation18 + $0x64] sm:$0xf] }
 0x93e   : > { %v2413_v44 = vmul.f32 %v6042_v48, %v6042_v48 }
 0x940   : > { %2419 = vadd.xlane.f32.xlu0 %v2413_v44  ;;  %v3675_v44 = vor.u32 %v3925_v3, %v3674_v62 }
 0x941   : > { %v2402_v33 = vpop.xlane.xlu0 %2401 }
 0x942   : > { %v2406_v12 = vmul.f32 %v2402_v33, %v5235_v23  ;;  %v3676_v33 = vld [vmem:[#allocation18 + $0x70] sm:$0xf0]  ;;  %2693 = vmatpush.bf16.msrb.mxu1 %v3675_v44 }
 0x943   : > { %v3679_v22 = vor.u32 %v3923_v19, %v3676_v33 }
 0x944   : > { %v6048_v36 = vsub.f32 %v6025_v49, %v2406_v12  ;;  %v3682_v12 = vld [vmem:[#allocation18 + $0x68] sm:$0xf] }
 0x945   : > { %2712 = vmatpush.bf16.msrb.mxu2 %v3679_v22 }
 0x946   : > { %v2414_v15 = vmul.f32 %v6048_v36, %v6048_v36  ;;  %2694 = vmatpush.bf16.msrb.mxu1 %v3659_v43 }
 0x948   : > { %2421 = vadd.xlane.f32.xlu2 %v2414_v15  ;;  %v3926_v15 = vld [vmem:[#allocation18 + $0x74] sm:$0xf0] }
 0x949   : > { %v3683_v18 = vor.u32 %v3926_v15, %v3682_v12  ;;  %2713 = vmatpush.bf16.msrb.mxu2 %v3663_v31 }
 0x94a   : > { %2695 = vmatpush.bf16.msrb.mxu1 %v3643_v7 }
 0x94b   : > { %2731 = vmatpush.bf16.msrb.mxu3 %v3683_v18 }
 0x94d   : > { %2714 = vmatpush.bf16.msrb.mxu2 %v3647_v50 }
 0x94e   : > { %2696 = vmatpush.bf16.msrb.mxu1 %v3627_v55 }
 0x94f   : > { %2732 = vmatpush.bf16.msrb.mxu3 %v3667_v10 }
 0x951   : > { %2715 = vmatpush.bf16.msrb.mxu2 %v3631_v21 }
 0x952   : > { %3177 = vmatpush.bf16.msra.mxu1 %v3950_v2 }
 0x953   : > { %2733 = vmatpush.bf16.msrb.mxu3 %v3651_v45 }
 0x955   : > { %3196 = vmatpush.bf16.msra.mxu2 %v3958_v9 }
 0x957   : > { %2734 = vmatpush.bf16.msrb.mxu3 %v3635_v56  ;;  %v6060_v56 = vld [vmem:[#allocation20 + $0xf0] sm:$0xff] }
 0x95b   : > { %3215 = vmatpush.bf16.msra.mxu3 %v3966_v61 }
 0x974   : > { %v2416_v37 = vpop.xlane.xlu2 %2415 }
 0x975   : > { %v2423_v5 = vmul.f32 %v2416_v37, %v5235_v23 }
 0x977   : > { %v2427_v13 = vadd.f32 1e-06, %v2423_v5 }
 0x979   : > { %4333 = vrsqrt.f32 %v2427_v13  ;;  %vm2437_vm8 = vweird.f32 %v2427_v13 }
 0x97c   : > { %v2418_v39 = vpop.xlane.xlu1 %2417 }
 0x97d   : > { %v2424_v14 = vmul.f32 %v2418_v39, %v5235_v23  ;;  %v6063_v39 = vld [vmem:[#allocation20 + $0xe8] sm:$0xff] }
 0x97f   : > { %v4334_v11 = vpop.eup %4333  ;;  %v2428_v8 = vadd.f32 1e-06, %v2424_v14  ;;  %v3957_v14 = vld [vmem:[#allocation20 + $0x70] sm:$0xff] }
 0x980   : > { %v2432_v62 = vmul.f32 %v4334_v11, %v2427_v13  ;;  %vm2438_vm7 = vweird.f32 %v4334_v11  ;;  %v3949_v13 = vld [vmem:[#allocation20 + $0x30] sm:$0xff]  ;;  %3197 = vmatpush.bf16.msra.mxu2 %v3957_v14 }
 0x981   : > { %4335 = vrsqrt.f32 %v2428_v8  ;;  %vm2439_vm9 = vmor %vm2437_vm8, %vm2438_vm7  ;;  %vm2447_vm11 = vweird.f32 %v2428_v8  ;;  %3178 = vmatpush.bf16.msra.mxu1 %v3949_v13 }
 0x982   : > { %v2433_v3 = vmul.f32 %v4334_v11, %v2432_v62  ;;  %v6066_v62 = vld [vmem:[#allocation20 + $0xe0] sm:$0xff] }
 0x984   : > { %v2434_v19 = vmul.f32 0.5, %v2433_v3  ;;  %v3956_v3 = vld [vmem:[#allocation20 + $0x68] sm:$0xff] }
 0x985   : > { %3198 = vmatpush.bf16.msra.mxu2 %v3956_v3 }
 0x986   : > { %v2435_v44 = vsub.f32 1.5, %v2434_v19  ;;  %v3964_v19 = vld [vmem:[#allocation20 + $0xa8] sm:$0xff] }
 0x987   : > { %v4336_v33 = vpop.eup %4335 }
 0x988   : > { %v2436_v12 = vmul.f32 %v4334_v11, %v2435_v44  ;;  %v2442_v15 = vmul.f32 %v4336_v33, %v2428_v8  ;;  %vm2448_vm10 = vweird.f32 %v4336_v33  ;;  %v3947_v8 = vld [vmem:[#allocation20 + $0x20] sm:$0xff]  ;;  %v3946_v44 = vld [vmem:[#allocation20 + $0x18] sm:$0xff] }
 0x989   : > { %vm2449_vm12 = vmor %vm2447_vm11, %vm2448_vm10 }
 0x98a   : > { %v2443_v22 = vmul.f32 %v4336_v33, %v2442_v15  ;;  %v2440_v18 = vsel %vm2439_vm9, %v4334_v11, %v2436_v12  ;;  %v3965_v11 = vld [vmem:[#allocation20 + $0xb0] sm:$0xff]  ;;  %v3955_v12 = vld [vmem:[#allocation20 + $0x60] sm:$0xff] }
 0x98b   : > { %v2471_v63 = vmul.f32 %v2440_v18, %v6030_v34  ;;  %3216 = vmatpush.bf16.msra.mxu3 %v3965_v11  ;;  %v3963_v15 = vld [vmem:[#allocation20 + $0xa0] sm:$0xff]  ;;  %3199 = vmatpush.bf16.msra.mxu2 %v3955_v12  ;;  %v6072_v18 = vld [vmem:[#allocation20 + $0xd0] sm:$0xff] }
 0x98c   : > { %v2444_v25 = vmul.f32 0.5, %v2443_v22  ;;  %v3945_v22 = vld [vmem:[#allocation20 + $0x10] sm:$0xff] }
 0x98d   : > { %v2476_v20 = vmul.f32 %v4200_v42, %v2471_v63  ;;  %v2519_v63 = vld [vmem:[%s6315_s10] sm:$0xf]  ;;  %s4721_s10 = sshra.s32 %s3279_s5, 4  ;;  %s4722_s10 = int_to_ptr.hbm [resolvable:$true] %s4721_s10 }
 0x98e   : > { %v2445_v57 = vsub.f32 1.5, %v2444_v25  ;;  %v3954_v25 = vld [vmem:[#allocation20 + $0x58] sm:$0xff]  ;;  %s4723_s1 = scalar_lea.hbm %s4722_s10, 32  ;;  %p4728_p0 = scmp.lt.s32.totalorder %s4722_s10, %s6319_s27 }
 0x98f   : > { %v2481_v31 = vadd.f32 %v4201_v17, %v2476_v20  ;;  %3217 = vmatpush.bf16.msra.mxu3 %v3964_v19  ;;  %3200 = vmatpush.bf16.msra.mxu2 %v3954_v25  ;;  %v3943_v20 = vld [vmem:[#allocation20] sm:$0xff]  ;;  %p4724_p1 = scmp.ne.s32.totalorder %s4722_s10, %s4723_s1  ;;  %p4729_p6 = scmp.lt.s32.totalorder %s4727_s0, %s4723_s1 }
 0x990   : > { %v2446_v29 = vmul.f32 %v4336_v33, %v2445_v57  ;;  %v3962_v57 = vld [vmem:[#allocation20 + $0x98] sm:$0xff] }
 0x991   : > { %p4725_p3 = pnand %p4724_p1, %p5112_p2  ;;  %p4730_p10 = por %p4729_p6, %p4728_p0 }
 0x992   : > { %v2450_v40 = vsel %vm2449_vm12, %v4336_v33, %v2446_v29  ;;  %v6069_v33 = vld [vmem:[#allocation20 + $0xd8] sm:$0xff]  ;;  %v6078_v29 = vld [vmem:[#allocation20 + $0xc8] sm:$0xff] }
 0x993   : > { %v2472_v43 = vmul.f32 %v2450_v40, %v6036_v46  ;;  %3218 = vmatpush.bf16.msra.mxu3 %v3963_v15  ;;  %v3953_v40 = vld [vmem:[#allocation20 + $0x50] sm:$0xff]  ;;  %p4726_p8 = pneg %p4725_p3 }
 0x994   : > { %3201 = vmatpush.bf16.msra.mxu2 %v3953_v40 }
 0x995   : > { %v2477_v52 = vmul.f32 %v4200_v42, %v2472_v43  ;;  %v3961_v43 = vld [vmem:[#allocation20 + $0x90] sm:$0xff]  ;;  %p4731_p7 = pnand %p4730_p10, %p4726_p8 }
 0x997   : > { %v2482_v10 = vadd.f32 %v4201_v17, %v2477_v52  ;;  %3219 = vmatpush.bf16.msra.mxu3 %v3962_v57  ;;  %v6083_v52 = vperm.slane %v2519_v63, 0 }
 0x999   : > { %v2485_v24 = vpack.c.bf16 %v2482_v10, %v2481_v31  ;;  %v6085_v31 = vperm.slane %v2519_v63, 3  ;;  %v3952_v10 = vld [vmem:[#allocation20 + $0x48] sm:$0xff] }
 0x99a   : > { %3202 = vmatpush.bf16.msra.mxu2 %v3952_v10 }
 0x99b   : > { %2697 = vmatmul.bf16.vlgmr.msrb.gmra.mxu1 %v2485_v24  ;;  %2716 = vmatmul.bf16.vlgmr.msrb.gmra.mxu2 %v2485_v24 }
 0x99c   : > { %2735 = vmatmul.bf16.vlgmr.msrb.gmra.mxu3 %v2485_v24  ;;  %2754 = vmatmul.bf16.vlgmr.msrb.gmra.mxu0 %v2485_v24  ;;  %v3960_v24 = vld [vmem:[#allocation20 + $0x88] sm:$0xff] }
 0x99d   : > { %3220 = vmatpush.bf16.msra.mxu3 %v3961_v43 }
 0x9a1   : > { %3221 = vmatpush.bf16.msra.mxu3 %v3960_v24 }
 0x9b3   : > { %v2420_v35 = vpop.xlane.xlu0 %2419 }
 0x9b4   : > { %v2425_v34 = vmul.f32 %v2420_v35, %v5235_v23 }
 0x9b6   : > { %v2429_v30 = vadd.f32 1e-06, %v2425_v34 }
 0x9b8   : > { %4337 = vrsqrt.f32 %v2429_v30  ;;  %vm2457_vm14 = vweird.f32 %v2429_v30 }
 0x9bb   : > { %v2422_v4 = vpop.xlane.xlu2 %2421 }
 0x9bc   : > { %v2426_v41 = vmul.f32 %v2422_v4, %v5235_v23 }
 0x9be   : > { %v4338_v6 = vpop.eup %4337  ;;  %v2430_v46 = vadd.f32 1e-06, %v2426_v41 }
 0x9bf   : > { %v2452_v7 = vmul.f32 %v4338_v6, %v2429_v30  ;;  %vm2458_vm13 = vweird.f32 %v4338_v6 }
 0x9c0   : > { %4339 = vrsqrt.f32 %v2430_v46  ;;  %vm2459_vm15 = vmor %vm2457_vm14, %vm2458_vm13  ;;  %vm2467_vm2 = vweird.f32 %v2430_v46 }
 0x9c1   : > { %v2453_v60 = vmul.f32 %v4338_v6, %v2452_v7  ;;  %v3959_v7 = vld [vmem:[#allocation20 + $0x80] sm:$0xff] }
 0x9c2   : > { %3222 = vmatpush.bf16.msra.mxu3 %v3959_v7 }
 0x9c3   : > { %v2454_v51 = vmul.f32 0.5, %v2453_v60 }
 0x9c5   : > { %v2455_v54 = vsub.f32 1.5, %v2454_v51  ;;  %v6098_v51 = vperm.slane %v2519_v63, 2 }
 0x9c6   : > { %v4340_v37 = vpop.eup %4339 }
 0x9c7   : > { %v2456_v50 = vmul.f32 %v4338_v6, %v2455_v54  ;;  %v2462_v45 = vmul.f32 %v4340_v37, %v2430_v46  ;;  %vm2468_vm1 = vweird.f32 %v4340_v37  ;;  %v3951_v46 = vld [vmem:[#allocation20 + $0x40] sm:$0xff] }
 0x9c8   : > { %vm2469_vm3 = vmor %vm2467_vm2, %vm2468_vm1  ;;  %3203 = vmatpush.bf16.msra.mxu2 %v3951_v46 }
 0x9c9   : > { %v2460_v38 = vsel %vm2459_vm15, %v4338_v6, %v2456_v50  ;;  %v2463_v1 = vmul.f32 %v4340_v37, %v2462_v45  ;;  %v6095_v6 = vperm.slane %v2519_v63, 1 }
 0x9ca   : > { %v2473_v26 = vmul.f32 %v2460_v38, %v6042_v48  ;;  %v3974_v48 = vld [vmem:[#allocation20 + $0xf8] sm:$0xff] }
 0x9cb   : > { %v2464_v5 = vmul.f32 0.5, %v2463_v1  ;;  %3234 = vmatpush.bf16.msra.mxu0 %v3974_v48 }
 0x9cc   : > { %v2478_v27 = vmul.f32 %v4200_v42, %v2473_v26 }
 0x9cd   : > { %v2465_v23 = vsub.f32 1.5, %v2464_v5 }
 0x9ce   : > { %v2483_v59 = vadd.f32 %v4201_v17, %v2478_v27 }
 0x9cf   : > { %v2466_v16 = vmul.f32 %v4340_v37, %v2465_v23  ;;  %3235 = vmatpush.bf16.msra.mxu0 %v6060_v56 }
 0x9d1   : > { %v2470_v32 = vsel %vm2469_vm3, %v4340_v37, %v2466_v16 }
 0x9d2   : > { %v2474_v55 = vmul.f32 %v2470_v32, %v6048_v36  ;;  %v3948_v36 = vld [vmem:[#allocation20 + $0x28] sm:$0xff] }
 0x9d3   : > { %3179 = vmatpush.bf16.msra.mxu1 %v3948_v36  ;;  %3236 = vmatpush.bf16.msra.mxu0 %v6063_v39 }
 0x9d4   : > { %v2479_v21 = vmul.f32 %v4200_v42, %v2474_v55  ;;  %v3944_v42 = vld [vmem:[#allocation20 + $0x8] sm:$0xff] }
 0x9d6   : > { %v2484_v58 = vadd.f32 %v4201_v17, %v2479_v21  ;;  %v6081_v17 = vld [vmem:[#allocation20 + $0xc0] sm:$0xff] }
 0x9d7   : > { %3180 = vmatpush.bf16.msra.mxu1 %v3947_v8  ;;  %3237 = vmatpush.bf16.msra.mxu0 %v6066_v62 }
 0x9d8   : > { %v2486_v53 = vpack.c.bf16 %v2484_v58, %v2483_v59 }
 0x9da   : > { %2702 = vmatmul.bf16.gmra.mxu1 %v2486_v53  ;;  %2721 = vmatmul.bf16.gmra.mxu2 %v2486_v53 }
 0x9db   : > { %2740 = vmatmul.bf16.gmra.mxu3 %v2486_v53  ;;  %2759 = vmatmul.bf16.gmra.mxu0 %v2486_v53 }
 0x9dc   : > { %3181 = vmatpush.bf16.msra.mxu1 %v3946_v44  ;;  %3238 = vmatpush.bf16.msra.mxu0 %v6069_v33 }
 0x9e0   : > { %3182 = vmatpush.bf16.msra.mxu1 %v3945_v22  ;;  %3239 = vmatpush.bf16.msra.mxu0 %v6072_v18 }
 0x9e4   : > { %3183 = vmatpush.bf16.msra.mxu1 %v3944_v42  ;;  %3240 = vmatpush.bf16.msra.mxu0 %v6078_v29 }
 0x9e8   : > { %3184 = vmatpush.bf16.msra.mxu1 %v3943_v20  ;;  %3241 = vmatpush.bf16.msra.mxu0 %v6081_v17 }
 0x9ec   : > { %3975 = vmatpush.bf16.msrb.mxu1 %v3974_v48 }
 0x9f0   : > { %3976 = vmatpush.bf16.msrb.mxu1 %v6060_v56 }
 0x9f4   : > { %3977 = vmatpush.bf16.msrb.mxu1 %v6063_v39 }
 0x9f8   : > { %3978 = vmatpush.bf16.msrb.mxu1 %v6066_v62 }
 0x9fc   : > { %3979 = vmatpush.bf16.msrb.mxu1 %v6069_v33 }
 0xa00   : > { %3980 = vmatpush.bf16.msrb.mxu1 %v6072_v18 }
 0xa04   : > { %3981 = vmatpush.bf16.msrb.mxu1 %v6078_v29 }
 0xa08   : > { %3982 = vmatpush.bf16.msrb.mxu1 %v6081_v17 }
 0xa18   : > { %v2698_v35 = vpop.f32.mrf.mxu1 }
 0xa19   : > { %v6089_v34 = vadd.f32 %v2698_v35, %v6083_v52  ;;  %v2755_v30 = vpop.f32.mrf.mxu0 }
 0xa1a   : > { %v6092_v4 = vadd.f32 %v2755_v30, %v6085_v31 }
 0xa1b   : > { %v2781_v41 = vmul.f32 0.044715, %v6089_v34 }
 0xa1c   : > { %v2784_v60 = vmul.f32 0.044715, %v6092_v4 }
 0xa1d   : > { %v2797_v54 = vmul.f32 %v2781_v41, %v6089_v34 }
 0xa1e   : > { %v2800_v37 = vmul.f32 %v2784_v60, %v6092_v4  ;;  %v2717_v50 = vpop.f32.mrf.mxu2 }
 0xa1f   : > { %v2813_v45 = vmul.f32 %v2797_v54, %v6089_v34  ;;  %v6105_v38 = vadd.f32 %v2717_v50, %v6095_v6  ;;  %v2736_v1 = vpop.f32.mrf.mxu3 }
 0xa20   : > { %v2816_v26 = vmul.f32 %v2800_v37, %v6092_v4  ;;  %v6109_v5 = vadd.f32 %v2736_v1, %v6098_v51  ;;  %v2700_v27 = vpop.f32.mrf.mxu1 }
 0xa21   : > { %v2829_v23 = vadd.f32 %v2813_v45, %v6089_v34  ;;  %v2782_v59 = vmul.f32 0.044715, %v6105_v38  ;;  %v2701_v16 = vadd.f32 %v2700_v27, %v6083_v52  ;;  %v2757_v32 = vpop.f32.mrf.mxu0 }
 0xa22   : > { %v2832_v55 = vadd.f32 %v2816_v26, %v6092_v4  ;;  %v2783_v21 = vmul.f32 0.044715, %v6109_v5  ;;  %v2758_v58 = vadd.f32 %v2757_v32, %v6085_v31  ;;  %v2765_v26 = vmul.f32 0.5, %v6089_v34 }
 0xa23   : > { %v2798_v53 = vmul.f32 %v2782_v59, %v6105_v38  ;;  %v2785_v2 = vmul.f32 0.044715, %v2701_v16  ;;  %v2845_v56 = vmul.f32 0.7978846, %v2829_v23  ;;  %v2769_v18 = vmul.f32 0.5, %v2701_v16 }
 0xa24   : > { %v2799_v48 = vmul.f32 %v2783_v21, %v6109_v5  ;;  %v2788_v13 = vmul.f32 0.044715, %v2758_v58  ;;  %v2848_v36 = vmul.f32 0.7978846, %v2832_v55  ;;  %v2768_v59 = vmul.f32 0.5, %v6092_v4 }
 0xa25   : > { %v2814_v9 = vmul.f32 %v2798_v53, %v6105_v38  ;;  %v2801_v61 = vmul.f32 %v2785_v2, %v2701_v16  ;;  %4341 = vtanh.f32 %v2845_v56  ;;  %v2772_v32 = vmul.f32 0.5, %v2758_v58 }
 0xa26   : > { %v2815_v39 = vmul.f32 %v2799_v48, %v6109_v5  ;;  %v2804_v14 = vmul.f32 %v2788_v13, %v2758_v58  ;;  %v2719_v11 = vpop.f32.mrf.mxu2  ;;  %4343 = vtanh.f32 %v2848_v36  ;;  %v2766_v36 = vmul.f32 0.5, %v6105_v38 }
 0xa27   : > { %v2830_v8 = vadd.f32 %v2814_v9, %v6105_v38  ;;  %v2817_v3 = vmul.f32 %v2801_v61, %v2701_v16  ;;  %v2720_v19 = vadd.f32 %v2719_v11, %v6095_v6  ;;  %v2738_v44 = vpop.f32.mrf.mxu3 }
 0xa28   : > { %v2831_v12 = vadd.f32 %v2815_v39, %v6109_v5  ;;  %v2820_v15 = vmul.f32 %v2804_v14, %v2758_v58  ;;  %v2739_v22 = vadd.f32 %v2738_v44, %v6098_v51 }
 0xa29   : > { %v2833_v25 = vadd.f32 %v2817_v3, %v2701_v16  ;;  %v2786_v57 = vmul.f32 0.044715, %v2720_v19  ;;  %v2846_v42 = vmul.f32 0.7978846, %v2830_v8  ;;  %v2770_v39 = vmul.f32 0.5, %v2720_v19 }
 0xa2a   : > { %v2836_v62 = vadd.f32 %v2820_v15, %v2758_v58  ;;  %v2787_v63 = vmul.f32 0.044715, %v2739_v22  ;;  %v2847_v20 = vmul.f32 0.7978846, %v2831_v12  ;;  %v2767_v58 = vmul.f32 0.5, %v6109_v5 }
 0xa2b   : > { %v2849_v40 = vmul.f32 0.7978846, %v2833_v25  ;;  %v2802_v43 = vmul.f32 %v2786_v57, %v2720_v19  ;;  %v4342_v41 = vpop.eup %4341  ;;  %v2771_v17 = vmul.f32 0.5, %v2739_v22 }
 0xa2c   : > { %v2852_v10 = vmul.f32 0.7978846, %v2836_v62  ;;  %v2803_v24 = vmul.f32 %v2787_v63, %v2739_v22  ;;  %v4344_v7 = vpop.eup %4343  ;;  %v2877_v37 = vadd.f32 1.0, %v4342_v41 }
 0xa2d   : > { %v2818_v35 = vmul.f32 %v2802_v43, %v2720_v19  ;;  %4345 = vtanh.f32 %v2849_v40  ;;  %v2880_v45 = vadd.f32 1.0, %v4344_v7 }
 0xa2e   : > { %v2819_v30 = vmul.f32 %v2803_v24, %v2739_v22  ;;  %4347 = vtanh.f32 %v2852_v10  ;;  %v2893_v29 = vmul.f32 %v2877_v37, %v2765_v26 }
 0xa2f   : > { %v2834_v46 = vadd.f32 %v2818_v35, %v2720_v19  ;;  %4349 = vtanh.f32 %v2846_v42  ;;  %v2896_v2 = vmul.f32 %v2880_v45, %v2768_v59 }
 0xa30   : > { %v2835_v33 = vadd.f32 %v2819_v30, %v2739_v22  ;;  %4351 = vtanh.f32 %v2847_v20 }
 0xa31   : > { %v2850_v60 = vmul.f32 0.7978846, %v2834_v46 }
 0xa32   : > { %v2851_v54 = vmul.f32 0.7978846, %v2835_v33 }
 0xa33   : > { %v4346_v50 = vpop.eup %4345  ;;  %4353 = vtanh.f32 %v2850_v60 }
 0xa34   : > { %v4348_v1 = vpop.eup %4347  ;;  %v2881_v27 = vadd.f32 1.0, %v4346_v50  ;;  %4355 = vtanh.f32 %v2851_v54 }
 0xa35   : > { %v4350_v23 = vpop.eup %4349  ;;  %v2884_v55 = vadd.f32 1.0, %v4348_v1 }
 0xa36   : > { %v4352_v21 = vpop.eup %4351  ;;  %v2897_v53 = vmul.f32 %v2881_v27, %v2769_v18  ;;  %v2878_v56 = vadd.f32 1.0, %v4350_v23 }
 0xa37   : > { %v2900_v48 = vmul.f32 %v2884_v55, %v2772_v32  ;;  %v2879_v34 = vadd.f32 1.0, %v4352_v21 }
 0xa38   : > { %v2909_v13 = vpack.c.bf16 %v2897_v53, %v2893_v29  ;;  %v2894_v11 = vmul.f32 %v2878_v56, %v2766_v36 }
 0xa39   : > { %v4354_v9 = vpop.eup %4353  ;;  %v2912_v61 = vpack.c.bf16 %v2900_v48, %v2896_v2  ;;  %v2895_v3 = vmul.f32 %v2879_v34, %v2767_v58 }
 0xa3a   : > { %v4356_v16 = vpop.eup %4355  ;;  %3185 = vmatmul.bf16.vlgmr.msra.gmra.mxu1 %v2909_v13  ;;  %v2882_v4 = vadd.f32 1.0, %v4354_v9 }
 0xa3b   : > { %3242 = vmatmul.bf16.vlgmr.msra.gmra.mxu0 %v2912_v61  ;;  %v2883_v14 = vadd.f32 1.0, %v4356_v16 }
 0xa3c   : > { %v2898_v8 = vmul.f32 %v2882_v4, %v2770_v39 }
 0xa3d   : > { %v2899_v44 = vmul.f32 %v2883_v14, %v2771_v17 }
 0xa3e   : > { %v2910_v12 = vpack.c.bf16 %v2898_v8, %v2894_v11 }
 0xa3f   : > { %v2911_v15 = vpack.c.bf16 %v2899_v44, %v2895_v3 }
 0xa40   : > { %3204 = vmatmul.bf16.vlgmr.msra.gmra.mxu2 %v2910_v12 }
 0xa41   : > { %3223 = vmatmul.bf16.vlgmr.msra.gmra.mxu3 %v2911_v15 }
 0xa57   : > { %v2703_v25 = vpop.f32.mrf.mxu1 }
 0xa58   : > { %v2704_v57 = vadd.f32 %v2703_v25, %v6083_v52  ;;  %v2760_v62 = vpop.f32.mrf.mxu0 }
 0xa59   : > { %v6143_v20 = vadd.f32 %v2760_v62, %v6085_v31 }
 0xa5a   : > { %v2789_v38 = vmul.f32 0.044715, %v2704_v57  ;;  %v2773_v12 = vmul.f32 0.5, %v2704_v57 }
 0xa5b   : > { %v2792_v37 = vmul.f32 0.044715, %v6143_v20 }
 0xa5c   : > { %v2805_v19 = vmul.f32 %v2789_v38, %v2704_v57 }
 0xa5d   : > { %v2722_v63 = vpop.f32.mrf.mxu2  ;;  %v2808_v21 = vmul.f32 %v2792_v37, %v6143_v20 }
 0xa5e   : > { %v6137_v42 = vadd.f32 %v2722_v63, %v6095_v6  ;;  %v2741_v5 = vpop.f32.mrf.mxu3  ;;  %v2821_v22 = vmul.f32 %v2805_v19, %v2704_v57 }
 0xa5f   : > { %v6140_v40 = vadd.f32 %v2741_v5, %v6098_v51  ;;  %v2705_v43 = vpop.f32.mrf.mxu1  ;;  %v2824_v34 = vmul.f32 %v2808_v21, %v6143_v20  ;;  %v4202_v21 = vld [vmem:[%s6316_s29] ss:$0 sm:$0xff] }
 0xa60   : > { %v2790_v10 = vmul.f32 0.044715, %v6137_v42  ;;  %v2706_v24 = vadd.f32 %v2705_v43, %v6083_v52  ;;  %v2762_v35 = vpop.f32.mrf.mxu0  ;;  %v2837_v30 = vadd.f32 %v2821_v22, %v2704_v57 }
 0xa61   : > { %v2791_v41 = vmul.f32 0.044715, %v6140_v40  ;;  %v6149_v46 = vadd.f32 %v2762_v35, %v6085_v31  ;;  %v2840_v17 = vadd.f32 %v2824_v34, %v6143_v20 }
 0xa62   : > { %v2793_v7 = vmul.f32 0.044715, %v2706_v24  ;;  %v2806_v33 = vmul.f32 %v2790_v10, %v6137_v42  ;;  %v2853_v45 = vmul.f32 0.7978846, %v2837_v30  ;;  %v2777_v15 = vmul.f32 0.5, %v2706_v24 }
 0xa63   : > { %v2796_v60 = vmul.f32 0.044715, %v6149_v46  ;;  %v2807_v54 = vmul.f32 %v2791_v41, %v6140_v40  ;;  %v2856_v38 = vmul.f32 0.7978846, %v2840_v17  ;;  %v2774_v41 = vmul.f32 0.5, %v6137_v42 }
 0xa64   : > { %v2809_v50 = vmul.f32 %v2793_v7, %v2706_v24  ;;  %v2822_v52 = vmul.f32 %v2806_v33, %v6137_v42  ;;  %4357 = vtanh.f32 %v2853_v45 }
 0xa65   : > { %v2724_v1 = vpop.f32.mrf.mxu2  ;;  %v2823_v26 = vmul.f32 %v2807_v54, %v6140_v40  ;;  %v2812_v18 = vmul.f32 %v2796_v60, %v6149_v46 }
 0xa66   : > { %v2725_v31 = vadd.f32 %v2724_v1, %v6095_v6  ;;  %v2743_v27 = vpop.f32.mrf.mxu3  ;;  %v2825_v23 = vmul.f32 %v2809_v50, %v2706_v24  ;;  %v2838_v59 = vadd.f32 %v2822_v52, %v6137_v42 }
 0xa67   : > { %v2744_v32 = vadd.f32 %v2743_v27, %v6098_v51  ;;  %v2839_v55 = vadd.f32 %v2823_v26, %v6140_v40  ;;  %v2828_v48 = vmul.f32 %v2812_v18, %v6149_v46 }
 0xa68   : > { %v2794_v29 = vmul.f32 0.044715, %v2725_v31  ;;  %v2841_v53 = vadd.f32 %v2825_v23, %v2706_v24  ;;  %v2854_v9 = vmul.f32 0.7978846, %v2838_v59  ;;  %v2778_v7 = vmul.f32 0.5, %v2725_v31 }
 0xa69   : > { %v2795_v2 = vmul.f32 0.044715, %v2744_v32  ;;  %v2855_v61 = vmul.f32 0.7978846, %v2839_v55  ;;  %v2844_v39 = vadd.f32 %v2828_v48, %v6149_v46  ;;  %v2775_v24 = vmul.f32 0.5, %v6140_v40 }
 0xa6a   : > { %v2857_v13 = vmul.f32 0.7978846, %v2841_v53  ;;  %v2810_v56 = vmul.f32 %v2794_v29, %v2725_v31  ;;  %v4358_v36 = vpop.eup %4357  ;;  %v2779_v33 = vmul.f32 0.5, %v2744_v32  ;;  %v2780_v23 = vmul.f32 0.5, %v6149_v46 }
 0xa6b   : > { %v2811_v6 = vmul.f32 %v2795_v2, %v2744_v32  ;;  %v2885_v11 = vadd.f32 1.0, %v4358_v36  ;;  %v2860_v44 = vmul.f32 0.7978846, %v2844_v39 }
 0xa6c   : > { %4359 = vtanh.f32 %v2857_v13  ;;  %v2826_v16 = vmul.f32 %v2810_v56, %v2725_v31 }
 0xa6d   : > { %v2827_v51 = vmul.f32 %v2811_v6, %v2744_v32  ;;  %4361 = vtanh.f32 %v2854_v9  ;;  %v2901_v63 = vmul.f32 %v2885_v11, %v2773_v12 }
 0xa6e   : > { %v2842_v4 = vadd.f32 %v2826_v16, %v2725_v31  ;;  %4363 = vtanh.f32 %v2855_v61  ;;  %v2776_v31 = vmul.f32 0.5, %v6143_v20 }
 0xa6f   : > { %v2843_v58 = vadd.f32 %v2827_v51, %v2744_v32 }
 0xa70   : > { %v2858_v14 = vmul.f32 0.7978846, %v2842_v4 }
 0xa71   : > { %v2859_v8 = vmul.f32 0.7978846, %v2843_v58 }
 0xa72   : > { %v4360_v3 = vpop.eup %4359  ;;  %4365 = vtanh.f32 %v2858_v14 }
 0xa73   : > { %v2889_v25 = vadd.f32 1.0, %v4360_v3  ;;  %4367 = vtanh.f32 %v2859_v8  ;;  %v4362_v62 = vpop.eup %4361 }
 0xa74   : > { %v4364_v19 = vpop.eup %4363  ;;  %4369 = vtanh.f32 %v2860_v44  ;;  %v2886_v43 = vadd.f32 1.0, %v4362_v62 }
 0xa75   : > { %v2905_v5 = vmul.f32 %v2889_v25, %v2777_v15  ;;  %v2887_v35 = vadd.f32 1.0, %v4364_v19  ;;  %4371 = vtanh.f32 %v2856_v38 }
 0xa76   : > { %v2902_v54 = vmul.f32 %v2886_v43, %v2774_v41 }
 0xa77   : > { %v2913_v22 = vpack.c.bf16 %v2905_v5, %v2901_v63  ;;  %v2903_v45 = vmul.f32 %v2887_v35, %v2775_v24 }
 0xa78   : > { %v4366_v10 = vpop.eup %4365 }
 0xa79   : > { %v4368_v30 = vpop.eup %4367  ;;  %3190 = vmatmul.bf16.gmra.mxu1 %v2913_v22  ;;  %v2890_v57 = vadd.f32 1.0, %v4366_v10 }
 0xa7a   : > { %v2891_v60 = vadd.f32 1.0, %v4368_v30  ;;  %v4370_v50 = vpop.eup %4369 }
 0xa7b   : > { %v2906_v37 = vmul.f32 %v2890_v57, %v2778_v7  ;;  %v4372_v26 = vpop.eup %4371  ;;  %v2892_v27 = vadd.f32 1.0, %v4370_v50 }
 0xa7c   : > { %v2907_v52 = vmul.f32 %v2891_v60, %v2779_v33  ;;  %v2888_v42 = vadd.f32 1.0, %v4372_v26 }
 0xa7d   : > { %v2914_v1 = vpack.c.bf16 %v2906_v37, %v2902_v54  ;;  %v2908_v59 = vmul.f32 %v2892_v27, %v2780_v23 }
 0xa7e   : > { %v2915_v18 = vpack.c.bf16 %v2907_v52, %v2903_v45  ;;  %v2904_v40 = vmul.f32 %v2888_v42, %v2776_v31 }
 0xa7f   : > { %3209 = vmatmul.bf16.gmra.mxu2 %v2914_v1 }
 0xa80   : > { %3228 = vmatmul.bf16.gmra.mxu3 %v2915_v18  ;;  %v2916_v32 = vpack.c.bf16 %v2908_v59, %v2904_v40 }
 0xa89   : > { %3247 = vmatmul.bf16.vlgmr.msrb.gmra.mxu1 %v2916_v32 }
 0xab7   : > { %v3186_v55 = vpop.f32.mrf.mxu1 }
 0xab8   : > { %v3187_v29 = vadd.f32 %v4202_v21, %v3186_v55  ;;  %v3243_v13 = vpop.f32.mrf.mxu0 }
 0xabf   : > { %v3188_v46 = vpop.f32.mrf.mxu1 }
 0xac0   : > { %v3189_v6 = vadd.f32 %v4202_v21, %v3188_v46  ;;  %v3245_v36 = vpop.f32.mrf.mxu0 }
 0xac3   : > { %v3205_v53 = vpop.f32.mrf.mxu2 }
 0xac4   : > { %v3206_v2 = vadd.f32 %v3205_v53, %v3187_v29  ;;  %v3224_v48 = vpop.f32.mrf.mxu3 }
 0xac6   : > { %v3225_v56 = vadd.f32 %v3224_v48, %v3206_v2 }
 0xac8   : > { %v3244_v9 = vadd.f32 %v3243_v13, %v3225_v56 }
 0xaca   : > { %v3253_v20 = vadd.f32 %v3244_v9, %v6013_v0 }
 0xacb   : > { %v3207_v61 = vpop.f32.mrf.mxu2 }
 0xacc   : > { %3257 = vst [vmem:[%s6177_s4] sm:$0xff] %v3253_v20  ;;  %v3208_v34 = vadd.f32 %v3207_v61, %v3189_v6  ;;  %v3226_v16 = vpop.f32.mrf.mxu3 }
 0xace   : > { %v3227_v51 = vadd.f32 %v3226_v16, %v3208_v34 }
 0xad0   : > { %v3246_v39 = vadd.f32 %v3245_v36, %v3227_v51 }
 0xad2   : > { %v3254_v4 = vadd.f32 %v3246_v39, %v6017_v47 }
 0xad4   : > { %3258 = vst [vmem:[%s6177_s4 + $0x8] sm:$0xff] %v3254_v4 }
 0xaf6   : > { %v3191_v58 = vpop.f32.mrf.mxu1 }
 0xaf7   : > { %v3192_v0 = vadd.f32 %v4202_v21, %v3191_v58 }
 0xafe   : > { %v3193_v17 = vpop.f32.mrf.mxu1 }
 0xaff   : > { %v3194_v15 = vadd.f32 %v4202_v21, %v3193_v17 }
 0xb02   : > { %v3210_v14 = vpop.f32.mrf.mxu2 }
 0xb03   : > { %v3211_v11 = vadd.f32 %v3210_v14, %v3192_v0  ;;  %v3229_v8 = vpop.f32.mrf.mxu3 }
 0xb05   : > { %v3230_v3 = vadd.f32 %v3229_v8, %v3211_v11 }
 0xb06   : > { %v3248_v44 = vpop.f32.mrf.mxu1 }
 0xb07   : > { %v3249_v12 = vadd.f32 %v3248_v44, %v3230_v3 }
 0xb09   : > { %v3255_v47 = vadd.f32 %v3249_v12, %v6021_v28 }
 0xb0a   : > { %v3212_v25 = vpop.f32.mrf.mxu2 }
 0xb0b   : > { %3259 = vst [vmem:[%s6177_s4 + $0x10] sm:$0xff] %v3255_v47  ;;  %v3213_v62 = vadd.f32 %v3212_v25, %v3194_v15  ;;  %v3231_v38 = vpop.f32.mrf.mxu3 }
 0xb0d   : > { %v3232_v19 = vadd.f32 %v3231_v38, %v3213_v62 }
 0xb0e   : > { %v3250_v63 = vpop.f32.mrf.mxu1 }
 0xb0f   : > { %v3251_v5 = vadd.f32 %v3250_v63, %v3232_v19 }
 0xb11   : > { %v3256_v22 = vadd.f32 %v3251_v5, %v6025_v49 }
 0xb13   : > { %3260 = vst [vmem:[%s6177_s4 + $0x18] sm:$0xff] %v3256_v22 }
 0xb14   : > { %4734 = shalt.err (!%p4731_p7)
}
 0xb15   : > { %s4876_s28 = smov 128   ;;  %s4877_s4 = smov 8  }
 0xb16   : > { %4023 = dma.vmem_to_hbm [thread:$0]  (%p5112_p2), %s3277_s11, 512, %s3279_s5, %s3262_s8, %s4876_s28, %s4876_s28, %s4877_s4  }
 0xb17 PF: > { %p4083_p11 = scmp.ge.s32.totalorder %s4853_s23, 2  ;;  %s3293_s7 = sand.u32 1, %s4825_s16  }
 0xb18   : > { %s3294_s12 = scalar_lea.sflag [#allocation5], %s3293_s7 }
 0xb19   : > { %p4061_p12 = pnand %p4083_p11, %p5118_p4 }
 0xb1b   : > { %p4062_p13 = pneg %p4061_p12 }
 0xb1d   : > { %4808 = dma.done.wait (%p4062_p13), %s3294_s12, 512  }
 0xb1e   : > { %4810 = vsyncadd (%p4062_p13), %s3294_s12, 4294966784  ;;  %s37_s23 = sadd.s32 1, %s4853_s23   ;;  %s6320_s14 = sld [smem:[#allocation34_spill]] }
 0xb1f   : > { %p34_p9 = scmp.ge.s32.totalorder %s37_s23, 6   ;;  %s6321_s24 = sld [smem:[#allocation35_spill]] }
 0xb20   : > { %s6322_s29 = smov %s4817_s30  ;;  %s6323_s30 = smov %s4821_s15 }
 0xb21   : > { %s6324_s15 = smov %s5142_s3  ;;  %s6325_s16 = smov %s4829_s17 }
 0xb22   : > { %s6326_s17 = smov %s4833_s18  ;;  %s6327_s18 = smov %s5126_s20 }
 0xb23   : > { %s6328_s19 = smov %s4845_s21  ;;  %s6329_s20 = smov %s4849_s22 }
 0xb24   : > { %s6330_s21 = smov %s6320_s14  ;;  %36 = sbr.rel (!%p34_p9) target bundleno = 31 (0x1f), region = 170 }
 0xb25   : > { %s6331_s22 = smov %s6321_s24 }
 0xb29   :  { %3300 = vsyncpa [#allocation4], 1 }
 0xb2a   :  { %3302 = vsyncpa [#allocation4 + $0x1], 1 }
 0xb2b   :  { %3303 = vsyncpa [#allocation7], 1 }
 0xb2c   :  { %3305 = vsyncpa [#allocation7 + $0x1], 1 }
 0xb2d   :  { %3306 = vsyncpa [#allocation10], 1 }
 0xb2e   :  { %3307 = vsyncpa [#allocation13], 1 }
 0xb2f   :  { %3308 = vsyncpa [#allocation16], 1 }
 0xb30   :  { %3309 = vsyncpa [#allocation19], 1 }
 0xb31   :  { %3310 = vsyncpa [#allocation5], 1 }
 0xb32   :  { %3312 = vsyncpa [#allocation5 + $0x1], 1 }

</bundles_post_ra>
